<compile_context>
chip_gen: v7x
topology: tpu7x:2x2x1
jax: 0.10.0
libtpu: 0.0.40
codegen_flags: <defaults>
</compile_context>

<pallas_src>
import numpy as np
import jax
import jax.numpy as jnp
from jax import lax
from jax.experimental import pallas as pl
from jax.experimental.pallas import tpu as pltpu


# ----------------------------------------------------------------------------
# Host-side parameter / mask packing helpers (kernel layout)
# ----------------------------------------------------------------------------
def _round_up(v, m):
    return ((v + m - 1) // m) * m


def _wmat(w_hwio, cin_pad):
    """(3,3,Cin,Cout) HWIO -> (Cout, 9*cin_pad) bf16, tap order k = ky*3 + kx."""
    kh, kw, cin, cout = w_hwio.shape
    if cin_pad != cin:
        w_hwio = jnp.pad(w_hwio, ((0, 0), (0, 0), (0, cin_pad - cin), (0, 0)))
    w = jnp.transpose(w_hwio, (3, 0, 1, 2)).reshape(cout, kh * kw * cin_pad)
    return w.astype(jnp.bfloat16)


def _colvec(v, c_pad=None):
    """(1, C) row -> (c_pad, 1) f32 column (zero-padded channels stay inert)."""
    v = v.reshape(-1, 1).astype(jnp.float32)
    if c_pad is not None and c_pad != v.shape[0]:
        v = jnp.pad(v, ((0, c_pad - v.shape[0]), (0, 0)))
    return v


def _tap_masks(d, H, W, b_tile):
    """(9, b_tile*H*W) f32 {0,1} border masks for dilation d, tiled per folded sample."""
    i = np.arange(H * W)
    y, x = i // W, i % W
    rows = []
    for k in range(9):
        dy = (k // 3 - 1) * d
        dx = (k % 3 - 1) * d
        m = (y + dy >= 0) & (y + dy < H) & (x + dx >= 0) & (x + dx < W)
        rows.append(m.astype(np.float32))
    m9 = np.tile(np.stack(rows), (1, b_tile))        # per-sample masks, replicated
    return jnp.asarray(m9, dtype=jnp.float32)


# ----------------------------------------------------------------------------
# Fused Pallas forward pass
# ----------------------------------------------------------------------------
def highresnet_forward(x_nchw, params, b_tile=None):
    N, cin, H, W = x_nchw.shape
    HW = H * W
    if b_tile is None:
        # Keep the grid length >= 2 (v7x has 2 TensorCores) while folding the rest of the
        # batch onto the lane axis to widen the matmul RHS.
        b_tile = N // 2 if (N >= 2 and N % 2 == 0) else 1
    assert N % b_tile == 0
    n_tiles = N // b_tile
    HWT = b_tile * HW
    cin_pad = max(16, _round_up(cin, 16))   # 16-row alignment for the bf16 col scratch

    # NCHW -> (n_tiles, cin_pad, b_tile*HW); lane axis = folded (sample, pixel).
    x = (x_nchw.reshape(n_tiles, b_tile, cin, HW)
         .transpose(0, 2, 1, 3).reshape(n_tiles, cin, HWT))
    if cin_pad != cin:
        x = jnp.pad(x, ((0, 0), (0, cin_pad - cin), (0, 0)))

    # ---- first block params: pad -> conv3x3 -> BN -> ReLU --------------------
    fb = params['first']
    c0 = fb['w'].shape[-1]
    first_arrays = [
        _wmat(fb['w'], cin_pad),        # (C0, 9*cin_pad) bf16
        _colvec(fb['b']),               # (C0, 1) f32
        _colvec(fb['post_scale']),
        _colvec(fb['post_shift']),
    ]

    # ---- dilation stages: stack the 6 conv layers of each stage ---------------
    stage_meta = []      # (dilation, stage_width, n_layers)
    stage_arrays = []    # per stage: W (L,Cs,9Cs) bf16, b / pre_scale / pre_shift (L,Cs,1)
    for db in params['dilation_blocks']:
        d = int(db['dilation'])
        cs = db['residual_blocks'][0]['cb2']['w'].shape[-1]
        Ws, Bs, Ss, Hs = [], [], [], []
        for rb in db['residual_blocks']:
            for cb in (rb['cb1'], rb['cb2']):
                Ws.append(_wmat(cb['w'], cs))                 # zero-pad Cin -> Cs
                Bs.append(_colvec(cb['b']))
                Ss.append(_colvec(cb['pre_scale'], cs))       # padded channels stay 0
                Hs.append(_colvec(cb['pre_shift'], cs))
        stage_meta.append((d, cs, len(Ws)))
        stage_arrays += [jnp.stack(Ws), jnp.stack(Bs), jnp.stack(Ss), jnp.stack(Hs)]
    n_stages = len(stage_meta)

    # ---- classifier: 1x1 conv + softmax over channels -------------------------
    cls = params['classifier']
    n_cls = cls['w'].shape[-1]
    cls_arrays = [jnp.transpose(cls['w'], (1, 0)).astype(jnp.bfloat16),   # (n_cls, Cf)
                  _colvec(cls['b'])]

    # ---- per-dilation border masks (host-precomputed, tiled per sample) -------
    unique_dils = sorted({1} | {m[0] for m in stage_meta})
    mask_arrays = [_tap_masks(d, H, W, b_tile) for d in unique_dils]

    c_max = max([c0, cin_pad] + [m[1] for m in stage_meta])

    inputs = [x] + mask_arrays + first_arrays + stage_arrays + cls_arrays

    # ---- fused kernel ----------------------------------------------------------
    def kernel(*refs):
        col_ref = refs[-1]                     # (9*c_max, HWT) bf16 im2col scratch
        o_ref = refs[-2]
        x_ref = refs[0]
        p = 1
        mask_vals = {}
        for d in unique_dils:                  # preload once per grid step (tiny)
            mask_vals[d] = refs[p][...]
            p += 1
        fw_ref, fb_ref, fps_ref, fph_ref = refs[p:p + 4]; p += 4
        srefs = refs[p:p + 4 * n_stages]; p += 4 * n_stages
        cw_ref, cb_ref = refs[p:p + 2]

        def conv3x3(a, w, bias, d):
            """a: (C, HWT) f32 -> (Cout, HWT) f32; one im2col matmul with K = 9*C."""
            C = a.shape[0]
            masks = mask_vals[d]
            for k in range(9):
                dy = (k // 3 - 1) * d
                dx = (k % 3 - 1) * d
                s = dy * W + dx
                if s == 0:
                    tap = a
                else:
                    # tap[:, i] = a[:, i + s]; wrap-around / out-of-image killed by mask.
                    tap = pltpu.roll(a, (-s) % HWT, axis=1) * masks[k:k + 1, :]
                col_ref[pl.ds(k * C, C), :] = tap.astype(jnp.bfloat16)
            col = col_ref[pl.ds(0, 9 * C), :]
            return jnp.dot(w, col, preferred_element_type=jnp.float32) + bias

        # first block: ZeroPad(1) -> Conv3x3 -> BN -> ReLU
        a = conv3x3(x_ref[...], fw_ref[...], fb_ref[...], 1)
        a = jnp.maximum(a * fps_ref[...] + fph_ref[...], 0.0)

        # dilation stages: residual blocks of 2 x [BN -> ReLU -> ZeroPad(d) -> Conv3x3]
        for si, (d, cs, n_layers) in enumerate(stage_meta):
            w_ref, b_ref, s_ref, h_ref = srefs[4 * si: 4 * si + 4]
            if a.shape[0] < cs:   # 'pad' shortcut channel extension (zeros)
                a = jnp.concatenate(
                    [a, jnp.zeros((cs - a.shape[0], HWT), jnp.float32)], axis=0)

            def res_block(rb, a, _d=d, _w=w_ref, _b=b_ref, _s=s_ref, _h=h_ref):
                res = a
                for j_off in range(2):
                    j = 2 * rb + j_off
                    pre = jnp.maximum(a * _s[j] + _h[j], 0.0)
                    a = conv3x3(pre, _w[j], _b[j], _d)
                return a + res

            a = lax.fori_loop(0, n_layers // 2, res_block, a)

        # classifier: 1x1 conv + softmax over channels (channels on sublanes)
        logits = jnp.dot(cw_ref[...], a.astype(jnp.bfloat16),
                         preferred_element_type=jnp.float32) + cb_ref[...]
        mx = jnp.max(logits, axis=0, keepdims=True)
        e = jnp.exp(logits - mx)
        inv = pl.reciprocal(jnp.sum(e, axis=0, keepdims=True), approx=True)
        o_ref[...] = e * inv                                    # (n_cls, HWT), lane-dense

    in_specs = [pl.BlockSpec((pl.Squeezed(), cin_pad, HWT), lambda n: (n, 0, 0))]
    for arr in inputs[1:]:
        nd = arr.ndim
        in_specs.append(pl.BlockSpec(arr.shape, lambda n, _nd=nd: (0,) * _nd))

    out = pl.pallas_call(
        kernel,
        out_shape=jax.ShapeDtypeStruct((n_tiles, n_cls, HWT), jnp.float32),
        grid=(n_tiles,),
        in_specs=in_specs,
        out_specs=pl.BlockSpec((pl.Squeezed(), n_cls, HWT), lambda n: (n, 0, 0)),
        scratch_shapes=[pltpu.VMEM((9 * c_max, HWT), jnp.bfloat16)],
        compiler_params=pltpu.CompilerParams(dimension_semantics=("parallel",)),
    )(*inputs)

    out = out.reshape(n_tiles, n_cls, b_tile, HW).transpose(0, 2, 1, 3)
    return out.reshape(N, n_cls, H, W)      # channel-first (NCHW), like PyTorch


# ----------------------------------------------------------------------------
# Pure-JAX reference (same layer ordering, f32 HIGHEST precision), for checking.
# ----------------------------------------------------------------------------
def conv3x3_block_ref(x, w, b, *, dilation, pre_bn=None, post_bn=None, residual=None):
    d = int(dilation)
    a = x
    if pre_bn is not None:
        a = jnp.maximum(a * pre_bn[0].reshape(1, 1, 1, -1)
                        + pre_bn[1].reshape(1, 1, 1, -1), 0.0)
    a = jnp.pad(a, ((0, 0), (d, d), (d, d), (0, 0)))
    y = lax.conv_general_dilated(a, w, window_strides=(1, 1), padding='VALID',
                                 rhs_dilation=(d, d),
                                 dimension_numbers=('NHWC', 'HWIO', 'NHWC'),
                                 precision=lax.Precision.HIGHEST)
    y = y + b.reshape(1, 1, 1, -1)
    if post_bn is not None:
        y = jnp.maximum(y * post_bn[0].reshape(1, 1, 1, -1)
                        + post_bn[1].reshape(1, 1, 1, -1), 0.0)
    if residual is not None:
        y = y + residual
    return y


def classifier_softmax_ref(x, w, b):
    logits = jnp.einsum('nhwc,cd->nhwd', x, w,
                        precision=lax.Precision.HIGHEST) + b.reshape(1, 1, 1, -1)
    return jax.nn.softmax(logits, axis=-1)


def highresnet_reference(x_nchw, params):
    x = jnp.transpose(x_nchw, (0, 2, 3, 1))  # NCHW -> NHWC
    fb = params['first']
    x = conv3x3_block_ref(x, fb['w'], fb['b'], dilation=1,
                          post_bn=(fb['post_scale'], fb['post_shift']))
    for db in params['dilation_blocks']:
        d = db['dilation']
        for rb in db['residual_blocks']:
            x_in = x
            cb1, cb2 = rb['cb1'], rb['cb2']
            h = conv3x3_block_ref(x, cb1['w'], cb1['b'], dilation=d,
                                  pre_bn=(cb1['pre_scale'], cb1['pre_shift']))
            cout = cb2['w'].shape[-1]
            cin = x_in.shape[-1]
            res = x_in if cin == cout else jnp.pad(
                x_in, ((0, 0), (0, 0), (0, 0), (0, cout - cin)))
            x = conv3x3_block_ref(h, cb2['w'], cb2['b'], dilation=d,
                                  pre_bn=(cb2['pre_scale'], cb2['pre_shift']),
                                  residual=res)
    cls = params['classifier']
    y = classifier_softmax_ref(x, cls['w'], cls['b'])
    return jnp.transpose(y, (0, 3, 1, 2))


# ----------------------------------------------------------------------------
# Deterministic parameter initialization (synthetic, eval-mode BN folded).
# ----------------------------------------------------------------------------
def _conv_w(key, cin, cout, k=3):
    return (jax.random.normal(key, (k, k, cin, cout), jnp.float32)
            * (1.0 / np.sqrt(cin * k * k))).astype(jnp.float32)


def _bias(key, cout):
    return (0.05 * jax.random.normal(key, (1, cout), jnp.float32)).astype(jnp.float32)


def _bn_affine(key, c, eps=1e-5):
    k1, k2, k3, k4 = jax.random.split(key, 4)
    gamma = 1.0 + 0.1 * jax.random.normal(k1, (c,), jnp.float32)
    beta = 0.1 * jax.random.normal(k2, (c,), jnp.float32)
    mean = 0.1 * jax.random.normal(k3, (c,), jnp.float32)
    var = 1.0 + 0.1 * jax.random.uniform(k4, (c,), jnp.float32)
    scale = gamma / jnp.sqrt(var + eps)
    shift = beta - mean * scale
    return scale.reshape(1, c).astype(jnp.float32), shift.reshape(1, c).astype(jnp.float32)


def init_params(key, in_channels, num_classes,
                initial_out_channels_power=4,
                layers_per_residual_block=2,
                residual_blocks_per_dilation=3,
                dilations=3):
    assert layers_per_residual_block == 2  # fused CB1/CB2 structure below
    keys = iter(jax.random.split(key, 256))
    c0 = 2 ** initial_out_channels_power

    params = {}
    ps, pb = _bn_affine(next(keys), c0)
    params['first'] = dict(w=_conv_w(next(keys), in_channels, c0),
                           b=_bias(next(keys), c0),
                           post_scale=ps, post_shift=pb)

    dblocks = []
    in_c, out_c = c0, c0
    for dil_idx in range(dilations):
        d = 2 ** dil_idx
        rbs = []
        cin = in_c
        for _ in range(residual_blocks_per_dilation):
            s1, h1 = _bn_affine(next(keys), cin)
            cb1 = dict(pre_scale=s1, pre_shift=h1,
                       w=_conv_w(next(keys), cin, out_c), b=_bias(next(keys), out_c))
            s2, h2 = _bn_affine(next(keys), out_c)
            cb2 = dict(pre_scale=s2, pre_shift=h2,
                       w=_conv_w(next(keys), out_c, out_c), b=_bias(next(keys), out_c))
            rbs.append(dict(cb1=cb1, cb2=cb2))
            cin = out_c
        dblocks.append(dict(dilation=d, residual_blocks=rbs))
        in_c = out_c
        out_c *= 2
    params['dilation_blocks'] = dblocks

    final_c = dblocks[-1]['residual_blocks'][-1]['cb2']['w'].shape[-1]
    params['classifier'] = dict(
        w=(jax.random.normal(next(keys), (final_c, num_classes), jnp.float32)
           * (1.0 / np.sqrt(final_c))).astype(jnp.float32),
        b=_bias(next(keys), num_classes))
    return params


# ----------------------------------------------------------------------------
if __name__ == "__main__":
    key = jax.random.PRNGKey(0)
    k_x, k_p = jax.random.split(key)

    N, C_in, H, W = 2, 3, 16, 16
    num_classes = 4

    x = jax.random.normal(k_x, (N, C_in, H, W), jnp.float32)  # NCHW like PyTorch
    params = init_params(k_p, C_in, num_classes)

    fwd = jax.jit(lambda inp: highresnet_forward(inp, params))
    out = jax.block_until_ready(fwd(x))

    assert out.shape == (N, num_classes, H, W), out.shape

    ref = jax.block_until_ready(highresnet_reference(x, params))
    err = float(jnp.max(jnp.abs(out - ref)))
    # bf16 MXU operands accumulate ~1% relative error over 19 conv layers -> loosened tol.
    assert err < 5e-2, f"max abs err vs reference: {err}"
    # softmax over the channel dim sums to ~1 (approx reciprocal -> loosened tol)
    assert float(jnp.max(jnp.abs(jnp.sum(out, axis=1) - 1.0))) < 1e-2

    print("KERNEL_OK")
</pallas_src>

<mosaic_0001>
module attributes {stable_mosaic.version = 11 : i64} {
  func.func @kernel(%arg0: i32, %arg1: memref<1x16x256xf32, #tpu.memory_space<vmem>>, %arg2: memref<9x256xf32, #tpu.memory_space<vmem>>, %arg3: memref<9x256xf32, #tpu.memory_space<vmem>>, %arg4: memref<9x256xf32, #tpu.memory_space<vmem>>, %arg5: memref<16x144xbf16, #tpu.memory_space<vmem>>, %arg6: memref<16x1xf32, #tpu.memory_space<vmem>>, %arg7: memref<16x1xf32, #tpu.memory_space<vmem>>, %arg8: memref<16x1xf32, #tpu.memory_space<vmem>>, %arg9: memref<6x16x144xbf16, #tpu.memory_space<vmem>>, %arg10: memref<6x16x1xf32, #tpu.memory_space<vmem>>, %arg11: memref<6x16x1xf32, #tpu.memory_space<vmem>>, %arg12: memref<6x16x1xf32, #tpu.memory_space<vmem>>, %arg13: memref<6x32x288xbf16, #tpu.memory_space<vmem>>, %arg14: memref<6x32x1xf32, #tpu.memory_space<vmem>>, %arg15: memref<6x32x1xf32, #tpu.memory_space<vmem>>, %arg16: memref<6x32x1xf32, #tpu.memory_space<vmem>>, %arg17: memref<6x64x576xbf16, #tpu.memory_space<vmem>>, %arg18: memref<6x64x1xf32, #tpu.memory_space<vmem>>, %arg19: memref<6x64x1xf32, #tpu.memory_space<vmem>>, %arg20: memref<6x64x1xf32, #tpu.memory_space<vmem>>, %arg21: memref<4x64xbf16, #tpu.memory_space<vmem>>, %arg22: memref<4x1xf32, #tpu.memory_space<vmem>>, %arg23: memref<1x4x256xf32, #tpu.memory_space<vmem>>, %arg24: memref<576x256xbf16, #tpu.memory_space<vmem>>) attributes {dimension_semantics = [#tpu.dimension_semantics<parallel>], iteration_bounds = array<i64: 2>, scalar_prefetch = 0 : i64, scratch_operands = 1 : i64, tpu.core_type = #tpu.core_type<tc>, window_params = [{transform_indices = @transform_0, window_bounds = array<i64: 1, 16, 256>}, {pipeline_mode = #tpu.pipeline_mode<synchronous>, transform_indices = @transform_1, window_bounds = array<i64: 9, 256>}, {pipeline_mode = #tpu.pipeline_mode<synchronous>, transform_indices = @transform_2, window_bounds = array<i64: 9, 256>}, {pipeline_mode = #tpu.pipeline_mode<synchronous>, transform_indices = @transform_3, window_bounds = array<i64: 9, 256>}, {pipeline_mode = #tpu.pipeline_mode<synchronous>, transform_indices = @transform_4, window_bounds = array<i64: 16, 144>}, {pipeline_mode = #tpu.pipeline_mode<synchronous>, transform_indices = @transform_5, window_bounds = array<i64: 16, 1>}, {pipeline_mode = #tpu.pipeline_mode<synchronous>, transform_indices = @transform_6, window_bounds = array<i64: 16, 1>}, {pipeline_mode = #tpu.pipeline_mode<synchronous>, transform_indices = @transform_7, window_bounds = array<i64: 16, 1>}, {pipeline_mode = #tpu.pipeline_mode<synchronous>, transform_indices = @transform_8, window_bounds = array<i64: 6, 16, 144>}, {pipeline_mode = #tpu.pipeline_mode<synchronous>, transform_indices = @transform_9, window_bounds = array<i64: 6, 16, 1>}, {pipeline_mode = #tpu.pipeline_mode<synchronous>, transform_indices = @transform_10, window_bounds = array<i64: 6, 16, 1>}, {pipeline_mode = #tpu.pipeline_mode<synchronous>, transform_indices = @transform_11, window_bounds = array<i64: 6, 16, 1>}, {pipeline_mode = #tpu.pipeline_mode<synchronous>, transform_indices = @transform_12, window_bounds = array<i64: 6, 32, 288>}, {pipeline_mode = #tpu.pipeline_mode<synchronous>, transform_indices = @transform_13, window_bounds = array<i64: 6, 32, 1>}, {pipeline_mode = #tpu.pipeline_mode<synchronous>, transform_indices = @transform_14, window_bounds = array<i64: 6, 32, 1>}, {pipeline_mode = #tpu.pipeline_mode<synchronous>, transform_indices = @transform_15, window_bounds = array<i64: 6, 32, 1>}, {pipeline_mode = #tpu.pipeline_mode<synchronous>, transform_indices = @transform_16, window_bounds = array<i64: 6, 64, 576>}, {pipeline_mode = #tpu.pipeline_mode<synchronous>, transform_indices = @transform_17, window_bounds = array<i64: 6, 64, 1>}, {pipeline_mode = #tpu.pipeline_mode<synchronous>, transform_indices = @transform_18, window_bounds = array<i64: 6, 64, 1>}, {pipeline_mode = #tpu.pipeline_mode<synchronous>, transform_indices = @transform_19, window_bounds = array<i64: 6, 64, 1>}, {pipeline_mode = #tpu.pipeline_mode<synchronous>, transform_indices = @transform_20, window_bounds = array<i64: 4, 64>}, {pipeline_mode = #tpu.pipeline_mode<synchronous>, transform_indices = @transform_21, window_bounds = array<i64: 4, 1>}, {transform_indices = @transform_22, window_bounds = array<i64: 1, 4, 256>}]} {
    %c0 = arith.constant 0 : index
    %c0_0 = arith.constant 0 : index
    %0 = vector.load %arg2[%c0, %c0_0] : memref<9x256xf32, #tpu.memory_space<vmem>>, vector<9x256xf32>
    %c0_1 = arith.constant 0 : index
    %c0_2 = arith.constant 0 : index
    %1 = vector.load %arg3[%c0_1, %c0_2] : memref<9x256xf32, #tpu.memory_space<vmem>>, vector<9x256xf32>
    %c0_3 = arith.constant 0 : index
    %c0_4 = arith.constant 0 : index
    %2 = vector.load %arg4[%c0_3, %c0_4] : memref<9x256xf32, #tpu.memory_space<vmem>>, vector<9x256xf32>
    %c0_5 = arith.constant 0 : index
    %c0_6 = arith.constant 0 : index
    %c0_7 = arith.constant 0 : index
    %3 = vector.load %arg1[%c0_5, %c0_6, %c0_7] : memref<1x16x256xf32, #tpu.memory_space<vmem>>, vector<1x16x256xf32>
    %4 = vector.shape_cast %3 : vector<1x16x256xf32> to vector<16x256xf32>
    %c0_8 = arith.constant 0 : index
    %c0_9 = arith.constant 0 : index
    %5 = vector.load %arg5[%c0_8, %c0_9] : memref<16x144xbf16, #tpu.memory_space<vmem>>, vector<16x144xbf16>
    %c0_10 = arith.constant 0 : index
    %c0_11 = arith.constant 0 : index
    %6 = vector.load %arg6[%c0_10, %c0_11] : memref<16x1xf32, #tpu.memory_space<vmem>>, vector<16x1xf32>
    %c17_i32 = arith.constant 17 : i32
    %7 = tpu.dynamic_rotate %4 by %c17_i32 dim 1 : vector<16x256xf32>, i32 -> vector<16x256xf32>
    %8 = vector.extract_strided_slice %0 {offsets = [0, 0], sizes = [1, 256], strides = [1, 1]} : vector<9x256xf32> to vector<1x256xf32>
    %9 = vector.broadcast %8 : vector<1x256xf32> to vector<16x256xf32>
    %10 = arith.mulf %7, %9 : vector<16x256xf32>
    %11 = arith.truncf %10 : vector<16x256xf32> to vector<16x256xbf16>
    %c0_12 = arith.constant 0 : index
    %c0_13 = arith.constant 0 : index
    %12 = vector.load %arg24[%c0_12, %c0_13] : memref<576x256xbf16, #tpu.memory_space<vmem>>, vector<16x256xbf16>
    tpu.vector_store %arg24[%c0_12, %c0_13], %11 {strides = array<i32>} : memref<576x256xbf16, #tpu.memory_space<vmem>>, vector<16x256xbf16>,
    %c16_i32 = arith.constant 16 : i32
    %13 = tpu.dynamic_rotate %4 by %c16_i32 dim 1 : vector<16x256xf32>, i32 -> vector<16x256xf32>
    %14 = vector.extract_strided_slice %0 {offsets = [1, 0], sizes = [1, 256], strides = [1, 1]} : vector<9x256xf32> to vector<1x256xf32>
    %15 = vector.broadcast %14 : vector<1x256xf32> to vector<16x256xf32>
    %16 = arith.mulf %13, %15 : vector<16x256xf32>
    %17 = arith.truncf %16 : vector<16x256xf32> to vector<16x256xbf16>
    %c16 = arith.constant 16 : index
    %c0_14 = arith.constant 0 : index
    %18 = vector.load %arg24[%c16, %c0_14] : memref<576x256xbf16, #tpu.memory_space<vmem>>, vector<16x256xbf16>
    tpu.vector_store %arg24[%c16, %c0_14], %17 {strides = array<i32>} : memref<576x256xbf16, #tpu.memory_space<vmem>>, vector<16x256xbf16>,
    %c15_i32 = arith.constant 15 : i32
    %19 = tpu.dynamic_rotate %4 by %c15_i32 dim 1 : vector<16x256xf32>, i32 -> vector<16x256xf32>
    %20 = vector.extract_strided_slice %0 {offsets = [2, 0], sizes = [1, 256], strides = [1, 1]} : vector<9x256xf32> to vector<1x256xf32>
    %21 = vector.broadcast %20 : vector<1x256xf32> to vector<16x256xf32>
    %22 = arith.mulf %19, %21 : vector<16x256xf32>
    %23 = arith.truncf %22 : vector<16x256xf32> to vector<16x256xbf16>
    %c32 = arith.constant 32 : index
    %c0_15 = arith.constant 0 : index
    %24 = vector.load %arg24[%c32, %c0_15] : memref<576x256xbf16, #tpu.memory_space<vmem>>, vector<16x256xbf16>
    tpu.vector_store %arg24[%c32, %c0_15], %23 {strides = array<i32>} : memref<576x256xbf16, #tpu.memory_space<vmem>>, vector<16x256xbf16>,
    %c1_i32 = arith.constant 1 : i32
    %25 = tpu.dynamic_rotate %4 by %c1_i32 dim 1 : vector<16x256xf32>, i32 -> vector<16x256xf32>
    %26 = vector.extract_strided_slice %0 {offsets = [3, 0], sizes = [1, 256], strides = [1, 1]} : vector<9x256xf32> to vector<1x256xf32>
    %27 = vector.broadcast %26 : vector<1x256xf32> to vector<16x256xf32>
    %28 = arith.mulf %25, %27 : vector<16x256xf32>
    %29 = arith.truncf %28 : vector<16x256xf32> to vector<16x256xbf16>
    %c48 = arith.constant 48 : index
    %c0_16 = arith.constant 0 : index
    %30 = vector.load %arg24[%c48, %c0_16] : memref<576x256xbf16, #tpu.memory_space<vmem>>, vector<16x256xbf16>
    tpu.vector_store %arg24[%c48, %c0_16], %29 {strides = array<i32>} : memref<576x256xbf16, #tpu.memory_space<vmem>>, vector<16x256xbf16>,
    %31 = arith.truncf %4 : vector<16x256xf32> to vector<16x256xbf16>
    %c64 = arith.constant 64 : index
    %c0_17 = arith.constant 0 : index
    %32 = vector.load %arg24[%c64, %c0_17] : memref<576x256xbf16, #tpu.memory_space<vmem>>, vector<16x256xbf16>
    tpu.vector_store %arg24[%c64, %c0_17], %31 {strides = array<i32>} : memref<576x256xbf16, #tpu.memory_space<vmem>>, vector<16x256xbf16>,
    %c255_i32 = arith.constant 255 : i32
    %33 = tpu.dynamic_rotate %4 by %c255_i32 dim 1 : vector<16x256xf32>, i32 -> vector<16x256xf32>
    %34 = vector.extract_strided_slice %0 {offsets = [5, 0], sizes = [1, 256], strides = [1, 1]} : vector<9x256xf32> to vector<1x256xf32>
    %35 = vector.broadcast %34 : vector<1x256xf32> to vector<16x256xf32>
    %36 = arith.mulf %33, %35 : vector<16x256xf32>
    %37 = arith.truncf %36 : vector<16x256xf32> to vector<16x256xbf16>
    %c80 = arith.constant 80 : index
    %c0_18 = arith.constant 0 : index
    %38 = vector.load %arg24[%c80, %c0_18] : memref<576x256xbf16, #tpu.memory_space<vmem>>, vector<16x256xbf16>
    tpu.vector_store %arg24[%c80, %c0_18], %37 {strides = array<i32>} : memref<576x256xbf16, #tpu.memory_space<vmem>>, vector<16x256xbf16>,
    %c241_i32 = arith.constant 241 : i32
    %39 = tpu.dynamic_rotate %4 by %c241_i32 dim 1 : vector<16x256xf32>, i32 -> vector<16x256xf32>
    %40 = vector.extract_strided_slice %0 {offsets = [6, 0], sizes = [1, 256], strides = [1, 1]} : vector<9x256xf32> to vector<1x256xf32>
    %41 = vector.broadcast %40 : vector<1x256xf32> to vector<16x256xf32>
    %42 = arith.mulf %39, %41 : vector<16x256xf32>
    %43 = arith.truncf %42 : vector<16x256xf32> to vector<16x256xbf16>
    %c96 = arith.constant 96 : index
    %c0_19 = arith.constant 0 : index
    %44 = vector.load %arg24[%c96, %c0_19] : memref<576x256xbf16, #tpu.memory_space<vmem>>, vector<16x256xbf16>
    tpu.vector_store %arg24[%c96, %c0_19], %43 {strides = array<i32>} : memref<576x256xbf16, #tpu.memory_space<vmem>>, vector<16x256xbf16>,
    %c240_i32 = arith.constant 240 : i32
    %45 = tpu.dynamic_rotate %4 by %c240_i32 dim 1 : vector<16x256xf32>, i32 -> vector<16x256xf32>
    %46 = vector.extract_strided_slice %0 {offsets = [7, 0], sizes = [1, 256], strides = [1, 1]} : vector<9x256xf32> to vector<1x256xf32>
    %47 = vector.broadcast %46 : vector<1x256xf32> to vector<16x256xf32>
    %48 = arith.mulf %45, %47 : vector<16x256xf32>
    %49 = arith.truncf %48 : vector<16x256xf32> to vector<16x256xbf16>
    %c112 = arith.constant 112 : index
    %c0_20 = arith.constant 0 : index
    %50 = vector.load %arg24[%c112, %c0_20] : memref<576x256xbf16, #tpu.memory_space<vmem>>, vector<16x256xbf16>
    tpu.vector_store %arg24[%c112, %c0_20], %49 {strides = array<i32>} : memref<576x256xbf16, #tpu.memory_space<vmem>>, vector<16x256xbf16>,
    %c239_i32 = arith.constant 239 : i32
    %51 = tpu.dynamic_rotate %4 by %c239_i32 dim 1 : vector<16x256xf32>, i32 -> vector<16x256xf32>
    %52 = vector.extract_strided_slice %0 {offsets = [8, 0], sizes = [1, 256], strides = [1, 1]} : vector<9x256xf32> to vector<1x256xf32>
    %53 = vector.broadcast %52 : vector<1x256xf32> to vector<16x256xf32>
    %54 = arith.mulf %51, %53 : vector<16x256xf32>
    %55 = arith.truncf %54 : vector<16x256xf32> to vector<16x256xbf16>
    %c128 = arith.constant 128 : index
    %c0_21 = arith.constant 0 : index
    %56 = vector.load %arg24[%c128, %c0_21] : memref<576x256xbf16, #tpu.memory_space<vmem>>, vector<16x256xbf16>
    tpu.vector_store %arg24[%c128, %c0_21], %55 {strides = array<i32>} : memref<576x256xbf16, #tpu.memory_space<vmem>>, vector<16x256xbf16>,
    %c0_22 = arith.constant 0 : index
    %c0_23 = arith.constant 0 : index
    %57 = vector.load %arg24[%c0_22, %c0_23] : memref<576x256xbf16, #tpu.memory_space<vmem>>, vector<144x256xbf16>
    %cst = arith.constant dense<0.000000e+00> : vector<16x256xf32>
    %58 = tpu.matmul %5, %57, %cst {dimension_numbers = #tpu.dot_dimension_numbers<[1], [0], [0], [1], [0, 0, 1, 1], [], []>} : vector<16x144xbf16>, vector<144x256xbf16>, vector<16x256xf32> -> vector<16x256xf32>
    %59 = vector.broadcast %6 : vector<16x1xf32> to vector<16x256xf32>
    %60 = arith.addf %58, %59 : vector<16x256xf32>
    %c0_24 = arith.constant 0 : index
    %c0_25 = arith.constant 0 : index
    %61 = vector.load %arg7[%c0_24, %c0_25] : memref<16x1xf32, #tpu.memory_space<vmem>>, vector<16x1xf32>
    %62 = vector.broadcast %61 : vector<16x1xf32> to vector<16x256xf32>
    %63 = arith.mulf %60, %62 : vector<16x256xf32>
    %c0_26 = arith.constant 0 : index
    %c0_27 = arith.constant 0 : index
    %64 = vector.load %arg8[%c0_26, %c0_27] : memref<16x1xf32, #tpu.memory_space<vmem>>, vector<16x1xf32>
    %65 = vector.broadcast %64 : vector<16x1xf32> to vector<16x256xf32>
    %66 = arith.addf %63, %65 : vector<16x256xf32>
    %cst_28 = arith.constant 0.000000e+00 : f32
    %67 = vector.broadcast %cst_28 : f32 to vector<16x256xf32>
    %68 = arith.maximumf %66, %67 : vector<16x256xf32>
    %c0_i32 = arith.constant 0 : i32
    %c3_i32 = arith.constant 3 : i32
    %69 = arith.addi %c0_i32, %c3_i32 : i32
    %c1_i32_29 = arith.constant 1 : i32
    %70 = scf.for %arg25 = %c0_i32 to %69 step %c1_i32_29 iter_args(%arg26 = %68) -> (vector<16x256xf32>)  : i32 {
      %c2_i32 = arith.constant 2 : i32
      %98 = arith.muli %c2_i32, %arg25 : i32
      %c0_i32_51 = arith.constant 0 : i32
      %99 = arith.addi %98, %c0_i32_51 : i32
      %100 = arith.index_cast %99 : i32 to index
      %c0_52 = arith.constant 0 : index
      %c0_53 = arith.constant 0 : index
      %101 = vector.load %arg11[%100, %c0_52, %c0_53] : memref<6x16x1xf32, #tpu.memory_space<vmem>>, vector<1x16x1xf32>
      %102 = vector.shape_cast %101 : vector<1x16x1xf32> to vector<16x1xf32>
      %103 = vector.broadcast %102 : vector<16x1xf32> to vector<16x256xf32>
      %104 = arith.mulf %arg26, %103 : vector<16x256xf32>
      %105 = arith.index_cast %99 : i32 to index
      %c0_54 = arith.constant 0 : index
      %c0_55 = arith.constant 0 : index
      %106 = vector.load %arg12[%105, %c0_54, %c0_55] : memref<6x16x1xf32, #tpu.memory_space<vmem>>, vector<1x16x1xf32>
      %107 = vector.shape_cast %106 : vector<1x16x1xf32> to vector<16x1xf32>
      %108 = vector.broadcast %107 : vector<16x1xf32> to vector<16x256xf32>
      %109 = arith.addf %104, %108 : vector<16x256xf32>
      %cst_56 = arith.constant 0.000000e+00 : f32
      %110 = vector.broadcast %cst_56 : f32 to vector<16x256xf32>
      %111 = arith.maximumf %109, %110 : vector<16x256xf32>
      %112 = arith.index_cast %99 : i32 to index
      %c0_57 = arith.constant 0 : index
      %c0_58 = arith.constant 0 : index
      %113 = vector.load %arg9[%112, %c0_57, %c0_58] : memref<6x16x144xbf16, #tpu.memory_space<vmem>>, vector<1x16x144xbf16>
      %114 = vector.shape_cast %113 : vector<1x16x144xbf16> to vector<16x144xbf16>
      %115 = arith.index_cast %99 : i32 to index
      %c0_59 = arith.constant 0 : index
      %c0_60 = arith.constant 0 : index
      %116 = vector.load %arg10[%115, %c0_59, %c0_60] : memref<6x16x1xf32, #tpu.memory_space<vmem>>, vector<1x16x1xf32>
      %117 = vector.shape_cast %116 : vector<1x16x1xf32> to vector<16x1xf32>
      %c17_i32_61 = arith.constant 17 : i32
      %118 = tpu.dynamic_rotate %111 by %c17_i32_61 dim 1 : vector<16x256xf32>, i32 -> vector<16x256xf32>
      %119 = vector.extract_strided_slice %0 {offsets = [0, 0], sizes = [1, 256], strides = [1, 1]} : vector<9x256xf32> to vector<1x256xf32>
      %120 = vector.broadcast %119 : vector<1x256xf32> to vector<16x256xf32>
      %121 = arith.mulf %118, %120 : vector<16x256xf32>
      %122 = arith.truncf %121 : vector<16x256xf32> to vector<16x256xbf16>
      %c0_62 = arith.constant 0 : index
      %c0_63 = arith.constant 0 : index
      %123 = vector.load %arg24[%c0_62, %c0_63] : memref<576x256xbf16, #tpu.memory_space<vmem>>, vector<16x256xbf16>
      tpu.vector_store %arg24[%c0_62, %c0_63], %122 {strides = array<i32>} : memref<576x256xbf16, #tpu.memory_space<vmem>>, vector<16x256xbf16>,
      %c16_i32_64 = arith.constant 16 : i32
      %124 = tpu.dynamic_rotate %111 by %c16_i32_64 dim 1 : vector<16x256xf32>, i32 -> vector<16x256xf32>
      %125 = vector.extract_strided_slice %0 {offsets = [1, 0], sizes = [1, 256], strides = [1, 1]} : vector<9x256xf32> to vector<1x256xf32>
      %126 = vector.broadcast %125 : vector<1x256xf32> to vector<16x256xf32>
      %127 = arith.mulf %124, %126 : vector<16x256xf32>
      %128 = arith.truncf %127 : vector<16x256xf32> to vector<16x256xbf16>
      %c16_65 = arith.constant 16 : index
      %c0_66 = arith.constant 0 : index
      %129 = vector.load %arg24[%c16_65, %c0_66] : memref<576x256xbf16, #tpu.memory_space<vmem>>, vector<16x256xbf16>
      tpu.vector_store %arg24[%c16_65, %c0_66], %128 {strides = array<i32>} : memref<576x256xbf16, #tpu.memory_space<vmem>>, vector<16x256xbf16>,
      %c15_i32_67 = arith.constant 15 : i32
      %130 = tpu.dynamic_rotate %111 by %c15_i32_67 dim 1 : vector<16x256xf32>, i32 -> vector<16x256xf32>
      %131 = vector.extract_strided_slice %0 {offsets = [2, 0], sizes = [1, 256], strides = [1, 1]} : vector<9x256xf32> to vector<1x256xf32>
      %132 = vector.broadcast %131 : vector<1x256xf32> to vector<16x256xf32>
      %133 = arith.mulf %130, %132 : vector<16x256xf32>
      %134 = arith.truncf %133 : vector<16x256xf32> to vector<16x256xbf16>
      %c32_68 = arith.constant 32 : index
      %c0_69 = arith.constant 0 : index
      %135 = vector.load %arg24[%c32_68, %c0_69] : memref<576x256xbf16, #tpu.memory_space<vmem>>, vector<16x256xbf16>
      tpu.vector_store %arg24[%c32_68, %c0_69], %134 {strides = array<i32>} : memref<576x256xbf16, #tpu.memory_space<vmem>>, vector<16x256xbf16>,
      %c1_i32_70 = arith.constant 1 : i32
      %136 = tpu.dynamic_rotate %111 by %c1_i32_70 dim 1 : vector<16x256xf32>, i32 -> vector<16x256xf32>
      %137 = vector.extract_strided_slice %0 {offsets = [3, 0], sizes = [1, 256], strides = [1, 1]} : vector<9x256xf32> to vector<1x256xf32>
      %138 = vector.broadcast %137 : vector<1x256xf32> to vector<16x256xf32>
      %139 = arith.mulf %136, %138 : vector<16x256xf32>
      %140 = arith.truncf %139 : vector<16x256xf32> to vector<16x256xbf16>
      %c48_71 = arith.constant 48 : index
      %c0_72 = arith.constant 0 : index
      %141 = vector.load %arg24[%c48_71, %c0_72] : memref<576x256xbf16, #tpu.memory_space<vmem>>, vector<16x256xbf16>
      tpu.vector_store %arg24[%c48_71, %c0_72], %140 {strides = array<i32>} : memref<576x256xbf16, #tpu.memory_space<vmem>>, vector<16x256xbf16>,
      %142 = arith.truncf %111 : vector<16x256xf32> to vector<16x256xbf16>
      %c64_73 = arith.constant 64 : index
      %c0_74 = arith.constant 0 : index
      %143 = vector.load %arg24[%c64_73, %c0_74] : memref<576x256xbf16, #tpu.memory_space<vmem>>, vector<16x256xbf16>
      tpu.vector_store %arg24[%c64_73, %c0_74], %142 {strides = array<i32>} : memref<576x256xbf16, #tpu.memory_space<vmem>>, vector<16x256xbf16>,
      %c255_i32_75 = arith.constant 255 : i32
      %144 = tpu.dynamic_rotate %111 by %c255_i32_75 dim 1 : vector<16x256xf32>, i32 -> vector<16x256xf32>
      %145 = vector.extract_strided_slice %0 {offsets = [5, 0], sizes = [1, 256], strides = [1, 1]} : vector<9x256xf32> to vector<1x256xf32>
      %146 = vector.broadcast %145 : vector<1x256xf32> to vector<16x256xf32>
      %147 = arith.mulf %144, %146 : vector<16x256xf32>
      %148 = arith.truncf %147 : vector<16x256xf32> to vector<16x256xbf16>
      %c80_76 = arith.constant 80 : index
      %c0_77 = arith.constant 0 : index
      %149 = vector.load %arg24[%c80_76, %c0_77] : memref<576x256xbf16, #tpu.memory_space<vmem>>, vector<16x256xbf16>
      tpu.vector_store %arg24[%c80_76, %c0_77], %148 {strides = array<i32>} : memref<576x256xbf16, #tpu.memory_space<vmem>>, vector<16x256xbf16>,
      %c241_i32_78 = arith.constant 241 : i32
      %150 = tpu.dynamic_rotate %111 by %c241_i32_78 dim 1 : vector<16x256xf32>, i32 -> vector<16x256xf32>
      %151 = vector.extract_strided_slice %0 {offsets = [6, 0], sizes = [1, 256], strides = [1, 1]} : vector<9x256xf32> to vector<1x256xf32>
      %152 = vector.broadcast %151 : vector<1x256xf32> to vector<16x256xf32>
      %153 = arith.mulf %150, %152 : vector<16x256xf32>
      %154 = arith.truncf %153 : vector<16x256xf32> to vector<16x256xbf16>
      %c96_79 = arith.constant 96 : index
      %c0_80 = arith.constant 0 : index
      %155 = vector.load %arg24[%c96_79, %c0_80] : memref<576x256xbf16, #tpu.memory_space<vmem>>, vector<16x256xbf16>
      tpu.vector_store %arg24[%c96_79, %c0_80], %154 {strides = array<i32>} : memref<576x256xbf16, #tpu.memory_space<vmem>>, vector<16x256xbf16>,
      %c240_i32_81 = arith.constant 240 : i32
      %156 = tpu.dynamic_rotate %111 by %c240_i32_81 dim 1 : vector<16x256xf32>, i32 -> vector<16x256xf32>
      %157 = vector.extract_strided_slice %0 {offsets = [7, 0], sizes = [1, 256], strides = [1, 1]} : vector<9x256xf32> to vector<1x256xf32>
      %158 = vector.broadcast %157 : vector<1x256xf32> to vector<16x256xf32>
      %159 = arith.mulf %156, %158 : vector<16x256xf32>
      %160 = arith.truncf %159 : vector<16x256xf32> to vector<16x256xbf16>
      %c112_82 = arith.constant 112 : index
      %c0_83 = arith.constant 0 : index
      %161 = vector.load %arg24[%c112_82, %c0_83] : memref<576x256xbf16, #tpu.memory_space<vmem>>, vector<16x256xbf16>
      tpu.vector_store %arg24[%c112_82, %c0_83], %160 {strides = array<i32>} : memref<576x256xbf16, #tpu.memory_space<vmem>>, vector<16x256xbf16>,
      %c239_i32_84 = arith.constant 239 : i32
      %162 = tpu.dynamic_rotate %111 by %c239_i32_84 dim 1 : vector<16x256xf32>, i32 -> vector<16x256xf32>
      %163 = vector.extract_strided_slice %0 {offsets = [8, 0], sizes = [1, 256], strides = [1, 1]} : vector<9x256xf32> to vector<1x256xf32>
      %164 = vector.broadcast %163 : vector<1x256xf32> to vector<16x256xf32>
      %165 = arith.mulf %162, %164 : vector<16x256xf32>
      %166 = arith.truncf %165 : vector<16x256xf32> to vector<16x256xbf16>
      %c128_85 = arith.constant 128 : index
      %c0_86 = arith.constant 0 : index
      %167 = vector.load %arg24[%c128_85, %c0_86] : memref<576x256xbf16, #tpu.memory_space<vmem>>, vector<16x256xbf16>
      tpu.vector_store %arg24[%c128_85, %c0_86], %166 {strides = array<i32>} : memref<576x256xbf16, #tpu.memory_space<vmem>>, vector<16x256xbf16>,
      %c0_87 = arith.constant 0 : index
      %c0_88 = arith.constant 0 : index
      %168 = vector.load %arg24[%c0_87, %c0_88] : memref<576x256xbf16, #tpu.memory_space<vmem>>, vector<144x256xbf16>
      %cst_89 = arith.constant dense<0.000000e+00> : vector<16x256xf32>
      %169 = tpu.matmul %114, %168, %cst_89 {dimension_numbers = #tpu.dot_dimension_numbers<[1], [0], [0], [1], [0, 0, 1, 1], [], []>} : vector<16x144xbf16>, vector<144x256xbf16>, vector<16x256xf32> -> vector<16x256xf32>
      %170 = vector.broadcast %117 : vector<16x1xf32> to vector<16x256xf32>
      %171 = arith.addf %169, %170 : vector<16x256xf32>
      %c2_i32_90 = arith.constant 2 : i32
      %172 = arith.muli %c2_i32_90, %arg25 : i32
      %c1_i32_91 = arith.constant 1 : i32
      %173 = arith.addi %172, %c1_i32_91 : i32
      %174 = arith.index_cast %173 : i32 to index
      %c0_92 = arith.constant 0 : index
      %c0_93 = arith.constant 0 : index
      %175 = vector.load %arg11[%174, %c0_92, %c0_93] : memref<6x16x1xf32, #tpu.memory_space<vmem>>, vector<1x16x1xf32>
      %176 = vector.shape_cast %175 : vector<1x16x1xf32> to vector<16x1xf32>
      %177 = vector.broadcast %176 : vector<16x1xf32> to vector<16x256xf32>
      %178 = arith.mulf %171, %177 : vector<16x256xf32>
      %179 = arith.index_cast %173 : i32 to index
      %c0_94 = arith.constant 0 : index
      %c0_95 = arith.constant 0 : index
      %180 = vector.load %arg12[%179, %c0_94, %c0_95] : memref<6x16x1xf32, #tpu.memory_space<vmem>>, vector<1x16x1xf32>
      %181 = vector.shape_cast %180 : vector<1x16x1xf32> to vector<16x1xf32>
      %182 = vector.broadcast %181 : vector<16x1xf32> to vector<16x256xf32>
      %183 = arith.addf %178, %182 : vector<16x256xf32>
      %cst_96 = arith.constant 0.000000e+00 : f32
      %184 = vector.broadcast %cst_96 : f32 to vector<16x256xf32>
      %185 = arith.maximumf %183, %184 : vector<16x256xf32>
      %186 = arith.index_cast %173 : i32 to index
      %c0_97 = arith.constant 0 : index
      %c0_98 = arith.constant 0 : index
      %187 = vector.load %arg9[%186, %c0_97, %c0_98] : memref<6x16x144xbf16, #tpu.memory_space<vmem>>, vector<1x16x144xbf16>
      %188 = vector.shape_cast %187 : vector<1x16x144xbf16> to vector<16x144xbf16>
      %189 = arith.index_cast %173 : i32 to index
      %c0_99 = arith.constant 0 : index
      %c0_100 = arith.constant 0 : index
      %190 = vector.load %arg10[%189, %c0_99, %c0_100] : memref<6x16x1xf32, #tpu.memory_space<vmem>>, vector<1x16x1xf32>
      %191 = vector.shape_cast %190 : vector<1x16x1xf32> to vector<16x1xf32>
      %c17_i32_101 = arith.constant 17 : i32
      %192 = tpu.dynamic_rotate %185 by %c17_i32_101 dim 1 : vector<16x256xf32>, i32 -> vector<16x256xf32>
      %193 = vector.extract_strided_slice %0 {offsets = [0, 0], sizes = [1, 256], strides = [1, 1]} : vector<9x256xf32> to vector<1x256xf32>
      %194 = vector.broadcast %193 : vector<1x256xf32> to vector<16x256xf32>
      %195 = arith.mulf %192, %194 : vector<16x256xf32>
      %196 = arith.truncf %195 : vector<16x256xf32> to vector<16x256xbf16>
      %c0_102 = arith.constant 0 : index
      %c0_103 = arith.constant 0 : index
      %197 = vector.load %arg24[%c0_102, %c0_103] : memref<576x256xbf16, #tpu.memory_space<vmem>>, vector<16x256xbf16>
      tpu.vector_store %arg24[%c0_102, %c0_103], %196 {strides = array<i32>} : memref<576x256xbf16, #tpu.memory_space<vmem>>, vector<16x256xbf16>,
      %c16_i32_104 = arith.constant 16 : i32
      %198 = tpu.dynamic_rotate %185 by %c16_i32_104 dim 1 : vector<16x256xf32>, i32 -> vector<16x256xf32>
      %199 = vector.extract_strided_slice %0 {offsets = [1, 0], sizes = [1, 256], strides = [1, 1]} : vector<9x256xf32> to vector<1x256xf32>
      %200 = vector.broadcast %199 : vector<1x256xf32> to vector<16x256xf32>
      %201 = arith.mulf %198, %200 : vector<16x256xf32>
      %202 = arith.truncf %201 : vector<16x256xf32> to vector<16x256xbf16>
      %c16_105 = arith.constant 16 : index
      %c0_106 = arith.constant 0 : index
      %203 = vector.load %arg24[%c16_105, %c0_106] : memref<576x256xbf16, #tpu.memory_space<vmem>>, vector<16x256xbf16>
      tpu.vector_store %arg24[%c16_105, %c0_106], %202 {strides = array<i32>} : memref<576x256xbf16, #tpu.memory_space<vmem>>, vector<16x256xbf16>,
      %c15_i32_107 = arith.constant 15 : i32
      %204 = tpu.dynamic_rotate %185 by %c15_i32_107 dim 1 : vector<16x256xf32>, i32 -> vector<16x256xf32>
      %205 = vector.extract_strided_slice %0 {offsets = [2, 0], sizes = [1, 256], strides = [1, 1]} : vector<9x256xf32> to vector<1x256xf32>
      %206 = vector.broadcast %205 : vector<1x256xf32> to vector<16x256xf32>
      %207 = arith.mulf %204, %206 : vector<16x256xf32>
      %208 = arith.truncf %207 : vector<16x256xf32> to vector<16x256xbf16>
      %c32_108 = arith.constant 32 : index
      %c0_109 = arith.constant 0 : index
      %209 = vector.load %arg24[%c32_108, %c0_109] : memref<576x256xbf16, #tpu.memory_space<vmem>>, vector<16x256xbf16>
      tpu.vector_store %arg24[%c32_108, %c0_109], %208 {strides = array<i32>} : memref<576x256xbf16, #tpu.memory_space<vmem>>, vector<16x256xbf16>,
      %c1_i32_110 = arith.constant 1 : i32
      %210 = tpu.dynamic_rotate %185 by %c1_i32_110 dim 1 : vector<16x256xf32>, i32 -> vector<16x256xf32>
      %211 = vector.extract_strided_slice %0 {offsets = [3, 0], sizes = [1, 256], strides = [1, 1]} : vector<9x256xf32> to vector<1x256xf32>
      %212 = vector.broadcast %211 : vector<1x256xf32> to vector<16x256xf32>
      %213 = arith.mulf %210, %212 : vector<16x256xf32>
      %214 = arith.truncf %213 : vector<16x256xf32> to vector<16x256xbf16>
      %c48_111 = arith.constant 48 : index
      %c0_112 = arith.constant 0 : index
      %215 = vector.load %arg24[%c48_111, %c0_112] : memref<576x256xbf16, #tpu.memory_space<vmem>>, vector<16x256xbf16>
      tpu.vector_store %arg24[%c48_111, %c0_112], %214 {strides = array<i32>} : memref<576x256xbf16, #tpu.memory_space<vmem>>, vector<16x256xbf16>,
      %216 = arith.truncf %185 : vector<16x256xf32> to vector<16x256xbf16>
      %c64_113 = arith.constant 64 : index
      %c0_114 = arith.constant 0 : index
      %217 = vector.load %arg24[%c64_113, %c0_114] : memref<576x256xbf16, #tpu.memory_space<vmem>>, vector<16x256xbf16>
      tpu.vector_store %arg24[%c64_113, %c0_114], %216 {strides = array<i32>} : memref<576x256xbf16, #tpu.memory_space<vmem>>, vector<16x256xbf16>,
      %c255_i32_115 = arith.constant 255 : i32
      %218 = tpu.dynamic_rotate %185 by %c255_i32_115 dim 1 : vector<16x256xf32>, i32 -> vector<16x256xf32>
      %219 = vector.extract_strided_slice %0 {offsets = [5, 0], sizes = [1, 256], strides = [1, 1]} : vector<9x256xf32> to vector<1x256xf32>
      %220 = vector.broadcast %219 : vector<1x256xf32> to vector<16x256xf32>
      %221 = arith.mulf %218, %220 : vector<16x256xf32>
      %222 = arith.truncf %221 : vector<16x256xf32> to vector<16x256xbf16>
      %c80_116 = arith.constant 80 : index
      %c0_117 = arith.constant 0 : index
      %223 = vector.load %arg24[%c80_116, %c0_117] : memref<576x256xbf16, #tpu.memory_space<vmem>>, vector<16x256xbf16>
      tpu.vector_store %arg24[%c80_116, %c0_117], %222 {strides = array<i32>} : memref<576x256xbf16, #tpu.memory_space<vmem>>, vector<16x256xbf16>,
      %c241_i32_118 = arith.constant 241 : i32
      %224 = tpu.dynamic_rotate %185 by %c241_i32_118 dim 1 : vector<16x256xf32>, i32 -> vector<16x256xf32>
      %225 = vector.extract_strided_slice %0 {offsets = [6, 0], sizes = [1, 256], strides = [1, 1]} : vector<9x256xf32> to vector<1x256xf32>
      %226 = vector.broadcast %225 : vector<1x256xf32> to vector<16x256xf32>
      %227 = arith.mulf %224, %226 : vector<16x256xf32>
      %228 = arith.truncf %227 : vector<16x256xf32> to vector<16x256xbf16>
      %c96_119 = arith.constant 96 : index
      %c0_120 = arith.constant 0 : index
      %229 = vector.load %arg24[%c96_119, %c0_120] : memref<576x256xbf16, #tpu.memory_space<vmem>>, vector<16x256xbf16>
      tpu.vector_store %arg24[%c96_119, %c0_120], %228 {strides = array<i32>} : memref<576x256xbf16, #tpu.memory_space<vmem>>, vector<16x256xbf16>,
      %c240_i32_121 = arith.constant 240 : i32
      %230 = tpu.dynamic_rotate %185 by %c240_i32_121 dim 1 : vector<16x256xf32>, i32 -> vector<16x256xf32>
      %231 = vector.extract_strided_slice %0 {offsets = [7, 0], sizes = [1, 256], strides = [1, 1]} : vector<9x256xf32> to vector<1x256xf32>
      %232 = vector.broadcast %231 : vector<1x256xf32> to vector<16x256xf32>
      %233 = arith.mulf %230, %232 : vector<16x256xf32>
      %234 = arith.truncf %233 : vector<16x256xf32> to vector<16x256xbf16>
      %c112_122 = arith.constant 112 : index
      %c0_123 = arith.constant 0 : index
      %235 = vector.load %arg24[%c112_122, %c0_123] : memref<576x256xbf16, #tpu.memory_space<vmem>>, vector<16x256xbf16>
      tpu.vector_store %arg24[%c112_122, %c0_123], %234 {strides = array<i32>} : memref<576x256xbf16, #tpu.memory_space<vmem>>, vector<16x256xbf16>,
      %c239_i32_124 = arith.constant 239 : i32
      %236 = tpu.dynamic_rotate %185 by %c239_i32_124 dim 1 : vector<16x256xf32>, i32 -> vector<16x256xf32>
      %237 = vector.extract_strided_slice %0 {offsets = [8, 0], sizes = [1, 256], strides = [1, 1]} : vector<9x256xf32> to vector<1x256xf32>
      %238 = vector.broadcast %237 : vector<1x256xf32> to vector<16x256xf32>
      %239 = arith.mulf %236, %238 : vector<16x256xf32>
      %240 = arith.truncf %239 : vector<16x256xf32> to vector<16x256xbf16>
      %c128_125 = arith.constant 128 : index
      %c0_126 = arith.constant 0 : index
      %241 = vector.load %arg24[%c128_125, %c0_126] : memref<576x256xbf16, #tpu.memory_space<vmem>>, vector<16x256xbf16>
      tpu.vector_store %arg24[%c128_125, %c0_126], %240 {strides = array<i32>} : memref<576x256xbf16, #tpu.memory_space<vmem>>, vector<16x256xbf16>,
      %c0_127 = arith.constant 0 : index
      %c0_128 = arith.constant 0 : index
      %242 = vector.load %arg24[%c0_127, %c0_128] : memref<576x256xbf16, #tpu.memory_space<vmem>>, vector<144x256xbf16>
      %cst_129 = arith.constant dense<0.000000e+00> : vector<16x256xf32>
      %243 = tpu.matmul %188, %242, %cst_129 {dimension_numbers = #tpu.dot_dimension_numbers<[1], [0], [0], [1], [0, 0, 1, 1], [], []>} : vector<16x144xbf16>, vector<144x256xbf16>, vector<16x256xf32> -> vector<16x256xf32>
      %244 = vector.broadcast %191 : vector<16x1xf32> to vector<16x256xf32>
      %245 = arith.addf %243, %244 : vector<16x256xf32>
      %246 = arith.addf %245, %arg26 : vector<16x256xf32>
      scf.yield %246 : vector<16x256xf32>
    }
    %c3_i32_30 = arith.constant 3 : i32
    %cst_31 = arith.constant 0.000000e+00 : f32
    %71 = vector.broadcast %cst_31 : f32 to vector<16x256xf32>
    %72 = tpu.concatenate %70, %71 in 0 : vector<16x256xf32>, vector<16x256xf32> -> vector<32x256xf32>
    %c0_i32_32 = arith.constant 0 : i32
    %c3_i32_33 = arith.constant 3 : i32
    %73 = arith.addi %c0_i32_32, %c3_i32_33 : i32
    %c1_i32_34 = arith.constant 1 : i32
    %74 = scf.for %arg25 = %c0_i32_32 to %73 step %c1_i32_34 iter_args(%arg26 = %72) -> (vector<32x256xf32>)  : i32 {
      %c2_i32 = arith.constant 2 : i32
      %98 = arith.muli %c2_i32, %arg25 : i32
      %c0_i32_51 = arith.constant 0 : i32
      %99 = arith.addi %98, %c0_i32_51 : i32
      %100 = arith.index_cast %99 : i32 to index
      %c0_52 = arith.constant 0 : index
      %c0_53 = arith.constant 0 : index
      %101 = vector.load %arg15[%100, %c0_52, %c0_53] : memref<6x32x1xf32, #tpu.memory_space<vmem>>, vector<1x32x1xf32>
      %102 = vector.shape_cast %101 : vector<1x32x1xf32> to vector<32x1xf32>
      %103 = vector.broadcast %102 : vector<32x1xf32> to vector<32x256xf32>
      %104 = arith.mulf %arg26, %103 : vector<32x256xf32>
      %105 = arith.index_cast %99 : i32 to index
      %c0_54 = arith.constant 0 : index
      %c0_55 = arith.constant 0 : index
      %106 = vector.load %arg16[%105, %c0_54, %c0_55] : memref<6x32x1xf32, #tpu.memory_space<vmem>>, vector<1x32x1xf32>
      %107 = vector.shape_cast %106 : vector<1x32x1xf32> to vector<32x1xf32>
      %108 = vector.broadcast %107 : vector<32x1xf32> to vector<32x256xf32>
      %109 = arith.addf %104, %108 : vector<32x256xf32>
      %cst_56 = arith.constant 0.000000e+00 : f32
      %110 = vector.broadcast %cst_56 : f32 to vector<32x256xf32>
      %111 = arith.maximumf %109, %110 : vector<32x256xf32>
      %112 = arith.index_cast %99 : i32 to index
      %c0_57 = arith.constant 0 : index
      %c0_58 = arith.constant 0 : index
      %113 = vector.load %arg13[%112, %c0_57, %c0_58] : memref<6x32x288xbf16, #tpu.memory_space<vmem>>, vector<1x32x288xbf16>
      %114 = vector.shape_cast %113 : vector<1x32x288xbf16> to vector<32x288xbf16>
      %115 = arith.index_cast %99 : i32 to index
      %c0_59 = arith.constant 0 : index
      %c0_60 = arith.constant 0 : index
      %116 = vector.load %arg14[%115, %c0_59, %c0_60] : memref<6x32x1xf32, #tpu.memory_space<vmem>>, vector<1x32x1xf32>
      %117 = vector.shape_cast %116 : vector<1x32x1xf32> to vector<32x1xf32>
      %c34_i32 = arith.constant 34 : i32
      %118 = tpu.dynamic_rotate %111 by %c34_i32 dim 1 : vector<32x256xf32>, i32 -> vector<32x256xf32>
      %119 = vector.extract_strided_slice %1 {offsets = [0, 0], sizes = [1, 256], strides = [1, 1]} : vector<9x256xf32> to vector<1x256xf32>
      %120 = vector.broadcast %119 : vector<1x256xf32> to vector<32x256xf32>
      %121 = arith.mulf %118, %120 : vector<32x256xf32>
      %122 = arith.truncf %121 : vector<32x256xf32> to vector<32x256xbf16>
      %c0_61 = arith.constant 0 : index
      %c0_62 = arith.constant 0 : index
      %123 = vector.load %arg24[%c0_61, %c0_62] : memref<576x256xbf16, #tpu.memory_space<vmem>>, vector<32x256xbf16>
      tpu.vector_store %arg24[%c0_61, %c0_62], %122 {strides = array<i32>} : memref<576x256xbf16, #tpu.memory_space<vmem>>, vector<32x256xbf16>,
      %c32_i32 = arith.constant 32 : i32
      %124 = tpu.dynamic_rotate %111 by %c32_i32 dim 1 : vector<32x256xf32>, i32 -> vector<32x256xf32>
      %125 = vector.extract_strided_slice %1 {offsets = [1, 0], sizes = [1, 256], strides = [1, 1]} : vector<9x256xf32> to vector<1x256xf32>
      %126 = vector.broadcast %125 : vector<1x256xf32> to vector<32x256xf32>
      %127 = arith.mulf %124, %126 : vector<32x256xf32>
      %128 = arith.truncf %127 : vector<32x256xf32> to vector<32x256xbf16>
      %c32_63 = arith.constant 32 : index
      %c0_64 = arith.constant 0 : index
      %129 = vector.load %arg24[%c32_63, %c0_64] : memref<576x256xbf16, #tpu.memory_space<vmem>>, vector<32x256xbf16>
      tpu.vector_store %arg24[%c32_63, %c0_64], %128 {strides = array<i32>} : memref<576x256xbf16, #tpu.memory_space<vmem>>, vector<32x256xbf16>,
      %c30_i32 = arith.constant 30 : i32
      %130 = tpu.dynamic_rotate %111 by %c30_i32 dim 1 : vector<32x256xf32>, i32 -> vector<32x256xf32>
      %131 = vector.extract_strided_slice %1 {offsets = [2, 0], sizes = [1, 256], strides = [1, 1]} : vector<9x256xf32> to vector<1x256xf32>
      %132 = vector.broadcast %131 : vector<1x256xf32> to vector<32x256xf32>
      %133 = arith.mulf %130, %132 : vector<32x256xf32>
      %134 = arith.truncf %133 : vector<32x256xf32> to vector<32x256xbf16>
      %c64_65 = arith.constant 64 : index
      %c0_66 = arith.constant 0 : index
      %135 = vector.load %arg24[%c64_65, %c0_66] : memref<576x256xbf16, #tpu.memory_space<vmem>>, vector<32x256xbf16>
      tpu.vector_store %arg24[%c64_65, %c0_66], %134 {strides = array<i32>} : memref<576x256xbf16, #tpu.memory_space<vmem>>, vector<32x256xbf16>,
      %c2_i32_67 = arith.constant 2 : i32
      %136 = tpu.dynamic_rotate %111 by %c2_i32_67 dim 1 : vector<32x256xf32>, i32 -> vector<32x256xf32>
      %137 = vector.extract_strided_slice %1 {offsets = [3, 0], sizes = [1, 256], strides = [1, 1]} : vector<9x256xf32> to vector<1x256xf32>
      %138 = vector.broadcast %137 : vector<1x256xf32> to vector<32x256xf32>
      %139 = arith.mulf %136, %138 : vector<32x256xf32>
      %140 = arith.truncf %139 : vector<32x256xf32> to vector<32x256xbf16>
      %c96_68 = arith.constant 96 : index
      %c0_69 = arith.constant 0 : index
      %141 = vector.load %arg24[%c96_68, %c0_69] : memref<576x256xbf16, #tpu.memory_space<vmem>>, vector<32x256xbf16>
      tpu.vector_store %arg24[%c96_68, %c0_69], %140 {strides = array<i32>} : memref<576x256xbf16, #tpu.memory_space<vmem>>, vector<32x256xbf16>,
      %142 = arith.truncf %111 : vector<32x256xf32> to vector<32x256xbf16>
      %c128_70 = arith.constant 128 : index
      %c0_71 = arith.constant 0 : index
      %143 = vector.load %arg24[%c128_70, %c0_71] : memref<576x256xbf16, #tpu.memory_space<vmem>>, vector<32x256xbf16>
      tpu.vector_store %arg24[%c128_70, %c0_71], %142 {strides = array<i32>} : memref<576x256xbf16, #tpu.memory_space<vmem>>, vector<32x256xbf16>,
      %c254_i32 = arith.constant 254 : i32
      %144 = tpu.dynamic_rotate %111 by %c254_i32 dim 1 : vector<32x256xf32>, i32 -> vector<32x256xf32>
      %145 = vector.extract_strided_slice %1 {offsets = [5, 0], sizes = [1, 256], strides = [1, 1]} : vector<9x256xf32> to vector<1x256xf32>
      %146 = vector.broadcast %145 : vector<1x256xf32> to vector<32x256xf32>
      %147 = arith.mulf %144, %146 : vector<32x256xf32>
      %148 = arith.truncf %147 : vector<32x256xf32> to vector<32x256xbf16>
      %c160 = arith.constant 160 : index
      %c0_72 = arith.constant 0 : index
      %149 = vector.load %arg24[%c160, %c0_72] : memref<576x256xbf16, #tpu.memory_space<vmem>>, vector<32x256xbf16>
      tpu.vector_store %arg24[%c160, %c0_72], %148 {strides = array<i32>} : memref<576x256xbf16, #tpu.memory_space<vmem>>, vector<32x256xbf16>,
      %c226_i32 = arith.constant 226 : i32
      %150 = tpu.dynamic_rotate %111 by %c226_i32 dim 1 : vector<32x256xf32>, i32 -> vector<32x256xf32>
      %151 = vector.extract_strided_slice %1 {offsets = [6, 0], sizes = [1, 256], strides = [1, 1]} : vector<9x256xf32> to vector<1x256xf32>
      %152 = vector.broadcast %151 : vector<1x256xf32> to vector<32x256xf32>
      %153 = arith.mulf %150, %152 : vector<32x256xf32>
      %154 = arith.truncf %153 : vector<32x256xf32> to vector<32x256xbf16>
      %c192 = arith.constant 192 : index
      %c0_73 = arith.constant 0 : index
      %155 = vector.load %arg24[%c192, %c0_73] : memref<576x256xbf16, #tpu.memory_space<vmem>>, vector<32x256xbf16>
      tpu.vector_store %arg24[%c192, %c0_73], %154 {strides = array<i32>} : memref<576x256xbf16, #tpu.memory_space<vmem>>, vector<32x256xbf16>,
      %c224_i32 = arith.constant 224 : i32
      %156 = tpu.dynamic_rotate %111 by %c224_i32 dim 1 : vector<32x256xf32>, i32 -> vector<32x256xf32>
      %157 = vector.extract_strided_slice %1 {offsets = [7, 0], sizes = [1, 256], strides = [1, 1]} : vector<9x256xf32> to vector<1x256xf32>
      %158 = vector.broadcast %157 : vector<1x256xf32> to vector<32x256xf32>
      %159 = arith.mulf %156, %158 : vector<32x256xf32>
      %160 = arith.truncf %159 : vector<32x256xf32> to vector<32x256xbf16>
      %c224 = arith.constant 224 : index
      %c0_74 = arith.constant 0 : index
      %161 = vector.load %arg24[%c224, %c0_74] : memref<576x256xbf16, #tpu.memory_space<vmem>>, vector<32x256xbf16>
      tpu.vector_store %arg24[%c224, %c0_74], %160 {strides = array<i32>} : memref<576x256xbf16, #tpu.memory_space<vmem>>, vector<32x256xbf16>,
      %c222_i32 = arith.constant 222 : i32
      %162 = tpu.dynamic_rotate %111 by %c222_i32 dim 1 : vector<32x256xf32>, i32 -> vector<32x256xf32>
      %163 = vector.extract_strided_slice %1 {offsets = [8, 0], sizes = [1, 256], strides = [1, 1]} : vector<9x256xf32> to vector<1x256xf32>
      %164 = vector.broadcast %163 : vector<1x256xf32> to vector<32x256xf32>
      %165 = arith.mulf %162, %164 : vector<32x256xf32>
      %166 = arith.truncf %165 : vector<32x256xf32> to vector<32x256xbf16>
      %c256 = arith.constant 256 : index
      %c0_75 = arith.constant 0 : index
      %167 = vector.load %arg24[%c256, %c0_75] : memref<576x256xbf16, #tpu.memory_space<vmem>>, vector<32x256xbf16>
      tpu.vector_store %arg24[%c256, %c0_75], %166 {strides = array<i32>} : memref<576x256xbf16, #tpu.memory_space<vmem>>, vector<32x256xbf16>,
      %c0_76 = arith.constant 0 : index
      %c0_77 = arith.constant 0 : index
      %168 = vector.load %arg24[%c0_76, %c0_77] : memref<576x256xbf16, #tpu.memory_space<vmem>>, vector<288x256xbf16>
      %cst_78 = arith.constant dense<0.000000e+00> : vector<32x256xf32>
      %169 = tpu.matmul %114, %168, %cst_78 {dimension_numbers = #tpu.dot_dimension_numbers<[1], [0], [0], [1], [0, 0, 1, 1], [], []>} : vector<32x288xbf16>, vector<288x256xbf16>, vector<32x256xf32> -> vector<32x256xf32>
      %170 = vector.broadcast %117 : vector<32x1xf32> to vector<32x256xf32>
      %171 = arith.addf %169, %170 : vector<32x256xf32>
      %c2_i32_79 = arith.constant 2 : i32
      %172 = arith.muli %c2_i32_79, %arg25 : i32
      %c1_i32_80 = arith.constant 1 : i32
      %173 = arith.addi %172, %c1_i32_80 : i32
      %174 = arith.index_cast %173 : i32 to index
      %c0_81 = arith.constant 0 : index
      %c0_82 = arith.constant 0 : index
      %175 = vector.load %arg15[%174, %c0_81, %c0_82] : memref<6x32x1xf32, #tpu.memory_space<vmem>>, vector<1x32x1xf32>
      %176 = vector.shape_cast %175 : vector<1x32x1xf32> to vector<32x1xf32>
      %177 = vector.broadcast %176 : vector<32x1xf32> to vector<32x256xf32>
      %178 = arith.mulf %171, %177 : vector<32x256xf32>
      %179 = arith.index_cast %173 : i32 to index
      %c0_83 = arith.constant 0 : index
      %c0_84 = arith.constant 0 : index
      %180 = vector.load %arg16[%179, %c0_83, %c0_84] : memref<6x32x1xf32, #tpu.memory_space<vmem>>, vector<1x32x1xf32>
      %181 = vector.shape_cast %180 : vector<1x32x1xf32> to vector<32x1xf32>
      %182 = vector.broadcast %181 : vector<32x1xf32> to vector<32x256xf32>
      %183 = arith.addf %178, %182 : vector<32x256xf32>
      %cst_85 = arith.constant 0.000000e+00 : f32
      %184 = vector.broadcast %cst_85 : f32 to vector<32x256xf32>
      %185 = arith.maximumf %183, %184 : vector<32x256xf32>
      %186 = arith.index_cast %173 : i32 to index
      %c0_86 = arith.constant 0 : index
      %c0_87 = arith.constant 0 : index
      %187 = vector.load %arg13[%186, %c0_86, %c0_87] : memref<6x32x288xbf16, #tpu.memory_space<vmem>>, vector<1x32x288xbf16>
      %188 = vector.shape_cast %187 : vector<1x32x288xbf16> to vector<32x288xbf16>
      %189 = arith.index_cast %173 : i32 to index
      %c0_88 = arith.constant 0 : index
      %c0_89 = arith.constant 0 : index
      %190 = vector.load %arg14[%189, %c0_88, %c0_89] : memref<6x32x1xf32, #tpu.memory_space<vmem>>, vector<1x32x1xf32>
      %191 = vector.shape_cast %190 : vector<1x32x1xf32> to vector<32x1xf32>
      %c34_i32_90 = arith.constant 34 : i32
      %192 = tpu.dynamic_rotate %185 by %c34_i32_90 dim 1 : vector<32x256xf32>, i32 -> vector<32x256xf32>
      %193 = vector.extract_strided_slice %1 {offsets = [0, 0], sizes = [1, 256], strides = [1, 1]} : vector<9x256xf32> to vector<1x256xf32>
      %194 = vector.broadcast %193 : vector<1x256xf32> to vector<32x256xf32>
      %195 = arith.mulf %192, %194 : vector<32x256xf32>
      %196 = arith.truncf %195 : vector<32x256xf32> to vector<32x256xbf16>
      %c0_91 = arith.constant 0 : index
      %c0_92 = arith.constant 0 : index
      %197 = vector.load %arg24[%c0_91, %c0_92] : memref<576x256xbf16, #tpu.memory_space<vmem>>, vector<32x256xbf16>
      tpu.vector_store %arg24[%c0_91, %c0_92], %196 {strides = array<i32>} : memref<576x256xbf16, #tpu.memory_space<vmem>>, vector<32x256xbf16>,
      %c32_i32_93 = arith.constant 32 : i32
      %198 = tpu.dynamic_rotate %185 by %c32_i32_93 dim 1 : vector<32x256xf32>, i32 -> vector<32x256xf32>
      %199 = vector.extract_strided_slice %1 {offsets = [1, 0], sizes = [1, 256], strides = [1, 1]} : vector<9x256xf32> to vector<1x256xf32>
      %200 = vector.broadcast %199 : vector<1x256xf32> to vector<32x256xf32>
      %201 = arith.mulf %198, %200 : vector<32x256xf32>
      %202 = arith.truncf %201 : vector<32x256xf32> to vector<32x256xbf16>
      %c32_94 = arith.constant 32 : index
      %c0_95 = arith.constant 0 : index
      %203 = vector.load %arg24[%c32_94, %c0_95] : memref<576x256xbf16, #tpu.memory_space<vmem>>, vector<32x256xbf16>
      tpu.vector_store %arg24[%c32_94, %c0_95], %202 {strides = array<i32>} : memref<576x256xbf16, #tpu.memory_space<vmem>>, vector<32x256xbf16>,
      %c30_i32_96 = arith.constant 30 : i32
      %204 = tpu.dynamic_rotate %185 by %c30_i32_96 dim 1 : vector<32x256xf32>, i32 -> vector<32x256xf32>
      %205 = vector.extract_strided_slice %1 {offsets = [2, 0], sizes = [1, 256], strides = [1, 1]} : vector<9x256xf32> to vector<1x256xf32>
      %206 = vector.broadcast %205 : vector<1x256xf32> to vector<32x256xf32>
      %207 = arith.mulf %204, %206 : vector<32x256xf32>
      %208 = arith.truncf %207 : vector<32x256xf32> to vector<32x256xbf16>
      %c64_97 = arith.constant 64 : index
      %c0_98 = arith.constant 0 : index
      %209 = vector.load %arg24[%c64_97, %c0_98] : memref<576x256xbf16, #tpu.memory_space<vmem>>, vector<32x256xbf16>
      tpu.vector_store %arg24[%c64_97, %c0_98], %208 {strides = array<i32>} : memref<576x256xbf16, #tpu.memory_space<vmem>>, vector<32x256xbf16>,
      %c2_i32_99 = arith.constant 2 : i32
      %210 = tpu.dynamic_rotate %185 by %c2_i32_99 dim 1 : vector<32x256xf32>, i32 -> vector<32x256xf32>
      %211 = vector.extract_strided_slice %1 {offsets = [3, 0], sizes = [1, 256], strides = [1, 1]} : vector<9x256xf32> to vector<1x256xf32>
      %212 = vector.broadcast %211 : vector<1x256xf32> to vector<32x256xf32>
      %213 = arith.mulf %210, %212 : vector<32x256xf32>
      %214 = arith.truncf %213 : vector<32x256xf32> to vector<32x256xbf16>
      %c96_100 = arith.constant 96 : index
      %c0_101 = arith.constant 0 : index
      %215 = vector.load %arg24[%c96_100, %c0_101] : memref<576x256xbf16, #tpu.memory_space<vmem>>, vector<32x256xbf16>
      tpu.vector_store %arg24[%c96_100, %c0_101], %214 {strides = array<i32>} : memref<576x256xbf16, #tpu.memory_space<vmem>>, vector<32x256xbf16>,
      %216 = arith.truncf %185 : vector<32x256xf32> to vector<32x256xbf16>
      %c128_102 = arith.constant 128 : index
      %c0_103 = arith.constant 0 : index
      %217 = vector.load %arg24[%c128_102, %c0_103] : memref<576x256xbf16, #tpu.memory_space<vmem>>, vector<32x256xbf16>
      tpu.vector_store %arg24[%c128_102, %c0_103], %216 {strides = array<i32>} : memref<576x256xbf16, #tpu.memory_space<vmem>>, vector<32x256xbf16>,
      %c254_i32_104 = arith.constant 254 : i32
      %218 = tpu.dynamic_rotate %185 by %c254_i32_104 dim 1 : vector<32x256xf32>, i32 -> vector<32x256xf32>
      %219 = vector.extract_strided_slice %1 {offsets = [5, 0], sizes = [1, 256], strides = [1, 1]} : vector<9x256xf32> to vector<1x256xf32>
      %220 = vector.broadcast %219 : vector<1x256xf32> to vector<32x256xf32>
      %221 = arith.mulf %218, %220 : vector<32x256xf32>
      %222 = arith.truncf %221 : vector<32x256xf32> to vector<32x256xbf16>
      %c160_105 = arith.constant 160 : index
      %c0_106 = arith.constant 0 : index
      %223 = vector.load %arg24[%c160_105, %c0_106] : memref<576x256xbf16, #tpu.memory_space<vmem>>, vector<32x256xbf16>
      tpu.vector_store %arg24[%c160_105, %c0_106], %222 {strides = array<i32>} : memref<576x256xbf16, #tpu.memory_space<vmem>>, vector<32x256xbf16>,
      %c226_i32_107 = arith.constant 226 : i32
      %224 = tpu.dynamic_rotate %185 by %c226_i32_107 dim 1 : vector<32x256xf32>, i32 -> vector<32x256xf32>
      %225 = vector.extract_strided_slice %1 {offsets = [6, 0], sizes = [1, 256], strides = [1, 1]} : vector<9x256xf32> to vector<1x256xf32>
      %226 = vector.broadcast %225 : vector<1x256xf32> to vector<32x256xf32>
      %227 = arith.mulf %224, %226 : vector<32x256xf32>
      %228 = arith.truncf %227 : vector<32x256xf32> to vector<32x256xbf16>
      %c192_108 = arith.constant 192 : index
      %c0_109 = arith.constant 0 : index
      %229 = vector.load %arg24[%c192_108, %c0_109] : memref<576x256xbf16, #tpu.memory_space<vmem>>, vector<32x256xbf16>
      tpu.vector_store %arg24[%c192_108, %c0_109], %228 {strides = array<i32>} : memref<576x256xbf16, #tpu.memory_space<vmem>>, vector<32x256xbf16>,
      %c224_i32_110 = arith.constant 224 : i32
      %230 = tpu.dynamic_rotate %185 by %c224_i32_110 dim 1 : vector<32x256xf32>, i32 -> vector<32x256xf32>
      %231 = vector.extract_strided_slice %1 {offsets = [7, 0], sizes = [1, 256], strides = [1, 1]} : vector<9x256xf32> to vector<1x256xf32>
      %232 = vector.broadcast %231 : vector<1x256xf32> to vector<32x256xf32>
      %233 = arith.mulf %230, %232 : vector<32x256xf32>
      %234 = arith.truncf %233 : vector<32x256xf32> to vector<32x256xbf16>
      %c224_111 = arith.constant 224 : index
      %c0_112 = arith.constant 0 : index
      %235 = vector.load %arg24[%c224_111, %c0_112] : memref<576x256xbf16, #tpu.memory_space<vmem>>, vector<32x256xbf16>
      tpu.vector_store %arg24[%c224_111, %c0_112], %234 {strides = array<i32>} : memref<576x256xbf16, #tpu.memory_space<vmem>>, vector<32x256xbf16>,
      %c222_i32_113 = arith.constant 222 : i32
      %236 = tpu.dynamic_rotate %185 by %c222_i32_113 dim 1 : vector<32x256xf32>, i32 -> vector<32x256xf32>
      %237 = vector.extract_strided_slice %1 {offsets = [8, 0], sizes = [1, 256], strides = [1, 1]} : vector<9x256xf32> to vector<1x256xf32>
      %238 = vector.broadcast %237 : vector<1x256xf32> to vector<32x256xf32>
      %239 = arith.mulf %236, %238 : vector<32x256xf32>
      %240 = arith.truncf %239 : vector<32x256xf32> to vector<32x256xbf16>
      %c256_114 = arith.constant 256 : index
      %c0_115 = arith.constant 0 : index
      %241 = vector.load %arg24[%c256_114, %c0_115] : memref<576x256xbf16, #tpu.memory_space<vmem>>, vector<32x256xbf16>
      tpu.vector_store %arg24[%c256_114, %c0_115], %240 {strides = array<i32>} : memref<576x256xbf16, #tpu.memory_space<vmem>>, vector<32x256xbf16>,
      %c0_116 = arith.constant 0 : index
      %c0_117 = arith.constant 0 : index
      %242 = vector.load %arg24[%c0_116, %c0_117] : memref<576x256xbf16, #tpu.memory_space<vmem>>, vector<288x256xbf16>
      %cst_118 = arith.constant dense<0.000000e+00> : vector<32x256xf32>
      %243 = tpu.matmul %188, %242, %cst_118 {dimension_numbers = #tpu.dot_dimension_numbers<[1], [0], [0], [1], [0, 0, 1, 1], [], []>} : vector<32x288xbf16>, vector<288x256xbf16>, vector<32x256xf32> -> vector<32x256xf32>
      %244 = vector.broadcast %191 : vector<32x1xf32> to vector<32x256xf32>
      %245 = arith.addf %243, %244 : vector<32x256xf32>
      %246 = arith.addf %245, %arg26 : vector<32x256xf32>
      scf.yield %246 : vector<32x256xf32>
    }
    %c3_i32_35 = arith.constant 3 : i32
    %cst_36 = arith.constant 0.000000e+00 : f32
    %75 = vector.broadcast %cst_36 : f32 to vector<32x256xf32>
    %76 = tpu.concatenate %74, %75 in 0 : vector<32x256xf32>, vector<32x256xf32> -> vector<64x256xf32>
    %c0_i32_37 = arith.constant 0 : i32
    %c3_i32_38 = arith.constant 3 : i32
    %77 = arith.addi %c0_i32_37, %c3_i32_38 : i32
    %c1_i32_39 = arith.constant 1 : i32
    %78 = scf.for %arg25 = %c0_i32_37 to %77 step %c1_i32_39 iter_args(%arg26 = %76) -> (vector<64x256xf32>)  : i32 {
      %c2_i32 = arith.constant 2 : i32
      %98 = arith.muli %c2_i32, %arg25 : i32
      %c0_i32_51 = arith.constant 0 : i32
      %99 = arith.addi %98, %c0_i32_51 : i32
      %100 = arith.index_cast %99 : i32 to index
      %c0_52 = arith.constant 0 : index
      %c0_53 = arith.constant 0 : index
      %101 = vector.load %arg19[%100, %c0_52, %c0_53] : memref<6x64x1xf32, #tpu.memory_space<vmem>>, vector<1x64x1xf32>
      %102 = vector.shape_cast %101 : vector<1x64x1xf32> to vector<64x1xf32>
      %103 = vector.broadcast %102 : vector<64x1xf32> to vector<64x256xf32>
      %104 = arith.mulf %arg26, %103 : vector<64x256xf32>
      %105 = arith.index_cast %99 : i32 to index
      %c0_54 = arith.constant 0 : index
      %c0_55 = arith.constant 0 : index
      %106 = vector.load %arg20[%105, %c0_54, %c0_55] : memref<6x64x1xf32, #tpu.memory_space<vmem>>, vector<1x64x1xf32>
      %107 = vector.shape_cast %106 : vector<1x64x1xf32> to vector<64x1xf32>
      %108 = vector.broadcast %107 : vector<64x1xf32> to vector<64x256xf32>
      %109 = arith.addf %104, %108 : vector<64x256xf32>
      %cst_56 = arith.constant 0.000000e+00 : f32
      %110 = vector.broadcast %cst_56 : f32 to vector<64x256xf32>
      %111 = arith.maximumf %109, %110 : vector<64x256xf32>
      %112 = arith.index_cast %99 : i32 to index
      %c0_57 = arith.constant 0 : index
      %c0_58 = arith.constant 0 : index
      %113 = vector.load %arg17[%112, %c0_57, %c0_58] : memref<6x64x576xbf16, #tpu.memory_space<vmem>>, vector<1x64x576xbf16>
      %114 = vector.shape_cast %113 : vector<1x64x576xbf16> to vector<64x576xbf16>
      %115 = arith.index_cast %99 : i32 to index
      %c0_59 = arith.constant 0 : index
      %c0_60 = arith.constant 0 : index
      %116 = vector.load %arg18[%115, %c0_59, %c0_60] : memref<6x64x1xf32, #tpu.memory_space<vmem>>, vector<1x64x1xf32>
      %117 = vector.shape_cast %116 : vector<1x64x1xf32> to vector<64x1xf32>
      %c68_i32 = arith.constant 68 : i32
      %118 = tpu.dynamic_rotate %111 by %c68_i32 dim 1 : vector<64x256xf32>, i32 -> vector<64x256xf32>
      %119 = vector.extract_strided_slice %2 {offsets = [0, 0], sizes = [1, 256], strides = [1, 1]} : vector<9x256xf32> to vector<1x256xf32>
      %120 = vector.broadcast %119 : vector<1x256xf32> to vector<64x256xf32>
      %121 = arith.mulf %118, %120 : vector<64x256xf32>
      %122 = arith.truncf %121 : vector<64x256xf32> to vector<64x256xbf16>
      %c0_61 = arith.constant 0 : index
      %c0_62 = arith.constant 0 : index
      %123 = vector.load %arg24[%c0_61, %c0_62] : memref<576x256xbf16, #tpu.memory_space<vmem>>, vector<64x256xbf16>
      tpu.vector_store %arg24[%c0_61, %c0_62], %122 {strides = array<i32>} : memref<576x256xbf16, #tpu.memory_space<vmem>>, vector<64x256xbf16>,
      %c64_i32 = arith.constant 64 : i32
      %124 = tpu.dynamic_rotate %111 by %c64_i32 dim 1 : vector<64x256xf32>, i32 -> vector<64x256xf32>
      %125 = vector.extract_strided_slice %2 {offsets = [1, 0], sizes = [1, 256], strides = [1, 1]} : vector<9x256xf32> to vector<1x256xf32>
      %126 = vector.broadcast %125 : vector<1x256xf32> to vector<64x256xf32>
      %127 = arith.mulf %124, %126 : vector<64x256xf32>
      %128 = arith.truncf %127 : vector<64x256xf32> to vector<64x256xbf16>
      %c64_63 = arith.constant 64 : index
      %c0_64 = arith.constant 0 : index
      %129 = vector.load %arg24[%c64_63, %c0_64] : memref<576x256xbf16, #tpu.memory_space<vmem>>, vector<64x256xbf16>
      tpu.vector_store %arg24[%c64_63, %c0_64], %128 {strides = array<i32>} : memref<576x256xbf16, #tpu.memory_space<vmem>>, vector<64x256xbf16>,
      %c60_i32 = arith.constant 60 : i32
      %130 = tpu.dynamic_rotate %111 by %c60_i32 dim 1 : vector<64x256xf32>, i32 -> vector<64x256xf32>
      %131 = vector.extract_strided_slice %2 {offsets = [2, 0], sizes = [1, 256], strides = [1, 1]} : vector<9x256xf32> to vector<1x256xf32>
      %132 = vector.broadcast %131 : vector<1x256xf32> to vector<64x256xf32>
      %133 = arith.mulf %130, %132 : vector<64x256xf32>
      %134 = arith.truncf %133 : vector<64x256xf32> to vector<64x256xbf16>
      %c128_65 = arith.constant 128 : index
      %c0_66 = arith.constant 0 : index
      %135 = vector.load %arg24[%c128_65, %c0_66] : memref<576x256xbf16, #tpu.memory_space<vmem>>, vector<64x256xbf16>
      tpu.vector_store %arg24[%c128_65, %c0_66], %134 {strides = array<i32>} : memref<576x256xbf16, #tpu.memory_space<vmem>>, vector<64x256xbf16>,
      %c4_i32 = arith.constant 4 : i32
      %136 = tpu.dynamic_rotate %111 by %c4_i32 dim 1 : vector<64x256xf32>, i32 -> vector<64x256xf32>
      %137 = vector.extract_strided_slice %2 {offsets = [3, 0], sizes = [1, 256], strides = [1, 1]} : vector<9x256xf32> to vector<1x256xf32>
      %138 = vector.broadcast %137 : vector<1x256xf32> to vector<64x256xf32>
      %139 = arith.mulf %136, %138 : vector<64x256xf32>
      %140 = arith.truncf %139 : vector<64x256xf32> to vector<64x256xbf16>
      %c192 = arith.constant 192 : index
      %c0_67 = arith.constant 0 : index
      %141 = vector.load %arg24[%c192, %c0_67] : memref<576x256xbf16, #tpu.memory_space<vmem>>, vector<64x256xbf16>
      tpu.vector_store %arg24[%c192, %c0_67], %140 {strides = array<i32>} : memref<576x256xbf16, #tpu.memory_space<vmem>>, vector<64x256xbf16>,
      %142 = arith.truncf %111 : vector<64x256xf32> to vector<64x256xbf16>
      %c256 = arith.constant 256 : index
      %c0_68 = arith.constant 0 : index
      %143 = vector.load %arg24[%c256, %c0_68] : memref<576x256xbf16, #tpu.memory_space<vmem>>, vector<64x256xbf16>
      tpu.vector_store %arg24[%c256, %c0_68], %142 {strides = array<i32>} : memref<576x256xbf16, #tpu.memory_space<vmem>>, vector<64x256xbf16>,
      %c252_i32 = arith.constant 252 : i32
      %144 = tpu.dynamic_rotate %111 by %c252_i32 dim 1 : vector<64x256xf32>, i32 -> vector<64x256xf32>
      %145 = vector.extract_strided_slice %2 {offsets = [5, 0], sizes = [1, 256], strides = [1, 1]} : vector<9x256xf32> to vector<1x256xf32>
      %146 = vector.broadcast %145 : vector<1x256xf32> to vector<64x256xf32>
      %147 = arith.mulf %144, %146 : vector<64x256xf32>
      %148 = arith.truncf %147 : vector<64x256xf32> to vector<64x256xbf16>
      %c320 = arith.constant 320 : index
      %c0_69 = arith.constant 0 : index
      %149 = vector.load %arg24[%c320, %c0_69] : memref<576x256xbf16, #tpu.memory_space<vmem>>, vector<64x256xbf16>
      tpu.vector_store %arg24[%c320, %c0_69], %148 {strides = array<i32>} : memref<576x256xbf16, #tpu.memory_space<vmem>>, vector<64x256xbf16>,
      %c196_i32 = arith.constant 196 : i32
      %150 = tpu.dynamic_rotate %111 by %c196_i32 dim 1 : vector<64x256xf32>, i32 -> vector<64x256xf32>
      %151 = vector.extract_strided_slice %2 {offsets = [6, 0], sizes = [1, 256], strides = [1, 1]} : vector<9x256xf32> to vector<1x256xf32>
      %152 = vector.broadcast %151 : vector<1x256xf32> to vector<64x256xf32>
      %153 = arith.mulf %150, %152 : vector<64x256xf32>
      %154 = arith.truncf %153 : vector<64x256xf32> to vector<64x256xbf16>
      %c384 = arith.constant 384 : index
      %c0_70 = arith.constant 0 : index
      %155 = vector.load %arg24[%c384, %c0_70] : memref<576x256xbf16, #tpu.memory_space<vmem>>, vector<64x256xbf16>
      tpu.vector_store %arg24[%c384, %c0_70], %154 {strides = array<i32>} : memref<576x256xbf16, #tpu.memory_space<vmem>>, vector<64x256xbf16>,
      %c192_i32 = arith.constant 192 : i32
      %156 = tpu.dynamic_rotate %111 by %c192_i32 dim 1 : vector<64x256xf32>, i32 -> vector<64x256xf32>
      %157 = vector.extract_strided_slice %2 {offsets = [7, 0], sizes = [1, 256], strides = [1, 1]} : vector<9x256xf32> to vector<1x256xf32>
      %158 = vector.broadcast %157 : vector<1x256xf32> to vector<64x256xf32>
      %159 = arith.mulf %156, %158 : vector<64x256xf32>
      %160 = arith.truncf %159 : vector<64x256xf32> to vector<64x256xbf16>
      %c448 = arith.constant 448 : index
      %c0_71 = arith.constant 0 : index
      %161 = vector.load %arg24[%c448, %c0_71] : memref<576x256xbf16, #tpu.memory_space<vmem>>, vector<64x256xbf16>
      tpu.vector_store %arg24[%c448, %c0_71], %160 {strides = array<i32>} : memref<576x256xbf16, #tpu.memory_space<vmem>>, vector<64x256xbf16>,
      %c188_i32 = arith.constant 188 : i32
      %162 = tpu.dynamic_rotate %111 by %c188_i32 dim 1 : vector<64x256xf32>, i32 -> vector<64x256xf32>
      %163 = vector.extract_strided_slice %2 {offsets = [8, 0], sizes = [1, 256], strides = [1, 1]} : vector<9x256xf32> to vector<1x256xf32>
      %164 = vector.broadcast %163 : vector<1x256xf32> to vector<64x256xf32>
      %165 = arith.mulf %162, %164 : vector<64x256xf32>
      %166 = arith.truncf %165 : vector<64x256xf32> to vector<64x256xbf16>
      %c512 = arith.constant 512 : index
      %c0_72 = arith.constant 0 : index
      %167 = vector.load %arg24[%c512, %c0_72] : memref<576x256xbf16, #tpu.memory_space<vmem>>, vector<64x256xbf16>
      tpu.vector_store %arg24[%c512, %c0_72], %166 {strides = array<i32>} : memref<576x256xbf16, #tpu.memory_space<vmem>>, vector<64x256xbf16>,
      %c0_73 = arith.constant 0 : index
      %c0_74 = arith.constant 0 : index
      %168 = vector.load %arg24[%c0_73, %c0_74] : memref<576x256xbf16, #tpu.memory_space<vmem>>, vector<576x256xbf16>
      %cst_75 = arith.constant dense<0.000000e+00> : vector<64x256xf32>
      %169 = tpu.matmul %114, %168, %cst_75 {dimension_numbers = #tpu.dot_dimension_numbers<[1], [0], [0], [1], [0, 0, 1, 1], [], []>} : vector<64x576xbf16>, vector<576x256xbf16>, vector<64x256xf32> -> vector<64x256xf32>
      %170 = vector.broadcast %117 : vector<64x1xf32> to vector<64x256xf32>
      %171 = arith.addf %169, %170 : vector<64x256xf32>
      %c2_i32_76 = arith.constant 2 : i32
      %172 = arith.muli %c2_i32_76, %arg25 : i32
      %c1_i32_77 = arith.constant 1 : i32
      %173 = arith.addi %172, %c1_i32_77 : i32
      %174 = arith.index_cast %173 : i32 to index
      %c0_78 = arith.constant 0 : index
      %c0_79 = arith.constant 0 : index
      %175 = vector.load %arg19[%174, %c0_78, %c0_79] : memref<6x64x1xf32, #tpu.memory_space<vmem>>, vector<1x64x1xf32>
      %176 = vector.shape_cast %175 : vector<1x64x1xf32> to vector<64x1xf32>
      %177 = vector.broadcast %176 : vector<64x1xf32> to vector<64x256xf32>
      %178 = arith.mulf %171, %177 : vector<64x256xf32>
      %179 = arith.index_cast %173 : i32 to index
      %c0_80 = arith.constant 0 : index
      %c0_81 = arith.constant 0 : index
      %180 = vector.load %arg20[%179, %c0_80, %c0_81] : memref<6x64x1xf32, #tpu.memory_space<vmem>>, vector<1x64x1xf32>
      %181 = vector.shape_cast %180 : vector<1x64x1xf32> to vector<64x1xf32>
      %182 = vector.broadcast %181 : vector<64x1xf32> to vector<64x256xf32>
      %183 = arith.addf %178, %182 : vector<64x256xf32>
      %cst_82 = arith.constant 0.000000e+00 : f32
      %184 = vector.broadcast %cst_82 : f32 to vector<64x256xf32>
      %185 = arith.maximumf %183, %184 : vector<64x256xf32>
      %186 = arith.index_cast %173 : i32 to index
      %c0_83 = arith.constant 0 : index
      %c0_84 = arith.constant 0 : index
      %187 = vector.load %arg17[%186, %c0_83, %c0_84] : memref<6x64x576xbf16, #tpu.memory_space<vmem>>, vector<1x64x576xbf16>
      %188 = vector.shape_cast %187 : vector<1x64x576xbf16> to vector<64x576xbf16>
      %189 = arith.index_cast %173 : i32 to index
      %c0_85 = arith.constant 0 : index
      %c0_86 = arith.constant 0 : index
      %190 = vector.load %arg18[%189, %c0_85, %c0_86] : memref<6x64x1xf32, #tpu.memory_space<vmem>>, vector<1x64x1xf32>
      %191 = vector.shape_cast %190 : vector<1x64x1xf32> to vector<64x1xf32>
      %c68_i32_87 = arith.constant 68 : i32
      %192 = tpu.dynamic_rotate %185 by %c68_i32_87 dim 1 : vector<64x256xf32>, i32 -> vector<64x256xf32>
      %193 = vector.extract_strided_slice %2 {offsets = [0, 0], sizes = [1, 256], strides = [1, 1]} : vector<9x256xf32> to vector<1x256xf32>
      %194 = vector.broadcast %193 : vector<1x256xf32> to vector<64x256xf32>
      %195 = arith.mulf %192, %194 : vector<64x256xf32>
      %196 = arith.truncf %195 : vector<64x256xf32> to vector<64x256xbf16>
      %c0_88 = arith.constant 0 : index
      %c0_89 = arith.constant 0 : index
      %197 = vector.load %arg24[%c0_88, %c0_89] : memref<576x256xbf16, #tpu.memory_space<vmem>>, vector<64x256xbf16>
      tpu.vector_store %arg24[%c0_88, %c0_89], %196 {strides = array<i32>} : memref<576x256xbf16, #tpu.memory_space<vmem>>, vector<64x256xbf16>,
      %c64_i32_90 = arith.constant 64 : i32
      %198 = tpu.dynamic_rotate %185 by %c64_i32_90 dim 1 : vector<64x256xf32>, i32 -> vector<64x256xf32>
      %199 = vector.extract_strided_slice %2 {offsets = [1, 0], sizes = [1, 256], strides = [1, 1]} : vector<9x256xf32> to vector<1x256xf32>
      %200 = vector.broadcast %199 : vector<1x256xf32> to vector<64x256xf32>
      %201 = arith.mulf %198, %200 : vector<64x256xf32>
      %202 = arith.truncf %201 : vector<64x256xf32> to vector<64x256xbf16>
      %c64_91 = arith.constant 64 : index
      %c0_92 = arith.constant 0 : index
      %203 = vector.load %arg24[%c64_91, %c0_92] : memref<576x256xbf16, #tpu.memory_space<vmem>>, vector<64x256xbf16>
      tpu.vector_store %arg24[%c64_91, %c0_92], %202 {strides = array<i32>} : memref<576x256xbf16, #tpu.memory_space<vmem>>, vector<64x256xbf16>,
      %c60_i32_93 = arith.constant 60 : i32
      %204 = tpu.dynamic_rotate %185 by %c60_i32_93 dim 1 : vector<64x256xf32>, i32 -> vector<64x256xf32>
      %205 = vector.extract_strided_slice %2 {offsets = [2, 0], sizes = [1, 256], strides = [1, 1]} : vector<9x256xf32> to vector<1x256xf32>
      %206 = vector.broadcast %205 : vector<1x256xf32> to vector<64x256xf32>
      %207 = arith.mulf %204, %206 : vector<64x256xf32>
      %208 = arith.truncf %207 : vector<64x256xf32> to vector<64x256xbf16>
      %c128_94 = arith.constant 128 : index
      %c0_95 = arith.constant 0 : index
      %209 = vector.load %arg24[%c128_94, %c0_95] : memref<576x256xbf16, #tpu.memory_space<vmem>>, vector<64x256xbf16>
      tpu.vector_store %arg24[%c128_94, %c0_95], %208 {strides = array<i32>} : memref<576x256xbf16, #tpu.memory_space<vmem>>, vector<64x256xbf16>,
      %c4_i32_96 = arith.constant 4 : i32
      %210 = tpu.dynamic_rotate %185 by %c4_i32_96 dim 1 : vector<64x256xf32>, i32 -> vector<64x256xf32>
      %211 = vector.extract_strided_slice %2 {offsets = [3, 0], sizes = [1, 256], strides = [1, 1]} : vector<9x256xf32> to vector<1x256xf32>
      %212 = vector.broadcast %211 : vector<1x256xf32> to vector<64x256xf32>
      %213 = arith.mulf %210, %212 : vector<64x256xf32>
      %214 = arith.truncf %213 : vector<64x256xf32> to vector<64x256xbf16>
      %c192_97 = arith.constant 192 : index
      %c0_98 = arith.constant 0 : index
      %215 = vector.load %arg24[%c192_97, %c0_98] : memref<576x256xbf16, #tpu.memory_space<vmem>>, vector<64x256xbf16>
      tpu.vector_store %arg24[%c192_97, %c0_98], %214 {strides = array<i32>} : memref<576x256xbf16, #tpu.memory_space<vmem>>, vector<64x256xbf16>,
      %216 = arith.truncf %185 : vector<64x256xf32> to vector<64x256xbf16>
      %c256_99 = arith.constant 256 : index
      %c0_100 = arith.constant 0 : index
      %217 = vector.load %arg24[%c256_99, %c0_100] : memref<576x256xbf16, #tpu.memory_space<vmem>>, vector<64x256xbf16>
      tpu.vector_store %arg24[%c256_99, %c0_100], %216 {strides = array<i32>} : memref<576x256xbf16, #tpu.memory_space<vmem>>, vector<64x256xbf16>,
      %c252_i32_101 = arith.constant 252 : i32
      %218 = tpu.dynamic_rotate %185 by %c252_i32_101 dim 1 : vector<64x256xf32>, i32 -> vector<64x256xf32>
      %219 = vector.extract_strided_slice %2 {offsets = [5, 0], sizes = [1, 256], strides = [1, 1]} : vector<9x256xf32> to vector<1x256xf32>
      %220 = vector.broadcast %219 : vector<1x256xf32> to vector<64x256xf32>
      %221 = arith.mulf %218, %220 : vector<64x256xf32>
      %222 = arith.truncf %221 : vector<64x256xf32> to vector<64x256xbf16>
      %c320_102 = arith.constant 320 : index
      %c0_103 = arith.constant 0 : index
      %223 = vector.load %arg24[%c320_102, %c0_103] : memref<576x256xbf16, #tpu.memory_space<vmem>>, vector<64x256xbf16>
      tpu.vector_store %arg24[%c320_102, %c0_103], %222 {strides = array<i32>} : memref<576x256xbf16, #tpu.memory_space<vmem>>, vector<64x256xbf16>,
      %c196_i32_104 = arith.constant 196 : i32
      %224 = tpu.dynamic_rotate %185 by %c196_i32_104 dim 1 : vector<64x256xf32>, i32 -> vector<64x256xf32>
      %225 = vector.extract_strided_slice %2 {offsets = [6, 0], sizes = [1, 256], strides = [1, 1]} : vector<9x256xf32> to vector<1x256xf32>
      %226 = vector.broadcast %225 : vector<1x256xf32> to vector<64x256xf32>
      %227 = arith.mulf %224, %226 : vector<64x256xf32>
      %228 = arith.truncf %227 : vector<64x256xf32> to vector<64x256xbf16>
      %c384_105 = arith.constant 384 : index
      %c0_106 = arith.constant 0 : index
      %229 = vector.load %arg24[%c384_105, %c0_106] : memref<576x256xbf16, #tpu.memory_space<vmem>>, vector<64x256xbf16>
      tpu.vector_store %arg24[%c384_105, %c0_106], %228 {strides = array<i32>} : memref<576x256xbf16, #tpu.memory_space<vmem>>, vector<64x256xbf16>,
      %c192_i32_107 = arith.constant 192 : i32
      %230 = tpu.dynamic_rotate %185 by %c192_i32_107 dim 1 : vector<64x256xf32>, i32 -> vector<64x256xf32>
      %231 = vector.extract_strided_slice %2 {offsets = [7, 0], sizes = [1, 256], strides = [1, 1]} : vector<9x256xf32> to vector<1x256xf32>
      %232 = vector.broadcast %231 : vector<1x256xf32> to vector<64x256xf32>
      %233 = arith.mulf %230, %232 : vector<64x256xf32>
      %234 = arith.truncf %233 : vector<64x256xf32> to vector<64x256xbf16>
      %c448_108 = arith.constant 448 : index
      %c0_109 = arith.constant 0 : index
      %235 = vector.load %arg24[%c448_108, %c0_109] : memref<576x256xbf16, #tpu.memory_space<vmem>>, vector<64x256xbf16>
      tpu.vector_store %arg24[%c448_108, %c0_109], %234 {strides = array<i32>} : memref<576x256xbf16, #tpu.memory_space<vmem>>, vector<64x256xbf16>,
      %c188_i32_110 = arith.constant 188 : i32
      %236 = tpu.dynamic_rotate %185 by %c188_i32_110 dim 1 : vector<64x256xf32>, i32 -> vector<64x256xf32>
      %237 = vector.extract_strided_slice %2 {offsets = [8, 0], sizes = [1, 256], strides = [1, 1]} : vector<9x256xf32> to vector<1x256xf32>
      %238 = vector.broadcast %237 : vector<1x256xf32> to vector<64x256xf32>
      %239 = arith.mulf %236, %238 : vector<64x256xf32>
      %240 = arith.truncf %239 : vector<64x256xf32> to vector<64x256xbf16>
      %c512_111 = arith.constant 512 : index
      %c0_112 = arith.constant 0 : index
      %241 = vector.load %arg24[%c512_111, %c0_112] : memref<576x256xbf16, #tpu.memory_space<vmem>>, vector<64x256xbf16>
      tpu.vector_store %arg24[%c512_111, %c0_112], %240 {strides = array<i32>} : memref<576x256xbf16, #tpu.memory_space<vmem>>, vector<64x256xbf16>,
      %c0_113 = arith.constant 0 : index
      %c0_114 = arith.constant 0 : index
      %242 = vector.load %arg24[%c0_113, %c0_114] : memref<576x256xbf16, #tpu.memory_space<vmem>>, vector<576x256xbf16>
      %cst_115 = arith.constant dense<0.000000e+00> : vector<64x256xf32>
      %243 = tpu.matmul %188, %242, %cst_115 {dimension_numbers = #tpu.dot_dimension_numbers<[1], [0], [0], [1], [0, 0, 1, 1], [], []>} : vector<64x576xbf16>, vector<576x256xbf16>, vector<64x256xf32> -> vector<64x256xf32>
      %244 = vector.broadcast %191 : vector<64x1xf32> to vector<64x256xf32>
      %245 = arith.addf %243, %244 : vector<64x256xf32>
      %246 = arith.addf %245, %arg26 : vector<64x256xf32>
      scf.yield %246 : vector<64x256xf32>
    }
    %c3_i32_40 = arith.constant 3 : i32
    %c0_41 = arith.constant 0 : index
    %c0_42 = arith.constant 0 : index
    %79 = vector.load %arg21[%c0_41, %c0_42] : memref<4x64xbf16, #tpu.memory_space<vmem>>, vector<4x64xbf16>
    %80 = arith.truncf %78 : vector<64x256xf32> to vector<64x256xbf16>
    %cst_43 = arith.constant dense<0.000000e+00> : vector<4x256xf32>
    %81 = tpu.matmul %79, %80, %cst_43 {dimension_numbers = #tpu.dot_dimension_numbers<[1], [0], [0], [1], [0, 0, 1, 1], [], []>} : vector<4x64xbf16>, vector<64x256xbf16>, vector<4x256xf32> -> vector<4x256xf32>
    %c0_44 = arith.constant 0 : index
    %c0_45 = arith.constant 0 : index
    %82 = vector.load %arg22[%c0_44, %c0_45] : memref<4x1xf32, #tpu.memory_space<vmem>>, vector<4x1xf32>
    %83 = vector.broadcast %82 : vector<4x1xf32> to vector<4x256xf32>
    %84 = arith.addf %81, %83 : vector<4x256xf32>
    %cst_46 = arith.constant dense<0xFF800000> : vector<256xf32>
    %85 = vector.multi_reduction <maximumf>, %84, %cst_46 [0] : vector<4x256xf32> to vector<256xf32>
    %86 = vector.shape_cast %85 : vector<256xf32> to vector<1x256xf32>
    %87 = vector.broadcast %86 : vector<1x256xf32> to vector<4x256xf32>
    %88 = arith.subf %84, %87 : vector<4x256xf32>
    %89 = math.exp %88 : vector<4x256xf32>
    %cst_47 = arith.constant dense<0.000000e+00> : vector<256xf32>
    %90 = vector.multi_reduction <add>, %89, %cst_47 [0] : vector<4x256xf32> to vector<256xf32>
    %91 = vector.shape_cast %90 : vector<256xf32> to vector<1x256xf32>
    %92 = tpu.reciprocal %91 {approx = true} : vector<1x256xf32> -> vector<1x256xf32>
    %93 = vector.broadcast %92 : vector<1x256xf32> to vector<4x256xf32>
    %94 = arith.mulf %89, %93 : vector<4x256xf32>
    %c0_48 = arith.constant 0 : index
    %c0_49 = arith.constant 0 : index
    %c0_50 = arith.constant 0 : index
    %95 = vector.load %arg23[%c0_48, %c0_49, %c0_50] : memref<1x4x256xf32, #tpu.memory_space<vmem>>, vector<1x4x256xf32>
    %96 = vector.shape_cast %95 : vector<1x4x256xf32> to vector<4x256xf32>
    %97 = vector.shape_cast %94 : vector<4x256xf32> to vector<1x4x256xf32>
    tpu.vector_store %arg23[%c0_48, %c0_49, %c0_50], %97 {strides = array<i32>} : memref<1x4x256xf32, #tpu.memory_space<vmem>>, vector<1x4x256xf32>,
    return
  }
  func.func @transform_0(%arg0: i32) -> (i32, i32, i32) {
    %c0_i32 = arith.constant 0 : i32
    %c0_i32_0 = arith.constant 0 : i32
    %c0_i32_1 = arith.constant 0 : i32
    return %arg0, %c0_i32, %c0_i32_0 : i32, i32, i32
  }
  func.func @transform_1(%arg0: i32) -> (i32, i32) {
    %c0_i32 = arith.constant 0 : i32
    %c0_i32_0 = arith.constant 0 : i32
    %c0_i32_1 = arith.constant 0 : i32
    return %c0_i32, %c0_i32_0 : i32, i32
  }
  func.func @transform_2(%arg0: i32) -> (i32, i32) {
    %c0_i32 = arith.constant 0 : i32
    %c0_i32_0 = arith.constant 0 : i32
    %c0_i32_1 = arith.constant 0 : i32
    return %c0_i32, %c0_i32_0 : i32, i32
  }
  func.func @transform_3(%arg0: i32) -> (i32, i32) {
    %c0_i32 = arith.constant 0 : i32
    %c0_i32_0 = arith.constant 0 : i32
    %c0_i32_1 = arith.constant 0 : i32
    return %c0_i32, %c0_i32_0 : i32, i32
  }
  func.func @transform_4(%arg0: i32) -> (i32, i32) {
    %c0_i32 = arith.constant 0 : i32
    %c0_i32_0 = arith.constant 0 : i32
    %c0_i32_1 = arith.constant 0 : i32
    return %c0_i32, %c0_i32_0 : i32, i32
  }
  func.func @transform_5(%arg0: i32) -> (i32, i32) {
    %c0_i32 = arith.constant 0 : i32
    %c0_i32_0 = arith.constant 0 : i32
    %c0_i32_1 = arith.constant 0 : i32
    return %c0_i32, %c0_i32_0 : i32, i32
  }
  func.func @transform_6(%arg0: i32) -> (i32, i32) {
    %c0_i32 = arith.constant 0 : i32
    %c0_i32_0 = arith.constant 0 : i32
    %c0_i32_1 = arith.constant 0 : i32
    return %c0_i32, %c0_i32_0 : i32, i32
  }
  func.func @transform_7(%arg0: i32) -> (i32, i32) {
    %c0_i32 = arith.constant 0 : i32
    %c0_i32_0 = arith.constant 0 : i32
    %c0_i32_1 = arith.constant 0 : i32
    return %c0_i32, %c0_i32_0 : i32, i32
  }
  func.func @transform_8(%arg0: i32) -> (i32, i32, i32) {
    %c0_i32 = arith.constant 0 : i32
    %c0_i32_0 = arith.constant 0 : i32
    %c0_i32_1 = arith.constant 0 : i32
    %c0_i32_2 = arith.constant 0 : i32
    return %c0_i32, %c0_i32_0, %c0_i32_1 : i32, i32, i32
  }
  func.func @transform_9(%arg0: i32) -> (i32, i32, i32) {
    %c0_i32 = arith.constant 0 : i32
    %c0_i32_0 = arith.constant 0 : i32
    %c0_i32_1 = arith.constant 0 : i32
    %c0_i32_2 = arith.constant 0 : i32
    return %c0_i32, %c0_i32_0, %c0_i32_1 : i32, i32, i32
  }
  func.func @transform_10(%arg0: i32) -> (i32, i32, i32) {
    %c0_i32 = arith.constant 0 : i32
    %c0_i32_0 = arith.constant 0 : i32
    %c0_i32_1 = arith.constant 0 : i32
    %c0_i32_2 = arith.constant 0 : i32
    return %c0_i32, %c0_i32_0, %c0_i32_1 : i32, i32, i32
  }
  func.func @transform_11(%arg0: i32) -> (i32, i32, i32) {
    %c0_i32 = arith.constant 0 : i32
    %c0_i32_0 = arith.constant 0 : i32
    %c0_i32_1 = arith.constant 0 : i32
    %c0_i32_2 = arith.constant 0 : i32
    return %c0_i32, %c0_i32_0, %c0_i32_1 : i32, i32, i32
  }
  func.func @transform_12(%arg0: i32) -> (i32, i32, i32) {
    %c0_i32 = arith.constant 0 : i32
    %c0_i32_0 = arith.constant 0 : i32
    %c0_i32_1 = arith.constant 0 : i32
    %c0_i32_2 = arith.constant 0 : i32
    return %c0_i32, %c0_i32_0, %c0_i32_1 : i32, i32, i32
  }
  func.func @transform_13(%arg0: i32) -> (i32, i32, i32) {
    %c0_i32 = arith.constant 0 : i32
    %c0_i32_0 = arith.constant 0 : i32
    %c0_i32_1 = arith.constant 0 : i32
    %c0_i32_2 = arith.constant 0 : i32
    return %c0_i32, %c0_i32_0, %c0_i32_1 : i32, i32, i32
  }
  func.func @transform_14(%arg0: i32) -> (i32, i32, i32) {
    %c0_i32 = arith.constant 0 : i32
    %c0_i32_0 = arith.constant 0 : i32
    %c0_i32_1 = arith.constant 0 : i32
    %c0_i32_2 = arith.constant 0 : i32
    return %c0_i32, %c0_i32_0, %c0_i32_1 : i32, i32, i32
  }
  func.func @transform_15(%arg0: i32) -> (i32, i32, i32) {
    %c0_i32 = arith.constant 0 : i32
    %c0_i32_0 = arith.constant 0 : i32
    %c0_i32_1 = arith.constant 0 : i32
    %c0_i32_2 = arith.constant 0 : i32
    return %c0_i32, %c0_i32_0, %c0_i32_1 : i32, i32, i32
  }
  func.func @transform_16(%arg0: i32) -> (i32, i32, i32) {
    %c0_i32 = arith.constant 0 : i32
    %c0_i32_0 = arith.constant 0 : i32
    %c0_i32_1 = arith.constant 0 : i32
    %c0_i32_2 = arith.constant 0 : i32
    return %c0_i32, %c0_i32_0, %c0_i32_1 : i32, i32, i32
  }
  func.func @transform_17(%arg0: i32) -> (i32, i32, i32) {
    %c0_i32 = arith.constant 0 : i32
    %c0_i32_0 = arith.constant 0 : i32
    %c0_i32_1 = arith.constant 0 : i32
    %c0_i32_2 = arith.constant 0 : i32
    return %c0_i32, %c0_i32_0, %c0_i32_1 : i32, i32, i32
  }
  func.func @transform_18(%arg0: i32) -> (i32, i32, i32) {
    %c0_i32 = arith.constant 0 : i32
    %c0_i32_0 = arith.constant 0 : i32
    %c0_i32_1 = arith.constant 0 : i32
    %c0_i32_2 = arith.constant 0 : i32
    return %c0_i32, %c0_i32_0, %c0_i32_1 : i32, i32, i32
  }
  func.func @transform_19(%arg0: i32) -> (i32, i32, i32) {
    %c0_i32 = arith.constant 0 : i32
    %c0_i32_0 = arith.constant 0 : i32
    %c0_i32_1 = arith.constant 0 : i32
    %c0_i32_2 = arith.constant 0 : i32
    return %c0_i32, %c0_i32_0, %c0_i32_1 : i32, i32, i32
  }
  func.func @transform_20(%arg0: i32) -> (i32, i32) {
    %c0_i32 = arith.constant 0 : i32
    %c0_i32_0 = arith.constant 0 : i32
    %c0_i32_1 = arith.constant 0 : i32
    return %c0_i32, %c0_i32_0 : i32, i32
  }
  func.func @transform_21(%arg0: i32) -> (i32, i32) {
    %c0_i32 = arith.constant 0 : i32
    %c0_i32_0 = arith.constant 0 : i32
    %c0_i32_1 = arith.constant 0 : i32
    return %c0_i32, %c0_i32_0 : i32, i32
  }
  func.func @transform_22(%arg0: i32) -> (i32, i32, i32) {
    %c0_i32 = arith.constant 0 : i32
    %c0_i32_0 = arith.constant 0 : i32
    %c0_i32_1 = arith.constant 0 : i32
    return %arg0, %c0_i32, %c0_i32_0 : i32, i32, i32
  }
}

</mosaic_0001>

<bundles_post_ra>
// kernel: _lambda_.1
= control target key start
LH: loop header
LB: loop body
LE: loop exit
PB: predicated region body
PF: predicated region fallthrough
CT: control target
= control target key end

     0   :  { %s11268_s0 = inlined_call_operand.vmem [shape: f32[2,16,256], index: 0, kind: input, shape index: {}]   ;;  %s11269_s1 = inlined_call_operand.hbm [shape: f32[9,256], index: 1, kind: input, shape index: {}]   ;;  %s11270_s2 = inlined_call_operand.hbm [shape: f32[9,256], index: 2, kind: input, shape index: {}]   ;;  %s11271_s3 = inlined_call_operand.hbm [shape: f32[9,256], index: 3, kind: input, shape index: {}]   ;;  %s11272_s4 = inlined_call_operand.vmem [shape: bf16[16,144], index: 4, kind: input, shape index: {}]   ;;  %s11273_s5 = inlined_call_operand.hbm [shape: f32[16,1], index: 5, kind: input, shape index: {}]   ;;  %s11274_s6 = inlined_call_operand.hbm [shape: f32[16,1], index: 6, kind: input, shape index: {}]   ;;  %s11275_s7 = inlined_call_operand.hbm [shape: f32[16,1], index: 7, kind: input, shape index: {}]   ;;  %s11276_s8 = inlined_call_operand.vmem [shape: bf16[6,16,144], index: 8, kind: input, shape index: {}]   ;;  %s11277_s9 = inlined_call_operand.vmem [shape: f32[6,16,1], index: 9, kind: input, shape index: {}]   ;;  %s11278_s10 = inlined_call_operand.vmem [shape: f32[6,16,1], index: 10, kind: input, shape index: {}]   ;;  %s11279_s11 = inlined_call_operand.hbm [shape: f32[6,16,1], index: 11, kind: input, shape index: {}]   ;;  %s11280_s12 = inlined_call_operand.vmem [shape: bf16[6,32,288], index: 12, kind: input, shape index: {}]   ;;  %s11281_s13 = inlined_call_operand.vmem [shape: f32[6,32,1], index: 13, kind: input, shape index: {}]   ;;  %s11282_s14 = inlined_call_operand.vmem [shape: f32[6,32,1], index: 14, kind: input, shape index: {}]   ;;  %s11283_s15 = inlined_call_operand.vmem [shape: f32[6,32,1], index: 15, kind: input, shape index: {}]   ;;  %s11284_s16 = inlined_call_operand.vmem [shape: bf16[6,64,576], index: 16, kind: input, shape index: {}]   ;;  %s11285_s17 = inlined_call_operand.vmem [shape: f32[6,64,1], index: 17, kind: input, shape index: {}]   ;;  %s11286_s18 = inlined_call_operand.vmem [shape: f32[6,64,1], index: 18, kind: input, shape index: {}]   ;;  %s11287_s19 = inlined_call_operand.vmem [shape: f32[6,64,1], index: 19, kind: input, shape index: {}]   ;;  %s11288_s20 = inlined_call_operand.hbm [shape: bf16[4,64], index: 20, kind: input, shape index: {}]   ;;  %s11289_s21 = inlined_call_operand.hbm [shape: f32[4,1], index: 21, kind: input, shape index: {}]   ;;  %s11290_s22 = inlined_call_operand.vmem [shape: f32[2,4,256], index: 22, kind: output, shape index: {}]  }
   0x1   :  { %11393 = sst [smem:[#allocation64_spill]] %s11268_s0 }
   0x2   :  { %11394 = sst [smem:[#allocation65_spill]] %s11269_s1 }
   0x3   :  { %11395 = sst [smem:[#allocation66_spill]] %s11270_s2 }
   0x4   :  { %11396 = sst [smem:[#allocation67_spill]] %s11271_s3 }
   0x5   :  { %11397 = sst [smem:[#allocation68_spill]] %s11272_s4 }
   0x6   :  { %11398 = sst [smem:[#allocation69_spill]] %s11273_s5 }
   0x7   :  { %11399 = sst [smem:[#allocation70_spill]] %s11274_s6 }
   0x8   :  { %11400 = sst [smem:[#allocation71_spill]] %s11275_s7 }
   0x9   :  { %11401 = sst [smem:[#allocation72_spill]] %s11281_s13 }
   0xa   :  { %11402 = sst [smem:[#allocation73_spill]] %s11284_s16 }
   0xb   :  { %11403 = sst [smem:[#allocation74_spill]] %s11285_s17 }
   0xc   :  { %11404 = sst [smem:[#allocation75_spill]] %s11286_s18 }
   0xd   :  { %11405 = sst [smem:[#allocation76_spill]] %s11287_s19 }
   0xe   :  { %11406 = sst [smem:[#allocation77_spill]] %s11288_s20 }
   0xf   :  { %27 = vsyncpa [#allocation4], 0 }
  0x10   :  { %28 = vsyncpa [#allocation6], 0 }
  0x11   :  { %29 = vsyncpa [#allocation9], 0 }
  0x12   :  { %30 = vsyncpa [#allocation12], 0 }
  0x13   :  { %31 = vsyncpa [#allocation15], 0  ;;  %s7468_s3 = smov 0  }
  0x14 LB: > { %11407 = sst [smem:[#allocation22_spill]] %s7181_s3  ;;  %s7474_s28 = sadd.s32 4294967295, %s7181_s3   ;;  %s7181_s3 = sphi %s7468_s3, %s37_s3  }
  0x15   : > { %p5931_p0 = scmp.ge.s32.totalorder %s7181_s3, 1  ;;  %p535_p1 = scmp.lt.s32.totalorder %s7181_s3, 3 }
  0x16   : > { %p11303_p2 = scmp.eq.s32.totalorder %s7474_s28, 0  ;;  %s7307_s30 = smov [#allocation5]  }
  0x17   : > { %p7479_p3 = pnand %p5931_p0, %p535_p1  ;;  %s560_s4 = sshll.u32 %s7307_s30, 4  ;;  %s7483_s4 = int_to_ptr.vmem [resolvable:$true] %s560_s4 }
  0x18   : > { %s7308_s0 = smov [#allocation8]   ;;  %s7309_s5 = smov [#allocation11]  }
  0x19   : > { %s11408_s29 = scalar_select %p7479_p3, 1, 0 }
  0x1a   : > { %p6333_p4 = pneg %p7479_p3  ;;  %s589_s23 = sshll.u32 %s7308_s0, 4  ;;  %s7487_s23 = int_to_ptr.vmem [resolvable:$true] %s589_s23 }
  0x1b   : > { %s7495_s24 = sshll.u32 %s7309_s5, 4  ;;  %s11410_s26 = sld [smem:[#allocation66_spill]]  ;;  %s616_s24 = int_to_ptr.vmem [resolvable:$true] %s7495_s24 }
  0x1c   : > { %p7491_p5 = pnand %p11303_p2, %p6333_p4 }
  0x1e   : > { %p7505_p7 = pneg %p7491_p5 }
  0x21   : > { %s6779_s2 = scalar_lea.hbm %s11410_s26, 512 }
  0x22   : > { %p6780_p6 = scmp.ne.s32.totalorder %s11410_s26, %s6779_s2  ;;  %p6786_p10 = scmp.lt.u32.totalorder %s6779_s2, %s11410_s26 }
  0x24   : > { %p6782_p8 = pnand %p7505_p7, %p6780_p6 }
  0x26   : > { %p6783_p9 = pneg %p6782_p8 }
  0x28   : > { %p6788_p11 = pnand %p6786_p10, %p6783_p9 }
  0x2a   : > { %6791 = shalt.err (!%p6788_p11)
}
  0x2b   : > { %s6792_s6 = scalar_lea.vmem %s7483_s4, 512  ;;  %p6800_p1 = scmp.lt.s32.totalorder %s7483_s4, %s7483_s4 }
  0x2c   : > { %p6793_p12 = scmp.ne.s32.totalorder %s7483_s4, %s6792_s6  ;;  %p6801_p4 = scmp.lt.s32.totalorder %s6792_s6, %s6792_s6 }
  0x2e   : > { %p6795_p13 = pnand %p6793_p12, %p7505_p7  ;;  %p6802_p6 = por %p6801_p4, %p6800_p1 }
  0x30   : > { %p6796_p0 = pneg %p6795_p13 }
  0x32   : > { %p6803_p8 = pnand %p6802_p6, %p6796_p0 }
  0x34   : > { %6806 = shalt.err (!%p6803_p8)
}
  0x35   : > { %s11298_s25 = smov 256   ;;  %s11300_s3 = smov 16  }
  0x36   : > { %6339 = dma.hbm_to_vmem [thread:$0]  (!%p7491_p5), %s11410_s26, 512, %s7483_s4, [#allocation6], %s11298_s25, %s11298_s25, %s11300_s3  }
  0x37   : > { %s11412_s17 = sld [smem:[#allocation69_spill]] }
  0x3d   : > { %s6807_s6 = scalar_lea.hbm %s11412_s17, 256 }
  0x3e   : > { %p6808_p9 = scmp.ne.s32.totalorder %s11412_s17, %s6807_s6  ;;  %p6814_p12 = scmp.lt.u32.totalorder %s6807_s6, %s11412_s17 }
  0x40   : > { %p6810_p10 = pnand %p6808_p9, %p7505_p7 }
  0x42   : > { %p6811_p11 = pneg %p6810_p10 }
  0x44   : > { %p6816_p13 = pnand %p6814_p12, %p6811_p11 }
  0x46   : > { %6819 = shalt.err (!%p6816_p13)
}
  0x47   : > { %s6820_s4 = scalar_lea.vmem %s7487_s23, 256  ;;  %p6828_p6 = scmp.lt.s32.totalorder %s7487_s23, %s7487_s23 }
  0x48   : > { %p6821_p0 = scmp.ne.s32.totalorder %s7487_s23, %s6820_s4  ;;  %p6829_p8 = scmp.lt.s32.totalorder %s6820_s4, %s6820_s4 }
  0x4a   : > { %p6823_p1 = pnand %p6821_p0, %p7505_p7  ;;  %p6830_p9 = por %p6829_p8, %p6828_p6 }
  0x4c   : > { %p6824_p4 = pneg %p6823_p1 }
  0x4e   : > { %p6831_p10 = pnand %p6830_p9, %p6824_p4 }
  0x50   : > { %6834 = shalt.err (!%p6831_p10)
}
  0x51   : > { %s11305_s16 = smov 128   ;;  %s11307_s13 = smov 8  }
  0x52   : > { %6345 = dma.hbm_to_vmem [thread:$0]  (!%p7491_p5), %s11412_s17, 256, %s7487_s23, [#allocation9], %s11305_s16, %s11305_s16, %s11307_s13  }
  0x53   : > { %s7314_s2 = smov [#allocation14]   ;;  %s11413_s7 = sld [smem:[#allocation71_spill]] }
  0x54   : > { %s675_s27 = sshll.u32 %s7314_s2, 4  ;;  %s676_s27 = int_to_ptr.vmem [resolvable:$true] %s675_s27 }
  0x59   : > { %s6835_s6 = scalar_lea.hbm %s11413_s7, 256 }
  0x5a   : > { %p6836_p11 = scmp.ne.s32.totalorder %s11413_s7, %s6835_s6  ;;  %p6842_p0 = scmp.lt.u32.totalorder %s6835_s6, %s11413_s7 }
  0x5c   : > { %p6838_p12 = pnand %p6836_p11, %p7505_p7 }
  0x5e   : > { %p6839_p13 = pneg %p6838_p12 }
  0x60   : > { %p6844_p1 = pnand %p6842_p0, %p6839_p13 }
  0x62   : > { %6847 = shalt.err (!%p6844_p1)
}
  0x63   : > { %s6848_s23 = scalar_lea.vmem %s616_s24, 256  ;;  %p6856_p9 = scmp.lt.s32.totalorder %s616_s24, %s616_s24 }
  0x64   : > { %p6849_p4 = scmp.ne.s32.totalorder %s616_s24, %s6848_s23  ;;  %p6857_p10 = scmp.lt.s32.totalorder %s6848_s23, %s6848_s23 }
  0x66   : > { %p6851_p6 = pnand %p6849_p4, %p7505_p7  ;;  %p6858_p2 = por %p6857_p10, %p6856_p9 }
  0x68   : > { %p6852_p8 = pneg %p6851_p6 }
  0x6a   : > { %p6859_p3 = pnand %p6858_p2, %p6852_p8 }
  0x6c   : > { %6862 = shalt.err (!%p6859_p3)
}
  0x6d   : > { %6351 = dma.hbm_to_vmem [thread:$0]  (!%p7491_p5), %s11413_s7, 256, %s616_s24, [#allocation12], %s11305_s16, %s11305_s16, %s11307_s13  }
  0x6e   : > { %s11414_s20 = sld [smem:[#allocation77_spill]] }
  0x74   : > { %s6863_s19 = scalar_lea.hbm %s11414_s20, 32 }
  0x75   : > { %p6864_p2 = scmp.ne.s32.totalorder %s11414_s20, %s6863_s19  ;;  %p6870_p12 = scmp.lt.u32.totalorder %s6863_s19, %s11414_s20 }
  0x77   : > { %p6866_p3 = pnand %p6864_p2, %p7505_p7 }
  0x79   : > { %p6867_p11 = pneg %p6866_p3 }
  0x7b   : > { %p6872_p13 = pnand %p6870_p12, %p6867_p11 }
  0x7d   : > { %6875 = shalt.err (!%p6872_p13)
}
  0x7e   : > { %s6876_s4 = scalar_lea.vmem %s676_s27, 32  ;;  %p6884_p6 = scmp.lt.s32.totalorder %s676_s27, %s676_s27 }
  0x7f   : > { %p6877_p0 = scmp.ne.s32.totalorder %s676_s27, %s6876_s4  ;;  %p6885_p8 = scmp.lt.s32.totalorder %s6876_s4, %s6876_s4 }
  0x81   : > { %p6879_p1 = pnand %p6877_p0, %p7505_p7  ;;  %p6886_p9 = por %p6885_p8, %p6884_p6 }
  0x83   : > { %p6880_p4 = pneg %p6879_p1 }
  0x85   : > { %p6887_p10 = pnand %p6886_p9, %p6880_p4 }
  0x87   : > { %6890 = shalt.err (!%p6887_p10)
}
  0x88   : > { %6357 = dma.hbm_to_vmem [thread:$0]  (!%p7491_p5), %s11414_s20, 32, %s676_s27, [#allocation15]  }
  0x89   : > { %s7315_s26 = smov [#allocation3]   ;;  %s7316_s3 = smov [#allocation7]  }
  0x8a   : > { %s547_s25 = sshll.u32 %s7315_s26, 4  ;;  %s573_s18 = sshll.u32 %s7316_s3, 4  ;;  %s548_s25 = int_to_ptr.vmem [resolvable:$true] %s547_s25  ;;  %s574_s18 = int_to_ptr.vmem [resolvable:$true] %s573_s18 }
  0x8b   : > { %s11415_s30 = sld [smem:[#allocation65_spill]] }
  0x91   : > { %s6891_s5 = scalar_lea.hbm %s11415_s30, 512 }
  0x92   : > { %p6892_p2 = scmp.ne.s32.totalorder %s11415_s30, %s6891_s5  ;;  %p6898_p12 = scmp.lt.u32.totalorder %s6891_s5, %s11415_s30 }
  0x94   : > { %p6894_p3 = pnand %p6892_p2, %p7505_p7 }
  0x96   : > { %p6895_p11 = pneg %p6894_p3 }
  0x98   : > { %p6900_p13 = pnand %p6898_p12, %p6895_p11 }
  0x9a   : > { %6903 = shalt.err (!%p6900_p13)
}
  0x9b   : > { %s6904_s27 = scalar_lea.vmem %s548_s25, 512  ;;  %p6912_p6 = scmp.lt.s32.totalorder %s548_s25, %s548_s25 }
  0x9c   : > { %p6905_p0 = scmp.ne.s32.totalorder %s548_s25, %s6904_s27  ;;  %p6913_p8 = scmp.lt.s32.totalorder %s6904_s27, %s6904_s27 }
  0x9e   : > { %p6907_p1 = pnand %p6905_p0, %p7505_p7  ;;  %p6914_p9 = por %p6913_p8, %p6912_p6 }
  0xa0   : > { %p6908_p4 = pneg %p6907_p1 }
  0xa2   : > { %p6915_p10 = pnand %p6914_p9, %p6908_p4 }
  0xa4   : > { %6918 = shalt.err (!%p6915_p10)
}
  0xa5   : > { %s11416_s23 = smov 16   ;;  %s11417_s26 = smov 256  }
  0xa6   : > { %6336 = dma.hbm_to_vmem [thread:$0]  (!%p7491_p5), %s11415_s30, 512, %s548_s25, [#allocation4], %s11417_s26, %s11417_s26, %s11416_s23  }
  0xa7   : > { %s11418_s5 = sld [smem:[#allocation67_spill]] }
  0xad   : > { %s6919_s6 = scalar_lea.hbm %s11418_s5, 512 }
  0xae   : > { %p6920_p2 = scmp.ne.s32.totalorder %s11418_s5, %s6919_s6  ;;  %p6926_p12 = scmp.lt.u32.totalorder %s6919_s6, %s11418_s5 }
  0xb0   : > { %p6922_p3 = pnand %p6920_p2, %p7505_p7 }
  0xb2   : > { %p6923_p11 = pneg %p6922_p3 }
  0xb4   : > { %p6928_p13 = pnand %p6926_p12, %p6923_p11 }
  0xb6   : > { %6931 = shalt.err (!%p6928_p13)
}
  0xb7   : > { %s6932_s16 = scalar_lea.vmem %s574_s18, 512  ;;  %p6940_p6 = scmp.lt.s32.totalorder %s574_s18, %s574_s18 }
  0xb8   : > { %p6933_p0 = scmp.ne.s32.totalorder %s574_s18, %s6932_s16  ;;  %p6941_p8 = scmp.lt.s32.totalorder %s6932_s16, %s6932_s16 }
  0xba   : > { %p6935_p1 = pnand %p6933_p0, %p7505_p7  ;;  %p6942_p9 = por %p6941_p8, %p6940_p6 }
  0xbc   : > { %p6936_p4 = pneg %p6935_p1 }
  0xbe   : > { %p6943_p10 = pnand %p6942_p9, %p6936_p4 }
  0xc0   : > { %6946 = shalt.err (!%p6943_p10)
}
  0xc1   : > { %6342 = dma.hbm_to_vmem [thread:$0]  (!%p7491_p5), %s11418_s5, 512, %s574_s18, [#allocation6], %s11417_s26, %s11417_s26, %s11416_s23  }
  0xc2   : > { %s7317_s3 = smov [#allocation10]   ;;  %s7318_s2 = smov [#allocation13]  }
  0xc3   : > { %s602_s19 = sshll.u32 %s7317_s3, 4  ;;  %s637_s6 = sshll.u32 %s7318_s2, 4  ;;  %s603_s19 = int_to_ptr.vmem [resolvable:$true] %s602_s19  ;;  %s638_s6 = int_to_ptr.vmem [resolvable:$true] %s637_s6 }
  0xc4   : > { %s11419_s27 = sld [smem:[#allocation70_spill]] }
  0xca   : > { %s6947_s16 = scalar_lea.hbm %s11419_s27, 256 }
  0xcb   : > { %p6948_p2 = scmp.ne.s32.totalorder %s11419_s27, %s6947_s16  ;;  %p6954_p12 = scmp.lt.u32.totalorder %s6947_s16, %s11419_s27 }
  0xcd   : > { %p6950_p3 = pnand %p6948_p2, %p7505_p7 }
  0xcf   : > { %p6951_p11 = pneg %p6950_p3 }
  0xd1   : > { %p6956_p13 = pnand %p6954_p12, %p6951_p11 }
  0xd3   : > { %6959 = shalt.err (!%p6956_p13)
}
  0xd4   : > { %s6960_s18 = scalar_lea.vmem %s603_s19, 256  ;;  %p6968_p6 = scmp.lt.s32.totalorder %s603_s19, %s603_s19 }
  0xd5   : > { %p6961_p0 = scmp.ne.s32.totalorder %s603_s19, %s6960_s18  ;;  %p6969_p8 = scmp.lt.s32.totalorder %s6960_s18, %s6960_s18 }
  0xd7   : > { %p6963_p1 = pnand %p6961_p0, %p7505_p7  ;;  %p6970_p9 = por %p6969_p8, %p6968_p6 }
  0xd9   : > { %p6964_p4 = pneg %p6963_p1 }
  0xdb   : > { %p6971_p10 = pnand %p6970_p9, %p6964_p4 }
  0xdd   : > { %6974 = shalt.err (!%p6971_p10)
}
  0xde   : > { %s11420_s7 = smov 8   ;;  %s11421_s17 = smov 128  }
  0xdf   : > { %6348 = dma.hbm_to_vmem [thread:$0]  (!%p7491_p5), %s11419_s27, 256, %s603_s19, [#allocation9], %s11421_s17, %s11421_s17, %s11420_s7  }
  0xe0   : > { %s6975_s3 = scalar_lea.hbm %s11279_s11, 1536 }
  0xe1   : > { %p6976_p2 = scmp.ne.s32.totalorder %s11279_s11, %s6975_s3  ;;  %p6982_p12 = scmp.lt.u32.totalorder %s6975_s3, %s11279_s11 }
  0xe3   : > { %p6978_p3 = pnand %p6976_p2, %p7505_p7 }
  0xe5   : > { %p6979_p11 = pneg %p6978_p3 }
  0xe7   : > { %p6984_p13 = pnand %p6982_p12, %p6979_p11 }
  0xe9   : > { %6987 = shalt.err (!%p6984_p13)
}
  0xea   : > { %s6988_s13 = scalar_lea.vmem %s638_s6, 1536  ;;  %p6996_p6 = scmp.lt.s32.totalorder %s638_s6, %s638_s6 }
  0xeb   : > { %p6989_p0 = scmp.ne.s32.totalorder %s638_s6, %s6988_s13  ;;  %p6997_p8 = scmp.lt.s32.totalorder %s6988_s13, %s6988_s13 }
  0xed   : > { %p6991_p1 = pnand %p6989_p0, %p7505_p7  ;;  %p6998_p9 = por %p6997_p8, %p6996_p6 }
  0xef   : > { %p6992_p4 = pneg %p6991_p1 }
  0xf1   : > { %p6999_p10 = pnand %p6998_p9, %p6992_p4 }
  0xf3   : > { %7002 = shalt.err (!%p6999_p10)
}
  0xf4   : > { %6354 = dma.hbm_to_vmem [thread:$0]  (!%p7491_p5), %s11279_s11, 1536, %s638_s6, [#allocation12], %s11421_s17, %s11421_s17, %s11420_s7  }
  0xf5   : > { %s7319_s20 = smov [#allocation16]   ;;  %s7003_s3 = scalar_lea.hbm %s11289_s21, 64 }
  0xf6   : > { %s686_s23 = sshll.u32 %s7319_s20, 4  ;;  %p7004_p2 = scmp.ne.s32.totalorder %s11289_s21, %s7003_s3  ;;  %s687_s23 = int_to_ptr.vmem [resolvable:$true] %s686_s23 }
  0xf7   : > { %p7010_p12 = scmp.lt.u32.totalorder %s7003_s3, %s11289_s21 }
  0xf8   : > { %p7006_p3 = pnand %p7004_p2, %p7505_p7 }
  0xfa   : > { %p7007_p11 = pneg %p7006_p3 }
  0xfc   : > { %p7012_p13 = pnand %p7010_p12, %p7007_p11 }
  0xfe   : > { %7015 = shalt.err (!%p7012_p13)
}
  0xff   : > { %s7016_s6 = scalar_lea.vmem %s687_s23, 64  ;;  %p7024_p6 = scmp.lt.s32.totalorder %s687_s23, %s687_s23 }
 0x100   : > { %p7017_p0 = scmp.ne.s32.totalorder %s687_s23, %s7016_s6  ;;  %p7025_p8 = scmp.lt.s32.totalorder %s7016_s6, %s7016_s6 }
 0x102   : > { %p7019_p1 = pnand %p7017_p0, %p7505_p7  ;;  %p7026_p9 = por %p7025_p8, %p7024_p6 }
 0x104   : > { %p7020_p4 = pneg %p7019_p1 }
 0x106   : > { %p7027_p10 = pnand %p7026_p9, %p7020_p4 }
 0x108   : > { %7030 = shalt.err (!%p7027_p10)
}
 0x109   : > { %6360 = dma.hbm_to_vmem [thread:$0]  (!%p7491_p5), %s11289_s21, 64, %s687_s23, [#allocation15]  }
 0x10a   : > { %p11422_p2 = scmp.ne.s32.totalorder %s11408_s29, 0 }
 0x10c   : > { %707 = sbr.rel (%p11422_p2) target bundleno = 4323 (0x10e3), region = 108 }
 0x113   : > { %p11423_p3 = scmp.eq.s32.totalorder %s7474_s28, 0 }
 0x115   : > { %7160 = dma.done.wait (%p11423_p3), [#allocation4], 512   ;;  %p11424_p7 = pmov %p11423_p3 }
 0x116   : > { %p11425_p11 = pmov %p11423_p3 }
 0x117   : > { %7162 = vsyncadd (%p11424_p7), [#allocation4], 4294966784 }
 0x118   : > { %7164 = dma.done.wait (%p11425_p11), [#allocation6], 1024   ;;  %p11426_p12 = pmov %p11423_p3 }
 0x119   : > { %p11427_p13 = pmov %p11423_p3 }
 0x11a   : > { %7166 = vsyncadd (%p11426_p12), [#allocation6], 4294966272 }
 0x11b   : > { %7168 = dma.done.wait (%p11427_p13), [#allocation9], 512   ;;  %p11428_p5 = pmov %p11423_p3 }
 0x11c   : > { %p11429_p0 = pmov %p11423_p3 }
 0x11d   : > { %7170 = vsyncadd (%p11428_p5), [#allocation9], 4294966784 }
 0x11e   : > { %7172 = dma.done.wait (%p11429_p0), [#allocation12], 1792   ;;  %p11430_p1 = pmov %p11429_p0 }
 0x11f   : > { %p11431_p4 = pmov %p11429_p0 }
 0x120   : > { %7174 = vsyncadd (%p11430_p1), [#allocation12], 4294965504 }
 0x121   : > { %7176 = dma.done.wait (%p11431_p4), [#allocation15], 96   ;;  %p11432_p6 = pmov %p11429_p0 }
 0x122   : > { %p801_p8 = scmp.lt.s32.totalorder %s7474_s28, 1  ;;  %s11433_s23 = sld [smem:[#allocation64_spill]]  ;;  %v7729_v0 = vld [vmem:[#allocation5] sm:$0xff]  ;;  %v7731_v1 = vld [vmem:[#allocation5 + $0x8] sm:$0xff]  ;;  %v7733_v2 = vld [vmem:[#allocation5 + $0x10] ss:$0 sm:$0xff]  ;;  %v840_v22 = vlaneseq }
 0x123   : > { %7178 = vsyncadd (%p11432_p6), [#allocation15], 4294967200  ;;  %11434 = vst [vmem:[#allocation23_spill] sm:$0xff] %v7729_v0  ;;  %v7735_v3 = vld [vmem:[#allocation5 + $0x18] ss:$0 sm:$0xff]  ;;  %v7737_v4 = vld [vmem:[#allocation7] sm:$0xff] }
 0x124   : > { %s11631_s28 = smov (!%p801_p8, %s7474_s28), 1  ;;  %11435 = vst [vmem:[#allocation24_spill] sm:$0xff] %v7731_v1  ;;  %11436 = vst [vmem:[#allocation25_spill] sm:$0xff] %v7737_v4  ;;  %v7739_v5 = vld [vmem:[#allocation7 + $0x8] sm:$0xff]  ;;  %v7741_v6 = vld [vmem:[#allocation7 + $0x10] ss:$0 sm:$0xff] }
 0x125   : > { %s6150_s29 = sshll.u32 %s11631_s28, 5  ;;  %s6151_s1 = sshll.u32 %s11631_s28, 3  ;;  %11437 = vst [vmem:[#allocation26_spill] sm:$0xff] %v7739_v5  ;;  %11438 = vst [vmem:[#allocation27_spill] sm:$0xff] %v7741_v6  ;;  %v7743_v7 = vld [vmem:[#allocation7 + $0x18] ss:$0 sm:$0xff] }
 0x126   : > { %s7724_s19 = scalar_lea.vmem %s11290_s22, %s6151_s1  ;;  %11439 = vst [vmem:[#allocation28_spill] sm:$0xff] %v7743_v7  ;;  %s7320_s28 = smov 17   ;;  %vm1107_vm0 = vcmask 130048   ;;  %v11312_v15 = vmov 0   ;;  %v831_v16 = vld [vmem:[#allocation8 + $0x8] sm:$0xff]  ;;  %v830_v17 = vld [vmem:[#allocation8] sm:$0xff] }
 0x127   : > { %s7321_s25 = smov 16   ;;  %s7322_s3 = smov 15   ;;  %6682 = vset.pattern.permute.xlu1 %v11312_v15  ;;  %6681 = vset.pattern.permute.xlu0 %v11312_v15  ;;  %v1154_v18 = vld [vmem:[#allocation10] sm:$0xff]  ;;  %v1155_v19 = vld [vmem:[#allocation10 + $0x8] sm:$0xff]  ;;  %v1170_v20 = vld [vmem:[#allocation11] sm:$0xff]  ;;  %v7795_v23 = vshrl.u32 %v840_v22, 7 }
 0x128   : > { %s805_s26 = scalar_lea.vmem %s11433_s23, %s6150_s29  ;;  %s7323_s2 = smov 1   ;;  %v1171_v21 = vld [vmem:[#allocation11 + $0x8] sm:$0xff]  ;;  %v7797_v24 = vand.u32 127, %v840_v22  ;;  %v7802_v27 = vld [vmem:[#allocation3] sm:$0xff] }
 0x129   : > { %v7745_v8 = vld [vmem:[%s805_s26 + $0x8] sm:$0xff]  ;;  %v7748_v9 = vld [vmem:[%s805_s26] sm:$0xff]  ;;  %v7751_v10 = vld [vmem:[%s805_s26 + $0x18] sm:$0xff]  ;;  %s7324_s4 = smov 127   ;;  %s7325_s24 = smov 113   ;;  %v7800_v25 = vsub.s32 0, %v7795_v23 }
 0x12a   : > { %836 = vrot.lane.b32.xlu1 %v7745_v8, %s7320_s28  ;;  %832 = vrot.lane.b32.xlu0 %v7748_v9, %s7320_s28  ;;  %v7753_v11 = vld [vmem:[%s805_s26 + $0x10] sm:$0xff]  ;;  %v951_v12 = vpack.c.bf16 %v7751_v10, %v7745_v8  ;;  %s7326_s16 = smov 112   ;;  %s11440_s17 = sld [smem:[#allocation68_spill]]  ;;  %v7804_v28 = vld [vmem:[#allocation3 + $0x8] sm:$0xff]  ;;  %vm842_vm1 = vcmp.lt.s32.totalorder %v7797_v24, 17  ;;  %v7824_v38 = vsub.s32 1, %v7795_v23 }
 0x12b   : > { %v950_v13 = vpack.c.bf16 %v7753_v11, %v7748_v9  ;;  %s7327_s29 = smov 111   ;;  %11441 = vst [vmem:[#allocation29_spill] sm:$0xff] %v7800_v25  ;;  %v7809_v30 = vrot.slane %v7802_v27, %v7800_v25  ;;  %v7813_v31 = vrot.slane %v7804_v28, %v7800_v25  ;;  %vm871_vm2 = vcmp.lt.s32.totalorder %v7797_v24, 16  ;;  %s8005_s13 = smov 0  }
 0x12c   : > { %11443 = vst [vmem:[#allocation31_spill] sm:$0xff] %v7824_v38  ;;  %v7833_v47 = vrot.slane %v7802_v27, %v7824_v38  ;;  %v7837_v48 = vrot.slane %v7804_v28, %v7824_v38  ;;  %v7844_v53 = vsub.s32 2, %v7795_v23  ;;  %vm900_vm3 = vcmp.lt.s32.totalorder %v7797_v24, 15 }
 0x12d   : > { %11442 = vst [vmem:[#allocation30_spill] sm:$0xff] %v7809_v30  ;;  %vm929_vm4 = vcmp.lt.s32.totalorder %v7797_v24, 1  ;;  %vm962_vm5 = vcmp.lt.s32.totalorder %v7797_v24, 127  ;;  %vm991_vm6 = vcmp.lt.s32.totalorder %v7797_v24, 113  ;;  %vm1020_vm7 = vcmp.lt.s32.totalorder %v7797_v24, 112 }
 0x12e   : > { %838 = vrot.lane.b32.xlu1 %v7751_v10, %s7320_s28  ;;  %834 = vrot.lane.b32.xlu0 %v7753_v11, %s7320_s28  ;;  %11444 = vst [vmem:[#allocation32_spill] sm:$0xff] %v7844_v53  ;;  %vm1049_vm8 = vcmp.lt.s32.totalorder %v7797_v24, 111 }
 0x130   : > { %v6685_v14 = vld [vmem:[%s11440_s17 + $0x4] ss:$8 sps:$4 sm:$0xff]  }
 0x131   : > { %5960 = vmatprep.mubr.msk.bf16.mxu0 %vm1107_vm0, %v6685_v14  ;;  %v7857_v14 = vrot.slane %v7802_v27, %v7844_v53 }
 0x132   : > { %865 = vrot.lane.b32.xlu1 %v7753_v11, %s7321_s25  ;;  %863 = vrot.lane.b32.xlu0 %v7748_v9, %s7321_s25 }
 0x136   : > { %869 = vrot.lane.b32.xlu1 %v7751_v10, %s7321_s25  ;;  %867 = vrot.lane.b32.xlu0 %v7745_v8, %s7321_s25 }
 0x13a   : > { %894 = vrot.lane.b32.xlu1 %v7753_v11, %s7322_s3  ;;  %892 = vrot.lane.b32.xlu0 %v7748_v9, %s7322_s3 }
 0x13e   : > { %898 = vrot.lane.b32.xlu1 %v7751_v10, %s7322_s3  ;;  %896 = vrot.lane.b32.xlu0 %v7745_v8, %s7322_s3 }
 0x142   : > { %923 = vrot.lane.b32.xlu1 %v7753_v11, %s7323_s2  ;;  %921 = vrot.lane.b32.xlu0 %v7748_v9, %s7323_s2 }
 0x146   : > { %927 = vrot.lane.b32.xlu1 %v7751_v10, %s7323_s2  ;;  %925 = vrot.lane.b32.xlu0 %v7745_v8, %s7323_s2 }
 0x14a   : > { %956 = vrot.lane.b32.xlu1 %v7753_v11, %s7324_s4  ;;  %954 = vrot.lane.b32.xlu0 %v7748_v9, %s7324_s4 }
 0x14e   : > { %960 = vrot.lane.b32.xlu1 %v7751_v10, %s7324_s4  ;;  %958 = vrot.lane.b32.xlu0 %v7745_v8, %s7324_s4 }
 0x152   : > { %985 = vrot.lane.b32.xlu1 %v7753_v11, %s7325_s24  ;;  %983 = vrot.lane.b32.xlu0 %v7748_v9, %s7325_s24 }
 0x156   : > { %989 = vrot.lane.b32.xlu1 %v7751_v10, %s7325_s24  ;;  %987 = vrot.lane.b32.xlu0 %v7745_v8, %s7325_s24 }
 0x15a   : > { %1014 = vrot.lane.b32.xlu1 %v7753_v11, %s7326_s16  ;;  %1012 = vrot.lane.b32.xlu0 %v7748_v9, %s7326_s16 }
 0x15e   : > { %1018 = vrot.lane.b32.xlu1 %v7751_v10, %s7326_s16  ;;  %1016 = vrot.lane.b32.xlu0 %v7745_v8, %s7326_s16 }
 0x162   : > { %1043 = vrot.lane.b32.xlu1 %v7753_v11, %s7327_s29  ;;  %1041 = vrot.lane.b32.xlu0 %v7748_v9, %s7327_s29 }
 0x166   : > { %1047 = vrot.lane.b32.xlu1 %v7751_v10, %s7327_s29  ;;  %1045 = vrot.lane.b32.xlu0 %v7745_v8, %s7327_s29 }
 0x16a   : > { %1095 = vperm.xlu1 %6682, %v831_v16   ;;  %1090 = vperm.xlu0 %6681, %v830_v17   ;;  %v7861_v16 = vrot.slane %v7804_v28, %v7844_v53 }
 0x16e   : > { %1158 = vperm.xlu1 %6682, %v1154_v18   ;;  %1163 = vperm.xlu0 %6681, %v1155_v19  }
 0x172   : > { %1174 = vperm.xlu1 %6682, %v1170_v20   ;;  %1179 = vperm.xlu0 %6681, %v1171_v21   ;;  %v7868_v21 = vsub.s32 3, %v7795_v23 }
 0x174   : > { %11445 = vst [vmem:[#allocation33_spill] sm:$0xff] %v7868_v21 }
 0x19c   : > { %v837_v26 = vpop.permute.xlu1 %836  ;;  %v833_v29 = vpop.permute.xlu0 %832 }
 0x19d   : > { %v843_v32 = vsel %vm842_vm1, %v833_v29, %v837_v26  ;;  %v845_v33 = vsel %vm842_vm1, %v837_v26, %v833_v29 }
 0x19e   : > { %v855_v39 = vmul.f32 %v7809_v30, %v845_v33  ;;  %v856_v40 = vmul.f32 %v7813_v31, %v843_v32 }
 0x1a0   : > { %v839_v34 = vpop.permute.xlu1 %838  ;;  %v835_v35 = vpop.permute.xlu0 %834 }
 0x1a1   : > { %v844_v36 = vsel %vm842_vm1, %v835_v35, %v839_v34  ;;  %v846_v37 = vsel %vm842_vm1, %v839_v34, %v835_v35 }
 0x1a2   : > { %v857_v41 = vmul.f32 %v7809_v30, %v846_v37  ;;  %v858_v42 = vmul.f32 %v7813_v31, %v844_v36 }
 0x1a4   : > { %v866_v43 = vpop.permute.xlu1 %865  ;;  %v859_v44 = vpack.c.bf16 %v857_v41, %v855_v39  ;;  %v860_v45 = vpack.c.bf16 %v858_v42, %v856_v40  ;;  %v864_v46 = vpop.permute.xlu0 %863  ;;  %v7881_v40 = vrot.slane %v7802_v27, %v7868_v21  ;;  %v7885_v41 = vrot.slane %v7804_v28, %v7868_v21 }
 0x1a6   : > { %1111 = vmatprep.subr.bf16.mxu0 %v860_v45 }
 0x1a7   : > { %1112 = vmatpush1.bf16.msra.mxu0 %v859_v44 }
 0x1a8   : > { %v870_v49 = vpop.permute.xlu1 %869  ;;  %v868_v52 = vpop.permute.xlu0 %867 }
 0x1a9   : > { %v873_v50 = vsel %vm871_vm2, %v866_v43, %v870_v49  ;;  %v875_v51 = vsel %vm871_vm2, %v870_v49, %v866_v43  ;;  %v872_v56 = vsel %vm871_vm2, %v864_v46, %v868_v52  ;;  %v874_v57 = vsel %vm871_vm2, %v868_v52, %v864_v46 }
 0x1aa   : > { %v886_v54 = vmul.f32 %v7833_v47, %v875_v51  ;;  %v887_v55 = vmul.f32 %v7837_v48, %v873_v50  ;;  %v884_v58 = vmul.f32 %v7833_v47, %v874_v57  ;;  %v885_v59 = vmul.f32 %v7837_v48, %v872_v56 }
 0x1ab   : > { %v7892_v46 = vsub.s32 5, %v7795_v23 }
 0x1ac   : > { %v895_v60 = vpop.permute.xlu1 %894  ;;  %v888_v61 = vpack.c.bf16 %v886_v54, %v884_v58  ;;  %v889_v62 = vpack.c.bf16 %v887_v55, %v885_v59  ;;  %v893_v63 = vpop.permute.xlu0 %892 }
 0x1ad   : > { %11446 = vst [vmem:[#allocation34_spill] sm:$0xff] %v7892_v46 }
 0x1ae   : > { %1113 = vmatprep.subr.bf16.mxu0 %v889_v62 }
 0x1af   : > { %1114 = vmatpush1.bf16.msra.mxu0 %v888_v61  ;;  %v7909_v61 = vrot.slane %v7804_v28, %v7892_v46 }
 0x1b0   : > { %v899_v17 = vpop.permute.xlu1 %898  ;;  %v897_v20 = vpop.permute.xlu0 %896 }
 0x1b1   : > { %v902_v18 = vsel %vm900_vm3, %v895_v60, %v899_v17  ;;  %v904_v19 = vsel %vm900_vm3, %v899_v17, %v895_v60  ;;  %v901_v29 = vsel %vm900_vm3, %v893_v63, %v897_v20  ;;  %v903_v32 = vsel %vm900_vm3, %v897_v20, %v893_v63 }
 0x1b2   : > { %v915_v22 = vmul.f32 %v7857_v14, %v904_v19  ;;  %v916_v26 = vmul.f32 %v7861_v16, %v902_v18  ;;  %v913_v33 = vmul.f32 %v7857_v14, %v903_v32  ;;  %v914_v34 = vmul.f32 %v7861_v16, %v901_v29 }
 0x1b3   : > { %v7905_v60 = vrot.slane %v7802_v27, %v7892_v46  ;;  %v7916_v19 = vsub.s32 6, %v7795_v23 }
 0x1b4   : > { %v924_v35 = vpop.permute.xlu1 %923  ;;  %v917_v36 = vpack.c.bf16 %v915_v22, %v913_v33  ;;  %v918_v37 = vpack.c.bf16 %v916_v26, %v914_v34  ;;  %v922_v39 = vpop.permute.xlu0 %921 }
 0x1b5   : > { %11447 = vst [vmem:[#allocation35_spill] sm:$0xff] %v7916_v19 }
 0x1b6   : > { %1115 = vmatprep.subr.bf16.mxu0 %v918_v37 }
 0x1b7   : > { %1116 = vmatpush1.bf16.msra.mxu0 %v917_v36  ;;  %v7939_v36 = vrot.slane %v7804_v28, %v7916_v19 }
 0x1b8   : > { %v928_v42 = vpop.permute.xlu1 %927  ;;  %v926_v45 = vpop.permute.xlu0 %925 }
 0x1b9   : > { %v931_v43 = vsel %vm929_vm4, %v924_v35, %v928_v42  ;;  %v933_v44 = vsel %vm929_vm4, %v928_v42, %v924_v35  ;;  %v930_v51 = vsel %vm929_vm4, %v922_v39, %v926_v45  ;;  %v932_v52 = vsel %vm929_vm4, %v926_v45, %v922_v39 }
 0x1ba   : > { %v944_v49 = vmul.f32 %v7881_v40, %v933_v44  ;;  %v945_v50 = vmul.f32 %v7885_v41, %v931_v43  ;;  %v942_v54 = vmul.f32 %v7881_v40, %v932_v52  ;;  %v943_v55 = vmul.f32 %v7885_v41, %v930_v51 }
 0x1bb   : > { %v7935_v35 = vrot.slane %v7802_v27, %v7916_v19  ;;  %v7946_v39 = vsub.s32 7, %v7795_v23 }
 0x1bc   : > { %v957_v56 = vpop.permute.xlu1 %956  ;;  %v946_v57 = vpack.c.bf16 %v944_v49, %v942_v54  ;;  %v947_v58 = vpack.c.bf16 %v945_v50, %v943_v55  ;;  %v955_v59 = vpop.permute.xlu0 %954 }
 0x1bd   : > { %11448 = vst [vmem:[#allocation36_spill] sm:$0xff] %v7946_v39  ;;  %v7959_v23 = vrot.slane %v7802_v27, %v7946_v39 }
 0x1be   : > { %1117 = vmatprep.subr.bf16.mxu0 %v947_v58 }
 0x1bf   : > { %1118 = vmatpush1.bf16.msra.mxu0 %v946_v57 }
 0x1c0   : > { %v961_v62 = vpop.permute.xlu1 %960  ;;  %v959_v18 = vpop.permute.xlu0 %958  ;;  %1119 = vmatprep.subr.bf16.mxu0 %v951_v12 }
 0x1c1   : > { %v964_v63 = vsel %vm962_vm5, %v957_v56, %v961_v62  ;;  %v966_v17 = vsel %vm962_vm5, %v961_v62, %v957_v56  ;;  %v963_v26 = vsel %vm962_vm5, %v955_v59, %v959_v18  ;;  %v965_v29 = vsel %vm962_vm5, %v959_v18, %v955_v59 }
 0x1c2   : > { %v977_v20 = vmul.f32 %v7905_v60, %v964_v63  ;;  %v978_v22 = vmul.f32 %v7909_v61, %v966_v17  ;;  %v975_v32 = vmul.f32 %v7905_v60, %v963_v26  ;;  %v976_v33 = vmul.f32 %v7909_v61, %v965_v29 }
 0x1c3   : > { %1120 = vmatpush1.bf16.msra.mxu0 %v950_v13  ;;  %v7963_v56 = vrot.slane %v7804_v28, %v7946_v39 }
 0x1c4   : > { %v986_v34 = vpop.permute.xlu1 %985  ;;  %v979_v8 = vpack.c.bf16 %v977_v20, %v975_v32  ;;  %v980_v10 = vpack.c.bf16 %v978_v22, %v976_v33  ;;  %v984_v12 = vpop.permute.xlu0 %983  ;;  %v7978_v33 = vld [vmem:[#allocation3 + $0x10] ss:$0 sm:$0xff] }
 0x1c6   : > { %1121 = vmatprep.subr.bf16.mxu0 %v980_v10 }
 0x1c7   : > { %1122 = vmatpush1.bf16.msra.mxu0 %v979_v8 }
 0x1c8   : > { %v990_v37 = vpop.permute.xlu1 %989  ;;  %v988_v13 = vpop.permute.xlu0 %987 }
 0x1c9   : > { %v993_v9 = vsel %vm991_vm6, %v986_v34, %v990_v37  ;;  %v995_v11 = vsel %vm991_vm6, %v990_v37, %v986_v34  ;;  %v992_v44 = vsel %vm991_vm6, %v984_v12, %v988_v13  ;;  %v994_v45 = vsel %vm991_vm6, %v988_v13, %v984_v12  ;;  %v7980_v34 = vld [vmem:[#allocation3 + $0x18] ss:$0 sm:$0xff] }
 0x1ca   : > { %v1006_v42 = vmul.f32 %v7935_v35, %v993_v9  ;;  %v1007_v43 = vmul.f32 %v7939_v36, %v995_v11  ;;  %v1004_v49 = vmul.f32 %v7935_v35, %v992_v44  ;;  %v1005_v50 = vmul.f32 %v7939_v36, %v994_v45 }
 0x1cc   : > { %v1015_v51 = vpop.permute.xlu1 %1014  ;;  %v1008_v52 = vpack.c.bf16 %v1006_v42, %v1004_v49  ;;  %v1009_v54 = vpack.c.bf16 %v1007_v43, %v1005_v50  ;;  %v1013_v55 = vpop.permute.xlu0 %1012  ;;  %v6683_v50 = vld [vmem:[%s11440_s17] ss:$8 sps:$4 sm:$0xff]  }
 0x1ce   : > { %1123 = vmatprep.subr.bf16.mxu0 %v1009_v54 }
 0x1cf   : > { %1124 = vmatpush1.bf16.msra.mxu0 %v1008_v52 }
 0x1d0   : > { %v1019_v57 = vpop.permute.xlu1 %1018  ;;  %v1017_v62 = vpop.permute.xlu0 %1016 }
 0x1d1   : > { %v1022_v58 = vsel %vm1020_vm7, %v1015_v51, %v1019_v57  ;;  %v1024_v59 = vsel %vm1020_vm7, %v1019_v57, %v1015_v51  ;;  %v1021_v27 = vsel %vm1020_vm7, %v1013_v55, %v1017_v62  ;;  %v1023_v28 = vsel %vm1020_vm7, %v1017_v62, %v1013_v55 }
 0x1d2   : > { %v1035_v63 = vmul.f32 %v7959_v23, %v1022_v58  ;;  %v1036_v17 = vmul.f32 %v7963_v56, %v1024_v59  ;;  %v1033_v18 = vmul.f32 %v7959_v23, %v1021_v27  ;;  %v1034_v20 = vmul.f32 %v7963_v56, %v1023_v28 }
 0x1d4   : > { %v1044_v22 = vpop.permute.xlu1 %1043  ;;  %v1037_v26 = vpack.c.bf16 %v1035_v63, %v1033_v18  ;;  %v1038_v29 = vpack.c.bf16 %v1036_v17, %v1034_v20  ;;  %v1042_v32 = vpop.permute.xlu0 %1041 }
 0x1d6   : > { %1125 = vmatprep.subr.bf16.mxu0 %v1038_v29 }
 0x1d7   : > { %1126 = vmatpush1.bf16.msra.mxu0 %v1037_v26 }
 0x1d8   : > { %v1048_v8 = vpop.permute.xlu1 %1047  ;;  %v1046_v37 = vpop.permute.xlu0 %1045 }
 0x1d9   : > { %v1051_v10 = vsel %vm1049_vm8, %v1044_v22, %v1048_v8  ;;  %v1053_v12 = vsel %vm1049_vm8, %v1048_v8, %v1044_v22  ;;  %v1050_v13 = vsel %vm1049_vm8, %v1042_v32, %v1046_v37  ;;  %v1052_v42 = vsel %vm1049_vm8, %v1046_v37, %v1042_v32 }
 0x1da   : > { %v1064_v9 = vmul.f32 %v7978_v33, %v1051_v10  ;;  %v1065_v11 = vmul.f32 %v7980_v34, %v1053_v12  ;;  %v1062_v43 = vmul.f32 %v7978_v33, %v1050_v13  ;;  %v1063_v44 = vmul.f32 %v7980_v34, %v1052_v42 }
 0x1dc   : > { %v1066_v45 = vpack.c.bf16 %v1064_v9, %v1062_v43  ;;  %v1067_v49 = vpack.c.bf16 %v1065_v11, %v1063_v44 }
 0x1de   : > { %1127 = vmatprep.subr.bf16.mxu0 %v1067_v49 }
 0x1df   : > { %1128 = vmatpush1.bf16.msra.mxu0 %v1066_v45 }
 0x1e2   : > { %1144 = vmatmul.mubr.bf16.vlgmr.msra.gmra.mrb[0].mxu0 %v6683_v50 }
 0x1e9   : > { %v1096_v51 = vpop.permute.xlu1 %1095  ;;  %v1091_v52 = vpop.permute.xlu0 %1090 }
 0x1ed   : > { %v1159_v54 = vpop.permute.xlu1 %1158  ;;  %v1164_v55 = vpop.permute.xlu0 %1163 }
 0x1f1   : > { %v1175_v18 = vpop.permute.xlu1 %1174  ;;  %v1180_v32 = vpop.permute.xlu0 %1179 }
 0x2b5   : > { %v1145_v57 = vpop.f32.mrb[0].mxu0 }
 0x2b6   : > { %v1146_v58 = vadd.f32 %v1145_v57, %v1091_v52  ;;  %v1147_v59 = vpop.f32.mrb[1].mxu0 }
 0x2b7   : > { %v1148_v62 = vadd.f32 %v1147_v59, %v1091_v52  ;;  %v1149_v63 = vpop.f32.mrb[2].mxu0 }
 0x2b8   : > { %v1166_v17 = vmul.f32 %v1159_v54, %v1146_v58  ;;  %v1150_v27 = vadd.f32 %v1149_v63, %v1096_v51  ;;  %v1151_v28 = vpop.f32.mrb[3].mxu0 }
 0x2b9   : > { %v1167_v20 = vmul.f32 %v1159_v54, %v1148_v62  ;;  %v1152_v22 = vadd.f32 %v1151_v28, %v1096_v51 }
 0x2ba   : > { %v1182_v26 = vadd.f32 %v1175_v18, %v1166_v17  ;;  %v1168_v29 = vmul.f32 %v1164_v55, %v1150_v27 }
 0x2bb   : > { %v1183_v8 = vadd.f32 %v1175_v18, %v1167_v20  ;;  %v1169_v10 = vmul.f32 %v1164_v55, %v1152_v22 }
 0x2bc   : > { %v1186_v12 = vmax.f32 %v1182_v26, 0.0   ;;  %v1184_v37 = vadd.f32 %v1180_v32, %v1168_v29 }
 0x2bd   : > { %v1187_v9 = vmax.f32 %v1183_v8, 0.0   ;;  %v1185_v11 = vadd.f32 %v1180_v32, %v1169_v10 }
 0x2be   : > { %v1188_v13 = vmax.f32 %v1184_v37, 0.0  }
 0x2bf   : > { %v1189_v42 = vmax.f32 %v1185_v11, 0.0  }
 0x2c0 LB: >> { %v11449_v30 = vld [vmem:[#allocation30_spill] sm:$0xff]  ;;  %v7329_v43 = vmov 0   ;;  %s8023_s18 = sshll.u32 %s7201_s13, 5  ;;  %s7330_s25 = smov 17   ;;  %v7185_v42 = vphi %v1189_v42, %v11453_v42   ;;  %s7201_s13 = sphi %s8005_s13, %s1195_s13   ;;  %v7197_v12 = vphi %v1186_v12, %v11456_v12   ;;  %v7193_v9 = vphi %v1187_v9, %v11455_v9   ;;  %v7189_v13 = vphi %v1188_v13, %v11454_v13  }
 0x2c1   : >> { %6687 = vset.pattern.permute.xlu1 %v7329_v43  ;;  %6686 = vset.pattern.permute.xlu0 %v7329_v43  ;;  %s8029_s26 = scalar_lea.vmem %s11278_s10, %s8023_s18  ;;  %s8032_s28 = scalar_lea.vmem [#allocation13], %s8023_s18 }
 0x2c2   : >> { %v1220_v44 = vld [vmem:[%s8032_s28] sm:$0xff]  ;;  %v1221_v49 = vld [vmem:[%s8032_s28 + $0x8] sm:$0xff]  ;;  %s7331_s3 = smov 16   ;;  %s7332_s2 = smov 15   ;;  %v5970_v37 = vld [vmem:[%s8029_s26 + $0x10] sm:$0xff] }
 0x2c3   : >> { %v1203_v45 = vld [vmem:[%s8029_s26] sm:$0xff]  ;;  %1224 = vperm.xlu1 %6687, %v1220_v44   ;;  %v1204_v50 = vld [vmem:[%s8029_s26 + $0x8] sm:$0xff]  ;;  %s7333_s4 = smov 1   ;;  %s7334_s24 = smov 127   ;;  %v5974_v43 = vld [vmem:[%s8032_s28 + $0x10] sm:$0xff] }
 0x2c4   : >> { %1207 = vperm.xlu0 %6686, %v1203_v45   ;;  %s11310_s16 = smov 113   ;;  %s7336_s6 = smov 112   ;;  %v5971_v44 = vld [vmem:[%s8029_s26 + $0x18] sm:$0xff] }
 0x2c5   : >> { %s7337_s7 = smov 111   ;;  %s8116_s0 = scalar_lea.vmem %s11276_s8, %s8023_s18  ;;  %v5975_v45 = vld [vmem:[%s8032_s28 + $0x18] sm:$0xff] }
 0x2c6   : >> { %v6690_v8 = vld [vmem:[%s8116_s0 + $0x4] ss:$8 sps:$4 sm:$0xff]   ;;  %s1195_s13 = sadd.s32 1, %s7201_s13  }
 0x2c7   : >> { %1229 = vperm.xlu1 %6687, %v1221_v49   ;;  %5967 = vmatprep.mubr.msk.bf16.mxu0 %vm1107_vm0, %v6690_v8  ;;  %p1192_p9 = scmp.ge.s32.totalorder %s1195_s13, 3  }
 0x2c8   : >> { %1212 = vperm.xlu0 %6686, %v1204_v50   ;;  %s8479_s26 = smov (%p1192_p9), 0  }
 0x342   : >> { %v1225_v51 = vpop.permute.xlu1 %1224 }
 0x343   : >> { %v1208_v52 = vpop.permute.xlu0 %1207 }
 0x344   : >> { %v1215_v54 = vmul.f32 %v7197_v12, %v1208_v52  ;;  %v1216_v55 = vmul.f32 %v7193_v9, %v1208_v52 }
 0x346   : >> { %v1232_v57 = vadd.f32 %v1225_v51, %v1215_v54  ;;  %v1233_v59 = vadd.f32 %v1225_v51, %v1216_v55  ;;  %v1230_v27 = vpop.permute.xlu1 %1229 }
 0x347   : >> { %v1213_v58 = vpop.permute.xlu0 %1212 }
 0x348   : >> { %v8040_v62 = vmax.f32 %v1232_v57, 0.0  ;;  %v1217_v63 = vmul.f32 %v7189_v13, %v1213_v58  ;;  %v1218_v17 = vmul.f32 %v7185_v42, %v1213_v58  ;;  %v8046_v20 = vmax.f32 %v1233_v59, 0.0 }
 0x34a   : >> { %v1234_v28 = vadd.f32 %v1230_v27, %v1217_v63  ;;  %v1235_v18 = vadd.f32 %v1230_v27, %v1218_v17  ;;  %1248 = vrot.lane.b32.xlu0 %v8040_v62, %s7330_s25 }
 0x34c   : >> { %v8048_v22 = vmax.f32 %v1234_v28, 0.0  ;;  %v8050_v26 = vmax.f32 %v1235_v18, 0.0 }
 0x34e   : >> { %1252 = vrot.lane.b32.xlu0 %v8046_v20, %s7330_s25  ;;  %1250 = vrot.lane.b32.xlu1 %v8048_v22, %s7330_s25  ;;  %v1329_v29 = vpack.c.bf16 %v8050_v26, %v8046_v20  ;;  %v1328_v32 = vpack.c.bf16 %v8048_v22, %v8040_v62 }
 0x352   : >> { %1268 = vrot.lane.b32.xlu0 %v8040_v62, %s7331_s3  ;;  %1254 = vrot.lane.b32.xlu1 %v8050_v26, %s7330_s25 }
 0x356   : >> { %1272 = vrot.lane.b32.xlu0 %v8046_v20, %s7331_s3  ;;  %1270 = vrot.lane.b32.xlu1 %v8048_v22, %s7331_s3 }
 0x35a   : >> { %1288 = vrot.lane.b32.xlu0 %v8040_v62, %s7332_s2  ;;  %1274 = vrot.lane.b32.xlu1 %v8050_v26, %s7331_s3 }
 0x35e   : >> { %1292 = vrot.lane.b32.xlu0 %v8046_v20, %s7332_s2  ;;  %1290 = vrot.lane.b32.xlu1 %v8048_v22, %s7332_s2 }
 0x362   : >> { %1308 = vrot.lane.b32.xlu0 %v8040_v62, %s7333_s4  ;;  %1294 = vrot.lane.b32.xlu1 %v8050_v26, %s7332_s2 }
 0x366   : >> { %1312 = vrot.lane.b32.xlu0 %v8046_v20, %s7333_s4  ;;  %1310 = vrot.lane.b32.xlu1 %v8048_v22, %s7333_s4 }
 0x36a   : >> { %1332 = vrot.lane.b32.xlu0 %v8040_v62, %s7334_s24  ;;  %1314 = vrot.lane.b32.xlu1 %v8050_v26, %s7333_s4 }
 0x36e   : >> { %1336 = vrot.lane.b32.xlu0 %v8046_v20, %s7334_s24  ;;  %1334 = vrot.lane.b32.xlu1 %v8048_v22, %s7334_s24 }
 0x372   : >> { %1352 = vrot.lane.b32.xlu0 %v8040_v62, %s11310_s16  ;;  %1338 = vrot.lane.b32.xlu1 %v8050_v26, %s7334_s24 }
 0x376   : >> { %1356 = vrot.lane.b32.xlu0 %v8046_v20, %s11310_s16  ;;  %1354 = vrot.lane.b32.xlu1 %v8048_v22, %s11310_s16 }
 0x37a   : >> { %1372 = vrot.lane.b32.xlu0 %v8040_v62, %s7336_s6  ;;  %1358 = vrot.lane.b32.xlu1 %v8050_v26, %s11310_s16  ;;  %s8123_s16 = scalar_lea.vmem %s11277_s9, %s8023_s18  ;;  %s11450_s18 = smov 113  }
 0x37b   : >> { %v1246_v10 = vld [vmem:[%s8123_s16] sm:$0xff]  ;;  %v1247_v11 = vld [vmem:[%s8123_s16 + $0x8] sm:$0xff] }
 0x37e   : >> { %1376 = vrot.lane.b32.xlu0 %v8046_v20, %s7336_s6  ;;  %1374 = vrot.lane.b32.xlu1 %v8048_v22, %s7336_s6 }
 0x382   : >> { %1392 = vrot.lane.b32.xlu0 %v8040_v62, %s7337_s7  ;;  %1378 = vrot.lane.b32.xlu1 %v8050_v26, %s7336_s6 }
 0x386   : >> { %1396 = vrot.lane.b32.xlu0 %v8046_v20, %s7337_s7  ;;  %1394 = vrot.lane.b32.xlu1 %v8048_v22, %s7337_s7 }
 0x38a   : >> { %1432 = vperm.xlu0 %6686, %v1246_v10   ;;  %1398 = vrot.lane.b32.xlu1 %v8050_v26, %s7337_s7 }
 0x38e   : >> { %1502 = vperm.xlu0 %6686, %v5970_v37   ;;  %1437 = vperm.xlu1 %6687, %v1247_v11  }
 0x392   : >> { %1519 = vperm.xlu0 %6686, %v5974_v43   ;;  %1507 = vperm.xlu1 %6687, %v5971_v44  }
 0x396   : >> { %1524 = vperm.xlu1 %6687, %v5975_v45  }
 0x3bc   : >> { %v1249_v49 = vpop.permute.xlu0 %1248 }
 0x3c0   : >> { %v1253_v50 = vpop.permute.xlu0 %1252  ;;  %v1251_v51 = vpop.permute.xlu1 %1250 }
 0x3c1   : >> { %v1256_v52 = vsel %vm842_vm1, %v1249_v49, %v1253_v50  ;;  %v1258_v54 = vsel %vm842_vm1, %v1253_v50, %v1249_v49 }
 0x3c2   : >> { %v1260_v63 = vmul.f32 %v1258_v54, %v11449_v30  ;;  %v1261_v17 = vmul.f32 %v1256_v52, %v7813_v31 }
 0x3c4   : >> { %v1269_v55 = vpop.permute.xlu0 %1268  ;;  %v1255_v57 = vpop.permute.xlu1 %1254 }
 0x3c5   : >> { %v1257_v58 = vsel %vm842_vm1, %v1251_v51, %v1255_v57  ;;  %v1259_v59 = vsel %vm842_vm1, %v1255_v57, %v1251_v51 }
 0x3c6   : >> { %v1262_v27 = vmul.f32 %v1259_v59, %v11449_v30  ;;  %v1263_v28 = vmul.f32 %v1257_v58, %v7813_v31 }
 0x3c8   : >> { %v1264_v18 = vpack.c.bf16 %v1262_v27, %v1260_v63  ;;  %v1265_v8 = vpack.c.bf16 %v1263_v28, %v1261_v17  ;;  %v1273_v10 = vpop.permute.xlu0 %1272  ;;  %v1271_v37 = vpop.permute.xlu1 %1270 }
 0x3c9   : >> { %v1276_v11 = vsel %vm871_vm2, %v1269_v55, %v1273_v10  ;;  %v1278_v43 = vsel %vm871_vm2, %v1273_v10, %v1269_v55 }
 0x3ca   : >> { %1452 = vmatprep.subr.bf16.mxu0 %v1265_v8  ;;  %v1280_v51 = vmul.f32 %v1278_v43, %v7833_v47  ;;  %v1281_v52 = vmul.f32 %v1276_v11, %v7837_v48 }
 0x3cb   : >> { %1453 = vmatpush1.bf16.msra.mxu0 %v1264_v18 }
 0x3cc   : >> { %v1289_v44 = vpop.permute.xlu0 %1288  ;;  %v1275_v45 = vpop.permute.xlu1 %1274 }
 0x3cd   : >> { %v1277_v49 = vsel %vm871_vm2, %v1271_v37, %v1275_v45  ;;  %v1279_v50 = vsel %vm871_vm2, %v1275_v45, %v1271_v37 }
 0x3ce   : >> { %v1282_v54 = vmul.f32 %v1279_v50, %v7833_v47  ;;  %v1283_v57 = vmul.f32 %v1277_v49, %v7837_v48 }
 0x3d0   : >> { %v1284_v58 = vpack.c.bf16 %v1282_v54, %v1280_v51  ;;  %v1285_v59 = vpack.c.bf16 %v1283_v57, %v1281_v52  ;;  %v1293_v55 = vpop.permute.xlu0 %1292  ;;  %v1291_v63 = vpop.permute.xlu1 %1290 }
 0x3d1   : >> { %v1296_v17 = vsel %vm900_vm3, %v1289_v44, %v1293_v55  ;;  %v1298_v27 = vsel %vm900_vm3, %v1293_v55, %v1289_v44 }
 0x3d2   : >> { %1454 = vmatprep.subr.bf16.mxu0 %v1285_v59  ;;  %v1300_v37 = vmul.f32 %v1298_v27, %v7857_v14  ;;  %v1301_v11 = vmul.f32 %v1296_v17, %v7861_v16 }
 0x3d3   : >> { %1455 = vmatpush1.bf16.msra.mxu0 %v1284_v58 }
 0x3d4   : >> { %v1309_v28 = vpop.permute.xlu0 %1308  ;;  %v1295_v18 = vpop.permute.xlu1 %1294 }
 0x3d5   : >> { %v1297_v8 = vsel %vm900_vm3, %v1291_v63, %v1295_v18  ;;  %v1299_v10 = vsel %vm900_vm3, %v1295_v18, %v1291_v63 }
 0x3d6   : >> { %v1302_v43 = vmul.f32 %v1299_v10, %v7857_v14  ;;  %v1303_v45 = vmul.f32 %v1297_v8, %v7861_v16 }
 0x3d8   : >> { %v1304_v49 = vpack.c.bf16 %v1302_v43, %v1300_v37  ;;  %v1305_v50 = vpack.c.bf16 %v1303_v45, %v1301_v11  ;;  %v1313_v44 = vpop.permute.xlu0 %1312  ;;  %v1311_v51 = vpop.permute.xlu1 %1310 }
 0x3d9   : >> { %v1316_v52 = vsel %vm929_vm4, %v1309_v28, %v1313_v44  ;;  %v1318_v54 = vsel %vm929_vm4, %v1313_v44, %v1309_v28 }
 0x3da   : >> { %1456 = vmatprep.subr.bf16.mxu0 %v1305_v50  ;;  %v1320_v63 = vmul.f32 %v1318_v54, %v7881_v40  ;;  %v1321_v17 = vmul.f32 %v1316_v52, %v7885_v41 }
 0x3db   : >> { %1457 = vmatpush1.bf16.msra.mxu0 %v1304_v49 }
 0x3dc   : >> { %v1333_v57 = vpop.permute.xlu0 %1332  ;;  %v1315_v58 = vpop.permute.xlu1 %1314 }
 0x3dd   : >> { %v1317_v59 = vsel %vm929_vm4, %v1311_v51, %v1315_v58  ;;  %v1319_v55 = vsel %vm929_vm4, %v1315_v58, %v1311_v51 }
 0x3de   : >> { %v1322_v27 = vmul.f32 %v1319_v55, %v7881_v40  ;;  %v1323_v18 = vmul.f32 %v1317_v59, %v7885_v41 }
 0x3e0   : >> { %v1324_v8 = vpack.c.bf16 %v1322_v27, %v1320_v63  ;;  %v1325_v10 = vpack.c.bf16 %v1323_v18, %v1321_v17  ;;  %v1337_v28 = vpop.permute.xlu0 %1336  ;;  %v1335_v37 = vpop.permute.xlu1 %1334 }
 0x3e1   : >> { %v1340_v11 = vsel %vm962_vm5, %v1333_v57, %v1337_v28  ;;  %v1342_v43 = vsel %vm962_vm5, %v1337_v28, %v1333_v57 }
 0x3e2   : >> { %1458 = vmatprep.subr.bf16.mxu0 %v1325_v10  ;;  %v1344_v51 = vmul.f32 %v1340_v11, %v7905_v60  ;;  %v1345_v52 = vmul.f32 %v1342_v43, %v7909_v61 }
 0x3e3   : >> { %1459 = vmatpush1.bf16.msra.mxu0 %v1324_v8 }
 0x3e4   : >> { %v1353_v45 = vpop.permute.xlu0 %1352  ;;  %v1339_v49 = vpop.permute.xlu1 %1338  ;;  %1460 = vmatprep.subr.bf16.mxu0 %v1329_v29 }
 0x3e5   : >> { %v1341_v50 = vsel %vm962_vm5, %v1335_v37, %v1339_v49  ;;  %v1343_v44 = vsel %vm962_vm5, %v1339_v49, %v1335_v37 }
 0x3e6   : >> { %v1346_v54 = vmul.f32 %v1341_v50, %v7905_v60  ;;  %v1347_v57 = vmul.f32 %v1343_v44, %v7909_v61 }
 0x3e7   : >> { %1461 = vmatpush1.bf16.msra.mxu0 %v1328_v32 }
 0x3e8   : >> { %v1348_v20 = vpack.c.bf16 %v1346_v54, %v1344_v51  ;;  %v1349_v26 = vpack.c.bf16 %v1347_v57, %v1345_v52  ;;  %v1357_v29 = vpop.permute.xlu0 %1356  ;;  %v1355_v58 = vpop.permute.xlu1 %1354 }
 0x3e9   : >> { %v1360_v59 = vsel %vm991_vm6, %v1353_v45, %v1357_v29  ;;  %v1362_v55 = vsel %vm991_vm6, %v1357_v29, %v1353_v45 }
 0x3ea   : >> { %1462 = vmatprep.subr.bf16.mxu0 %v1349_v26  ;;  %v1364_v22 = vmul.f32 %v1360_v59, %v7935_v35  ;;  %v1365_v32 = vmul.f32 %v1362_v55, %v7939_v36 }
 0x3eb   : >> { %1463 = vmatpush1.bf16.msra.mxu0 %v1348_v20 }
 0x3ec   : >> { %v1373_v63 = vpop.permute.xlu0 %1372  ;;  %v1359_v17 = vpop.permute.xlu1 %1358 }
 0x3ed   : >> { %v1361_v27 = vsel %vm991_vm6, %v1355_v58, %v1359_v17  ;;  %v1363_v62 = vsel %vm991_vm6, %v1359_v17, %v1355_v58 }
 0x3ee   : >> { %v1366_v18 = vmul.f32 %v1361_v27, %v7935_v35  ;;  %v1367_v8 = vmul.f32 %v1363_v62, %v7939_v36 }
 0x3f0   : >> { %v1368_v10 = vpack.c.bf16 %v1366_v18, %v1364_v22  ;;  %v1369_v28 = vpack.c.bf16 %v1367_v8, %v1365_v32  ;;  %v1377_v37 = vpop.permute.xlu0 %1376  ;;  %v1375_v11 = vpop.permute.xlu1 %1374 }
 0x3f1   : >> { %v1380_v43 = vsel %vm1020_vm7, %v1373_v63, %v1377_v37  ;;  %v1382_v45 = vsel %vm1020_vm7, %v1377_v37, %v1373_v63  ;;  %v6688_v37 = vld [vmem:[%s8116_s0] ss:$8 sps:$4 sm:$0xff]  }
 0x3f2   : >> { %1464 = vmatprep.subr.bf16.mxu0 %v1369_v28  ;;  %v1384_v52 = vmul.f32 %v1380_v43, %v7959_v23  ;;  %v1385_v54 = vmul.f32 %v1382_v45, %v7963_v56 }
 0x3f3   : >> { %1465 = vmatpush1.bf16.msra.mxu0 %v1368_v10 }
 0x3f4   : >> { %v1393_v49 = vpop.permute.xlu0 %1392  ;;  %v1379_v50 = vpop.permute.xlu1 %1378 }
 0x3f5   : >> { %v1381_v44 = vsel %vm1020_vm7, %v1375_v11, %v1379_v50  ;;  %v1383_v51 = vsel %vm1020_vm7, %v1379_v50, %v1375_v11 }
 0x3f6   : >> { %v1386_v57 = vmul.f32 %v1381_v44, %v7959_v23  ;;  %v1387_v20 = vmul.f32 %v1383_v51, %v7963_v56 }
 0x3f8   : >> { %v1388_v26 = vpack.c.bf16 %v1386_v57, %v1384_v52  ;;  %v1389_v29 = vpack.c.bf16 %v1387_v20, %v1385_v54  ;;  %v1397_v58 = vpop.permute.xlu0 %1396  ;;  %v1395_v59 = vpop.permute.xlu1 %1394 }
 0x3f9   : >> { %v1400_v55 = vsel %vm1049_vm8, %v1393_v49, %v1397_v58  ;;  %v1402_v63 = vsel %vm1049_vm8, %v1397_v58, %v1393_v49 }
 0x3fa   : >> { %1466 = vmatprep.subr.bf16.mxu0 %v1389_v29  ;;  %v1404_v22 = vmul.f32 %v7978_v33, %v1400_v55  ;;  %v1405_v32 = vmul.f32 %v7980_v34, %v1402_v63 }
 0x3fb   : >> { %1467 = vmatpush1.bf16.msra.mxu0 %v1388_v26 }
 0x3fc   : >> { %v1399_v17 = vpop.permute.xlu1 %1398 }
 0x3fd   : >> { %v1401_v27 = vsel %vm1049_vm8, %v1395_v59, %v1399_v17  ;;  %v1403_v62 = vsel %vm1049_vm8, %v1399_v17, %v1395_v59 }
 0x3fe   : >> { %v1406_v18 = vmul.f32 %v7978_v33, %v1401_v27  ;;  %v1407_v8 = vmul.f32 %v7980_v34, %v1403_v62 }
 0x400   : >> { %v1408_v10 = vpack.c.bf16 %v1406_v18, %v1404_v22  ;;  %v1409_v28 = vpack.c.bf16 %v1407_v8, %v1405_v32 }
 0x402   : >> { %1468 = vmatprep.subr.bf16.mxu0 %v1409_v28 }
 0x403   : >> { %1469 = vmatpush1.bf16.msra.mxu0 %v1408_v10 }
 0x406   : >> { %1485 = vmatmul.mubr.bf16.vlgmr.msra.gmra.mrb[0].mxu0 %v6688_v37 }
 0x409   : >> { %v1433_v11 = vpop.permute.xlu0 %1432 }
 0x40d   : >> { %v1438_v43 = vpop.permute.xlu1 %1437  ;;  %v1503_v45 = vpop.permute.xlu0 %1502 }
 0x411   : >> { %v1508_v49 = vpop.permute.xlu1 %1507  ;;  %v1520_v29 = vpop.permute.xlu0 %1519 }
 0x415   : >> { %v1525_v17 = vpop.permute.xlu1 %1524 }
 0x4d9   : >> { %v1486_v50 = vpop.f32.mrb[0].mxu0 }
 0x4da   : >> { %v1487_v44 = vadd.f32 %v1486_v50, %v1433_v11  ;;  %v1488_v51 = vpop.f32.mrb[1].mxu0 }
 0x4db   : >> { %v1489_v52 = vadd.f32 %v1488_v51, %v1433_v11  ;;  %v1490_v54 = vpop.f32.mrb[2].mxu0 }
 0x4dc   : >> { %v1510_v57 = vmul.f32 %v1503_v45, %v1487_v44  ;;  %v1491_v20 = vadd.f32 %v1490_v54, %v1438_v43  ;;  %v1492_v26 = vpop.f32.mrb[3].mxu0 }
 0x4dd   : >> { %v1511_v58 = vmul.f32 %v1503_v45, %v1489_v52  ;;  %v1493_v59 = vadd.f32 %v1492_v26, %v1438_v43  ;;  %v6693_v43 = vld [vmem:[%s8116_s0 + $0x14] ss:$8 sps:$4 sm:$0xff]  }
 0x4de   : >> { %v1527_v55 = vadd.f32 %v1520_v29, %v1510_v57  ;;  %v1512_v63 = vmul.f32 %v1508_v49, %v1491_v20  ;;  %5986 = vmatprep.mubr.msk.bf16.mxu1 %vm1107_vm0, %v6693_v43  ;;  %v5982_v45 = vld [vmem:[%s8123_s16 + $0x10] sm:$0xff] }
 0x4df   : >> { %v1528_v27 = vadd.f32 %v1520_v29, %v1511_v58  ;;  %v1513_v62 = vmul.f32 %v1508_v49, %v1493_v59  ;;  %v5983_v49 = vld [vmem:[%s8123_s16 + $0x18] sm:$0xff] }
 0x4e0   : >> { %v8241_v22 = vmax.f32 %v1527_v55, 0.0  ;;  %v1529_v32 = vadd.f32 %v1525_v17, %v1512_v63 }
 0x4e1   : >> { %v1530_v18 = vadd.f32 %v1525_v17, %v1513_v62  ;;  %v8247_v10 = vmax.f32 %v1528_v27, 0.0 }
 0x4e2   : >> { %v8243_v8 = vmax.f32 %v1529_v32, 0.0  ;;  %1543 = vrot.lane.b32.xlu0 %v8241_v22, %s7330_s25 }
 0x4e3   : >> { %v8249_v28 = vmax.f32 %v1530_v18, 0.0 }
 0x4e4   : >> { %1545 = vrot.lane.b32.xlu1 %v8243_v8, %s7330_s25 }
 0x4e6   : >> { %1563 = vrot.lane.b32.xlu0 %v8241_v22, %s7331_s3 }
 0x4e8   : >> { %1565 = vrot.lane.b32.xlu1 %v8243_v8, %s7331_s3 }
 0x4ea   : >> { %1583 = vrot.lane.b32.xlu0 %v8241_v22, %s7332_s2 }
 0x4ec   : >> { %1585 = vrot.lane.b32.xlu1 %v8243_v8, %s7332_s2 }
 0x4ee   : >> { %1603 = vrot.lane.b32.xlu0 %v8241_v22, %s7333_s4 }
 0x4f0   : >> { %1605 = vrot.lane.b32.xlu1 %v8243_v8, %s7333_s4 }
 0x4f2   : >> { %1627 = vrot.lane.b32.xlu0 %v8241_v22, %s7334_s24 }
 0x4f4   : >> { %1629 = vrot.lane.b32.xlu1 %v8243_v8, %s7334_s24 }
 0x4f6   : >> { %1647 = vrot.lane.b32.xlu0 %v8241_v22, %s11450_s18 }
 0x4f8   : >> { %1649 = vrot.lane.b32.xlu1 %v8243_v8, %s11450_s18 }
 0x4fa   : >> { %1667 = vrot.lane.b32.xlu0 %v8241_v22, %s7336_s6 }
 0x4fc   : >> { %1669 = vrot.lane.b32.xlu1 %v8243_v8, %s7336_s6 }
 0x4fe   : >> { %1547 = vrot.lane.b32.xlu0 %v8247_v10, %s7330_s25 }
 0x500   : >> { %1549 = vrot.lane.b32.xlu1 %v8249_v28, %s7330_s25 }
 0x502   : >> { %1567 = vrot.lane.b32.xlu0 %v8247_v10, %s7331_s3 }
 0x504   : >> { %1569 = vrot.lane.b32.xlu1 %v8249_v28, %s7331_s3 }
 0x506   : >> { %1587 = vrot.lane.b32.xlu0 %v8247_v10, %s7332_s2 }
 0x508   : >> { %1589 = vrot.lane.b32.xlu1 %v8249_v28, %s7332_s2 }
 0x50a   : >> { %1607 = vrot.lane.b32.xlu0 %v8247_v10, %s7333_s4 }
 0x50c   : >> { %1609 = vrot.lane.b32.xlu1 %v8249_v28, %s7333_s4 }
 0x50e   : >> { %1687 = vrot.lane.b32.xlu0 %v8241_v22, %s7337_s7 }
 0x510   : >> { %1689 = vrot.lane.b32.xlu1 %v8243_v8, %s7337_s7 }
 0x512   : >> { %1631 = vrot.lane.b32.xlu0 %v8247_v10, %s7334_s24 }
 0x514   : >> { %1633 = vrot.lane.b32.xlu1 %v8249_v28, %s7334_s24 }
 0x516   : >> { %1651 = vrot.lane.b32.xlu0 %v8247_v10, %s11450_s18 }
 0x518   : >> { %1653 = vrot.lane.b32.xlu1 %v8249_v28, %s11450_s18 }
 0x51a   : >> { %1671 = vrot.lane.b32.xlu0 %v8247_v10, %s7336_s6 }
 0x51c   : >> { %1673 = vrot.lane.b32.xlu1 %v8249_v28, %s7336_s6 }
 0x51e   : >> { %1691 = vrot.lane.b32.xlu0 %v8247_v10, %s7337_s7 }
 0x520   : >> { %1693 = vrot.lane.b32.xlu1 %v8249_v28, %s7337_s7 }
 0x522   : >> { %1727 = vperm.xlu0 %6686, %v5982_v45  }
 0x524   : >> { %1732 = vperm.xlu1 %6687, %v5983_v49  }
 0x554   : >> { %v1544_v50 = vpop.permute.xlu0 %1543 }
 0x556   : >> { %v1546_v44 = vpop.permute.xlu1 %1545 }
 0x558   : >> { %v1564_v51 = vpop.permute.xlu0 %1563 }
 0x55a   : >> { %v1566_v52 = vpop.permute.xlu1 %1565 }
 0x55c   : >> { %v1584_v54 = vpop.permute.xlu0 %1583 }
 0x55e   : >> { %v1586_v57 = vpop.permute.xlu1 %1585 }
 0x560   : >> { %v1604_v20 = vpop.permute.xlu0 %1603 }
 0x562   : >> { %v1606_v26 = vpop.permute.xlu1 %1605 }
 0x564   : >> { %v8321_v29 = vpop.permute.xlu0 %1627 }
 0x566   : >> { %v8323_v58 = vpop.permute.xlu1 %1629 }
 0x568   : >> { %v8325_v59 = vpop.permute.xlu0 %1647 }
 0x56a   : >> { %v8327_v55 = vpop.permute.xlu1 %1649 }
 0x56c   : >> { %v8329_v63 = vpop.permute.xlu0 %1667 }
 0x56e   : >> { %v8331_v17 = vpop.permute.xlu1 %1669 }
 0x570   : >> { %v1548_v27 = vpop.permute.xlu0 %1547 }
 0x571   : >> { %v1551_v62 = vsel %vm842_vm1, %v1544_v50, %v1548_v27  ;;  %v1553_v32 = vsel %vm842_vm1, %v1548_v27, %v1544_v50 }
 0x572   : >> { %v1550_v18 = vpop.permute.xlu1 %1549  ;;  %v1555_v49 = vmul.f32 %v1553_v32, %v11449_v30  ;;  %v1556_v15 = vmul.f32 %v1551_v62, %v7813_v31 }
 0x573   : >> { %v1552_v43 = vsel %vm842_vm1, %v1546_v44, %v1550_v18  ;;  %v1554_v45 = vsel %vm842_vm1, %v1550_v18, %v1546_v44 }
 0x574   : >> { %v1557_v37 = vmul.f32 %v1554_v45, %v11449_v30  ;;  %v1558_v11 = vmul.f32 %v1552_v43, %v7813_v31  ;;  %v1568_v7 = vpop.permute.xlu0 %1567 }
 0x575   : >> { %v1571_v6 = vsel %vm871_vm2, %v1564_v51, %v1568_v7  ;;  %v1573_v50 = vsel %vm871_vm2, %v1568_v7, %v1564_v51 }
 0x576   : >> { %v1559_v27 = vpack.c.bf16 %v1557_v37, %v1555_v49  ;;  %v1560_v5 = vpack.c.bf16 %v1558_v11, %v1556_v15  ;;  %v1570_v4 = vpop.permute.xlu1 %1569  ;;  %v1575_v32 = vmul.f32 %v1573_v50, %v7833_v47  ;;  %v1576_v18 = vmul.f32 %v1571_v6, %v7837_v48 }
 0x577   : >> { %v1572_v44 = vsel %vm871_vm2, %v1566_v52, %v1570_v4  ;;  %v1574_v62 = vsel %vm871_vm2, %v1570_v4, %v1566_v52 }
 0x578   : >> { %v1577_v43 = vmul.f32 %v1574_v62, %v7833_v47  ;;  %v1578_v45 = vmul.f32 %v1572_v44, %v7837_v48  ;;  %v1588_v30 = vpop.permute.xlu0 %1587  ;;  %1747 = vmatprep.subr.bf16.mxu1 %v1560_v5 }
 0x579   : >> { %v1591_v7 = vsel %vm900_vm3, %v1584_v54, %v1588_v30  ;;  %v1593_v15 = vsel %vm900_vm3, %v1588_v30, %v1584_v54  ;;  %1748 = vmatpush1.bf16.msra.mxu1 %v1559_v27 }
 0x57a   : >> { %v1579_v37 = vpack.c.bf16 %v1577_v43, %v1575_v32  ;;  %v1580_v11 = vpack.c.bf16 %v1578_v45, %v1576_v18  ;;  %v1590_v4 = vpop.permute.xlu1 %1589  ;;  %v1595_v52 = vmul.f32 %v1593_v15, %v7857_v14  ;;  %v1596_v5 = vmul.f32 %v1591_v7, %v7861_v16 }
 0x57b   : >> { %v1592_v51 = vsel %vm900_vm3, %v1586_v57, %v1590_v4  ;;  %v1594_v6 = vsel %vm900_vm3, %v1590_v4, %v1586_v57 }
 0x57c   : >> { %v1597_v49 = vmul.f32 %v1594_v6, %v7857_v14  ;;  %v1598_v50 = vmul.f32 %v1592_v51, %v7861_v16  ;;  %v1608_v44 = vpop.permute.xlu0 %1607  ;;  %1749 = vmatprep.subr.bf16.mxu1 %v1580_v11 }
 0x57d   : >> { %v1611_v30 = vsel %vm929_vm4, %v1604_v20, %v1608_v44  ;;  %v1613_v54 = vsel %vm929_vm4, %v1608_v44, %v1604_v20  ;;  %1750 = vmatpush1.bf16.msra.mxu1 %v1579_v37 }
 0x57e   : >> { %v1599_v27 = vpack.c.bf16 %v1597_v49, %v1595_v52  ;;  %v1600_v62 = vpack.c.bf16 %v1598_v50, %v1596_v5  ;;  %v1610_v57 = vpop.permute.xlu1 %1609  ;;  %v1615_v43 = vmul.f32 %v1613_v54, %v7881_v40  ;;  %v1616_v45 = vmul.f32 %v1611_v30, %v7885_v41 }
 0x57f   : >> { %v1612_v32 = vsel %vm929_vm4, %v1606_v26, %v1610_v57  ;;  %v1614_v18 = vsel %vm929_vm4, %v1610_v57, %v1606_v26  ;;  %v11451_v5 = vpack.c.bf16 %v8249_v28, %v8247_v10 }
 0x580   : >> { %v1617_v7 = vmul.f32 %v1614_v18, %v7881_v40  ;;  %v1618_v15 = vmul.f32 %v1612_v32, %v7885_v41  ;;  %v1688_v11 = vpop.permute.xlu0 %1687  ;;  %1751 = vmatprep.subr.bf16.mxu1 %v1600_v62 }
 0x581   : >> { %1752 = vmatpush1.bf16.msra.mxu1 %v1599_v27 }
 0x582   : >> { %v1619_v20 = vpack.c.bf16 %v1617_v7, %v1615_v43  ;;  %v1620_v37 = vpack.c.bf16 %v1618_v15, %v1616_v45  ;;  %v1690_v4 = vpop.permute.xlu1 %1689 }
 0x584   : >> { %v1632_v51 = vpop.permute.xlu0 %1631  ;;  %1753 = vmatprep.subr.bf16.mxu1 %v1620_v37 }
 0x585   : >> { %v1635_v26 = vsel %vm962_vm5, %v8321_v29, %v1632_v51  ;;  %v1637_v6 = vsel %vm962_vm5, %v1632_v51, %v8321_v29  ;;  %1754 = vmatpush1.bf16.msra.mxu1 %v1619_v20 }
 0x586   : >> { %v1634_v52 = vpop.permute.xlu1 %1633  ;;  %1755 = vmatprep.subr.bf16.mxu1 %v11451_v5  ;;  %v1639_v44 = vmul.f32 %v1635_v26, %v7905_v60  ;;  %v1640_v30 = vmul.f32 %v1637_v6, %v7909_v61 }
 0x587   : >> { %v1636_v49 = vsel %vm962_vm5, %v8323_v58, %v1634_v52  ;;  %v1638_v50 = vsel %vm962_vm5, %v1634_v52, %v8323_v58  ;;  %v11452_v58 = vpack.c.bf16 %v8243_v8, %v8241_v22 }
 0x588   : >> { %v1641_v29 = vmul.f32 %v1636_v49, %v7905_v60  ;;  %v1642_v54 = vmul.f32 %v1638_v50, %v7909_v61  ;;  %v1652_v27 = vpop.permute.xlu0 %1651 }
 0x589   : >> { %v1655_v10 = vsel %vm991_vm6, %v8325_v59, %v1652_v27  ;;  %v1657_v28 = vsel %vm991_vm6, %v1652_v27, %v8325_v59  ;;  %1756 = vmatpush1.bf16.msra.mxu1 %v11452_v58 }
 0x58a   : >> { %v1643_v62 = vpack.c.bf16 %v1641_v29, %v1639_v44  ;;  %v1644_v57 = vpack.c.bf16 %v1642_v54, %v1640_v30  ;;  %v1654_v32 = vpop.permute.xlu1 %1653  ;;  %v1659_v45 = vmul.f32 %v1655_v10, %v7935_v35  ;;  %v1660_v7 = vmul.f32 %v1657_v28, %v7939_v36 }
 0x58b   : >> { %v1656_v18 = vsel %vm991_vm6, %v8327_v55, %v1654_v32  ;;  %v1658_v43 = vsel %vm991_vm6, %v1654_v32, %v8327_v55 }
 0x58c   : >> { %v1661_v59 = vmul.f32 %v1656_v18, %v7935_v35  ;;  %v1662_v22 = vmul.f32 %v1658_v43, %v7939_v36  ;;  %v1672_v8 = vpop.permute.xlu0 %1671  ;;  %1757 = vmatprep.subr.bf16.mxu1 %v1644_v57  ;;  %v6691_v18 = vld [vmem:[%s8116_s0 + $0x10] ss:$8 sps:$4 sm:$0xff]  }
 0x58d   : >> { %v1675_v15 = vsel %vm1020_vm7, %v8329_v63, %v1672_v8  ;;  %v1677_v20 = vsel %vm1020_vm7, %v1672_v8, %v8329_v63  ;;  %1758 = vmatpush1.bf16.msra.mxu1 %v1643_v62 }
 0x58e   : >> { %v1663_v55 = vpack.c.bf16 %v1661_v59, %v1659_v45  ;;  %v1664_v37 = vpack.c.bf16 %v1662_v22, %v1660_v7  ;;  %v1674_v51 = vpop.permute.xlu1 %1673  ;;  %v1679_v52 = vmul.f32 %v1675_v15, %v7959_v23  ;;  %v1680_v5 = vmul.f32 %v1677_v20, %v7963_v56 }
 0x58f   : >> { %v1676_v26 = vsel %vm1020_vm7, %v8331_v17, %v1674_v51  ;;  %v1678_v6 = vsel %vm1020_vm7, %v1674_v51, %v8331_v17 }
 0x590   : >> { %v1681_v49 = vmul.f32 %v1676_v26, %v7959_v23  ;;  %v1682_v63 = vmul.f32 %v1678_v6, %v7963_v56  ;;  %v1692_v50 = vpop.permute.xlu0 %1691  ;;  %1759 = vmatprep.subr.bf16.mxu1 %v1664_v37 }
 0x591   : >> { %v1695_v44 = vsel %vm1049_vm8, %v1688_v11, %v1692_v50  ;;  %v1697_v30 = vsel %vm1049_vm8, %v1692_v50, %v1688_v11  ;;  %1760 = vmatpush1.bf16.msra.mxu1 %v1663_v55 }
 0x592   : >> { %v1683_v29 = vpack.c.bf16 %v1681_v49, %v1679_v52  ;;  %v1684_v17 = vpack.c.bf16 %v1682_v63, %v1680_v5  ;;  %v1694_v54 = vpop.permute.xlu1 %1693  ;;  %v1699_v28 = vmul.f32 %v7978_v33, %v1695_v44  ;;  %v1700_v58 = vmul.f32 %v7980_v34, %v1697_v30 }
 0x593   : >> { %v1696_v27 = vsel %vm1049_vm8, %v1690_v4, %v1694_v54  ;;  %v1698_v10 = vsel %vm1049_vm8, %v1694_v54, %v1690_v4  ;;  %v8465_v52 = vmov (%p1192_p9), 0.0   ;;  %v8467_v5 = vmov (%p1192_p9), 0.0  }
 0x594   : >> { %v1701_v62 = vmul.f32 %v7978_v33, %v1696_v27  ;;  %v1702_v57 = vmul.f32 %v7980_v34, %v1698_v10  ;;  %1761 = vmatprep.subr.bf16.mxu1 %v1684_v17  ;;  %v8469_v49 = vmov (%p1192_p9), 0.0  }
 0x595   : >> { %1762 = vmatpush1.bf16.msra.mxu1 %v1683_v29 }
 0x596   : >> { %v1703_v11 = vpack.c.bf16 %v1701_v62, %v1699_v28  ;;  %v1704_v32 = vpack.c.bf16 %v1702_v57, %v1700_v58 }
 0x598   : >> { %1763 = vmatprep.subr.bf16.mxu1 %v1704_v32 }
 0x599   : >> { %1764 = vmatpush1.bf16.msra.mxu1 %v1703_v11 }
 0x59c   : >> { %1780 = vmatmul.mubr.bf16.vlgmr.msra.gmra.mrb[0].mxu1 %v6691_v18 }
 0x5a1   : >> { %v1728_v43 = vpop.permute.xlu0 %1727 }
 0x5a3   : >> { %v1733_v59 = vpop.permute.xlu1 %1732 }
 0x66f   : >> { %v1781_v45 = vpop.f32.mrb[0].mxu1 }
 0x670   : >> { %v1782_v7 = vadd.f32 %v1781_v45, %v1728_v43  ;;  %v1783_v4 = vpop.f32.mrb[1].mxu1 }
 0x671   : >> { %v1784_v22 = vadd.f32 %v1783_v4, %v1728_v43  ;;  %v1785_v8 = vpop.f32.mrb[2].mxu1  ;;  %1194 = sbr.rel (!%p1192_p9) target bundleno = 704 (0x2c0), region = 220 }
 0x672   : >> { %v1790_v15 = vadd.f32 %v7197_v12, %v1782_v7   ;;  %v1786_v20 = vadd.f32 %v1785_v8, %v1733_v59  ;;  %v1787_v55 = vpop.f32.mrb[3].mxu1 }
 0x673   : >> { %v1791_v37 = vadd.f32 %v7193_v9, %v1784_v22   ;;  %v1788_v51 = vadd.f32 %v1787_v55, %v1733_v59 }
 0x674   : >> { %v1792_v26 = vadd.f32 %v7189_v13, %v1786_v20   ;;  %v11456_v12 = vmov %v1790_v15 }
 0x675   : >> { %v1793_v6 = vadd.f32 %v7185_v42, %v1788_v51   ;;  %v11455_v9 = vmov %v1791_v37  ;;  %v8463_v12 = vmov (%p1192_p9), 0.0  }
 0x676   : >> { %v11454_v13 = vmov %v1792_v26 }
 0x677   : >> { %v11453_v42 = vmov %v1793_v6 }
 0x678 LB: >> { %v11457_v25 = vld [vmem:[#allocation29_spill] sm:$0xff]  ;;  %v11458_v19 = vld [vmem:[#allocation35_spill] sm:$0xff]  ;;  %v11460_v39 = vld [vmem:[#allocation36_spill] sm:$0xff]  ;;  %11466 = vst [vmem:[#allocation37_spill] sm:$0xff] %v7205_v12  ;;  %v11320_v31 = vmov 0   ;;  %s8511_s13 = sshll.u32 %s7237_s26, 6  ;;  %s7237_s26 = sphi %s8479_s26, %s1799_s26   ;;  %v7233_v15 = vphi %v1790_v15, %v11490_v15   ;;  %v7229_v37 = vphi %v1791_v37, %v11489_v37   ;;  %v7225_v26 = vphi %v1792_v26, %v11488_v26   ;;  %v7221_v6 = vphi %v1793_v6, %v11487_v6   ;;  %v7217_v49 = vphi %v8469_v49, %v11486_v49   ;;  %v7213_v5 = vphi %v8467_v5, %v11485_v5   ;;  %v7209_v52 = vphi %v8465_v52, %v11484_v52   ;;  %v7205_v12 = vphi %v8463_v12, %v11483_v12  }
 0x679   : >> { %v11459_v38 = vld [vmem:[#allocation31_spill] sm:$0xff]  ;;  %v11461_v53 = vld [vmem:[#allocation32_spill] sm:$0xff]  ;;  %v11462_v21 = vld [vmem:[#allocation33_spill] sm:$0xff]  ;;  %11467 = vst [vmem:[#allocation38_spill] sm:$0xff] %v7209_v52  ;;  %6695 = vset.pattern.permute.xlu1 %v11320_v31  ;;  %6694 = vset.pattern.permute.xlu0 %v11320_v31  ;;  %s6160_s28 = smul.u32 96, %s7237_s26  ;;  %s8518_s2 = scalar_lea.vmem %s11283_s15, %s8511_s13  ;;  %vm1916_vm9 = vcmp.lt.s32.totalorder %v7797_v24, 34 }
 0x67a   : >> { %v11463_v46 = vld [vmem:[#allocation34_spill] sm:$0xff]  ;;  %v11464_v1 = vld [vmem:[#allocation24_spill] sm:$0xff]  ;;  %v11465_v0 = vld [vmem:[#allocation23_spill] sm:$0xff]  ;;  %11468 = vst [vmem:[#allocation39_spill] sm:$0xff] %v7213_v5  ;;  %s8524_s16 = scalar_lea.vmem %s11282_s14, %s8511_s13  ;;  %s7339_s1 = smov 34   ;;  %vm1965_vm10 = vcmp.lt.s32.totalorder %v7797_v24, 32 }
 0x67b   : >> { %v1844_v47 = vld [vmem:[%s8518_s2] sm:$0xff]  ;;  %s8531_s29 = scalar_lea.vmem %s11280_s12, %s6160_s28  ;;  %v1845_v14 = vld [vmem:[%s8518_s2 + $0x8] sm:$0xff]  ;;  %v1814_v40 = vld [vmem:[%s8524_s16 + $0x18] sm:$0xff]  ;;  %s7340_s0 = smov 32   ;;  %vm2014_vm11 = vcmp.lt.s32.totalorder %v7797_v24, 30  ;;  %vm2063_vm12 = vcmp.lt.s32.totalorder %v7797_v24, 2 }
 0x67c   : >> { %v1811_v48 = vld [vmem:[%s8524_s16] sm:$0xff]  ;;  %1850 = vperm.xlu1 %6695, %v1844_v47   ;;  %v1812_v16 = vld [vmem:[%s8524_s16 + $0x8] sm:$0xff]  ;;  %v1813_v41 = vld [vmem:[%s8524_s16 + $0x10] sm:$0xff]  ;;  %s7341_s20 = smov 30   ;;  %s7342_s23 = smov 2   ;;  %vm2120_vm13 = vcmp.lt.s32.totalorder %v7797_v24, 126 }
 0x67d   : >> { %1817 = vperm.xlu0 %6694, %v1811_v48   ;;  %v1847_v60 = vld [vmem:[%s8518_s2 + $0x18] sm:$0xff]  ;;  %v1846_v61 = vld [vmem:[%s8518_s2 + $0x10] sm:$0xff]  ;;  %s7343_s18 = smov 126   ;;  %s7344_s28 = smov 98   ;;  %v8685_v48 = vrot.slane %v11465_v0, %v11457_v25  ;;  %vm2169_vm14 = vcmp.lt.s32.totalorder %v7797_v24, 98  ;;  %vm2218_vm15 = vcmp.lt.s32.totalorder %v7797_v24, 96 }
 0x67e   : >> { %s7345_s25 = smov 96   ;;  %v6698_v20 = vld [vmem:[%s8531_s29 + $0x4] ss:$12 sps:$4 sm:$0xff]   ;;  %s7346_s3 = smov 94   ;;  %vm2267_vm0 = vcmp.lt.s32.totalorder %v7797_v24, 94  ;;  %vm2386_vm1 = vcmask 261120  }
 0x67f   : >> { %2425 = vmatprep.mubr.bf16.mxu0 %v6698_v20  ;;  %s11469_s6 = sld [smem:[#allocation72_spill]]  ;;  %s1799_s26 = sadd.s32 1, %s7237_s26  }
 0x680   : >> { %1855 = vperm.xlu1 %6695, %v1845_v14   ;;  %v8689_v14 = vrot.slane %v11464_v1, %v11457_v25  ;;  %p1796_p10 = scmp.ge.s32.totalorder %s1799_s26, 3  }
 0x681   : >> { %1822 = vperm.xlu0 %6694, %v1812_v16   ;;  %s9501_s26 = smov (%p1796_p10), 0  }
 0x684   : >> { %1832 = vperm.xlu1 %6695, %v1814_v40  }
 0x685   : >> { %1827 = vperm.xlu0 %6694, %v1813_v41   ;;  %s8713_s7 = scalar_lea.vmem %s11469_s6, %s8511_s13 }
 0x688   : >> { %1865 = vperm.xlu1 %6695, %v1847_v60  }
 0x689   : >> { %1860 = vperm.xlu0 %6694, %v1846_v61  }
 0x6fb   : >> { %v1851_v35 = vpop.permute.xlu1 %1850 }
 0x6fc   : >> { %v1818_v36 = vpop.permute.xlu0 %1817 }
 0x6fd   : >> { %v1835_v23 = vmul.f32 %v7233_v15, %v1818_v36  ;;  %v1836_v56 = vmul.f32 %v7229_v37, %v1818_v36 }
 0x6ff   : >> { %v1868_v33 = vadd.f32 %v1851_v35, %v1835_v23  ;;  %v1856_v34 = vpop.permute.xlu1 %1855  ;;  %v1869_v13 = vadd.f32 %v1851_v35, %v1836_v56 }
 0x700   : >> { %v1823_v9 = vpop.permute.xlu0 %1822 }
 0x701   : >> { %v8541_v42 = vmax.f32 %v1868_v33, 0.0  ;;  %v1837_v63 = vmul.f32 %v7225_v26, %v1823_v9  ;;  %v1838_v50 = vmul.f32 %v7221_v6, %v1823_v9  ;;  %v8547_v17 = vmax.f32 %v1869_v13, 0.0 }
 0x703   : >> { %v1870_v44 = vadd.f32 %v1856_v34, %v1837_v63  ;;  %1900 = vrot.lane.b32.xlu0 %v8541_v42, %s7339_s1  ;;  %v1833_v30 = vpop.permute.xlu1 %1832  ;;  %v1871_v54 = vadd.f32 %v1856_v34, %v1838_v50  ;;  %v1896_v63 = vld [vmem:[%s8713_s7] sm:$0xff] }
 0x704   : >> { %v1828_v29 = vpop.permute.xlu0 %1827  ;;  %v1841_v10 = vmul.f32 %v7209_v52, %v1833_v30  ;;  %v1842_v43 = vmul.f32 %v7205_v12, %v1833_v30 }
 0x705   : >> { %v8549_v27 = vmax.f32 %v1870_v44, 0.0  ;;  %v1839_v28 = vmul.f32 %v7217_v49, %v1828_v29  ;;  %v8557_v57 = vmax.f32 %v1871_v54, 0.0  ;;  %v1840_v11 = vmul.f32 %v7213_v5, %v1828_v29  ;;  %v1897_v29 = vld [vmem:[%s8713_s7 + $0x8] sm:$0xff] }
 0x707   : >> { %1908 = vrot.lane.b32.xlu0 %v8547_v17, %s7339_s1  ;;  %1902 = vrot.lane.b32.xlu1 %v8549_v27, %s7339_s1  ;;  %v1866_v58 = vpop.permute.xlu1 %1865 }
 0x708   : >> { %v1861_v62 = vpop.permute.xlu0 %1860  ;;  %v1874_v32 = vadd.f32 %v1866_v58, %v1841_v10  ;;  %v1875_v4 = vadd.f32 %v1866_v58, %v1842_v43  ;;  %v6003_v58 = vld [vmem:[%s8524_s16 + $0x20] sm:$0xff] }
 0x709   : >> { %v1872_v18 = vadd.f32 %v1861_v62, %v1839_v28  ;;  %v1873_v45 = vadd.f32 %v1861_v62, %v1840_v11 }
 0x70a   : >> { %v8565_v59 = vmax.f32 %v1874_v32, 0.0  ;;  %v8573_v8 = vmax.f32 %v1875_v4, 0.0 }
 0x70b   : >> { %v8561_v7 = vmax.f32 %v1872_v18, 0.0  ;;  %1910 = vrot.lane.b32.xlu1 %v8557_v57, %s7339_s1  ;;  %v8569_v22 = vmax.f32 %v1873_v45, 0.0  ;;  %v6004_v45 = vld [vmem:[%s8524_s16 + $0x28] sm:$0xff] }
 0x70d   : >> { %1904 = vrot.lane.b32.xlu0 %v8561_v7, %s7339_s1 }
 0x70f   : >> { %1906 = vrot.lane.b32.xlu1 %v8565_v59, %s7339_s1 }
 0x711   : >> { %1912 = vrot.lane.b32.xlu0 %v8569_v22, %s7339_s1 }
 0x713   : >> { %1914 = vrot.lane.b32.xlu1 %v8573_v8, %s7339_s1 }
 0x715   : >> { %1949 = vrot.lane.b32.xlu0 %v8541_v42, %s7340_s0 }
 0x717   : >> { %1951 = vrot.lane.b32.xlu1 %v8549_v27, %s7340_s0 }
 0x719   : >> { %1957 = vrot.lane.b32.xlu0 %v8547_v17, %s7340_s0 }
 0x71b   : >> { %1959 = vrot.lane.b32.xlu1 %v8557_v57, %s7340_s0 }
 0x71d   : >> { %1953 = vrot.lane.b32.xlu0 %v8561_v7, %s7340_s0 }
 0x71f   : >> { %1955 = vrot.lane.b32.xlu1 %v8565_v59, %s7340_s0 }
 0x721   : >> { %1961 = vrot.lane.b32.xlu0 %v8569_v22, %s7340_s0 }
 0x723   : >> { %1963 = vrot.lane.b32.xlu1 %v8573_v8, %s7340_s0 }
 0x725   : >> { %1998 = vrot.lane.b32.xlu0 %v8541_v42, %s7341_s20 }
 0x727   : >> { %2000 = vrot.lane.b32.xlu1 %v8549_v27, %s7341_s20 }
 0x729   : >> { %2006 = vrot.lane.b32.xlu0 %v8547_v17, %s7341_s20 }
 0x72b   : >> { %2008 = vrot.lane.b32.xlu1 %v8557_v57, %s7341_s20 }
 0x72d   : >> { %2002 = vrot.lane.b32.xlu0 %v8561_v7, %s7341_s20 }
 0x72f   : >> { %2004 = vrot.lane.b32.xlu1 %v8565_v59, %s7341_s20 }
 0x731   : >> { %2010 = vrot.lane.b32.xlu0 %v8569_v22, %s7341_s20 }
 0x733   : >> { %2012 = vrot.lane.b32.xlu1 %v8573_v8, %s7341_s20 }
 0x735   : >> { %2047 = vrot.lane.b32.xlu0 %v8541_v42, %s7342_s23 }
 0x737   : >> { %2049 = vrot.lane.b32.xlu1 %v8549_v27, %s7342_s23 }
 0x739   : >> { %2055 = vrot.lane.b32.xlu0 %v8547_v17, %s7342_s23 }
 0x73b   : >> { %2057 = vrot.lane.b32.xlu1 %v8557_v57, %s7342_s23 }
 0x73d   : >> { %2051 = vrot.lane.b32.xlu0 %v8561_v7, %s7342_s23 }
 0x73f   : >> { %2053 = vrot.lane.b32.xlu1 %v8565_v59, %s7342_s23 }
 0x741   : >> { %2059 = vrot.lane.b32.xlu0 %v8569_v22, %s7342_s23 }
 0x743   : >> { %2061 = vrot.lane.b32.xlu1 %v8573_v8, %s7342_s23 }
 0x745   : >> { %2104 = vrot.lane.b32.xlu0 %v8541_v42, %s7343_s18 }
 0x747   : >> { %2106 = vrot.lane.b32.xlu1 %v8549_v27, %s7343_s18 }
 0x749   : >> { %2112 = vrot.lane.b32.xlu0 %v8547_v17, %s7343_s18 }
 0x74b   : >> { %2114 = vrot.lane.b32.xlu1 %v8557_v57, %s7343_s18 }
 0x74d   : >> { %2108 = vrot.lane.b32.xlu0 %v8561_v7, %s7343_s18 }
 0x74f   : >> { %2110 = vrot.lane.b32.xlu1 %v8565_v59, %s7343_s18 }
 0x751   : >> { %2116 = vrot.lane.b32.xlu0 %v8569_v22, %s7343_s18 }
 0x753   : >> { %2118 = vrot.lane.b32.xlu1 %v8573_v8, %s7343_s18 }
 0x755   : >> { %2153 = vrot.lane.b32.xlu0 %v8541_v42, %s7344_s28 }
 0x757   : >> { %2155 = vrot.lane.b32.xlu1 %v8549_v27, %s7344_s28 }
 0x759   : >> { %2161 = vrot.lane.b32.xlu0 %v8547_v17, %s7344_s28 }
 0x75b   : >> { %2163 = vrot.lane.b32.xlu1 %v8557_v57, %s7344_s28 }
 0x75d   : >> { %2157 = vrot.lane.b32.xlu0 %v8561_v7, %s7344_s28 }
 0x75f   : >> { %2159 = vrot.lane.b32.xlu1 %v8565_v59, %s7344_s28 }
 0x761   : >> { %2165 = vrot.lane.b32.xlu0 %v8569_v22, %s7344_s28 }
 0x763   : >> { %2167 = vrot.lane.b32.xlu1 %v8573_v8, %s7344_s28 }
 0x765   : >> { %2202 = vrot.lane.b32.xlu0 %v8541_v42, %s7345_s25 }
 0x767   : >> { %2204 = vrot.lane.b32.xlu1 %v8549_v27, %s7345_s25 }
 0x769   : >> { %2210 = vrot.lane.b32.xlu0 %v8547_v17, %s7345_s25 }
 0x76b   : >> { %2212 = vrot.lane.b32.xlu1 %v8557_v57, %s7345_s25 }
 0x76d   : >> { %2206 = vrot.lane.b32.xlu0 %v8561_v7, %s7345_s25 }
 0x76f   : >> { %2208 = vrot.lane.b32.xlu1 %v8565_v59, %s7345_s25 }
 0x771   : >> { %2214 = vrot.lane.b32.xlu0 %v8569_v22, %s7345_s25 }
 0x773   : >> { %2216 = vrot.lane.b32.xlu1 %v8573_v8, %s7345_s25 }
 0x775   : >> { %v1901_v55 = vpop.permute.xlu0 %1900  ;;  %2251 = vrot.lane.b32.xlu0 %v8541_v42, %s7346_s3 }
 0x777   : >> { %2253 = vrot.lane.b32.xlu1 %v8549_v27, %s7346_s3 }
 0x779   : >> { %v1909_v51 = vpop.permute.xlu0 %1908  ;;  %v1903_v47 = vpop.permute.xlu1 %1902  ;;  %2259 = vrot.lane.b32.xlu0 %v8547_v17, %s7346_s3 }
 0x77a   : >> { %v1917_v16 = vsel %vm1916_vm9, %v1901_v55, %v1909_v51  ;;  %v1921_v40 = vsel %vm1916_vm9, %v1909_v51, %v1901_v55  ;;  %v1898_v51 = vld [vmem:[%s8713_s7 + $0x10] sm:$0xff] }
 0x77b   : >> { %2261 = vrot.lane.b32.xlu1 %v8557_v57, %s7346_s3  ;;  %v1933_v35 = vmul.f32 %v8685_v48, %v1921_v40  ;;  %v1934_v36 = vmul.f32 %v8689_v14, %v1917_v16  ;;  %v8743_v16 = vrot.slane %v11464_v1, %v11459_v38 }
 0x77d   : >> { %v1911_v41 = vpop.permute.xlu1 %1910  ;;  %2255 = vrot.lane.b32.xlu0 %v8561_v7, %s7346_s3 }
 0x77e   : >> { %v1918_v60 = vsel %vm1916_vm9, %v1903_v47, %v1911_v41  ;;  %v1922_v61 = vsel %vm1916_vm9, %v1911_v41, %v1903_v47  ;;  %v8739_v47 = vrot.slane %v11465_v0, %v11459_v38 }
 0x77f   : >> { %v1935_v23 = vmul.f32 %v8685_v48, %v1922_v61  ;;  %v1936_v56 = vmul.f32 %v8689_v14, %v1918_v60  ;;  %v1905_v33 = vpop.permute.xlu0 %1904  ;;  %2257 = vrot.lane.b32.xlu1 %v8565_v59, %s7346_s3  ;;  %v1899_v61 = vld [vmem:[%s8713_s7 + $0x18] sm:$0xff] }
 0x781   : >> { %v1941_v34 = vpack.c.bf16 %v1935_v23, %v1933_v35  ;;  %v1942_v9 = vpack.c.bf16 %v1936_v56, %v1934_v36  ;;  %2263 = vrot.lane.b32.xlu0 %v8569_v22, %s7346_s3  ;;  %v1907_v13 = vpop.permute.xlu1 %1906  ;;  %v6009_v56 = vld [vmem:[%s8518_s2 + $0x20] sm:$0xff] }
 0x783   : >> { %v1913_v50 = vpop.permute.xlu0 %1912  ;;  %2265 = vrot.lane.b32.xlu1 %v8573_v8, %s7346_s3  ;;  %2393 = vmatprep.subr.bf16.mxu0 %v1942_v9 }
 0x784   : >> { %v1919_v44 = vsel %vm1916_vm9, %v1905_v33, %v1913_v50  ;;  %v1923_v30 = vsel %vm1916_vm9, %v1913_v50, %v1905_v33  ;;  %2394 = vmatpush1.bf16.msra.mxu0 %v1941_v34  ;;  %v6010_v50 = vld [vmem:[%s8518_s2 + $0x28] sm:$0xff] }
 0x785   : >> { %2338 = vperm.xlu0 %6694, %v1896_v63   ;;  %v1915_v54 = vpop.permute.xlu1 %1914  ;;  %v1937_v62 = vmul.f32 %v8685_v48, %v1923_v30  ;;  %v1938_v11 = vmul.f32 %v8689_v14, %v1919_v44 }
 0x786   : >> { %v1920_v10 = vsel %vm1916_vm9, %v1907_v13, %v1915_v54  ;;  %v1924_v28 = vsel %vm1916_vm9, %v1915_v54, %v1907_v13  ;;  %v6005_v54 = vld [vmem:[%s8524_s16 + $0x30] sm:$0xff] }
 0x787   : >> { %v1939_v32 = vmul.f32 %v8685_v48, %v1924_v28  ;;  %v1940_v18 = vmul.f32 %v8689_v14, %v1920_v10  ;;  %v1950_v43 = vpop.permute.xlu0 %1949  ;;  %2343 = vperm.xlu1 %6695, %v1897_v29  }
 0x789   : >> { %v1943_v4 = vpack.c.bf16 %v1939_v32, %v1937_v62  ;;  %v1944_v20 = vpack.c.bf16 %v1940_v18, %v1938_v11  ;;  %2508 = vperm.xlu0 %6694, %v6003_v58   ;;  %v1952_v55 = vpop.permute.xlu1 %1951  ;;  %v6006_v62 = vld [vmem:[%s8524_s16 + $0x38] sm:$0xff] }
 0x78b   : >> { %v1958_v40 = vpop.permute.xlu0 %1957  ;;  %2513 = vperm.xlu1 %6695, %v6004_v45   ;;  %2395 = vmatprep.subr.bf16.mxu0 %v1944_v20 }
 0x78c   : >> { %v1966_v41 = vsel %vm1965_vm10, %v1950_v43, %v1958_v40  ;;  %v1970_v60 = vsel %vm1965_vm10, %v1958_v40, %v1950_v43  ;;  %2396 = vmatpush1.bf16.msra.mxu0 %v1943_v4  ;;  %v6011_v43 = vld [vmem:[%s8518_s2 + $0x30] sm:$0xff]  ;;  %v6012_v40 = vld [vmem:[%s8518_s2 + $0x38] sm:$0xff] }
 0x78d   : >> { %2348 = vperm.xlu0 %6694, %v1898_v51   ;;  %v1960_v35 = vpop.permute.xlu1 %1959  ;;  %v1982_v33 = vmul.f32 %v8739_v47, %v1970_v60  ;;  %v1983_v34 = vmul.f32 %v8743_v16, %v1966_v41 }
 0x78e   : >> { %v1967_v36 = vsel %vm1965_vm10, %v1952_v55, %v1960_v35  ;;  %v1971_v23 = vsel %vm1965_vm10, %v1960_v35, %v1952_v55  ;;  %v8779_v35 = vrot.slane %v11465_v0, %v11461_v53 }
 0x78f   : >> { %v1984_v9 = vmul.f32 %v8739_v47, %v1971_v23  ;;  %v1985_v13 = vmul.f32 %v8743_v16, %v1967_v36  ;;  %v1954_v63 = vpop.permute.xlu0 %1953  ;;  %2353 = vperm.xlu1 %6695, %v1899_v61   ;;  %v8783_v36 = vrot.slane %v11464_v1, %v11461_v53 }
 0x791   : >> { %v1990_v44 = vpack.c.bf16 %v1984_v9, %v1982_v33  ;;  %v1991_v30 = vpack.c.bf16 %v1985_v13, %v1983_v34  ;;  %2541 = vperm.xlu0 %6694, %v6009_v56   ;;  %v1956_v29 = vpop.permute.xlu1 %1955 }
 0x793   : >> { %v1962_v10 = vpop.permute.xlu0 %1961  ;;  %2546 = vperm.xlu1 %6695, %v6010_v50   ;;  %2397 = vmatprep.subr.bf16.mxu0 %v1991_v30 }
 0x794   : >> { %v1968_v28 = vsel %vm1965_vm10, %v1954_v63, %v1962_v10  ;;  %v1972_v58 = vsel %vm1965_vm10, %v1962_v10, %v1954_v63  ;;  %2398 = vmatpush1.bf16.msra.mxu0 %v1990_v44 }
 0x795   : >> { %2518 = vperm.xlu0 %6694, %v6005_v54   ;;  %v1964_v11 = vpop.permute.xlu1 %1963  ;;  %v1986_v45 = vmul.f32 %v8739_v47, %v1972_v58  ;;  %v1987_v4 = vmul.f32 %v8743_v16, %v1968_v28 }
 0x796   : >> { %v1969_v32 = vsel %vm1965_vm10, %v1956_v29, %v1964_v11  ;;  %v1973_v18 = vsel %vm1965_vm10, %v1964_v11, %v1956_v29 }
 0x797   : >> { %v1988_v20 = vmul.f32 %v8739_v47, %v1973_v18  ;;  %v1989_v55 = vmul.f32 %v8743_v16, %v1969_v32  ;;  %v1999_v51 = vpop.permute.xlu0 %1998  ;;  %2523 = vperm.xlu1 %6695, %v6006_v62  }
 0x799   : >> { %v1992_v41 = vpack.c.bf16 %v1988_v20, %v1986_v45  ;;  %v1993_v60 = vpack.c.bf16 %v1989_v55, %v1987_v4  ;;  %2551 = vperm.xlu0 %6694, %v6011_v43   ;;  %v2001_v61 = vpop.permute.xlu1 %2000 }
 0x79b   : >> { %v2007_v23 = vpop.permute.xlu0 %2006  ;;  %2556 = vperm.xlu1 %6695, %v6012_v40   ;;  %2399 = vmatprep.subr.bf16.mxu0 %v1993_v60 }
 0x79c   : >> { %v2015_v56 = vsel %vm2014_vm11, %v1999_v51, %v2007_v23  ;;  %v2019_v33 = vsel %vm2014_vm11, %v2007_v23, %v1999_v51  ;;  %2400 = vmatpush1.bf16.msra.mxu0 %v1992_v41  ;;  %v8816_v23 = vrot.slane %v11464_v1, %v11462_v21 }
 0x79d   : >> { %v2009_v34 = vpop.permute.xlu1 %2008  ;;  %v2031_v63 = vmul.f32 %v8779_v35, %v2019_v33  ;;  %v2032_v50 = vmul.f32 %v8783_v36, %v2015_v56 }
 0x79e   : >> { %v2016_v9 = vsel %vm2014_vm11, %v2001_v61, %v2009_v34  ;;  %v2020_v13 = vsel %vm2014_vm11, %v2009_v34, %v2001_v61  ;;  %v8812_v61 = vrot.slane %v11465_v0, %v11462_v21 }
 0x79f   : >> { %v2033_v44 = vmul.f32 %v8779_v35, %v2020_v13  ;;  %v2034_v30 = vmul.f32 %v8783_v36, %v2016_v9  ;;  %v2003_v29 = vpop.permute.xlu0 %2002 }
 0x7a1   : >> { %v2039_v54 = vpack.c.bf16 %v2033_v44, %v2031_v63  ;;  %v2040_v10 = vpack.c.bf16 %v2034_v30, %v2032_v50  ;;  %v2005_v28 = vpop.permute.xlu1 %2004 }
 0x7a3   : >> { %v2011_v58 = vpop.permute.xlu0 %2010  ;;  %2401 = vmatprep.subr.bf16.mxu0 %v2040_v10 }
 0x7a4   : >> { %v2017_v62 = vsel %vm2014_vm11, %v2003_v29, %v2011_v58  ;;  %v2021_v11 = vsel %vm2014_vm11, %v2011_v58, %v2003_v29  ;;  %2402 = vmatpush1.bf16.msra.mxu0 %v2039_v54 }
 0x7a5   : >> { %v2013_v32 = vpop.permute.xlu1 %2012  ;;  %v2035_v45 = vmul.f32 %v8779_v35, %v2021_v11  ;;  %v2036_v4 = vmul.f32 %v8783_v36, %v2017_v62 }
 0x7a6   : >> { %v2018_v18 = vsel %vm2014_vm11, %v2005_v28, %v2013_v32  ;;  %v2022_v43 = vsel %vm2014_vm11, %v2013_v32, %v2005_v28 }
 0x7a7   : >> { %v2037_v20 = vmul.f32 %v8779_v35, %v2022_v43  ;;  %v2038_v55 = vmul.f32 %v8783_v36, %v2018_v18  ;;  %v2048_v51 = vpop.permute.xlu0 %2047 }
 0x7a9   : >> { %v2041_v40 = vpack.c.bf16 %v2037_v20, %v2035_v45  ;;  %v2042_v41 = vpack.c.bf16 %v2038_v55, %v2036_v4  ;;  %v2050_v60 = vpop.permute.xlu1 %2049 }
 0x7ab   : >> { %v2056_v56 = vpop.permute.xlu0 %2055  ;;  %2403 = vmatprep.subr.bf16.mxu0 %v2042_v41 }
 0x7ac   : >> { %v2064_v33 = vsel %vm2063_vm12, %v2048_v51, %v2056_v56  ;;  %v2068_v34 = vsel %vm2063_vm12, %v2056_v56, %v2048_v51  ;;  %2404 = vmatpush1.bf16.msra.mxu0 %v2041_v40 }
 0x7ad   : >> { %v2058_v9 = vpop.permute.xlu1 %2057  ;;  %v2080_v50 = vmul.f32 %v8812_v61, %v2068_v34  ;;  %v2081_v44 = vmul.f32 %v8816_v23, %v2064_v33  ;;  %v2097_v34 = vpack.c.bf16 %v8557_v57, %v8547_v17 }
 0x7ae   : >> { %v2065_v13 = vsel %vm2063_vm12, %v2050_v60, %v2058_v9  ;;  %v2069_v63 = vsel %vm2063_vm12, %v2058_v9, %v2050_v60  ;;  %v8847_v9 = vrot.slane %v11464_v1, %v11463_v46 }
 0x7af   : >> { %v2082_v30 = vmul.f32 %v8812_v61, %v2069_v63  ;;  %v2083_v29 = vmul.f32 %v8816_v23, %v2065_v13  ;;  %v2052_v54 = vpop.permute.xlu0 %2051 }
 0x7b1   : >> { %v2088_v10 = vpack.c.bf16 %v2082_v30, %v2080_v50  ;;  %v2089_v28 = vpack.c.bf16 %v2083_v29, %v2081_v44  ;;  %v2054_v58 = vpop.permute.xlu1 %2053  ;;  %v2096_v44 = vpack.c.bf16 %v8549_v27, %v8541_v42  ;;  %v2099_v29 = vpack.c.bf16 %v8573_v8, %v8569_v22 }
 0x7b3   : >> { %v2060_v62 = vpop.permute.xlu0 %2059  ;;  %2405 = vmatprep.subr.bf16.mxu0 %v2089_v28 }
 0x7b4   : >> { %v2066_v11 = vsel %vm2063_vm12, %v2052_v54, %v2060_v62  ;;  %v2070_v32 = vsel %vm2063_vm12, %v2060_v62, %v2052_v54  ;;  %2406 = vmatpush1.bf16.msra.mxu0 %v2088_v10  ;;  %v8862_v54 = vrot.slane %v11465_v0, %v11463_v46 }
 0x7b5   : >> { %v2062_v18 = vpop.permute.xlu1 %2061  ;;  %v2084_v4 = vmul.f32 %v8812_v61, %v2070_v32  ;;  %v2085_v20 = vmul.f32 %v8816_v23, %v2066_v11 }
 0x7b6   : >> { %v2067_v43 = vsel %vm2063_vm12, %v2054_v58, %v2062_v18  ;;  %v2071_v45 = vsel %vm2063_vm12, %v2062_v18, %v2054_v58  ;;  %v2098_v58 = vpack.c.bf16 %v8565_v59, %v8561_v7 }
 0x7b7   : >> { %v2086_v55 = vmul.f32 %v8812_v61, %v2071_v45  ;;  %v2087_v51 = vmul.f32 %v8816_v23, %v2067_v43  ;;  %v2105_v40 = vpop.permute.xlu0 %2104 }
 0x7b9   : >> { %v2090_v41 = vpack.c.bf16 %v2086_v55, %v2084_v4  ;;  %v2091_v60 = vpack.c.bf16 %v2087_v51, %v2085_v20  ;;  %v2107_v56 = vpop.permute.xlu1 %2106 }
 0x7bb   : >> { %v2113_v33 = vpop.permute.xlu0 %2112  ;;  %2407 = vmatprep.subr.bf16.mxu0 %v2091_v60 }
 0x7bc   : >> { %2408 = vmatpush1.bf16.msra.mxu0 %v2090_v41  ;;  %v2125_v63 = vsel %vm2120_vm13, %v2113_v33, %v2105_v40  ;;  %v2121_v10 = vsel %vm2120_vm13, %v2105_v40, %v2113_v33  ;;  %v8890_v33 = vrot.slane %v11464_v1, %v11458_v19 }
 0x7bd   : >> { %v2115_v13 = vpop.permute.xlu1 %2114  ;;  %2409 = vmatprep.subr.bf16.mxu0 %v2097_v34  ;;  %v2138_v28 = vmul.f32 %v8847_v9, %v2125_v63  ;;  %v2137_v22 = vmul.f32 %v8862_v54, %v2121_v10 }
 0x7be   : >> { %v2126_v50 = vsel %vm2120_vm13, %v2115_v13, %v2107_v56  ;;  %v2122_v30 = vsel %vm2120_vm13, %v2107_v56, %v2115_v13  ;;  %v8886_v56 = vrot.slane %v11465_v0, %v11458_v19 }
 0x7bf   : >> { %v2140_v17 = vmul.f32 %v8847_v9, %v2126_v50  ;;  %v2109_v57 = vpop.permute.xlu0 %2108  ;;  %v2139_v27 = vmul.f32 %v8862_v54, %v2122_v30 }
 0x7c0   : >> { %2410 = vmatpush1.bf16.msra.mxu0 %v2096_v44 }
 0x7c1   : >> { %v2111_v42 = vpop.permute.xlu1 %2110  ;;  %2411 = vmatprep.subr.bf16.mxu0 %v2099_v29  ;;  %v2146_v62 = vpack.c.bf16 %v2140_v17, %v2138_v28  ;;  %v2145_v43 = vpack.c.bf16 %v2139_v27, %v2137_v22 }
 0x7c3   : >> { %v2117_v11 = vpop.permute.xlu0 %2116 }
 0x7c4   : >> { %v2123_v8 = vsel %vm2120_vm13, %v2109_v57, %v2117_v11  ;;  %v2127_v32 = vsel %vm2120_vm13, %v2117_v11, %v2109_v57  ;;  %2412 = vmatpush1.bf16.msra.mxu0 %v2098_v58 }
 0x7c5   : >> { %v2119_v18 = vpop.permute.xlu1 %2118  ;;  %2413 = vmatprep.subr.bf16.mxu0 %v2146_v62  ;;  %v2141_v59 = vmul.f32 %v8862_v54, %v2123_v8  ;;  %v2142_v4 = vmul.f32 %v8847_v9, %v2127_v32 }
 0x7c6   : >> { %v2124_v45 = vsel %vm2120_vm13, %v2111_v42, %v2119_v18  ;;  %v2128_v7 = vsel %vm2120_vm13, %v2119_v18, %v2111_v42 }
 0x7c7   : >> { %v2143_v20 = vmul.f32 %v8862_v54, %v2124_v45  ;;  %v2144_v55 = vmul.f32 %v8847_v9, %v2128_v7  ;;  %v2154_v51 = vpop.permute.xlu0 %2153 }
 0x7c8   : >> { %2414 = vmatpush1.bf16.msra.mxu0 %v2145_v43 }
 0x7c9   : >> { %v2147_v40 = vpack.c.bf16 %v2143_v20, %v2141_v59  ;;  %v2148_v41 = vpack.c.bf16 %v2144_v55, %v2142_v4  ;;  %v2156_v60 = vpop.permute.xlu1 %2155 }
 0x7cb   : >> { %v2162_v34 = vpop.permute.xlu0 %2161  ;;  %2415 = vmatprep.subr.bf16.mxu0 %v2148_v41  ;;  %v8923_v41 = vrot.slane %v11464_v1, %v11460_v39 }
 0x7cc   : >> { %v2170_v13 = vsel %vm2169_vm14, %v2154_v51, %v2162_v34  ;;  %v2174_v63 = vsel %vm2169_vm14, %v2162_v34, %v2154_v51  ;;  %2416 = vmatpush1.bf16.msra.mxu0 %v2147_v40  ;;  %v8919_v40 = vrot.slane %v11465_v0, %v11460_v39 }
 0x7cd   : >> { %v2164_v50 = vpop.permute.xlu1 %2163  ;;  %v2186_v17 = vmul.f32 %v8886_v56, %v2170_v13  ;;  %v2187_v57 = vmul.f32 %v8890_v33, %v2174_v63 }
 0x7ce   : >> { %v2171_v44 = vsel %vm2169_vm14, %v2156_v60, %v2164_v50  ;;  %v2175_v30 = vsel %vm2169_vm14, %v2164_v50, %v2156_v60 }
 0x7cf   : >> { %v2188_v29 = vmul.f32 %v8886_v56, %v2171_v44  ;;  %v2189_v10 = vmul.f32 %v8890_v33, %v2175_v30  ;;  %v2158_v28 = vpop.permute.xlu0 %2157 }
 0x7d1   : >> { %v2194_v42 = vpack.c.bf16 %v2188_v29, %v2186_v17  ;;  %v2195_v27 = vpack.c.bf16 %v2189_v10, %v2187_v57  ;;  %v2160_v58 = vpop.permute.xlu1 %2159 }
 0x7d3   : >> { %v2166_v62 = vpop.permute.xlu0 %2165  ;;  %2417 = vmatprep.subr.bf16.mxu0 %v2195_v27 }
 0x7d4   : >> { %v2172_v11 = vsel %vm2169_vm14, %v2158_v28, %v2166_v62  ;;  %v2176_v22 = vsel %vm2169_vm14, %v2166_v62, %v2158_v28  ;;  %2418 = vmatpush1.bf16.msra.mxu0 %v2194_v42 }
 0x7d5   : >> { %v2168_v8 = vpop.permute.xlu1 %2167  ;;  %v2190_v43 = vmul.f32 %v8886_v56, %v2172_v11  ;;  %v2191_v45 = vmul.f32 %v8890_v33, %v2176_v22 }
 0x7d6   : >> { %v2173_v32 = vsel %vm2169_vm14, %v2160_v58, %v2168_v8  ;;  %v2177_v18 = vsel %vm2169_vm14, %v2168_v8, %v2160_v58 }
 0x7d7   : >> { %v2192_v7 = vmul.f32 %v8886_v56, %v2173_v32  ;;  %v2193_v59 = vmul.f32 %v8890_v33, %v2177_v18  ;;  %v2203_v4 = vpop.permute.xlu0 %2202 }
 0x7d9   : >> { %v2196_v20 = vpack.c.bf16 %v2192_v7, %v2190_v43  ;;  %v2197_v55 = vpack.c.bf16 %v2193_v59, %v2191_v45  ;;  %v2205_v51 = vpop.permute.xlu1 %2204 }
 0x7db   : >> { %v2211_v60 = vpop.permute.xlu0 %2210  ;;  %2419 = vmatprep.subr.bf16.mxu0 %v2197_v55 }
 0x7dc   : >> { %v2219_v34 = vsel %vm2218_vm15, %v2203_v4, %v2211_v60  ;;  %v2223_v13 = vsel %vm2218_vm15, %v2211_v60, %v2203_v4  ;;  %2420 = vmatpush1.bf16.msra.mxu0 %v2196_v20  ;;  %v6696_v60 = vld [vmem:[%s8531_s29] ss:$12 sps:$4 sm:$0xff]  }
 0x7dd   : >> { %v2213_v63 = vpop.permute.xlu1 %2212  ;;  %v2235_v30 = vmul.f32 %v8919_v40, %v2219_v34  ;;  %v2236_v17 = vmul.f32 %v8923_v41, %v2223_v13 }
 0x7de   : >> { %v2220_v50 = vsel %vm2218_vm15, %v2205_v51, %v2213_v63  ;;  %v2224_v44 = vsel %vm2218_vm15, %v2213_v63, %v2205_v51  ;;  %v6699_v63 = vld [vmem:[%s8531_s29 + $0x1c] ss:$12 sps:$4 sm:$0xff]  }
 0x7df   : >> { %v2237_v57 = vmul.f32 %v8919_v40, %v2220_v50  ;;  %v2238_v29 = vmul.f32 %v8923_v41, %v2224_v44  ;;  %v2207_v10 = vpop.permute.xlu0 %2206 }
 0x7e1   : >> { %v2243_v28 = vpack.c.bf16 %v2237_v57, %v2235_v30  ;;  %v2244_v42 = vpack.c.bf16 %v2238_v29, %v2236_v17  ;;  %v2209_v27 = vpop.permute.xlu1 %2208 }
 0x7e3   : >> { %v2215_v58 = vpop.permute.xlu0 %2214  ;;  %2421 = vmatprep.subr.bf16.mxu0 %v2244_v42 }
 0x7e4   : >> { %v2221_v62 = vsel %vm2218_vm15, %v2207_v10, %v2215_v58  ;;  %v2225_v11 = vsel %vm2218_vm15, %v2215_v58, %v2207_v10  ;;  %2422 = vmatpush1.bf16.msra.mxu0 %v2243_v28 }
 0x7e5   : >> { %v2217_v22 = vpop.permute.xlu1 %2216  ;;  %v2239_v18 = vmul.f32 %v8919_v40, %v2221_v62  ;;  %v2240_v43 = vmul.f32 %v8923_v41, %v2225_v11  ;;  %v6701_v11 = vld [vmem:[%s8531_s29 + $0x18] ss:$12 sps:$4 sm:$0xff]  }
 0x7e6   : >> { %v2222_v8 = vsel %vm2218_vm15, %v2209_v27, %v2217_v22  ;;  %v2226_v32 = vsel %vm2218_vm15, %v2217_v22, %v2209_v27 }
 0x7e7   : >> { %v2241_v45 = vmul.f32 %v8919_v40, %v2222_v8  ;;  %v2242_v7 = vmul.f32 %v8923_v41, %v2226_v32  ;;  %v2252_v59 = vpop.permute.xlu0 %2251 }
 0x7e9   : >> { %v2245_v4 = vpack.c.bf16 %v2241_v45, %v2239_v18  ;;  %v2246_v20 = vpack.c.bf16 %v2242_v7, %v2240_v43  ;;  %v2254_v55 = vpop.permute.xlu1 %2253 }
 0x7eb   : >> { %v2260_v51 = vpop.permute.xlu0 %2259  ;;  %2423 = vmatprep.subr.bf16.mxu0 %v2246_v20 }
 0x7ec   : >> { %v2268_v34 = vsel %vm2267_vm0, %v2252_v59, %v2260_v51  ;;  %v2272_v13 = vsel %vm2267_vm0, %v2260_v51, %v2252_v59  ;;  %2424 = vmatpush1.bf16.msra.mxu0 %v2245_v4  ;;  %v6702_v51 = vld [vmem:[%s8531_s29 + $0x8] ss:$12 sps:$4 sm:$0xff]  }
 0x7ed   : >> { %v2262_v50 = vpop.permute.xlu1 %2261  ;;  %v2284_v17 = vmul.f32 %v7733_v2, %v2268_v34  ;;  %v2285_v57 = vmul.f32 %v7735_v3, %v2272_v13 }
 0x7ee   : >> { %v2269_v44 = vsel %vm2267_vm0, %v2254_v55, %v2262_v50  ;;  %v2273_v30 = vsel %vm2267_vm0, %v2262_v50, %v2254_v55 }
 0x7ef   : >> { %v2286_v29 = vmul.f32 %v7733_v2, %v2269_v44  ;;  %v2287_v10 = vmul.f32 %v7735_v3, %v2273_v30  ;;  %v2256_v28 = vpop.permute.xlu0 %2255  ;;  %2426 = vmatmul.mubr.bf16.vlgmr.msra.gmra.mrb[0].mxu0 %v6696_v60  ;;  %v6703_v60 = vld [vmem:[%s8531_s29 + $0x20] ss:$12 sps:$4 sm:$0xff]  }
 0x7f0   : >> { %2435 = vmatprep.mubr.bf16.mxu0 %v6699_v63 }
 0x7f1   : >> { %v2292_v42 = vpack.c.bf16 %v2286_v29, %v2284_v17  ;;  %v2293_v27 = vpack.c.bf16 %v2287_v10, %v2285_v57  ;;  %v2258_v58 = vpop.permute.xlu1 %2257 }
 0x7f3   : >> { %v2264_v62 = vpop.permute.xlu0 %2263  ;;  %2446 = vmatprep.subr.bf16.mxu0 %v2293_v27 }
 0x7f4   : >> { %v2270_v22 = vsel %vm2267_vm0, %v2256_v28, %v2264_v62  ;;  %v2274_v8 = vsel %vm2267_vm0, %v2264_v62, %v2256_v28  ;;  %2447 = vmatpush1.bf16.msra.mxu0 %v2292_v42 }
 0x7f5   : >> { %v2266_v32 = vpop.permute.xlu1 %2265  ;;  %v2288_v45 = vmul.f32 %v7733_v2, %v2270_v22  ;;  %v2289_v7 = vmul.f32 %v7735_v3, %v2274_v8 }
 0x7f6   : >> { %v2271_v18 = vsel %vm2267_vm0, %v2258_v58, %v2266_v32  ;;  %v2275_v43 = vsel %vm2267_vm0, %v2266_v32, %v2258_v58 }
 0x7f7   : >> { %v2290_v59 = vmul.f32 %v7733_v2, %v2271_v18  ;;  %v2291_v4 = vmul.f32 %v7735_v3, %v2275_v43  ;;  %2436 = vmatmul.mubr.bf16.gmra.mrb[4].mxu0 %v6701_v11 }
 0x7f8   : >> { %2478 = vmatprep.mubr.bf16.mxu0 %v11320_v31 }
 0x7f9   : >> { %v2294_v20 = vpack.c.bf16 %v2290_v59, %v2288_v45  ;;  %v2295_v55 = vpack.c.bf16 %v2291_v4, %v2289_v7 }
 0x7fb   : >> { %2448 = vmatprep.subr.bf16.mxu0 %v2295_v55 }
 0x7fc   : >> { %2449 = vmatpush1.bf16.msra.mxu0 %v2294_v20 }
 0x7ff   : >> { %5999 = vmatmul.mubr.msk.bf16.vlgmr.msra.gmra.mrb[0].mxu0 %vm2386_vm1, %v6702_v51 }
 0x800   : >> { %2488 = vmatprep.mubr.bf16.mxu0 %v11320_v31 }
 0x804   : >> { %v2339_v34 = vpop.permute.xlu0 %2338 }
 0x806   : >> { %v2344_v13 = vpop.permute.xlu1 %2343 }
 0x807   : >> { %6000 = vmatmul.mubr.msk.bf16.gmra.mrb[4].mxu0 %vm2386_vm1, %v6703_v60 }
 0x808   : >> { %v2509_v63 = vpop.permute.xlu0 %2508 }
 0x80a   : >> { %v2514_v50 = vpop.permute.xlu1 %2513 }
 0x80c   : >> { %v2349_v44 = vpop.permute.xlu0 %2348 }
 0x80e   : >> { %v2354_v30 = vpop.permute.xlu1 %2353 }
 0x810   : >> { %v2542_v17 = vpop.permute.xlu0 %2541 }
 0x812   : >> { %v2547_v28 = vpop.permute.xlu1 %2546 }
 0x814   : >> { %v2519_v43 = vpop.permute.xlu0 %2518 }
 0x816   : >> { %v2524_v20 = vpop.permute.xlu1 %2523 }
 0x8d2   : >> { %v2480_v57 = vpop.f32.mrb[0].mxu0 }
 0x8d3   : >> { %v6169_v29 = vadd.f32 %v2480_v57, %v2339_v34  ;;  %v2482_v10 = vpop.f32.mrb[1].mxu0 }
 0x8d4   : >> { %v6170_v42 = vadd.f32 %v2482_v10, %v2339_v34  ;;  %v2484_v27 = vpop.f32.mrb[2].mxu0 }
 0x8d5   : >> { %v2526_v58 = vmul.f32 %v6169_v29, %v2509_v63  ;;  %v6171_v62 = vadd.f32 %v2484_v27, %v2344_v13  ;;  %v2486_v11 = vpop.f32.mrb[3].mxu0  ;;  %v2552_v27 = vpop.permute.xlu0 %2551 }
 0x8d6   : >> { %v2527_v22 = vmul.f32 %v6170_v42, %v2509_v63  ;;  %v6172_v8 = vadd.f32 %v2486_v11, %v2344_v13 }
 0x8d7   : >> { %v2559_v32 = vadd.f32 %v2542_v17, %v2526_v58  ;;  %v2528_v18 = vmul.f32 %v6171_v62, %v2514_v50 }
 0x8d8   : >> { %v2560_v45 = vadd.f32 %v2542_v17, %v2527_v22  ;;  %v2529_v7 = vmul.f32 %v6172_v8, %v2514_v50 }
 0x8d9   : >> { %v8983_v59 = vmax.f32 %v2559_v32, 0.0  ;;  %v2561_v4 = vadd.f32 %v2547_v28, %v2528_v18 }
 0x8da   : >> { %v2562_v55 = vadd.f32 %v2547_v28, %v2529_v7  ;;  %v2490_v51 = vpop.f32.mrb[4].mxu0  ;;  %v8989_v63 = vmax.f32 %v2560_v45, 0.0 }
 0x8db   : >> { %v8985_v60 = vmax.f32 %v2561_v4, 0.0  ;;  %v6173_v34 = vadd.f32 %v2490_v51, %v2349_v44  ;;  %v2492_v57 = vpop.f32.mrb[5].mxu0  ;;  %2591 = vrot.lane.b32.xlu0 %v8983_v59, %s7339_s1 }
 0x8dc   : >> { %v8991_v13 = vmax.f32 %v2562_v55, 0.0  ;;  %v6174_v29 = vadd.f32 %v2492_v57, %v2349_v44  ;;  %v2494_v17 = vpop.f32.mrb[6].mxu0  ;;  %v2557_v44 = vpop.permute.xlu1 %2556 }
 0x8dd   : >> { %v2530_v50 = vmul.f32 %v6173_v34, %v2519_v43  ;;  %v6175_v10 = vadd.f32 %v2494_v17, %v2354_v30  ;;  %v2496_v42 = vpop.f32.mrb[7].mxu0  ;;  %2593 = vrot.lane.b32.xlu1 %v8985_v60, %s7339_s1  ;;  %v6706_v34 = vld [vmem:[%s8531_s29 + $0x34] ss:$12 sps:$4 sm:$0xff]  }
 0x8de   : >> { %v2531_v58 = vmul.f32 %v6174_v29, %v2519_v43  ;;  %v6176_v62 = vadd.f32 %v2496_v42, %v2354_v30  ;;  %3043 = vmatprep.mubr.bf16.mxu1 %v6706_v34 }
 0x8df   : >> { %v2563_v22 = vadd.f32 %v2552_v27, %v2530_v50  ;;  %v2532_v8 = vmul.f32 %v6175_v10, %v2524_v20  ;;  %2631 = vrot.lane.b32.xlu0 %v8983_v59, %s7340_s0 }
 0x8e0   : >> { %v2564_v32 = vadd.f32 %v2552_v27, %v2531_v58  ;;  %v2533_v18 = vmul.f32 %v6176_v62, %v2524_v20  ;;  %v6025_v27 = vld [vmem:[%s8713_s7 + $0x20] sm:$0xff]  ;;  %v6026_v62 = vld [vmem:[%s8713_s7 + $0x28] sm:$0xff] }
 0x8e1   : >> { %v2565_v45 = vadd.f32 %v2557_v44, %v2532_v8  ;;  %2633 = vrot.lane.b32.xlu1 %v8985_v60, %s7340_s0  ;;  %v9003_v4 = vmax.f32 %v2563_v22, 0.0  ;;  %v6027_v8 = vld [vmem:[%s8713_s7 + $0x30] sm:$0xff] }
 0x8e2   : >> { %v2566_v7 = vadd.f32 %v2557_v44, %v2533_v18  ;;  %v9009_v30 = vmax.f32 %v2564_v32, 0.0  ;;  %v6028_v32 = vld [vmem:[%s8713_s7 + $0x38] sm:$0xff] }
 0x8e3   : >> { %v9005_v43 = vmax.f32 %v2565_v45, 0.0  ;;  %2671 = vrot.lane.b32.xlu0 %v8983_v59, %s7341_s20 }
 0x8e4   : >> { %v9011_v55 = vmax.f32 %v2566_v7, 0.0 }
 0x8e5   : >> { %2673 = vrot.lane.b32.xlu1 %v8985_v60, %s7341_s20 }
 0x8e7   : >> { %2711 = vrot.lane.b32.xlu0 %v8983_v59, %s7342_s23 }
 0x8e9   : >> { %2713 = vrot.lane.b32.xlu1 %v8985_v60, %s7342_s23 }
 0x8eb   : >> { %2759 = vrot.lane.b32.xlu0 %v8983_v59, %s7343_s18 }
 0x8ed   : >> { %2761 = vrot.lane.b32.xlu1 %v8985_v60, %s7343_s18 }
 0x8ef   : >> { %2599 = vrot.lane.b32.xlu0 %v8989_v63, %s7339_s1 }
 0x8f1   : >> { %2601 = vrot.lane.b32.xlu1 %v8991_v13, %s7339_s1 }
 0x8f3   : >> { %2639 = vrot.lane.b32.xlu0 %v8989_v63, %s7340_s0 }
 0x8f5   : >> { %2641 = vrot.lane.b32.xlu1 %v8991_v13, %s7340_s0 }
 0x8f7   : >> { %2679 = vrot.lane.b32.xlu0 %v8989_v63, %s7341_s20 }
 0x8f9   : >> { %2681 = vrot.lane.b32.xlu1 %v8991_v13, %s7341_s20 }
 0x8fb   : >> { %2719 = vrot.lane.b32.xlu0 %v8989_v63, %s7342_s23 }
 0x8fd   : >> { %2721 = vrot.lane.b32.xlu1 %v8991_v13, %s7342_s23 }
 0x8ff   : >> { %2595 = vrot.lane.b32.xlu0 %v9003_v4, %s7339_s1 }
 0x901   : >> { %2597 = vrot.lane.b32.xlu1 %v9005_v43, %s7339_s1 }
 0x903   : >> { %2635 = vrot.lane.b32.xlu0 %v9003_v4, %s7340_s0 }
 0x905   : >> { %2637 = vrot.lane.b32.xlu1 %v9005_v43, %s7340_s0 }
 0x907   : >> { %2675 = vrot.lane.b32.xlu0 %v9003_v4, %s7341_s20 }
 0x909   : >> { %2677 = vrot.lane.b32.xlu1 %v9005_v43, %s7341_s20 }
 0x90b   : >> { %2715 = vrot.lane.b32.xlu0 %v9003_v4, %s7342_s23 }
 0x90d   : >> { %2717 = vrot.lane.b32.xlu1 %v9005_v43, %s7342_s23 }
 0x90f   : >> { %2603 = vrot.lane.b32.xlu0 %v9009_v30, %s7339_s1 }
 0x911   : >> { %2605 = vrot.lane.b32.xlu1 %v9011_v55, %s7339_s1 }
 0x913   : >> { %2767 = vrot.lane.b32.xlu0 %v8989_v63, %s7343_s18 }
 0x915   : >> { %2769 = vrot.lane.b32.xlu1 %v8991_v13, %s7343_s18 }
 0x917   : >> { %2643 = vrot.lane.b32.xlu0 %v9009_v30, %s7340_s0 }
 0x919   : >> { %2645 = vrot.lane.b32.xlu1 %v9011_v55, %s7340_s0 }
 0x91b   : >> { %2683 = vrot.lane.b32.xlu0 %v9009_v30, %s7341_s20 }
 0x91d   : >> { %2765 = vrot.lane.b32.xlu1 %v9005_v43, %s7343_s18 }
 0x91f   : >> { %2723 = vrot.lane.b32.xlu0 %v9009_v30, %s7342_s23 }
 0x921   : >> { %2685 = vrot.lane.b32.xlu1 %v9011_v55, %s7341_s20 }
 0x923   : >> { %2763 = vrot.lane.b32.xlu0 %v9003_v4, %s7343_s18 }
 0x925   : >> { %2801 = vrot.lane.b32.xlu1 %v8985_v60, %s7344_s28 }
 0x927   : >> { %2771 = vrot.lane.b32.xlu0 %v9009_v30, %s7343_s18 }
 0x929   : >> { %2725 = vrot.lane.b32.xlu1 %v9011_v55, %s7342_s23 }
 0x92b   : >> { %2799 = vrot.lane.b32.xlu0 %v8983_v59, %s7344_s28 }
 0x92d   : >> { %2809 = vrot.lane.b32.xlu1 %v8991_v13, %s7344_s28 }
 0x92f   : >> { %2807 = vrot.lane.b32.xlu0 %v8989_v63, %s7344_s28 }
 0x931   : >> { %2805 = vrot.lane.b32.xlu1 %v9005_v43, %s7344_s28 }
 0x933   : >> { %2803 = vrot.lane.b32.xlu0 %v9003_v4, %s7344_s28 }
 0x935   : >> { %2841 = vrot.lane.b32.xlu1 %v8985_v60, %s7345_s25 }
 0x937   : >> { %2811 = vrot.lane.b32.xlu0 %v9009_v30, %s7344_s28 }
 0x939   : >> { %2773 = vrot.lane.b32.xlu1 %v9011_v55, %s7343_s18 }
 0x93b   : >> { %2839 = vrot.lane.b32.xlu0 %v8983_v59, %s7345_s25 }
 0x93d   : >> { %2849 = vrot.lane.b32.xlu1 %v8991_v13, %s7345_s25 }
 0x93f   : >> { %2847 = vrot.lane.b32.xlu0 %v8989_v63, %s7345_s25 }
 0x941   : >> { %2813 = vrot.lane.b32.xlu1 %v9011_v55, %s7344_s28 }
 0x943   : >> { %2843 = vrot.lane.b32.xlu0 %v9003_v4, %s7345_s25 }
 0x945   : >> { %2845 = vrot.lane.b32.xlu1 %v9005_v43, %s7345_s25 }
 0x947   : >> { %2851 = vrot.lane.b32.xlu0 %v9009_v30, %s7345_s25 }
 0x949   : >> { %2853 = vrot.lane.b32.xlu1 %v9011_v55, %s7345_s25 }
 0x94b   : >> { %2879 = vrot.lane.b32.xlu0 %v8983_v59, %s7346_s3 }
 0x94d   : >> { %2881 = vrot.lane.b32.xlu1 %v8985_v60, %s7346_s3  ;;  %v2592_v57 = vpop.permute.xlu0 %2591 }
 0x94f   : >> { %v2594_v29 = vpop.permute.xlu1 %2593  ;;  %2887 = vrot.lane.b32.xlu0 %v8989_v63, %s7346_s3 }
 0x951   : >> { %2889 = vrot.lane.b32.xlu1 %v8991_v13, %s7346_s3  ;;  %v2632_v17 = vpop.permute.xlu0 %2631 }
 0x953   : >> { %v2634_v50 = vpop.permute.xlu1 %2633  ;;  %2883 = vrot.lane.b32.xlu0 %v9003_v4, %s7346_s3 }
 0x955   : >> { %2885 = vrot.lane.b32.xlu1 %v9005_v43, %s7346_s3  ;;  %v2672_v10 = vpop.permute.xlu0 %2671 }
 0x957   : >> { %v2674_v42 = vpop.permute.xlu1 %2673  ;;  %2891 = vrot.lane.b32.xlu0 %v9009_v30, %s7346_s3 }
 0x959   : >> { %2893 = vrot.lane.b32.xlu1 %v9011_v55, %s7346_s3  ;;  %v2712_v58 = vpop.permute.xlu0 %2711 }
 0x95b   : >> { %v2714_v22 = vpop.permute.xlu1 %2713  ;;  %2957 = vperm.xlu0 %6694, %v6025_v27  }
 0x95d   : >> { %2962 = vperm.xlu1 %6695, %v6026_v62   ;;  %v9139_v44 = vpop.permute.xlu0 %2759 }
 0x95f   : >> { %v9142_v18 = vpop.permute.xlu1 %2761  ;;  %2967 = vperm.xlu0 %6694, %v6027_v8  }
 0x961   : >> { %2972 = vperm.xlu1 %6695, %v6028_v32   ;;  %v2600_v45 = vpop.permute.xlu0 %2599 }
 0x962   : >> { %v2607_v7 = vsel %vm1916_vm9, %v2592_v57, %v2600_v45  ;;  %v2611_v34 = vsel %vm1916_vm9, %v2600_v45, %v2592_v57 }
 0x963   : >> { %v2602_v31 = vpop.permute.xlu1 %2601  ;;  %v2615_v20 = vmul.f32 %v2611_v34, %v8685_v48  ;;  %v2616_v51 = vmul.f32 %v2607_v7, %v8689_v14 }
 0x964   : >> { %v2608_v27 = vsel %vm1916_vm9, %v2594_v29, %v2602_v31  ;;  %v2612_v62 = vsel %vm1916_vm9, %v2602_v31, %v2594_v29 }
 0x965   : >> { %v2617_v8 = vmul.f32 %v2612_v62, %v8685_v48  ;;  %v2618_v32 = vmul.f32 %v2608_v27, %v8689_v14  ;;  %v2640_v28 = vpop.permute.xlu0 %2639 }
 0x966   : >> { %v2647_v11 = vsel %vm1965_vm10, %v2632_v17, %v2640_v28  ;;  %v2651_v57 = vsel %vm1965_vm10, %v2640_v28, %v2632_v17 }
 0x967   : >> { %v2623_v45 = vpack.c.bf16 %v2617_v8, %v2615_v20  ;;  %v2624_v0 = vpack.c.bf16 %v2618_v32, %v2616_v51  ;;  %v2642_v1 = vpop.permute.xlu1 %2641  ;;  %v9165_v7 = vmul.f32 %v2651_v57, %v8739_v47  ;;  %v9168_v34 = vmul.f32 %v2647_v11, %v8743_v16 }
 0x968   : >> { %v2648_v31 = vsel %vm1965_vm10, %v2634_v50, %v2642_v1  ;;  %v2652_v29 = vsel %vm1965_vm10, %v2642_v1, %v2634_v50 }
 0x969   : >> { %v9171_v27 = vmul.f32 %v2652_v29, %v8739_v47  ;;  %v9174_v28 = vmul.f32 %v2648_v31, %v8743_v16  ;;  %v2680_v20 = vpop.permute.xlu0 %2679  ;;  %3011 = vmatprep.subr.bf16.mxu1 %v2624_v0 }
 0x96a   : >> { %v2687_v51 = vsel %vm2014_vm11, %v2672_v10, %v2680_v20  ;;  %v2691_v1 = vsel %vm2014_vm11, %v2680_v20, %v2672_v10  ;;  %3012 = vmatpush1.bf16.msra.mxu1 %v2623_v45 }
 0x96b   : >> { %v2664_v11 = vpack.c.bf16 %v9174_v28, %v9168_v34  ;;  %v2682_v50 = vpop.permute.xlu1 %2681  ;;  %v9189_v8 = vmul.f32 %v2691_v1, %v8779_v35  ;;  %v9192_v32 = vmul.f32 %v2687_v51, %v8783_v36 }
 0x96c   : >> { %v2688_v62 = vsel %vm2014_vm11, %v2674_v42, %v2682_v50  ;;  %v2692_v0 = vsel %vm2014_vm11, %v2682_v50, %v2674_v42 }
 0x96d   : >> { %v9195_v10 = vmul.f32 %v2692_v0, %v8779_v35  ;;  %v9198_v57 = vmul.f32 %v2688_v62, %v8783_v36  ;;  %v2720_v45 = vpop.permute.xlu0 %2719 }
 0x96e   : >> { %v2727_v31 = vsel %vm2063_vm12, %v2712_v58, %v2720_v45  ;;  %v2731_v29 = vsel %vm2063_vm12, %v2720_v45, %v2712_v58 }
 0x96f   : >> { %v2722_v28 = vpop.permute.xlu1 %2721  ;;  %v9213_v1 = vmul.f32 %v2731_v29, %v8812_v61  ;;  %v9216_v50 = vmul.f32 %v2727_v31, %v8816_v23 }
 0x970   : >> { %v2728_v20 = vsel %vm2063_vm12, %v2714_v22, %v2722_v28  ;;  %v2732_v51 = vsel %vm2063_vm12, %v2722_v28, %v2714_v22 }
 0x971   : >> { %v9219_v58 = vmul.f32 %v2732_v51, %v8812_v61  ;;  %v9222_v62 = vmul.f32 %v2728_v20, %v8816_v23  ;;  %v2596_v0 = vpop.permute.xlu0 %2595 }
 0x973   : >> { %v2598_v22 = vpop.permute.xlu1 %2597 }
 0x975   : >> { %v2636_v28 = vpop.permute.xlu0 %2635 }
 0x977   : >> { %v2638_v29 = vpop.permute.xlu1 %2637 }
 0x979   : >> { %v2676_v34 = vpop.permute.xlu0 %2675 }
 0x97b   : >> { %v2678_v17 = vpop.permute.xlu1 %2677 }
 0x97d   : >> { %v9228_v31 = vpop.permute.xlu0 %2715 }
 0x97f   : >> { %v9230_v46 = vpop.permute.xlu1 %2717 }
 0x981   : >> { %v2604_v51 = vpop.permute.xlu0 %2603 }
 0x982   : >> { %v2609_v20 = vsel %vm1916_vm9, %v2596_v0, %v2604_v51  ;;  %v2613_v21 = vsel %vm1916_vm9, %v2604_v51, %v2596_v0 }
 0x983   : >> { %v2606_v45 = vpop.permute.xlu1 %2605  ;;  %v2619_v39 = vmul.f32 %v2613_v21, %v8685_v48  ;;  %v2620_v38 = vmul.f32 %v2609_v20, %v8689_v14 }
 0x984   : >> { %v2610_v42 = vsel %vm1916_vm9, %v2598_v22, %v2606_v45  ;;  %v2614_v53 = vsel %vm1916_vm9, %v2606_v45, %v2598_v22 }
 0x985   : >> { %v2621_v19 = vmul.f32 %v2614_v53, %v8685_v48  ;;  %v2622_v25 = vmul.f32 %v2610_v42, %v8689_v14  ;;  %v2768_v12 = vpop.permute.xlu0 %2767 }
 0x986   : >> { %v2775_v0 = vsel %vm2120_vm13, %v9139_v44, %v2768_v12  ;;  %v2779_v51 = vsel %vm2120_vm13, %v2768_v12, %v9139_v44 }
 0x987   : >> { %v2625_v52 = vpack.c.bf16 %v2621_v19, %v2619_v39  ;;  %v2626_v5 = vpack.c.bf16 %v2622_v25, %v2620_v38  ;;  %v2770_v45 = vpop.permute.xlu1 %2769  ;;  %v9257_v48 = vmul.f32 %v2775_v0, %v8862_v54  ;;  %v9260_v14 = vmul.f32 %v2779_v51, %v8847_v9 }
 0x988   : >> { %v2776_v21 = vsel %vm2120_vm13, %v9142_v18, %v2770_v45  ;;  %v2780_v53 = vsel %vm2120_vm13, %v2770_v45, %v9142_v18  ;;  %v11470_v45 = vpack.c.bf16 %v9171_v27, %v9165_v7 }
 0x989   : >> { %v9263_v42 = vmul.f32 %v2776_v21, %v8862_v54  ;;  %v9266_v25 = vmul.f32 %v2780_v53, %v8847_v9  ;;  %v2644_v38 = vpop.permute.xlu0 %2643  ;;  %3013 = vmatprep.subr.bf16.mxu1 %v2626_v5 }
 0x98a   : >> { %v2649_v19 = vsel %vm1965_vm10, %v2636_v28, %v2644_v38  ;;  %v2653_v39 = vsel %vm1965_vm10, %v2644_v38, %v2636_v28  ;;  %3014 = vmatpush1.bf16.msra.mxu1 %v2625_v52 }
 0x98b   : >> { %v2791_v12 = vpack.c.bf16 %v9263_v42, %v9257_v48  ;;  %v2792_v44 = vpack.c.bf16 %v9266_v25, %v9260_v14  ;;  %v2646_v18 = vpop.permute.xlu1 %2645  ;;  %3015 = vmatprep.subr.bf16.mxu1 %v2664_v11  ;;  %v2659_v20 = vmul.f32 %v2653_v39, %v8739_v47  ;;  %v2660_v0 = vmul.f32 %v2649_v19, %v8743_v16 }
 0x98c   : >> { %v2650_v22 = vsel %vm1965_vm10, %v2638_v29, %v2646_v18  ;;  %v2654_v5 = vsel %vm1965_vm10, %v2646_v18, %v2638_v29 }
 0x98d   : >> { %v2661_v52 = vmul.f32 %v2654_v5, %v8739_v47  ;;  %v2662_v28 = vmul.f32 %v2650_v22, %v8743_v16  ;;  %v2684_v51 = vpop.permute.xlu0 %2683  ;;  %v11471_v16 = vpack.c.bf16 %v9198_v57, %v9192_v32 }
 0x98e   : >> { %3016 = vmatpush1.bf16.msra.mxu1 %v11470_v45  ;;  %v2689_v29 = vsel %vm2014_vm11, %v2676_v34, %v2684_v51  ;;  %v2693_v19 = vsel %vm2014_vm11, %v2684_v51, %v2676_v34 }
 0x98f   : >> { %v2665_v11 = vpack.c.bf16 %v2661_v52, %v2659_v20  ;;  %v2666_v21 = vpack.c.bf16 %v2662_v28, %v2660_v0  ;;  %v9287_v53 = vpop.permute.xlu1 %2765  ;;  %v2699_v39 = vmul.f32 %v2693_v19, %v8779_v35  ;;  %v2700_v18 = vmul.f32 %v2689_v29, %v8783_v36 }
 0x990   : >> { %v11472_v20 = vpack.c.bf16 %v9195_v10, %v9189_v8  ;;  %v11473_v28 = vpack.c.bf16 %v9222_v62, %v9216_v50  ;;  %v11474_v50 = vpack.c.bf16 %v9219_v58, %v9213_v1 }
 0x991   : >> { %v2724_v38 = vpop.permute.xlu0 %2723  ;;  %3017 = vmatprep.subr.bf16.mxu1 %v2666_v21 }
 0x992   : >> { %3018 = vmatpush1.bf16.msra.mxu1 %v2665_v11 }
 0x993   : >> { %v2686_v47 = vpop.permute.xlu1 %2685  ;;  %3019 = vmatprep.subr.bf16.mxu1 %v11471_v16 }
 0x994   : >> { %v2690_v7 = vsel %vm2014_vm11, %v2678_v17, %v2686_v47  ;;  %v2694_v27 = vsel %vm2014_vm11, %v2686_v47, %v2678_v17  ;;  %v2729_v17 = vsel %vm2063_vm12, %v9228_v31, %v2724_v38 }
 0x995   : >> { %v2701_v22 = vmul.f32 %v2694_v27, %v8779_v35  ;;  %v2702_v34 = vmul.f32 %v2690_v7, %v8783_v36  ;;  %v2764_v5 = vpop.permute.xlu0 %2763  ;;  %v2733_v35 = vsel %vm2063_vm12, %v2724_v38, %v9228_v31  ;;  %v2740_v45 = vmul.f32 %v2729_v17, %v8816_v23 }
 0x996   : >> { %3020 = vmatpush1.bf16.msra.mxu1 %v11472_v20  ;;  %v2739_v51 = vmul.f32 %v2733_v35, %v8812_v61  ;;  %v11476_v20 = vpack.c.bf16 %v8985_v60, %v8983_v59 }
 0x997   : >> { %v2705_v32 = vpack.c.bf16 %v2701_v22, %v2699_v39  ;;  %v2706_v57 = vpack.c.bf16 %v2702_v34, %v2700_v18  ;;  %v2802_v0 = vpop.permute.xlu1 %2801  ;;  %v11475_v39 = vpack.c.bf16 %v8991_v13, %v8989_v63  ;;  %v11478_v13 = vpack.c.bf16 %v9005_v43, %v9003_v4 }
 0x999   : >> { %v2772_v52 = vpop.permute.xlu0 %2771  ;;  %3021 = vmatprep.subr.bf16.mxu1 %v2706_v57  ;;  %v11477_v57 = vpack.c.bf16 %v9011_v55, %v9009_v30 }
 0x99a   : >> { %3022 = vmatpush1.bf16.msra.mxu1 %v2705_v32  ;;  %v2777_v17 = vsel %vm2120_vm13, %v2764_v5, %v2772_v52  ;;  %v2781_v63 = vsel %vm2120_vm13, %v2772_v52, %v2764_v5 }
 0x99b   : >> { %v2726_v36 = vpop.permute.xlu1 %2725  ;;  %3023 = vmatprep.subr.bf16.mxu1 %v11473_v28  ;;  %v2787_v30 = vmul.f32 %v2777_v17, %v8862_v54  ;;  %v2788_v55 = vmul.f32 %v2781_v63, %v8847_v9 }
 0x99c   : >> { %v2730_v8 = vsel %vm2063_vm12, %v9230_v46, %v2726_v36  ;;  %v2734_v10 = vsel %vm2063_vm12, %v2726_v36, %v9230_v46 }
 0x99d   : >> { %v2741_v31 = vmul.f32 %v2734_v10, %v8812_v61  ;;  %v2742_v11 = vmul.f32 %v2730_v8, %v8816_v23  ;;  %v2800_v21 = vpop.permute.xlu0 %2799 }
 0x99e   : >> { %3024 = vmatpush1.bf16.msra.mxu1 %v11474_v50 }
 0x99f   : >> { %v2745_v62 = vpack.c.bf16 %v2741_v31, %v2739_v51  ;;  %v2746_v38 = vpack.c.bf16 %v2742_v11, %v2740_v45  ;;  %v2810_v29 = vpop.permute.xlu1 %2809 }
 0x9a0   : >> { %v2816_v19 = vsel %vm2169_vm14, %v2802_v0, %v2810_v29  ;;  %v2820_v46 = vsel %vm2169_vm14, %v2810_v29, %v2802_v0 }
 0x9a1   : >> { %v2808_v47 = vpop.permute.xlu0 %2807  ;;  %3025 = vmatprep.subr.bf16.mxu1 %v2746_v38  ;;  %v2825_v1 = vmul.f32 %v2816_v19, %v8886_v56  ;;  %v2826_v58 = vmul.f32 %v2820_v46, %v8890_v33 }
 0x9a2   : >> { %v2815_v61 = vsel %vm2169_vm14, %v2800_v21, %v2808_v47  ;;  %v2819_v23 = vsel %vm2169_vm14, %v2808_v47, %v2800_v21  ;;  %3026 = vmatpush1.bf16.msra.mxu1 %v2745_v62 }
 0x9a3   : >> { %v2823_v16 = vmul.f32 %v2815_v61, %v8886_v56  ;;  %v2824_v7 = vmul.f32 %v2819_v23, %v8890_v33  ;;  %v2806_v27 = vpop.permute.xlu1 %2805  ;;  %3027 = vmatprep.subr.bf16.mxu1 %v11475_v39 }
 0x9a5   : >> { %v2831_v18 = vpack.c.bf16 %v2825_v1, %v2823_v16  ;;  %v2832_v22 = vpack.c.bf16 %v2826_v58, %v2824_v7  ;;  %v2804_v34 = vpop.permute.xlu0 %2803 }
 0x9a6   : >> { %3028 = vmatpush1.bf16.msra.mxu1 %v11476_v20 }
 0x9a7   : >> { %v2842_v32 = vpop.permute.xlu1 %2841  ;;  %3029 = vmatprep.subr.bf16.mxu1 %v11477_v57 }
 0x9a9   : >> { %v2812_v0 = vpop.permute.xlu0 %2811 }
 0x9aa   : >> { %3030 = vmatpush1.bf16.msra.mxu1 %v11478_v13  ;;  %v2817_v36 = vsel %vm2169_vm14, %v2804_v34, %v2812_v0  ;;  %v6707_v13 = vld [vmem:[%s8531_s29 + $0x4c] ss:$12 sps:$4 sm:$0xff]  }
 0x9ab   : >> { %v2774_v35 = vpop.permute.xlu1 %2773  ;;  %3031 = vmatprep.subr.bf16.mxu1 %v2792_v44  ;;  %v2827_v45 = vmul.f32 %v2817_v36, %v8886_v56 }
 0x9ac   : >> { %v2778_v59 = vsel %vm2120_vm13, %v9287_v53, %v2774_v35  ;;  %v2782_v60 = vsel %vm2120_vm13, %v2774_v35, %v9287_v53 }
 0x9ad   : >> { %v2789_v4 = vmul.f32 %v2778_v59, %v8862_v54  ;;  %v2790_v43 = vmul.f32 %v2782_v60, %v8847_v9  ;;  %v2840_v5 = vpop.permute.xlu0 %2839  ;;  %v2821_v9 = vsel %vm2169_vm14, %v2812_v0, %v2804_v34  ;;  %v6704_v0 = vld [vmem:[%s8531_s29 + $0x30] ss:$12 sps:$4 sm:$0xff]  }
 0x9ae   : >> { %3032 = vmatpush1.bf16.msra.mxu1 %v2791_v12  ;;  %v2828_v31 = vmul.f32 %v2821_v9, %v8890_v33 }
 0x9af   : >> { %v2793_v14 = vpack.c.bf16 %v2789_v4, %v2787_v30  ;;  %v2794_v25 = vpack.c.bf16 %v2790_v43, %v2788_v55  ;;  %v2850_v44 = vpop.permute.xlu1 %2849 }
 0x9b0   : >> { %v2856_v52 = vsel %vm2218_vm15, %v2842_v32, %v2850_v44  ;;  %v2860_v53 = vsel %vm2218_vm15, %v2850_v44, %v2842_v32  ;;  %v6709_v44 = vld [vmem:[%s8531_s29 + $0x48] ss:$12 sps:$4 sm:$0xff]  }
 0x9b1   : >> { %v2848_v54 = vpop.permute.xlu0 %2847  ;;  %3033 = vmatprep.subr.bf16.mxu1 %v2794_v25  ;;  %v2865_v12 = vmul.f32 %v2856_v52, %v8919_v40  ;;  %v2866_v28 = vmul.f32 %v2860_v53, %v8923_v41 }
 0x9b2   : >> { %v2855_v48 = vsel %vm2218_vm15, %v2840_v5, %v2848_v54  ;;  %v2859_v42 = vsel %vm2218_vm15, %v2848_v54, %v2840_v5  ;;  %3034 = vmatpush1.bf16.msra.mxu1 %v2793_v14 }
 0x9b3   : >> { %v2863_v8 = vmul.f32 %v2855_v48, %v8919_v40  ;;  %v2864_v10 = vmul.f32 %v2859_v42, %v8923_v41  ;;  %v2814_v51 = vpop.permute.xlu1 %2813  ;;  %3035 = vmatprep.subr.bf16.mxu1 %v2832_v22 }
 0x9b4   : >> { %v2818_v11 = vsel %vm2169_vm14, %v2806_v27, %v2814_v51  ;;  %v2822_v21 = vsel %vm2169_vm14, %v2814_v51, %v2806_v27 }
 0x9b5   : >> { %v2871_v50 = vpack.c.bf16 %v2865_v12, %v2863_v8  ;;  %v2872_v62 = vpack.c.bf16 %v2866_v28, %v2864_v10  ;;  %v2829_v38 = vmul.f32 %v2818_v11, %v8886_v56  ;;  %v2830_v29 = vmul.f32 %v2822_v21, %v8890_v33  ;;  %v2844_v19 = vpop.permute.xlu0 %2843 }
 0x9b6   : >> { %3036 = vmatpush1.bf16.msra.mxu1 %v2831_v18  ;;  %v11479_v8 = vmov 0  }
 0x9b7   : >> { %v2833_v46 = vpack.c.bf16 %v2829_v38, %v2827_v45  ;;  %v2834_v47 = vpack.c.bf16 %v2830_v29, %v2828_v31  ;;  %v2846_v61 = vpop.permute.xlu1 %2845  ;;  %v6710_v45 = vld [vmem:[%s8531_s29 + $0x38] ss:$12 sps:$4 sm:$0xff]   ;;  %v6711_v31 = vld [vmem:[%s8531_s29 + $0x50] ss:$12 sps:$4 sm:$0xff]  }
 0x9b9   : >> { %v2852_v23 = vpop.permute.xlu0 %2851  ;;  %3037 = vmatprep.subr.bf16.mxu1 %v2834_v47 }
 0x9ba   : >> { %v2857_v1 = vsel %vm2218_vm15, %v2844_v19, %v2852_v23  ;;  %v2861_v58 = vsel %vm2218_vm15, %v2852_v23, %v2844_v19  ;;  %3038 = vmatpush1.bf16.msra.mxu1 %v2833_v46 }
 0x9bb   : >> { %v2854_v16 = vpop.permute.xlu1 %2853  ;;  %3039 = vmatprep.subr.bf16.mxu1 %v2872_v62  ;;  %v2867_v7 = vmul.f32 %v2857_v1, %v8919_v40  ;;  %v2868_v27 = vmul.f32 %v2861_v58, %v8923_v41 }
 0x9bc   : >> { %v2858_v56 = vsel %vm2218_vm15, %v2846_v61, %v2854_v16  ;;  %v2862_v33 = vsel %vm2218_vm15, %v2854_v16, %v2846_v61 }
 0x9bd   : >> { %v2869_v39 = vmul.f32 %v2858_v56, %v8919_v40  ;;  %v2870_v18 = vmul.f32 %v2862_v33, %v8923_v41  ;;  %v2880_v22 = vpop.permute.xlu0 %2879 }
 0x9be   : >> { %3040 = vmatpush1.bf16.msra.mxu1 %v2871_v50 }
 0x9bf   : >> { %v2873_v34 = vpack.c.bf16 %v2869_v39, %v2867_v7  ;;  %v2874_v20 = vpack.c.bf16 %v2870_v18, %v2868_v27  ;;  %v2882_v32 = vpop.permute.xlu1 %2881 }
 0x9c1   : >> { %v2888_v57 = vpop.permute.xlu0 %2887  ;;  %3041 = vmatprep.subr.bf16.mxu1 %v2874_v20 }
 0x9c2   : >> { %v2895_v17 = vsel %vm2267_vm0, %v2880_v22, %v2888_v57  ;;  %v2899_v63 = vsel %vm2267_vm0, %v2888_v57, %v2880_v22  ;;  %3042 = vmatpush1.bf16.msra.mxu1 %v2873_v34 }
 0x9c3   : >> { %v2890_v35 = vpop.permute.xlu1 %2889  ;;  %v2903_v59 = vmul.f32 %v7733_v2, %v2895_v17  ;;  %v2904_v60 = vmul.f32 %v7735_v3, %v2899_v63  ;;  %v11482_v63 = vld [vmem:[#allocation37_spill] sm:$0xff] }
 0x9c4   : >> { %v2896_v40 = vsel %vm2267_vm0, %v2882_v32, %v2890_v35  ;;  %v2900_v41 = vsel %vm2267_vm0, %v2890_v35, %v2882_v32  ;;  %v11480_v32 = vld [vmem:[#allocation39_spill] sm:$0xff]  ;;  %v9469_v35 = vmov (%p1796_p10), 0.0  }
 0x9c5   : >> { %v2905_v30 = vmul.f32 %v7733_v2, %v2896_v40  ;;  %v2906_v55 = vmul.f32 %v7735_v3, %v2900_v41  ;;  %v2884_v4 = vpop.permute.xlu0 %2883  ;;  %3044 = vmatmul.mubr.bf16.vlgmr.msra.gmra.mrb[0].mxu1 %v6704_v0  ;;  %v9471_v40 = vmov (%p1796_p10), 0.0   ;;  %v9473_v41 = vmov (%p1796_p10), 0.0  }
 0x9c6   : >> { %3053 = vmatprep.mubr.bf16.mxu1 %v6707_v13 }
 0x9c7   : >> { %v2911_v43 = vpack.c.bf16 %v2905_v30, %v2903_v59  ;;  %v2912_v5 = vpack.c.bf16 %v2906_v55, %v2904_v60  ;;  %v2886_v14 = vpop.permute.xlu1 %2885  ;;  %v9475_v59 = vmov (%p1796_p10), 0.0   ;;  %v9477_v60 = vmov (%p1796_p10), 0.0  }
 0x9c8   : > { %v9479_v30 = vmov (%p1796_p10), 0.0   ;;  %v9481_v55 = vmov (%p1796_p10), 0.0  }
 0x9c9   : >> { %2915 = vst [vmem:[#allocation2 + $0x100] sm:$0xff] %v2911_v43  ;;  %2916 = vst [vmem:[#allocation2 + $0x108] sm:$0xff] %v2912_v5  ;;  %v2892_v25 = vpop.permute.xlu0 %2891  ;;  %3064 = vmatprep.subr.bf16.mxu1 %v2912_v5 }
 0x9ca   : >> { %v2897_v52 = vsel %vm2267_vm0, %v2884_v4, %v2892_v25  ;;  %v2901_v53 = vsel %vm2267_vm0, %v2892_v25, %v2884_v4  ;;  %3065 = vmatpush1.bf16.msra.mxu1 %v2911_v43  ;;  %v9483_v4 = vmov (%p1796_p10), 0.0  }
 0x9cb   : >> { %v2894_v36 = vpop.permute.xlu1 %2893  ;;  %v2907_v48 = vmul.f32 %v7733_v2, %v2897_v52  ;;  %v2908_v42 = vmul.f32 %v7735_v3, %v2901_v53 }
 0x9cc   : >> { %v2898_v9 = vsel %vm2267_vm0, %v2886_v14, %v2894_v36  ;;  %v2902_v54 = vsel %vm2267_vm0, %v2894_v36, %v2886_v14 }
 0x9cd   : >> { %v2909_v12 = vmul.f32 %v7733_v2, %v2898_v9  ;;  %v2910_v28 = vmul.f32 %v7735_v3, %v2902_v54  ;;  %3054 = vmatmul.mubr.bf16.gmra.mrb[4].mxu1 %v6709_v44 }
 0x9ce   : >> { %3096 = vmatprep.mubr.bf16.mxu1 %v11479_v8 }
 0x9cf   : >> { %v2913_v10 = vpack.c.bf16 %v2909_v12, %v2907_v48  ;;  %v2914_v51 = vpack.c.bf16 %v2910_v28, %v2908_v42 }
 0x9d1   : >> { %2917 = vst [vmem:[#allocation2 + $0x110] sm:$0xff] %v2913_v10  ;;  %2918 = vst [vmem:[#allocation2 + $0x118] sm:$0xff] %v2914_v51  ;;  %3066 = vmatprep.subr.bf16.mxu1 %v2914_v51 }
 0x9d2   : >> { %3067 = vmatpush1.bf16.msra.mxu1 %v2913_v10 }
 0x9d5   : >> { %6035 = vmatmul.mubr.msk.bf16.vlgmr.msra.gmra.mrb[0].mxu1 %vm2386_vm1, %v6710_v45 }
 0x9d6   : >> { %3106 = vmatprep.mubr.bf16.mxu1 %v11479_v8 }
 0x9da   : >> { %v2958_v11 = vpop.permute.xlu0 %2957 }
 0x9dc   : >> { %v2963_v38 = vpop.permute.xlu1 %2962 }
 0x9dd   : >> { %6036 = vmatmul.mubr.msk.bf16.gmra.mrb[4].mxu1 %vm2386_vm1, %v6711_v31 }
 0x9de   : >> { %v2968_v56 = vpop.permute.xlu0 %2967 }
 0x9e0   : >> { %v2973_v39 = vpop.permute.xlu1 %2972 }
 0xaa8   : >> { %v3098_v21 = vpop.f32.mrb[0].mxu1 }
 0xaa9   : >> { %v6177_v50 = vadd.f32 %v3098_v21, %v2958_v11  ;;  %v3100_v62 = vpop.f32.mrb[1].mxu1 }
 0xaaa   : >> { %v6178_v29 = vadd.f32 %v3100_v62, %v2958_v11  ;;  %v3102_v19 = vpop.f32.mrb[2].mxu1 }
 0xaab   : >> { %v3117_v46 = vadd.f32 %v7233_v15, %v6177_v50   ;;  %v6179_v47 = vadd.f32 %v3102_v19, %v2963_v38  ;;  %v3104_v61 = vpop.f32.mrb[3].mxu1 }
 0xaac   : >> { %v3118_v23 = vadd.f32 %v7229_v37, %v6178_v29   ;;  %v6180_v1 = vadd.f32 %v3104_v61, %v2963_v38  ;;  %v11481_v37 = vld [vmem:[#allocation38_spill] sm:$0xff] }
 0xaad   : >> { %v3119_v58 = vadd.f32 %v7225_v26, %v6179_v47  }
 0xaae   : >> { %v3120_v16 = vadd.f32 %v7221_v6, %v6180_v1  }
 0xaaf   : >> { %v11488_v26 = vmov %v3119_v58 }
 0xab0   : >> { %v3108_v33 = vpop.f32.mrb[4].mxu1  ;;  %v11487_v6 = vmov %v3120_v16 }
 0xab1   : >> { %v6181_v7 = vadd.f32 %v3108_v33, %v2968_v56  ;;  %v3110_v27 = vpop.f32.mrb[5].mxu1 }
 0xab2   : >> { %v6182_v18 = vadd.f32 %v3110_v27, %v2968_v56  ;;  %v3112_v22 = vpop.f32.mrb[6].mxu1  ;;  %1798 = sbr.rel (!%p1796_p10) target bundleno = 1656 (0x678), region = 231 }
 0xab3   : >> { %v3121_v34 = vadd.f32 %v7217_v49, %v6181_v7   ;;  %v6183_v20 = vadd.f32 %v3112_v22, %v2973_v39  ;;  %v3114_v15 = vpop.f32.mrb[7].mxu1 }
 0xab4   : >> { %v3122_v57 = vadd.f32 %v11480_v32, %v6182_v18   ;;  %v6184_v0 = vadd.f32 %v3114_v15, %v2973_v39  ;;  %v11490_v15 = vmov %v3117_v46 }
 0xab5   : >> { %v3123_v17 = vadd.f32 %v11481_v37, %v6183_v20   ;;  %v11486_v49 = vmov %v3121_v34  ;;  %v11489_v37 = vmov %v3118_v23 }
 0xab6   : >> { %v3124_v13 = vadd.f32 %v11482_v63, %v6184_v0   ;;  %v11485_v5 = vmov %v3122_v57 }
 0xab7   : >> { %v11484_v52 = vmov %v3123_v17 }
 0xab8   : >> { %v11483_v12 = vmov %v3124_v13 }
 0xab9 LB: >> { %11491 = vst [vmem:[#allocation40_spill] sm:$0xff] %v7241_v35  ;;  %11492 = vst [vmem:[#allocation41_spill] sm:$0xff] %v7245_v40  ;;  %v11348_v2 = vmov 0   ;;  %s9557_s13 = sshll.u32 %s7305_s26, 7  ;;  %s11507_s29 = sld [smem:[#allocation76_spill]]  ;;  %vm3363_vm2 = vcmp.lt.s32.totalorder %v7797_v24, 68  ;;  %s7305_s26 = sphi %s9501_s26, %s3130_s26   ;;  %v7301_v46 = vphi %v3117_v46, %v11627_v46   ;;  %v7297_v23 = vphi %v3118_v23, %v11626_v23   ;;  %v7293_v58 = vphi %v3119_v58, %v11625_v58   ;;  %v7289_v16 = vphi %v3120_v16, %v11624_v16   ;;  %v7285_v34 = vphi %v3121_v34, %v11623_v34   ;;  %v7281_v57 = vphi %v3122_v57, %v11622_v57   ;;  %v7277_v17 = vphi %v3123_v17, %v11621_v17   ;;  %v7273_v13 = vphi %v3124_v13, %v11620_v13   ;;  %v7269_v4 = vphi %v9483_v4, %v11619_v4   ;;  %v7265_v55 = vphi %v9481_v55, %v11618_v55   ;;  %v7261_v30 = vphi %v9479_v30, %v11617_v30   ;;  %v7257_v60 = vphi %v9477_v60, %v11616_v60   ;;  %v7253_v59 = vphi %v9475_v59, %v11615_v59   ;;  %v7249_v41 = vphi %v9473_v41, %v11614_v41   ;;  %v7245_v40 = vphi %v9471_v40, %v11613_v40   ;;  %v7241_v35 = vphi %v9469_v35, %v11612_v35  }
 0xaba   : >> { %11493 = vst [vmem:[#allocation42_spill] sm:$0xff] %v7249_v41  ;;  %11494 = vst [vmem:[#allocation43_spill] sm:$0xff] %v7253_v59  ;;  %6713 = vset.pattern.permute.xlu1 %v11348_v2  ;;  %6712 = vset.pattern.permute.xlu0 %v11348_v2  ;;  %s11508_s23 = sld [smem:[#allocation75_spill]]  ;;  %s6165_s28 = smul.u32 320, %s7305_s26  ;;  %vm3452_vm3 = vcmp.lt.s32.totalorder %v7797_v24, 64  ;;  %vm3541_vm4 = vcmp.lt.s32.totalorder %v7797_v24, 60 }
 0xabb   : >> { %11495 = vst [vmem:[#allocation44_spill] sm:$0xff] %v7257_v60  ;;  %11496 = vst [vmem:[#allocation45_spill] sm:$0xff] %v7261_v30  ;;  %s11509_s4 = sld [smem:[#allocation73_spill]]  ;;  %s7348_s6 = smov 68   ;;  %v11521_v2 = vld [vmem:[#allocation32_spill] sm:$0xff]  ;;  %vm3630_vm5 = vcmp.lt.s32.totalorder %v7797_v24, 4 }
 0xabc   : >> { %11497 = vst [vmem:[#allocation46_spill] sm:$0xff] %v7265_v55  ;;  %11498 = vst [vmem:[#allocation47_spill] sm:$0xff] %v7269_v4  ;;  %s7349_s7 = smov 64   ;;  %s7350_s2 = smov 60   ;;  %vm3735_vm6 = vcmp.lt.s32.totalorder %v7797_v24, 124  ;;  %vm4124_vm7 = vcmask 523264  }
 0xabd   : >> { %11499 = vst [vmem:[#allocation48_spill] sm:$0xff] %v7273_v13  ;;  %11500 = vst [vmem:[#allocation49_spill] sm:$0xff] %v7277_v17  ;;  %s7351_s16 = smov 4   ;;  %s3130_s26 = sadd.s32 1, %s7305_s26  }
 0xabe   : >> { %11501 = vst [vmem:[#allocation50_spill] sm:$0xff] %v7281_v57  ;;  %11502 = vst [vmem:[#allocation51_spill] sm:$0xff] %v7285_v34  ;;  %p11207_p2 = scmp.ge.s32.totalorder %s3130_s26, 3  }
 0xabf   : >> { %11503 = vst [vmem:[#allocation52_spill] sm:$0xff] %v7289_v16  ;;  %11504 = vst [vmem:[#allocation53_spill] sm:$0xff] %v7293_v58  ;;  %s9563_s1 = scalar_lea.vmem %s11507_s29, %s9557_s13  ;;  %s7352_s29 = smov 124   ;;  %vm5571_vm8 = vcmask (%p11207_p2), 1043456  }
 0xac0   : >> { %11505 = vst [vmem:[#allocation54_spill] sm:$0xff] %v7297_v23  ;;  %11506 = vst [vmem:[#allocation55_spill] sm:$0xff] %v7301_v46  ;;  %s9569_s18 = scalar_lea.vmem %s11508_s23, %s9557_s13  ;;  %v3215_v3 = vld [vmem:[%s9563_s1] sm:$0xff]  ;;  %v3216_v6 = vld [vmem:[%s9563_s1 + $0x8] sm:$0xff]  ;;  %s11520_s23 = sld [smem:[#allocation74_spill]] }
 0xac1   : >> { %v3150_v26 = vld [vmem:[%s9569_s18] sm:$0xff]  ;;  %3225 = vperm.xlu1 %6713, %v3215_v3   ;;  %v3151_v49 = vld [vmem:[%s9569_s18 + $0x8] sm:$0xff]  ;;  %s9579_s24 = scalar_lea.vmem %s11509_s4, %s6165_s28  ;;  %v3153_v43 = vld [vmem:[%s9569_s18 + $0x18] sm:$0xff] }
 0xac2   : >> { %3160 = vperm.xlu0 %6712, %v3150_v26   ;;  %v3152_v5 = vld [vmem:[%s9569_s18 + $0x10] sm:$0xff]  ;;  %v3218_v14 = vld [vmem:[%s9563_s1 + $0x18] sm:$0xff]  ;;  %v3155_v44 = vld [vmem:[%s9569_s18 + $0x28] sm:$0xff] }
 0xac3   : >> { %v3217_v25 = vld [vmem:[%s9563_s1 + $0x10] sm:$0xff]  ;;  %v3154_v52 = vld [vmem:[%s9569_s18 + $0x20] sm:$0xff]  ;;  %v3220_v53 = vld [vmem:[%s9563_s1 + $0x28] sm:$0xff] }
 0xac4   : >> { %v3219_v36 = vld [vmem:[%s9563_s1 + $0x20] sm:$0xff]  ;;  %v3157_v9 = vld [vmem:[%s9569_s18 + $0x38] sm:$0xff]  ;;  %v3156_v54 = vld [vmem:[%s9569_s18 + $0x30] sm:$0xff] }
 0xac5   : >> { %3230 = vperm.xlu1 %6713, %v3216_v6   ;;  %v3222_v48 = vld [vmem:[%s9563_s1 + $0x38] sm:$0xff]  ;;  %v3221_v42 = vld [vmem:[%s9563_s1 + $0x30] sm:$0xff] }
 0xac6   : >> { %3165 = vperm.xlu0 %6712, %v3151_v49   ;;  %s9946_s28 = scalar_lea.vmem %s11520_s23, %s9557_s13 }
 0xac9   : >> { %3175 = vperm.xlu1 %6713, %v3153_v43  }
 0xaca   : >> { %3170 = vperm.xlu0 %6712, %v3152_v5  }
 0xacd   : >> { %3240 = vperm.xlu1 %6713, %v3218_v14  }
 0xace   : >> { %3235 = vperm.xlu0 %6712, %v3217_v25  }
 0xad1   : >> { %3185 = vperm.xlu1 %6713, %v3155_v44  }
 0xad2   : >> { %3180 = vperm.xlu0 %6712, %v3154_v52  }
 0xad5   : >> { %3250 = vperm.xlu1 %6713, %v3220_v53  }
 0xad6   : >> { %3245 = vperm.xlu0 %6712, %v3219_v36  }
 0xad9   : >> { %3195 = vperm.xlu1 %6713, %v3157_v9  }
 0xada   : >> { %3190 = vperm.xlu0 %6712, %v3156_v54  }
 0xadd   : >> { %3260 = vperm.xlu1 %6713, %v3222_v48  }
 0xade   : >> { %3255 = vperm.xlu0 %6712, %v3221_v42  }
 0xb40   : >> { %v3226_v12 = vpop.permute.xlu1 %3225 }
 0xb41   : >> { %v3161_v28 = vpop.permute.xlu0 %3160 }
 0xb42   : >> { %v3198_v8 = vmul.f32 %v7301_v46, %v3161_v28  ;;  %v3199_v10 = vmul.f32 %v7297_v23, %v3161_v28 }
 0xb44   : >> { %v3263_v51 = vadd.f32 %v3226_v12, %v3198_v8  ;;  %v3231_v45 = vpop.permute.xlu1 %3230  ;;  %v3264_v11 = vadd.f32 %v3226_v12, %v3199_v10 }
 0xb45   : >> { %v3166_v31 = vpop.permute.xlu0 %3165 }
 0xb46   : >> { %v9595_v21 = vmax.f32 %v3263_v51, 0.0  ;;  %v3200_v50 = vmul.f32 %v7293_v58, %v3166_v31  ;;  %v3201_v62 = vmul.f32 %v7289_v16, %v3166_v31  ;;  %v9601_v61 = vmax.f32 %v3264_v11, 0.0  ;;  %v11526_v58 = vld [vmem:[#allocation33_spill] sm:$0xff] }
 0xb48   : >> { %v3265_v38 = vadd.f32 %v3231_v45, %v3200_v50  ;;  %v3266_v29 = vadd.f32 %v3231_v45, %v3201_v62  ;;  %3331 = vrot.lane.b32.xlu0 %v9595_v21, %s7348_s6  ;;  %v3176_v19 = vpop.permute.xlu1 %3175 }
 0xb49   : >> { %v3171_v47 = vpop.permute.xlu0 %3170  ;;  %v3204_v33 = vmul.f32 %v7277_v17, %v3176_v19  ;;  %v3205_v7 = vmul.f32 %v7273_v13, %v3176_v19  ;;  %v6075_v13 = vld [vmem:[%s9569_s18 + $0x70] sm:$0xff] }
 0xb4a   : >> { %v9603_v1 = vmax.f32 %v3265_v38, 0.0  ;;  %v9605_v56 = vmax.f32 %v3266_v29, 0.0  ;;  %v3202_v27 = vmul.f32 %v7285_v34, %v3171_v47  ;;  %v3203_v22 = vmul.f32 %v7281_v57, %v3171_v47 }
 0xb4c   : >> { %v3687_v39 = vpack.c.bf16 %v9603_v1, %v9595_v21  ;;  %v3688_v18 = vpack.c.bf16 %v9605_v56, %v9601_v61  ;;  %3347 = vrot.lane.b32.xlu0 %v9601_v61, %s7348_s6  ;;  %3333 = vrot.lane.b32.xlu1 %v9603_v1, %s7348_s6  ;;  %v3241_v20 = vpop.permute.xlu1 %3240 }
 0xb4d   : >> { %v3236_v15 = vpop.permute.xlu0 %3235  ;;  %v3269_v32 = vadd.f32 %v3241_v20, %v3204_v33  ;;  %v3270_v0 = vadd.f32 %v3241_v20, %v3205_v7 }
 0xb4e   : >> { %3695 = vst [vmem:[#allocation2 + $0x100] sm:$0xff] %v3687_v39  ;;  %3696 = vst [vmem:[#allocation2 + $0x108] sm:$0xff] %v3688_v18  ;;  %v3267_v37 = vadd.f32 %v3236_v15, %v3202_v27  ;;  %v3268_v63 = vadd.f32 %v3236_v15, %v3203_v22 }
 0xb4f   : >> { %v9619_v3 = vmax.f32 %v3269_v32, 0.0  ;;  %v9621_v26 = vmax.f32 %v3270_v0, 0.0 }
 0xb50   : >> { %v9623_v6 = vmax.f32 %v3267_v37, 0.0  ;;  %v9625_v49 = vmax.f32 %v3268_v63, 0.0  ;;  %3349 = vrot.lane.b32.xlu1 %v9605_v56, %s7348_s6  ;;  %v3186_v43 = vpop.permute.xlu1 %3185 }
 0xb51   : >> { %v3181_v5 = vpop.permute.xlu0 %3180  ;;  %v3208_v44 = vmul.f32 %v7261_v30, %v3186_v43  ;;  %v3209_v52 = vmul.f32 %v7257_v60, %v3186_v43  ;;  %v3329_v60 = vld [vmem:[%s9946_s28 + $0x30] sm:$0xff] }
 0xb52   : >> { %v3689_v14 = vpack.c.bf16 %v9619_v3, %v9623_v6  ;;  %v3690_v25 = vpack.c.bf16 %v9621_v26, %v9625_v49  ;;  %3335 = vrot.lane.b32.xlu0 %v9623_v6, %s7348_s6  ;;  %v3206_v53 = vmul.f32 %v7269_v4, %v3181_v5  ;;  %v3207_v36 = vmul.f32 %v7265_v55, %v3181_v5  ;;  %v11510_v5 = vld [vmem:[#allocation29_spill] sm:$0xff] }
 0xb54   : >> { %3697 = vst [vmem:[#allocation2 + $0x110] sm:$0xff] %v3689_v14  ;;  %3698 = vst [vmem:[#allocation2 + $0x118] sm:$0xff] %v3690_v25  ;;  %3337 = vrot.lane.b32.xlu1 %v9619_v3, %s7348_s6  ;;  %v3251_v9 = vpop.permute.xlu1 %3250  ;;  %v11511_v14 = vld [vmem:[#allocation25_spill] sm:$0xff] }
 0xb55   : >> { %v3246_v54 = vpop.permute.xlu0 %3245  ;;  %v3273_v48 = vadd.f32 %v3251_v9, %v3208_v44  ;;  %v3274_v42 = vadd.f32 %v3251_v9, %v3209_v52  ;;  %v9776_v25 = vrot.slane %v11511_v14, %v11510_v5  ;;  %v11512_v44 = vld [vmem:[#allocation26_spill] sm:$0xff]  ;;  %v11513_v9 = vld [vmem:[#allocation35_spill] sm:$0xff]  ;;  %v10188_v23 = vrot.slane %v11511_v14, %v11526_v58 }
 0xb56   : >> { %v3271_v12 = vadd.f32 %v3246_v54, %v3206_v53  ;;  %v3272_v28 = vadd.f32 %v3246_v54, %v3207_v36  ;;  %3351 = vrot.lane.b32.xlu0 %v9625_v49, %s7348_s6  ;;  %v9780_v52 = vrot.slane %v11512_v44, %v11510_v5  ;;  %v9786_v54 = vrot.slane %v11511_v14, %v11513_v9 }
 0xb57   : >> { %v9643_v8 = vmax.f32 %v3273_v48, 0.0  ;;  %v9645_v10 = vmax.f32 %v3274_v42, 0.0  ;;  %v9790_v48 = vrot.slane %v11512_v44, %v11513_v9  ;;  %11527 = vst [vmem:[#allocation62_spill] sm:$0xff] %v10188_v23 }
 0xb58   : >> { %v9647_v51 = vmax.f32 %v3271_v12, 0.0  ;;  %v9649_v45 = vmax.f32 %v3272_v28, 0.0  ;;  %3353 = vrot.lane.b32.xlu1 %v9621_v26, %s7348_s6  ;;  %v3196_v31 = vpop.permute.xlu1 %3195 }
 0xb59   : >> { %v3191_v11 = vpop.permute.xlu0 %3190  ;;  %v3212_v38 = vmul.f32 %v7245_v40, %v3196_v31  ;;  %v3213_v29 = vmul.f32 %v7241_v35, %v3196_v31  ;;  %v6074_v35 = vld [vmem:[%s9569_s18 + $0x68] sm:$0xff] }
 0xb5a   : >> { %v3691_v50 = vpack.c.bf16 %v9643_v8, %v9647_v51  ;;  %v3692_v62 = vpack.c.bf16 %v9645_v10, %v9649_v45  ;;  %3339 = vrot.lane.b32.xlu0 %v9647_v51, %s7348_s6  ;;  %v3210_v19 = vmul.f32 %v7253_v59, %v3191_v11  ;;  %v3211_v47 = vmul.f32 %v7249_v41, %v3191_v11 }
 0xb5c   : >> { %3699 = vst [vmem:[#allocation2 + $0x120] sm:$0xff] %v3691_v50  ;;  %3700 = vst [vmem:[#allocation2 + $0x128] sm:$0xff] %v3692_v62  ;;  %3341 = vrot.lane.b32.xlu1 %v9643_v8, %s7348_s6  ;;  %v3261_v33 = vpop.permute.xlu1 %3260 }
 0xb5d   : >> { %v3256_v7 = vpop.permute.xlu0 %3255  ;;  %v3277_v27 = vadd.f32 %v3261_v33, %v3212_v38  ;;  %v3278_v39 = vadd.f32 %v3261_v33, %v3213_v29 }
 0xb5e   : >> { %v3275_v18 = vadd.f32 %v3256_v7, %v3210_v19  ;;  %v3276_v22 = vadd.f32 %v3256_v7, %v3211_v47  ;;  %3355 = vrot.lane.b32.xlu0 %v9649_v45, %s7348_s6  ;;  %v6716_v19 = vld [vmem:[%s9579_s24 + $0x4] ss:$20 sps:$4 sm:$0xff]  }
 0xb5f   : >> { %v9667_v20 = vmax.f32 %v3277_v27, 0.0  ;;  %v9669_v15 = vmax.f32 %v3278_v39, 0.0  ;;  %4169 = vmatprep.mubr.bf16.mxu0 %v6716_v19 }
 0xb60   : >> { %v9671_v32 = vmax.f32 %v3275_v18, 0.0  ;;  %v9673_v0 = vmax.f32 %v3276_v22, 0.0  ;;  %3357 = vrot.lane.b32.xlu1 %v9645_v10, %s7348_s6 }
 0xb62   : >> { %v3693_v37 = vpack.c.bf16 %v9667_v20, %v9671_v32  ;;  %v3694_v63 = vpack.c.bf16 %v9669_v15, %v9673_v0  ;;  %3343 = vrot.lane.b32.xlu0 %v9671_v32, %s7348_s6 }
 0xb64   : >> { %3701 = vst [vmem:[#allocation2 + $0x130] sm:$0xff] %v3693_v37  ;;  %3702 = vst [vmem:[#allocation2 + $0x138] sm:$0xff] %v3694_v63  ;;  %3345 = vrot.lane.b32.xlu1 %v9667_v20, %s7348_s6 }
 0xb66   : >> { %3359 = vrot.lane.b32.xlu0 %v9673_v0, %s7348_s6 }
 0xb68   : >> { %3361 = vrot.lane.b32.xlu1 %v9669_v15, %s7348_s6 }
 0xb6a   : >> { %3420 = vrot.lane.b32.xlu0 %v9595_v21, %s7349_s7 }
 0xb6c   : >> { %3422 = vrot.lane.b32.xlu1 %v9603_v1, %s7349_s7 }
 0xb6e   : >> { %3436 = vrot.lane.b32.xlu0 %v9601_v61, %s7349_s7 }
 0xb70   : >> { %3438 = vrot.lane.b32.xlu1 %v9605_v56, %s7349_s7 }
 0xb72   : >> { %3424 = vrot.lane.b32.xlu0 %v9623_v6, %s7349_s7 }
 0xb74   : >> { %3426 = vrot.lane.b32.xlu1 %v9619_v3, %s7349_s7 }
 0xb76   : >> { %3440 = vrot.lane.b32.xlu0 %v9625_v49, %s7349_s7 }
 0xb78   : >> { %3442 = vrot.lane.b32.xlu1 %v9621_v26, %s7349_s7 }
 0xb7a   : >> { %3428 = vrot.lane.b32.xlu0 %v9647_v51, %s7349_s7 }
 0xb7c   : >> { %3430 = vrot.lane.b32.xlu1 %v9643_v8, %s7349_s7 }
 0xb7e   : >> { %3444 = vrot.lane.b32.xlu0 %v9649_v45, %s7349_s7 }
 0xb80   : >> { %3446 = vrot.lane.b32.xlu1 %v9645_v10, %s7349_s7 }
 0xb82   : >> { %3432 = vrot.lane.b32.xlu0 %v9671_v32, %s7349_s7 }
 0xb84   : >> { %3434 = vrot.lane.b32.xlu1 %v9667_v20, %s7349_s7 }
 0xb86   : >> { %3448 = vrot.lane.b32.xlu0 %v9673_v0, %s7349_s7 }
 0xb88   : >> { %3450 = vrot.lane.b32.xlu1 %v9669_v15, %s7349_s7 }
 0xb8a   : >> { %3509 = vrot.lane.b32.xlu0 %v9595_v21, %s7350_s2 }
 0xb8c   : >> { %3511 = vrot.lane.b32.xlu1 %v9603_v1, %s7350_s2 }
 0xb8e   : >> { %3525 = vrot.lane.b32.xlu0 %v9601_v61, %s7350_s2 }
 0xb90   : >> { %3527 = vrot.lane.b32.xlu1 %v9605_v56, %s7350_s2 }
 0xb92   : >> { %3513 = vrot.lane.b32.xlu0 %v9623_v6, %s7350_s2 }
 0xb94   : >> { %3515 = vrot.lane.b32.xlu1 %v9619_v3, %s7350_s2 }
 0xb96   : >> { %3529 = vrot.lane.b32.xlu0 %v9625_v49, %s7350_s2 }
 0xb98   : >> { %3531 = vrot.lane.b32.xlu1 %v9621_v26, %s7350_s2 }
 0xb9a   : >> { %3517 = vrot.lane.b32.xlu0 %v9647_v51, %s7350_s2 }
 0xb9c   : >> { %3519 = vrot.lane.b32.xlu1 %v9643_v8, %s7350_s2 }
 0xb9e   : >> { %3533 = vrot.lane.b32.xlu0 %v9649_v45, %s7350_s2 }
 0xba0   : >> { %3535 = vrot.lane.b32.xlu1 %v9645_v10, %s7350_s2 }
 0xba2   : >> { %3521 = vrot.lane.b32.xlu0 %v9671_v32, %s7350_s2 }
 0xba4   : >> { %3523 = vrot.lane.b32.xlu1 %v9667_v20, %s7350_s2 }
 0xba6   : >> { %3537 = vrot.lane.b32.xlu0 %v9673_v0, %s7350_s2 }
 0xba8   : >> { %3539 = vrot.lane.b32.xlu1 %v9669_v15, %s7350_s2 }
 0xbaa   : >> { %3598 = vrot.lane.b32.xlu0 %v9595_v21, %s7351_s16 }
 0xbac   : >> { %3600 = vrot.lane.b32.xlu1 %v9603_v1, %s7351_s16 }
 0xbae   : >> { %3614 = vrot.lane.b32.xlu0 %v9601_v61, %s7351_s16 }
 0xbb0   : >> { %3616 = vrot.lane.b32.xlu1 %v9605_v56, %s7351_s16 }
 0xbb2   : >> { %3602 = vrot.lane.b32.xlu0 %v9623_v6, %s7351_s16 }
 0xbb4   : >> { %3604 = vrot.lane.b32.xlu1 %v9619_v3, %s7351_s16 }
 0xbb6   : >> { %3618 = vrot.lane.b32.xlu0 %v9625_v49, %s7351_s16 }
 0xbb8   : >> { %3620 = vrot.lane.b32.xlu1 %v9621_v26, %s7351_s16 }
 0xbba   : >> { %v3332_v43 = vpop.permute.xlu0 %3331  ;;  %3606 = vrot.lane.b32.xlu0 %v9647_v51, %s7351_s16 }
 0xbbc   : >> { %3608 = vrot.lane.b32.xlu1 %v9643_v8, %s7351_s16 }
 0xbbe   : >> { %v3348_v53 = vpop.permute.xlu0 %3347  ;;  %v3334_v36 = vpop.permute.xlu1 %3333  ;;  %3622 = vrot.lane.b32.xlu0 %v9649_v45, %s7351_s16 }
 0xbbf   : >> { %v3364_v42 = vsel %vm3363_vm2, %v3332_v43, %v3348_v53  ;;  %v3372_v12 = vsel %vm3363_vm2, %v3348_v53, %v3332_v43 }
 0xbc0   : >> { %3624 = vrot.lane.b32.xlu1 %v9645_v10, %s7351_s16  ;;  %v3388_v28 = vmul.f32 %v9776_v25, %v3372_v12  ;;  %v3389_v31 = vmul.f32 %v9780_v52, %v3364_v42  ;;  %v3800_v50 = vmul.f32 %v9786_v54, %v3364_v42  ;;  %v3801_v62 = vmul.f32 %v9790_v48, %v3372_v12 }
 0xbc2   : >> { %v3350_v11 = vpop.permute.xlu1 %3349  ;;  %3610 = vrot.lane.b32.xlu0 %v9671_v32, %s7351_s16 }
 0xbc3   : >> { %v3365_v38 = vsel %vm3363_vm2, %v3334_v36, %v3350_v11  ;;  %v3373_v29 = vsel %vm3363_vm2, %v3350_v11, %v3334_v36 }
 0xbc4   : >> { %v3390_v47 = vmul.f32 %v9776_v25, %v3373_v29  ;;  %v3391_v33 = vmul.f32 %v9780_v52, %v3365_v38  ;;  %v3802_v7 = vmul.f32 %v9786_v54, %v3365_v38  ;;  %v3803_v27 = vmul.f32 %v9790_v48, %v3373_v29  ;;  %v3336_v39 = vpop.permute.xlu0 %3335  ;;  %3612 = vrot.lane.b32.xlu1 %v9667_v20, %s7351_s16 }
 0xbc6   : >> { %v3404_v18 = vpack.c.bf16 %v3390_v47, %v3388_v28  ;;  %v3405_v22 = vpack.c.bf16 %v3391_v33, %v3389_v31  ;;  %v3816_v37 = vpack.c.bf16 %v3802_v7, %v3800_v50  ;;  %v3817_v63 = vpack.c.bf16 %v3803_v27, %v3801_v62  ;;  %v3338_v43 = vpop.permute.xlu1 %3337  ;;  %3626 = vrot.lane.b32.xlu0 %v9673_v0, %s7351_s16 }
 0xbc8   : >> { %3824 = vst [vmem:[#allocation2 + $0x180] sm:$0xff] %v3816_v37  ;;  %3825 = vst [vmem:[#allocation2 + $0x188] sm:$0xff] %v3817_v63  ;;  %v3352_v5 = vpop.permute.xlu0 %3351  ;;  %3628 = vrot.lane.b32.xlu1 %v9669_v15, %s7351_s16  ;;  %4137 = vmatprep.subr.bf16.mxu0 %v3405_v22 }
 0xbc9   : >> { %v3366_v53 = vsel %vm3363_vm2, %v3336_v39, %v3352_v5  ;;  %v3374_v36 = vsel %vm3363_vm2, %v3352_v5, %v3336_v39  ;;  %4138 = vmatpush1.bf16.msra.mxu0 %v3404_v18 }
 0xbca   : >> { %v3392_v9 = vmul.f32 %v9776_v25, %v3374_v36  ;;  %v3393_v42 = vmul.f32 %v9780_v52, %v3366_v53  ;;  %v3354_v12 = vpop.permute.xlu1 %3353  ;;  %3703 = vrot.lane.b32.xlu0 %v9595_v21, %s7352_s29  ;;  %v3804_v28 = vmul.f32 %v9786_v54, %v3366_v53  ;;  %v3805_v31 = vmul.f32 %v9790_v48, %v3374_v36 }
 0xbcb   : >> { %v3367_v11 = vsel %vm3363_vm2, %v3338_v43, %v3354_v12  ;;  %v3375_v50 = vsel %vm3363_vm2, %v3354_v12, %v3338_v43 }
 0xbcc   : >> { %v3394_v62 = vmul.f32 %v9776_v25, %v3375_v50  ;;  %v3395_v38 = vmul.f32 %v9780_v52, %v3367_v11  ;;  %v3806_v29 = vmul.f32 %v9786_v54, %v3367_v11  ;;  %v3807_v19 = vmul.f32 %v9790_v48, %v3375_v50  ;;  %v3340_v47 = vpop.permute.xlu0 %3339  ;;  %3705 = vrot.lane.b32.xlu1 %v9603_v1, %s7352_s29 }
 0xbce   : >> { %v3406_v21 = vpack.c.bf16 %v3394_v62, %v3392_v9  ;;  %v3407_v33 = vpack.c.bf16 %v3395_v38, %v3393_v42  ;;  %v3818_v7 = vpack.c.bf16 %v3806_v29, %v3804_v28  ;;  %v3819_v27 = vpack.c.bf16 %v3807_v19, %v3805_v31  ;;  %v3342_v39 = vpop.permute.xlu1 %3341  ;;  %3719 = vrot.lane.b32.xlu0 %v9601_v61, %s7352_s29 }
 0xbd0   : >> { %3826 = vst [vmem:[#allocation2 + $0x190] sm:$0xff] %v3818_v7  ;;  %3827 = vst [vmem:[#allocation2 + $0x198] sm:$0xff] %v3819_v27  ;;  %v3356_v18 = vpop.permute.xlu0 %3355  ;;  %3721 = vrot.lane.b32.xlu1 %v9605_v56, %s7352_s29  ;;  %4139 = vmatprep.subr.bf16.mxu0 %v3407_v33 }
 0xbd1   : >> { %v3368_v22 = vsel %vm3363_vm2, %v3340_v47, %v3356_v18  ;;  %v3376_v1 = vsel %vm3363_vm2, %v3356_v18, %v3340_v47  ;;  %4140 = vmatpush1.bf16.msra.mxu0 %v3406_v21 }
 0xbd2   : >> { %v3396_v37 = vmul.f32 %v9776_v25, %v3376_v1  ;;  %v3397_v63 = vmul.f32 %v9780_v52, %v3368_v22  ;;  %v3358_v43 = vpop.permute.xlu1 %3357  ;;  %3707 = vrot.lane.b32.xlu0 %v9623_v6, %s7352_s29  ;;  %v3808_v61 = vmul.f32 %v9786_v54, %v3368_v22  ;;  %v3809_v56 = vmul.f32 %v9790_v48, %v3376_v1  ;;  %v11514_v1 = vld [vmem:[#allocation31_spill] sm:$0xff] }
 0xbd3   : >> { %v3369_v5 = vsel %vm3363_vm2, %v3342_v39, %v3358_v43  ;;  %v3377_v53 = vsel %vm3363_vm2, %v3358_v43, %v3342_v39 }
 0xbd4   : >> { %v3398_v36 = vmul.f32 %v9776_v25, %v3377_v53  ;;  %v3399_v9 = vmul.f32 %v9780_v52, %v3369_v5  ;;  %v3810_v42 = vmul.f32 %v9786_v54, %v3369_v5  ;;  %v3811_v12 = vmul.f32 %v9790_v48, %v3377_v53  ;;  %v3344_v28 = vpop.permute.xlu0 %3343  ;;  %3709 = vrot.lane.b32.xlu1 %v9619_v3, %s7352_s29  ;;  %v11517_v53 = vld [vmem:[#allocation36_spill] sm:$0xff] }
 0xbd6   : >> { %v3408_v6 = vpack.c.bf16 %v3398_v36, %v3396_v37  ;;  %v3409_v31 = vpack.c.bf16 %v3399_v9, %v3397_v63  ;;  %v3820_v11 = vpack.c.bf16 %v3810_v42, %v3808_v61  ;;  %v3821_v50 = vpack.c.bf16 %v3811_v12, %v3809_v56  ;;  %3723 = vrot.lane.b32.xlu0 %v9625_v49, %s7352_s29  ;;  %v3346_v62 = vpop.permute.xlu1 %3345 }
 0xbd7   : >> { %v9894_v37 = vrot.slane %v11511_v14, %v11514_v1  ;;  %v9898_v63 = vrot.slane %v11512_v44, %v11514_v1  ;;  %v9906_v36 = vrot.slane %v11511_v14, %v11517_v53  ;;  %v9910_v9 = vrot.slane %v11512_v44, %v11517_v53  ;;  %v6069_v53 = vld [vmem:[%s9569_s18 + $0x40] sm:$0xff] }
 0xbd8   : >> { %3828 = vst [vmem:[#allocation2 + $0x1a0] sm:$0xff] %v3820_v11  ;;  %3829 = vst [vmem:[#allocation2 + $0x1a8] sm:$0xff] %v3821_v50  ;;  %v3360_v38 = vpop.permute.xlu0 %3359  ;;  %3725 = vrot.lane.b32.xlu1 %v9621_v26, %s7352_s29  ;;  %4141 = vmatprep.subr.bf16.mxu0 %v3409_v31 }
 0xbd9   : >> { %v3370_v29 = vsel %vm3363_vm2, %v3344_v28, %v3360_v38  ;;  %v3378_v3 = vsel %vm3363_vm2, %v3360_v38, %v3344_v28  ;;  %4142 = vmatpush1.bf16.msra.mxu0 %v3408_v6  ;;  %11515 = vst [vmem:[#allocation56_spill] sm:$0xff] %v9894_v37  ;;  %11516 = vst [vmem:[#allocation57_spill] sm:$0xff] %v9898_v63 }
 0xbda   : >> { %v3400_v19 = vmul.f32 %v9776_v25, %v3378_v3  ;;  %v3401_v47 = vmul.f32 %v9780_v52, %v3370_v29  ;;  %3711 = vrot.lane.b32.xlu0 %v9647_v51, %s7352_s29  ;;  %v3362_v49 = vpop.permute.xlu1 %3361  ;;  %v3812_v21 = vmul.f32 %v9786_v54, %v3370_v29  ;;  %v9877_v26 = vmul.f32 %v9790_v48, %v3378_v3 }
 0xbdb   : >> { %v3371_v33 = vsel %vm3363_vm2, %v3346_v62, %v3362_v49  ;;  %v3379_v7 = vsel %vm3363_vm2, %v3362_v49, %v3346_v62  ;;  %11518 = vst [vmem:[#allocation58_spill] sm:$0xff] %v9906_v36  ;;  %11519 = vst [vmem:[#allocation59_spill] sm:$0xff] %v9910_v9 }
 0xbdc   : >> { %v3402_v27 = vmul.f32 %v9776_v25, %v3379_v7  ;;  %v3403_v39 = vmul.f32 %v9780_v52, %v3371_v33  ;;  %v3814_v18 = vmul.f32 %v9786_v54, %v3371_v33  ;;  %v9887_v51 = vmul.f32 %v9790_v48, %v3379_v7  ;;  %v3421_v22 = vpop.permute.xlu0 %3420  ;;  %3713 = vrot.lane.b32.xlu1 %v9643_v8, %s7352_s29 }
 0xbde   : >> { %v3410_v43 = vpack.c.bf16 %v3402_v27, %v3400_v19  ;;  %v3411_v61 = vpack.c.bf16 %v3403_v39, %v3401_v47  ;;  %v3822_v56 = vpack.c.bf16 %v3814_v18, %v3812_v21  ;;  %3727 = vrot.lane.b32.xlu0 %v9649_v45, %s7352_s29  ;;  %v3423_v8 = vpop.permute.xlu1 %3422 }
 0xbe0   : >> { %3830 = vst [vmem:[#allocation2 + $0x1b0] sm:$0xff] %v3822_v56  ;;  %v3437_v42 = vpop.permute.xlu0 %3436  ;;  %3729 = vrot.lane.b32.xlu1 %v9645_v10, %s7352_s29  ;;  %4143 = vmatprep.subr.bf16.mxu0 %v3411_v61 }
 0xbe1   : >> { %v3453_v12 = vsel %vm3452_vm3, %v3421_v22, %v3437_v42  ;;  %v3461_v45 = vsel %vm3452_vm3, %v3437_v42, %v3421_v22  ;;  %4144 = vmatpush1.bf16.msra.mxu0 %v3410_v43  ;;  %v3324_v22 = vld [vmem:[%s9946_s28 + $0x8] sm:$0xff] }
 0xbe2   : >> { %v3477_v28 = vmul.f32 %v9894_v37, %v3461_v45  ;;  %v3478_v6 = vmul.f32 %v9898_v63, %v3453_v12  ;;  %3715 = vrot.lane.b32.xlu0 %v9671_v32, %s7352_s29  ;;  %v3439_v31 = vpop.permute.xlu1 %3438  ;;  %v9923_v11 = vmul.f32 %v9906_v36, %v3453_v12  ;;  %v9926_v10 = vmul.f32 %v9910_v9, %v3461_v45 }
 0xbe3   : >> { %v3454_v50 = vsel %vm3452_vm3, %v3423_v8, %v3439_v31  ;;  %v3462_v62 = vsel %vm3452_vm3, %v3439_v31, %v3423_v8  ;;  %v6070_v31 = vld [vmem:[%s9569_s18 + $0x48] sm:$0xff] }
 0xbe4   : >> { %v3479_v38 = vmul.f32 %v9894_v37, %v3462_v62  ;;  %v3480_v29 = vmul.f32 %v9898_v63, %v3454_v50  ;;  %v9935_v3 = vmul.f32 %v9906_v36, %v3454_v50  ;;  %v9938_v32 = vmul.f32 %v9910_v9, %v3462_v62  ;;  %v3425_v19 = vpop.permute.xlu0 %3424  ;;  %3717 = vrot.lane.b32.xlu1 %v9667_v20, %s7352_s29  ;;  %v3323_v20 = vld [vmem:[%s9946_s28] sm:$0xff] }
 0xbe6   : >> { %v3493_v47 = vpack.c.bf16 %v3479_v38, %v3477_v28  ;;  %v3494_v49 = vpack.c.bf16 %v3480_v29, %v3478_v6  ;;  %3731 = vrot.lane.b32.xlu0 %v9673_v0, %s7352_s29  ;;  %v3427_v7 = vpop.permute.xlu1 %3426  ;;  %v6081_v29 = vld [vmem:[%s9563_s1 + $0x50] sm:$0xff] }
 0xbe8   : >> { %v3441_v27 = vpop.permute.xlu0 %3440  ;;  %3733 = vrot.lane.b32.xlu1 %v9669_v15, %s7352_s29  ;;  %4145 = vmatprep.subr.bf16.mxu0 %v3494_v49 }
 0xbe9   : >> { %v3455_v39 = vsel %vm3452_vm3, %v3425_v19, %v3441_v27  ;;  %v3463_v18 = vsel %vm3452_vm3, %v3441_v27, %v3425_v19  ;;  %4146 = vmatpush1.bf16.msra.mxu0 %v3493_v47  ;;  %v3325_v47 = vld [vmem:[%s9946_s28 + $0x10] sm:$0xff]  ;;  %v3326_v27 = vld [vmem:[%s9946_s28 + $0x18] sm:$0xff] }
 0xbea   : >> { %v3481_v1 = vmul.f32 %v9894_v37, %v3463_v18  ;;  %v3482_v0 = vmul.f32 %v9898_v63, %v3455_v39  ;;  %3986 = vperm.xlu0 %6712, %v3323_v20   ;;  %v3443_v43 = vpop.permute.xlu1 %3442  ;;  %v9965_v61 = vmul.f32 %v9906_v36, %v3455_v39  ;;  %v9968_v15 = vmul.f32 %v9910_v9, %v3463_v18 }
 0xbeb   : >> { %v3456_v56 = vsel %vm3452_vm3, %v3427_v7, %v3443_v43  ;;  %v3464_v8 = vsel %vm3452_vm3, %v3443_v43, %v3427_v7 }
 0xbec   : >> { %v3483_v42 = vmul.f32 %v9894_v37, %v3464_v8  ;;  %v3484_v12 = vmul.f32 %v9898_v63, %v3456_v56  ;;  %v9978_v45 = vmul.f32 %v9906_v36, %v3456_v56  ;;  %v9981_v28 = vmul.f32 %v9910_v9, %v3464_v8  ;;  %v3429_v6 = vpop.permute.xlu0 %3428  ;;  %3991 = vperm.xlu1 %6713, %v3324_v22   ;;  %v6079_v8 = vld [vmem:[%s9563_s1 + $0x40] sm:$0xff] }
 0xbee   : >> { %v3495_v50 = vpack.c.bf16 %v3483_v42, %v3481_v1  ;;  %v3496_v62 = vpack.c.bf16 %v3484_v12, %v3482_v0  ;;  %4369 = vperm.xlu0 %6712, %v6069_v53   ;;  %v3431_v19 = vpop.permute.xlu1 %3430 }
 0xbf0   : >> { %v3445_v49 = vpop.permute.xlu0 %3444  ;;  %4374 = vperm.xlu1 %6713, %v6070_v31   ;;  %4147 = vmatprep.subr.bf16.mxu0 %v3496_v62 }
 0xbf1   : >> { %v3457_v7 = vsel %vm3452_vm3, %v3429_v6, %v3445_v49  ;;  %v3465_v20 = vsel %vm3452_vm3, %v3445_v49, %v3429_v6  ;;  %4148 = vmatpush1.bf16.msra.mxu0 %v3495_v50  ;;  %v6080_v50 = vld [vmem:[%s9563_s1 + $0x48] sm:$0xff] }
 0xbf2   : >> { %v3485_v39 = vmul.f32 %v9894_v37, %v3465_v20  ;;  %v3486_v18 = vmul.f32 %v9898_v63, %v3457_v7  ;;  %3996 = vperm.xlu0 %6712, %v3325_v47   ;;  %v3447_v22 = vpop.permute.xlu1 %3446  ;;  %v9997_v1 = vmul.f32 %v9906_v36, %v3457_v7  ;;  %v10000_v0 = vmul.f32 %v9910_v9, %v3465_v20  ;;  %v6071_v20 = vld [vmem:[%s9569_s18 + $0x50] sm:$0xff] }
 0xbf3   : >> { %v3458_v43 = vsel %vm3452_vm3, %v3431_v19, %v3447_v22  ;;  %v3466_v56 = vsel %vm3452_vm3, %v3447_v22, %v3431_v19  ;;  %v3328_v19 = vld [vmem:[%s9946_s28 + $0x28] sm:$0xff] }
 0xbf4   : >> { %v3487_v53 = vmul.f32 %v9894_v37, %v3466_v56  ;;  %v3488_v42 = vmul.f32 %v9898_v63, %v3458_v43  ;;  %v10010_v12 = vmul.f32 %v9906_v36, %v3458_v43  ;;  %v10013_v6 = vmul.f32 %v9910_v9, %v3466_v56  ;;  %v3433_v31 = vpop.permute.xlu0 %3432  ;;  %4001 = vperm.xlu1 %6713, %v3326_v27  }
 0xbf6   : >> { %v3497_v62 = vpack.c.bf16 %v3487_v53, %v3485_v39  ;;  %v3498_v47 = vpack.c.bf16 %v3488_v42, %v3486_v18  ;;  %4434 = vperm.xlu0 %6712, %v6079_v8   ;;  %v3435_v7 = vpop.permute.xlu1 %3434  ;;  %v6072_v39 = vld [vmem:[%s9569_s18 + $0x58] sm:$0xff] }
 0xbf8   : >> { %v3449_v22 = vpop.permute.xlu0 %3448  ;;  %4439 = vperm.xlu1 %6713, %v6080_v50   ;;  %4149 = vmatprep.subr.bf16.mxu0 %v3498_v47 }
 0xbf9   : >> { %v3459_v43 = vsel %vm3452_vm3, %v3433_v31, %v3449_v22  ;;  %v3467_v27 = vsel %vm3452_vm3, %v3449_v22, %v3433_v31  ;;  %4150 = vmatpush1.bf16.msra.mxu0 %v3497_v62  ;;  %v3327_v62 = vld [vmem:[%s9946_s28 + $0x20] sm:$0xff] }
 0xbfa   : >> { %v3489_v18 = vmul.f32 %v9894_v37, %v3467_v27  ;;  %v3490_v56 = vmul.f32 %v9898_v63, %v3459_v43  ;;  %4379 = vperm.xlu0 %6712, %v6071_v20   ;;  %v3451_v8 = vpop.permute.xlu1 %3450  ;;  %v10029_v53 = vmul.f32 %v9906_v36, %v3459_v43  ;;  %v10032_v42 = vmul.f32 %v9910_v9, %v3467_v27 }
 0xbfb   : >> { %v3460_v50 = vsel %vm3452_vm3, %v3435_v7, %v3451_v8  ;;  %v3468_v31 = vsel %vm3452_vm3, %v3451_v8, %v3435_v7  ;;  %v10050_v7 = vrot.slane %v11511_v14, %v11521_v2  ;;  %v10054_v8 = vrot.slane %v11512_v44, %v11521_v2 }
 0xbfc   : >> { %v3491_v47 = vmul.f32 %v9894_v37, %v3468_v31  ;;  %v3492_v20 = vmul.f32 %v9898_v63, %v3460_v50  ;;  %v10042_v22 = vmul.f32 %v9906_v36, %v3460_v50  ;;  %v10045_v43 = vmul.f32 %v9910_v9, %v3468_v31  ;;  %v3510_v27 = vpop.permute.xlu0 %3509  ;;  %4384 = vperm.xlu1 %6713, %v6072_v39   ;;  %v11524_v31 = vld [vmem:[#allocation27_spill] sm:$0xff]  ;;  %v6717_v9 = vld [vmem:[%s9579_s24 + $0x2c] ss:$20 sps:$4 sm:$0xff]   ;;  %v6722_v37 = vld [vmem:[%s9579_s24 + $0x50] ss:$20 sps:$4 sm:$0xff]  }
 0xbfd   : >> { %11522 = vst [vmem:[#allocation60_spill] sm:$0xff] %v10050_v7  ;;  %11523 = vst [vmem:[#allocation61_spill] sm:$0xff] %v10054_v8 }
 0xbfe   : >> { %v3499_v49 = vpack.c.bf16 %v3491_v47, %v3489_v18  ;;  %v3500_v50 = vpack.c.bf16 %v3492_v20, %v3490_v56  ;;  %4006 = vperm.xlu0 %6712, %v3327_v62   ;;  %v3512_v38 = vpop.permute.xlu1 %3511  ;;  %v6082_v56 = vld [vmem:[%s9563_s1 + $0x58] sm:$0xff] }
 0xc00   : >> { %v3526_v21 = vpop.permute.xlu0 %3525  ;;  %4011 = vperm.xlu1 %6713, %v3328_v19   ;;  %4151 = vmatprep.subr.bf16.mxu0 %v3500_v50  ;;  %v11525_v19 = vld [vmem:[#allocation28_spill] sm:$0xff] }
 0xc01   : >> { %v3542_v2 = vsel %vm3541_vm4, %v3510_v27, %v3526_v21  ;;  %v3550_v18 = vsel %vm3541_vm4, %v3526_v21, %v3510_v27  ;;  %4152 = vmatpush1.bf16.msra.mxu0 %v3499_v49  ;;  %v6073_v49 = vld [vmem:[%s9569_s18 + $0x60] sm:$0xff] }
 0xc02   : >> { %v3566_v47 = vmul.f32 %v10050_v7, %v3550_v18  ;;  %v3567_v20 = vmul.f32 %v10054_v8, %v3542_v2  ;;  %4444 = vperm.xlu0 %6712, %v6081_v29   ;;  %v3528_v62 = vpop.permute.xlu1 %3527  ;;  %v10070_v39 = vmul.f32 %v11524_v31, %v3542_v2  ;;  %v10073_v50 = vmul.f32 %v11525_v19, %v3550_v18 }
 0xc03   : >> { %v3543_v33 = vsel %vm3541_vm4, %v3512_v38, %v3528_v62  ;;  %v3551_v21 = vsel %vm3541_vm4, %v3528_v62, %v3512_v38  ;;  %v6084_v62 = vld [vmem:[%s9563_s1 + $0x68] sm:$0xff] }
 0xc04   : >> { %v3568_v27 = vmul.f32 %v10050_v7, %v3551_v21  ;;  %v3569_v5 = vmul.f32 %v10054_v8, %v3543_v33  ;;  %v10083_v29 = vmul.f32 %v11524_v31, %v3543_v33  ;;  %v10086_v2 = vmul.f32 %v11525_v19, %v3551_v21  ;;  %v3514_v18 = vpop.permute.xlu0 %3513  ;;  %4449 = vperm.xlu1 %6713, %v6082_v56  }
 0xc06   : >> { %v3582_v40 = vpack.c.bf16 %v3568_v27, %v3566_v47  ;;  %v3583_v41 = vpack.c.bf16 %v3569_v5, %v3567_v20  ;;  %4389 = vperm.xlu0 %6712, %v6073_v49   ;;  %v3516_v59 = vpop.permute.xlu1 %3515  ;;  %v3330_v5 = vld [vmem:[%s9946_s28 + $0x38] sm:$0xff] }
 0xc08   : >> { %v3530_v33 = vpop.permute.xlu0 %3529  ;;  %4394 = vperm.xlu1 %6713, %v6074_v35   ;;  %4153 = vmatprep.subr.bf16.mxu0 %v3583_v41 }
 0xc09   : >> { %v3544_v21 = vsel %vm3541_vm4, %v3514_v18, %v3530_v33  ;;  %v3552_v56 = vsel %vm3541_vm4, %v3530_v33, %v3514_v18  ;;  %4154 = vmatpush1.bf16.msra.mxu0 %v3582_v40  ;;  %v6083_v18 = vld [vmem:[%s9563_s1 + $0x60] sm:$0xff] }
 0xc0a   : >> { %v3570_v47 = vmul.f32 %v10050_v7, %v3552_v56  ;;  %v3571_v20 = vmul.f32 %v10054_v8, %v3544_v21  ;;  %4016 = vperm.xlu0 %6712, %v3329_v60   ;;  %v3532_v49 = vpop.permute.xlu1 %3531  ;;  %v10102_v27 = vmul.f32 %v11524_v31, %v3544_v21  ;;  %v10105_v35 = vmul.f32 %v11525_v19, %v3552_v56 }
 0xc0b   : >> { %v3545_v41 = vsel %vm3541_vm4, %v3516_v59, %v3532_v49  ;;  %v3553_v40 = vsel %vm3541_vm4, %v3532_v49, %v3516_v59 }
 0xc0c   : >> { %v3572_v33 = vmul.f32 %v10050_v7, %v3553_v40  ;;  %v3573_v38 = vmul.f32 %v10054_v8, %v3545_v41  ;;  %v10115_v60 = vmul.f32 %v11524_v31, %v3545_v41  ;;  %v10118_v21 = vmul.f32 %v11525_v19, %v3553_v40  ;;  %v3518_v56 = vpop.permute.xlu0 %3517  ;;  %4021 = vperm.xlu1 %6713, %v3330_v5  }
 0xc0e   : >> { %v3584_v30 = vpack.c.bf16 %v3572_v33, %v3570_v47  ;;  %v3585_v55 = vpack.c.bf16 %v3573_v38, %v3571_v20  ;;  %4454 = vperm.xlu0 %6712, %v6083_v18   ;;  %v3520_v4 = vpop.permute.xlu1 %3519  ;;  %v6076_v38 = vld [vmem:[%s9569_s18 + $0x78] sm:$0xff] }
 0xc10   : >> { %v3534_v41 = vpop.permute.xlu0 %3533  ;;  %4459 = vperm.xlu1 %6713, %v6084_v62   ;;  %4155 = vmatprep.subr.bf16.mxu0 %v3585_v55 }
 0xc11   : >> { %v3546_v40 = vsel %vm3541_vm4, %v3518_v56, %v3534_v41  ;;  %v3554_v5 = vsel %vm3541_vm4, %v3534_v41, %v3518_v56  ;;  %4156 = vmatpush1.bf16.msra.mxu0 %v3584_v30  ;;  %v6085_v30 = vld [vmem:[%s9563_s1 + $0x70] sm:$0xff] }
 0xc12   : >> { %v3574_v47 = vmul.f32 %v10050_v7, %v3554_v5  ;;  %v3575_v20 = vmul.f32 %v10054_v8, %v3546_v40  ;;  %4399 = vperm.xlu0 %6712, %v6075_v13   ;;  %v3536_v18 = vpop.permute.xlu1 %3535  ;;  %v10134_v33 = vmul.f32 %v11524_v31, %v3546_v40  ;;  %v10137_v55 = vmul.f32 %v11525_v19, %v3554_v5  ;;  %v6086_v5 = vld [vmem:[%s9563_s1 + $0x78] sm:$0xff] }
 0xc13   : >> { %v3547_v62 = vsel %vm3541_vm4, %v3520_v4, %v3536_v18  ;;  %v3555_v56 = vsel %vm3541_vm4, %v3536_v18, %v3520_v4 }
 0xc14   : >> { %v3576_v41 = vmul.f32 %v10050_v7, %v3555_v56  ;;  %v3577_v59 = vmul.f32 %v10054_v8, %v3547_v62  ;;  %v10147_v13 = vmul.f32 %v11524_v31, %v3547_v62  ;;  %v10150_v40 = vmul.f32 %v11525_v19, %v3555_v56  ;;  %v3522_v49 = vpop.permute.xlu0 %3521  ;;  %4404 = vperm.xlu1 %6713, %v6076_v38  }
 0xc16   : >> { %v3586_v17 = vpack.c.bf16 %v3576_v41, %v3574_v47  ;;  %v3587_v57 = vpack.c.bf16 %v3577_v59, %v3575_v20  ;;  %4464 = vperm.xlu0 %6712, %v6085_v30   ;;  %v3524_v18 = vpop.permute.xlu1 %3523 }
 0xc18   : >> { %v3538_v16 = vpop.permute.xlu0 %3537  ;;  %4469 = vperm.xlu1 %6713, %v6086_v5   ;;  %4157 = vmatprep.subr.bf16.mxu0 %v3587_v57 }
 0xc19   : >> { %v3548_v62 = vsel %vm3541_vm4, %v3522_v49, %v3538_v16  ;;  %v3556_v38 = vsel %vm3541_vm4, %v3538_v16, %v3522_v49  ;;  %4158 = vmatpush1.bf16.msra.mxu0 %v3586_v17 }
 0xc1a   : >> { %v3578_v59 = vmul.f32 %v10050_v7, %v3556_v38  ;;  %v3579_v47 = vmul.f32 %v10054_v8, %v3548_v62  ;;  %v3540_v20 = vpop.permute.xlu1 %3539  ;;  %v10164_v56 = vmul.f32 %v11524_v31, %v3548_v62  ;;  %v10167_v30 = vmul.f32 %v11525_v19, %v3556_v38 }
 0xc1b   : >> { %v3549_v57 = vsel %vm3541_vm4, %v3524_v18, %v3540_v20  ;;  %v3557_v41 = vsel %vm3541_vm4, %v3540_v20, %v3524_v18 }
 0xc1c   : >> { %v3580_v16 = vmul.f32 %v10050_v7, %v3557_v41  ;;  %v3581_v17 = vmul.f32 %v10054_v8, %v3549_v57  ;;  %v10176_v49 = vmul.f32 %v11524_v31, %v3549_v57  ;;  %v10179_v5 = vmul.f32 %v11525_v19, %v3557_v41  ;;  %v3599_v62 = vpop.permute.xlu0 %3598  ;;  %v3945_v7 = vld [vmem:[#allocation2 + $0x108] sm:$0xff] }
 0xc1d   : >> { %v10192_v57 = vrot.slane %v11512_v44, %v11526_v58 }
 0xc1e   : >> { %v3588_v38 = vpack.c.bf16 %v3580_v16, %v3578_v59  ;;  %v3589_v34 = vpack.c.bf16 %v3581_v17, %v3579_v47  ;;  %v3601_v20 = vpop.permute.xlu1 %3600 }
 0xc1f   : >> { %11528 = vst [vmem:[#allocation63_spill] sm:$0xff] %v10192_v57 }
 0xc20   : >> { %v3615_v41 = vpop.permute.xlu0 %3614  ;;  %4159 = vmatprep.subr.bf16.mxu0 %v3589_v34 }
 0xc21   : >> { %v3631_v59 = vsel %vm3630_vm5, %v3599_v62, %v3615_v41  ;;  %v3639_v47 = vsel %vm3630_vm5, %v3615_v41, %v3599_v62  ;;  %4160 = vmatpush1.bf16.msra.mxu0 %v3588_v38 }
 0xc22   : >> { %v3617_v16 = vpop.permute.xlu1 %3616  ;;  %v3655_v18 = vmul.f32 %v10188_v23, %v3639_v47  ;;  %v3656_v58 = vmul.f32 %v10192_v57, %v3631_v59 }
 0xc23   : >> { %v3632_v17 = vsel %vm3630_vm5, %v3601_v20, %v3617_v16  ;;  %v3640_v4 = vsel %vm3630_vm5, %v3617_v16, %v3601_v20 }
 0xc24   : >> { %v3657_v34 = vmul.f32 %v10188_v23, %v3640_v4  ;;  %v3658_v46 = vmul.f32 %v10192_v57, %v3632_v17  ;;  %v3603_v19 = vpop.permute.xlu0 %3602 }
 0xc26   : >> { %v3671_v31 = vpack.c.bf16 %v3657_v34, %v3655_v18  ;;  %v3672_v8 = vpack.c.bf16 %v3658_v46, %v3656_v58  ;;  %v3605_v62 = vpop.permute.xlu1 %3604 }
 0xc28   : >> { %v3619_v38 = vpop.permute.xlu0 %3618  ;;  %4161 = vmatprep.subr.bf16.mxu0 %v3672_v8 }
 0xc29   : >> { %v3633_v41 = vsel %vm3630_vm5, %v3603_v19, %v3619_v38  ;;  %v3641_v20 = vsel %vm3630_vm5, %v3619_v38, %v3603_v19  ;;  %4162 = vmatpush1.bf16.msra.mxu0 %v3671_v31 }
 0xc2a   : >> { %v3621_v47 = vpop.permute.xlu1 %3620  ;;  %v3659_v18 = vmul.f32 %v10188_v23, %v3641_v20  ;;  %v3660_v46 = vmul.f32 %v10192_v57, %v3633_v41 }
 0xc2b   : >> { %v3634_v59 = vsel %vm3630_vm5, %v3605_v62, %v3621_v47  ;;  %v3642_v4 = vsel %vm3630_vm5, %v3621_v47, %v3605_v62 }
 0xc2c   : >> { %v3661_v8 = vmul.f32 %v10188_v23, %v3642_v4  ;;  %v3662_v16 = vmul.f32 %v10192_v57, %v3634_v59  ;;  %v3607_v17 = vpop.permute.xlu0 %3606 }
 0xc2e   : >> { %v3673_v58 = vpack.c.bf16 %v3661_v8, %v3659_v18  ;;  %v3674_v34 = vpack.c.bf16 %v3662_v16, %v3660_v46  ;;  %v3609_v19 = vpop.permute.xlu1 %3608 }
 0xc30   : >> { %v3623_v31 = vpop.permute.xlu0 %3622  ;;  %4163 = vmatprep.subr.bf16.mxu0 %v3674_v34 }
 0xc31   : >> { %v3635_v38 = vsel %vm3630_vm5, %v3607_v17, %v3623_v31  ;;  %v3643_v62 = vsel %vm3630_vm5, %v3623_v31, %v3607_v17  ;;  %4164 = vmatpush1.bf16.msra.mxu0 %v3673_v58 }
 0xc32   : >> { %v3625_v20 = vpop.permute.xlu1 %3624  ;;  %v3663_v59 = vmul.f32 %v10188_v23, %v3643_v62  ;;  %v3664_v4 = vmul.f32 %v10192_v57, %v3635_v38 }
 0xc33   : >> { %v3636_v41 = vsel %vm3630_vm5, %v3609_v19, %v3625_v20  ;;  %v3644_v47 = vsel %vm3630_vm5, %v3625_v20, %v3609_v19 }
 0xc34   : >> { %v3665_v18 = vmul.f32 %v10188_v23, %v3644_v47  ;;  %v3666_v46 = vmul.f32 %v10192_v57, %v3636_v41  ;;  %v3611_v8 = vpop.permute.xlu0 %3610 }
 0xc36   : >> { %v3675_v16 = vpack.c.bf16 %v3665_v18, %v3663_v59  ;;  %v3676_v34 = vpack.c.bf16 %v3666_v46, %v3664_v4  ;;  %v3613_v17 = vpop.permute.xlu1 %3612 }
 0xc38   : >> { %v3627_v58 = vpop.permute.xlu0 %3626  ;;  %4165 = vmatprep.subr.bf16.mxu0 %v3676_v34 }
 0xc39   : >> { %v3637_v31 = vsel %vm3630_vm5, %v3611_v8, %v3627_v58  ;;  %v3645_v19 = vsel %vm3630_vm5, %v3627_v58, %v3611_v8  ;;  %4166 = vmatpush1.bf16.msra.mxu0 %v3675_v16  ;;  %v6714_v58 = vld [vmem:[%s9579_s24] ss:$20 sps:$4 sm:$0xff]  }
 0xc3a   : >> { %v3629_v62 = vpop.permute.xlu1 %3628  ;;  %v3667_v41 = vmul.f32 %v10188_v23, %v3645_v19  ;;  %v3668_v47 = vmul.f32 %v10192_v57, %v3637_v31  ;;  %v3944_v31 = vld [vmem:[#allocation2 + $0x100] sm:$0xff] }
 0xc3b   : >> { %v3638_v38 = vsel %vm3630_vm5, %v3613_v17, %v3629_v62  ;;  %v3646_v20 = vsel %vm3630_vm5, %v3629_v62, %v3613_v17  ;;  %v3947_v62 = vld [vmem:[#allocation2 + $0x118] sm:$0xff] }
 0xc3c   : >> { %v3669_v59 = vmul.f32 %v10188_v23, %v3646_v20  ;;  %v3670_v4 = vmul.f32 %v10192_v57, %v3638_v38  ;;  %v3704_v18 = vpop.permute.xlu0 %3703  ;;  %v3948_v23 = vld [vmem:[#allocation2 + $0x120] sm:$0xff] }
 0xc3e   : >> { %v3677_v46 = vpack.c.bf16 %v3669_v59, %v3667_v41  ;;  %v3678_v8 = vpack.c.bf16 %v3670_v4, %v3668_v47  ;;  %v3706_v16 = vpop.permute.xlu1 %3705  ;;  %v3946_v41 = vld [vmem:[#allocation2 + $0x110] sm:$0xff]  ;;  %v6719_v47 = vld [vmem:[%s9579_s24 + $0x28] ss:$20 sps:$4 sm:$0xff]  }
 0xc3f   : >> { %v3949_v4 = vld [vmem:[#allocation2 + $0x128] sm:$0xff] }
 0xc40   : >> { %v3720_v34 = vpop.permute.xlu0 %3719  ;;  %4167 = vmatprep.subr.bf16.mxu0 %v3678_v8 }
 0xc41   : >> { %4168 = vmatpush1.bf16.msra.mxu0 %v3677_v46  ;;  %v11529_v46 = vld [vmem:[#allocation34_spill] sm:$0xff] }
 0xc42   : >> { %v3722_v17 = vpop.permute.xlu1 %3721  ;;  %4210 = vmatprep.subr.bf16.mxu0 %v3945_v7  ;;  %v6720_v7 = vld [vmem:[%s9579_s24 + $0x54] ss:$20 sps:$4 sm:$0xff]   ;;  %v10251_v8 = vrot.slane %v11512_v44, %v11529_v46 }
 0xc43   : >> { %v3745_v59 = vsel %vm3735_vm6, %v3722_v17, %v3706_v16 }
 0xc44   : >> { %v3708_v19 = vpop.permute.xlu0 %3707  ;;  %4170 = vmatmul.mubr.bf16.vlgmr.msra.gmra.mrb[0].mxu0 %v6714_v58 }
 0xc45   : >> { %4211 = vmatpush1.bf16.msra.mxu0 %v3944_v31  ;;  %4179 = vmatprep.mubr.bf16.mxu0 %v6717_v9  ;;  %v3744_v9 = vsel %vm3735_vm6, %v3720_v34, %v3704_v18  ;;  %v3737_v31 = vsel %vm3735_vm6, %v3706_v16, %v3722_v17  ;;  %v3736_v16 = vsel %vm3735_vm6, %v3704_v18, %v3720_v34  ;;  %v6723_v34 = vld [vmem:[%s9579_s24 + $0x7c] ss:$20 sps:$4 sm:$0xff]  }
 0xc46   : >> { %v3710_v38 = vpop.permute.xlu1 %3709  ;;  %4212 = vmatprep.subr.bf16.mxu0 %v3947_v62  ;;  %v3763_v62 = vmul.f32 %v10251_v8, %v3745_v59  ;;  %v3761_v17 = vmul.f32 %v10251_v8, %v3744_v9 }
 0xc48   : >> { %v3724_v20 = vpop.permute.xlu0 %3723 }
 0xc49   : >> { %4213 = vmatpush1.bf16.msra.mxu0 %v3946_v41  ;;  %v10260_v41 = vrot.slane %v11511_v14, %v11529_v46  ;;  %v3746_v46 = vsel %vm3735_vm6, %v3724_v20, %v3708_v19  ;;  %v3777_v14 = vpack.c.bf16 %v3763_v62, %v3761_v17  ;;  %v3738_v9 = vsel %vm3735_vm6, %v3708_v19, %v3724_v20 }
 0xc4a   : >> { %v3726_v58 = vpop.permute.xlu1 %3725  ;;  %4214 = vmatprep.subr.bf16.mxu0 %v3949_v4  ;;  %v3951_v4 = vld [vmem:[#allocation2 + $0x138] sm:$0xff] }
 0xc4b   : >> { %v3747_v44 = vsel %vm3735_vm6, %v3726_v58, %v3710_v38  ;;  %v3739_v36 = vsel %vm3735_vm6, %v3710_v38, %v3726_v58  ;;  %v3760_v18 = vmul.f32 %v10260_v41, %v3736_v16 }
 0xc4c   : >> { %v3712_v57 = vpop.permute.xlu0 %3711  ;;  %4180 = vmatmul.mubr.bf16.gmra.mrb[4].mxu0 %v6719_v47  ;;  %v3762_v47 = vmul.f32 %v10260_v41, %v3737_v31  ;;  %v3765_v31 = vmul.f32 %v10251_v8, %v3746_v46  ;;  %v3766_v17 = vmul.f32 %v10260_v41, %v3739_v36 }
 0xc4d   : >> { %4215 = vmatpush1.bf16.msra.mxu0 %v3948_v23  ;;  %4189 = vmatprep.mubr.bf16.mxu0 %v6720_v7  ;;  %v3767_v23 = vmul.f32 %v10251_v8, %v3747_v44  ;;  %v3950_v7 = vld [vmem:[#allocation2 + $0x130] sm:$0xff] }
 0xc4e   : >> { %v3714_v59 = vpop.permute.xlu1 %3713  ;;  %4216 = vmatprep.subr.bf16.mxu0 %v3951_v4  ;;  %v3776_v62 = vpack.c.bf16 %v3762_v47, %v3760_v18 }
 0xc4f   : >> { %v3779_v58 = vpack.c.bf16 %v3767_v23, %v3765_v31  ;;  %v6725_v31 = vld [vmem:[%s9579_s24 + $0x78] ss:$20 sps:$4 sm:$0xff]  }
 0xc50   : >> { %v3728_v63 = vpop.permute.xlu0 %3727 }
 0xc51   : >> { %4217 = vmatpush1.bf16.msra.mxu0 %v3950_v7  ;;  %v3748_v44 = vsel %vm3735_vm6, %v3728_v63, %v3712_v57  ;;  %v3740_v36 = vsel %vm3735_vm6, %v3712_v57, %v3728_v63  ;;  %v6728_v63 = vld [vmem:[%s9579_s24 + $0xc] ss:$20 sps:$4 sm:$0xff]  }
 0xc52   : >> { %v3730_v4 = vpop.permute.xlu1 %3729  ;;  %4218 = vmatprep.subr.bf16.mxu0 %v3777_v14  ;;  %v3764_v14 = vmul.f32 %v10260_v41, %v3738_v9  ;;  %v3769_v47 = vmul.f32 %v10251_v8, %v3748_v44 }
 0xc53   : >> { %v3749_v38 = vsel %vm3735_vm6, %v3730_v4, %v3714_v59  ;;  %v3741_v16 = vsel %vm3735_vm6, %v3714_v59, %v3730_v4 }
 0xc54   : >> { %v3771_v19 = vmul.f32 %v10251_v8, %v3749_v38  ;;  %v3716_v20 = vpop.permute.xlu0 %3715  ;;  %4190 = vmatmul.mubr.bf16.gmra.mrb[8].mxu0 %v6722_v37  ;;  %v3778_v23 = vpack.c.bf16 %v3766_v17, %v3764_v14  ;;  %v3770_v7 = vmul.f32 %v10260_v41, %v3741_v16  ;;  %v3768_v37 = vmul.f32 %v10260_v41, %v3740_v36  ;;  %v3961_v14 = vld [vmem:[#allocation2 + $0x188] sm:$0xff]  ;;  %v3960_v36 = vld [vmem:[#allocation2 + $0x180] sm:$0xff] }
 0xc55   : >> { %4219 = vmatpush1.bf16.msra.mxu0 %v3776_v62  ;;  %4199 = vmatprep.mubr.bf16.mxu0 %v6723_v34 }
 0xc56   : >> { %v3718_v46 = vpop.permute.xlu1 %3717  ;;  %4220 = vmatprep.subr.bf16.mxu0 %v3779_v58  ;;  %v3781_v59 = vpack.c.bf16 %v3771_v19, %v3769_v47  ;;  %v3780_v4 = vpack.c.bf16 %v3770_v7, %v3768_v37  ;;  %v3963_v47 = vld [vmem:[#allocation2 + $0x198] sm:$0xff]  ;;  %v3964_v7 = vld [vmem:[#allocation2 + $0x1a0] sm:$0xff]  ;;  %v11532_v37 = vpack.c.bf16 %v9935_v3, %v9923_v11  ;;  %v11537_v11 = vpack.c.bf16 %v10045_v43, %v10032_v42 }
 0xc57   : >> { %v6726_v3 = vld [vmem:[%s9579_s24 + $0x8] ss:$20 sps:$4 sm:$0xff]   ;;  %v11545_v42 = vpack.c.bf16 %v10179_v5, %v10167_v30  ;;  %v11546_v43 = vpack.c.bf16 %v10176_v49, %v10164_v56 }
 0xc58   : >> { %v3732_v18 = vpop.permute.xlu0 %3731 }
 0xc59   : >> { %v3742_v9 = vsel %vm3735_vm6, %v3716_v20, %v3732_v18  ;;  %v3750_v34 = vsel %vm3735_vm6, %v3732_v18, %v3716_v20  ;;  %4221 = vmatpush1.bf16.msra.mxu0 %v3778_v23  ;;  %v3965_v23 = vld [vmem:[#allocation2 + $0x1a8] sm:$0xff]  ;;  %v3966_v18 = vld [vmem:[#allocation2 + $0x1b0] sm:$0xff] }
 0xc5a   : >> { %v3734_v57 = vpop.permute.xlu1 %3733  ;;  %4222 = vmatprep.subr.bf16.mxu0 %v3781_v59  ;;  %v3772_v44 = vmul.f32 %v10260_v41, %v3742_v9  ;;  %v3773_v38 = vmul.f32 %v10251_v8, %v3750_v34  ;;  %v11530_v59 = vpack.c.bf16 %v9887_v51, %v9877_v26  ;;  %v11533_v9 = vpack.c.bf16 %v9981_v28, %v9968_v15 }
 0xc5b   : >> { %v3743_v62 = vsel %vm3735_vm6, %v3718_v46, %v3734_v57  ;;  %v3751_v17 = vsel %vm3735_vm6, %v3734_v57, %v3718_v46  ;;  %v3962_v46 = vld [vmem:[#allocation2 + $0x190] sm:$0xff]  ;;  %v11534_v26 = vpack.c.bf16 %v9978_v45, %v9965_v61  ;;  %v11535_v51 = vpack.c.bf16 %v10013_v6, %v10000_v0 }
 0xc5c   : >> { %v3774_v58 = vmul.f32 %v10260_v41, %v3743_v62  ;;  %v3775_v16 = vmul.f32 %v10251_v8, %v3751_v17  ;;  %4200 = vmatmul.mubr.bf16.gmra.mrb[12].mxu0 %v6725_v31  ;;  %v11531_v31 = vpack.c.bf16 %v9938_v32, %v9926_v10  ;;  %v11536_v10 = vpack.c.bf16 %v10010_v12, %v9997_v1  ;;  %v6729_v61 = vld [vmem:[%s9579_s24 + $0x34] ss:$20 sps:$4 sm:$0xff]   ;;  %v6731_v1 = vld [vmem:[%s9579_s24 + $0x30] ss:$20 sps:$4 sm:$0xff]  }
 0xc5d   : >> { %4223 = vmatpush1.bf16.msra.mxu0 %v3780_v4  ;;  %4242 = vmatprep.mubr.bf16.mxu0 %v6728_v63  ;;  %v11538_v32 = vpack.c.bf16 %v10042_v22, %v10029_v53  ;;  %v11539_v15 = vpack.c.bf16 %v10086_v2, %v10073_v50  ;;  %v11540_v45 = vpack.c.bf16 %v10083_v29, %v10070_v39  ;;  %v6732_v12 = vld [vmem:[%s9579_s24 + $0x5c] ss:$20 sps:$4 sm:$0xff]   ;;  %v6734_v22 = vld [vmem:[%s9579_s24 + $0x58] ss:$20 sps:$4 sm:$0xff]   ;;  %v6737_v50 = vld [vmem:[%s9579_s24 + $0x80] ss:$20 sps:$4 sm:$0xff]  }
 0xc5e   : >> { %v3782_v19 = vpack.c.bf16 %v3774_v58, %v3772_v44  ;;  %v3783_v20 = vpack.c.bf16 %v3775_v16, %v3773_v38  ;;  %v11541_v28 = vpack.c.bf16 %v10118_v21, %v10105_v35  ;;  %v11542_v0 = vpack.c.bf16 %v10115_v60, %v10102_v27  ;;  %v6735_v39 = vld [vmem:[%s9579_s24 + $0x84] ss:$20 sps:$4 sm:$0xff]   ;;  %v6740_v35 = vld [vmem:[%s9579_s24 + $0x60] ss:$20 sps:$4 sm:$0xff]   ;;  %v6741_v60 = vld [vmem:[%s9579_s24 + $0x88] ss:$20 sps:$4 sm:$0xff]  }
 0xc5f   : >> { %v11543_v6 = vpack.c.bf16 %v10150_v40, %v10137_v55  ;;  %v11544_v53 = vpack.c.bf16 %v10147_v13, %v10134_v33  ;;  %v11547_v29 = vmov 0   ;;  %v6738_v2 = vld [vmem:[%s9579_s24 + $0x10] ss:$20 sps:$4 sm:$0xff]   ;;  %v6739_v27 = vld [vmem:[%s9579_s24 + $0x38] ss:$20 sps:$4 sm:$0xff]  }
 0xc60   : >> { %4224 = vmatprep.subr.bf16.mxu0 %v3783_v20 }
 0xc61   : >> { %4225 = vmatpush1.bf16.msra.mxu0 %v3782_v19 }
 0xc62   : >> { %4226 = vmatprep.subr.bf16.mxu0 %v3961_v14 }
 0xc65   : >> { %4227 = vmatpush1.bf16.msra.mxu0 %v3960_v36 }
 0xc66   : >> { %4228 = vmatprep.subr.bf16.mxu0 %v3963_v47 }
 0xc69   : >> { %4229 = vmatpush1.bf16.msra.mxu0 %v3962_v46  ;;  %v3987_v21 = vpop.permute.xlu0 %3986 }
 0xc6a   : >> { %4230 = vmatprep.subr.bf16.mxu0 %v3965_v23 }
 0xc6b   : >> { %v3992_v33 = vpop.permute.xlu1 %3991 }
 0xc6d   : >> { %4231 = vmatpush1.bf16.msra.mxu0 %v3964_v7  ;;  %v4370_v55 = vpop.permute.xlu0 %4369 }
 0xc6e   : >> { %4232 = vmatprep.subr.bf16.mxu0 %v11530_v59 }
 0xc6f   : >> { %v4375_v13 = vpop.permute.xlu1 %4374 }
 0xc71   : >> { %4233 = vmatpush1.bf16.msra.mxu0 %v3966_v18  ;;  %v3997_v40 = vpop.permute.xlu0 %3996 }
 0xc72   : >> { %4234 = vmatprep.subr.bf16.mxu0 %v11531_v31 }
 0xc73   : >> { %v4002_v56 = vpop.permute.xlu1 %4001 }
 0xc75   : >> { %4235 = vmatpush1.bf16.msra.mxu0 %v11532_v37  ;;  %v4435_v30 = vpop.permute.xlu0 %4434 }
 0xc76   : >> { %4236 = vmatprep.subr.bf16.mxu0 %v11533_v9 }
 0xc77   : >> { %v4440_v49 = vpop.permute.xlu1 %4439 }
 0xc79   : >> { %4237 = vmatpush1.bf16.msra.mxu0 %v11534_v26  ;;  %v4380_v5 = vpop.permute.xlu0 %4379 }
 0xc7a   : >> { %4238 = vmatprep.subr.bf16.mxu0 %v11535_v51 }
 0xc7b   : >> { %v4385_v34 = vpop.permute.xlu1 %4384 }
 0xc7d   : >> { %4239 = vmatpush1.bf16.msra.mxu0 %v11536_v10  ;;  %v4007_v63 = vpop.permute.xlu0 %4006 }
 0xc7e   : >> { %4240 = vmatprep.subr.bf16.mxu0 %v11537_v11 }
 0xc7f   : >> { %v10377_v57 = vpop.permute.xlu1 %4011 }
 0xc81   : >> { %4241 = vmatpush1.bf16.msra.mxu0 %v11538_v32  ;;  %v4445_v4 = vpop.permute.xlu0 %4444 }
 0xc82   : >> { %4283 = vmatprep.subr.bf16.mxu0 %v11539_v15 }
 0xc83   : >> { %v4450_v62 = vpop.permute.xlu1 %4449 }
 0xc84   : >> { %4243 = vmatmul.mubr.bf16.vlgmr.msra.gmra.mrb[0].mxu0 %v6726_v3 }
 0xc85   : >> { %4284 = vmatpush1.bf16.msra.mxu0 %v11540_v45  ;;  %4252 = vmatprep.mubr.bf16.mxu0 %v6729_v61  ;;  %v4390_v36 = vpop.permute.xlu0 %4389 }
 0xc86   : >> { %4285 = vmatprep.subr.bf16.mxu0 %v11541_v28 }
 0xc87   : >> { %v4395_v59 = vpop.permute.xlu1 %4394 }
 0xc89   : >> { %4286 = vmatpush1.bf16.msra.mxu0 %v11542_v0  ;;  %v10385_v32 = vpop.permute.xlu0 %4016 }
 0xc8a   : >> { %4287 = vmatprep.subr.bf16.mxu0 %v11543_v6 }
 0xc8c   : >> { %4253 = vmatmul.mubr.bf16.gmra.mrb[4].mxu0 %v6731_v1 }
 0xc8d   : >> { %4288 = vmatpush1.bf16.msra.mxu0 %v11544_v53  ;;  %4262 = vmatprep.mubr.bf16.mxu0 %v6732_v12  ;;  %v10395_v53 = vpop.permute.xlu1 %4021 }
 0xc8e   : >> { %4289 = vmatprep.subr.bf16.mxu0 %v11545_v42 }
 0xc91   : >> { %4290 = vmatpush1.bf16.msra.mxu0 %v11546_v43 }
 0xc94   : >> { %4263 = vmatmul.mubr.bf16.gmra.mrb[8].mxu0 %v6734_v22 }
 0xc95   : >> { %4272 = vmatprep.mubr.bf16.mxu0 %v6735_v39 }
 0xc9c   : >> { %4273 = vmatmul.mubr.bf16.gmra.mrb[12].mxu0 %v6737_v50 }
 0xc9d   : >> { %4315 = vmatprep.mubr.bf16.mxu0 %v11547_v29 }
 0xca4   : >> { %6063 = vmatmul.mubr.msk.bf16.vlgmr.msra.gmra.mrb[0].mxu0 %vm4124_vm7, %v6738_v2 }
 0xca5   : >> { %4325 = vmatprep.mubr.bf16.mxu0 %v11547_v29 }
 0xcac   : >> { %6064 = vmatmul.mubr.msk.bf16.gmra.mrb[4].mxu0 %vm4124_vm7, %v6739_v27 }
 0xcad   : >> { %4335 = vmatprep.mubr.bf16.mxu0 %v11547_v29 }
 0xcb4   : >> { %6065 = vmatmul.mubr.msk.bf16.gmra.mrb[8].mxu0 %vm4124_vm7, %v6740_v35 }
 0xcb5   : >> { %4345 = vmatprep.mubr.bf16.mxu0 %v11547_v29 }
 0xcbc   : >> { %6066 = vmatmul.mubr.msk.bf16.gmra.mrb[12].mxu0 %vm4124_vm7, %v6741_v60  ;;  %v4455_v60 = vpop.permute.xlu0 %4454 }
 0xd77   : >> { %v4317_v17 = vpop.f32.mrb[0].mxu0 }
 0xd78   : >> { %v6201_v44 = vadd.f32 %v4317_v17, %v3987_v21  ;;  %v4319_v38 = vpop.f32.mrb[1].mxu0 }
 0xd79   : >> { %v6202_v58 = vadd.f32 %v4319_v38, %v3987_v21  ;;  %v4321_v16 = vpop.f32.mrb[2].mxu0 }
 0xd7a   : >> { %v4407_v19 = vmul.f32 %v6201_v44, %v4370_v55  ;;  %v6203_v20 = vadd.f32 %v4321_v16, %v3992_v33  ;;  %v4323_v14 = vpop.f32.mrb[3].mxu0 }
 0xd7b   : >> { %v4408_v47 = vmul.f32 %v6202_v58, %v4370_v55  ;;  %v6204_v46 = vadd.f32 %v4323_v14, %v3992_v33  ;;  %v4400_v14 = vpop.permute.xlu0 %4399 }
 0xd7c   : >> { %v4472_v23 = vadd.f32 %v4435_v30, %v4407_v19  ;;  %v4409_v7 = vmul.f32 %v6203_v20, %v4375_v13 }
 0xd7d   : >> { %v4473_v18 = vadd.f32 %v4435_v30, %v4408_v47  ;;  %v4410_v31 = vmul.f32 %v6204_v46, %v4375_v13  ;;  %v4460_v30 = vpop.permute.xlu1 %4459 }
 0xd7e   : >> { %v10379_v37 = vmax.f32 %v4472_v23, 0.0  ;;  %v4474_v9 = vadd.f32 %v4440_v49, %v4409_v7 }
 0xd7f   : >> { %v4475_v26 = vadd.f32 %v4440_v49, %v4410_v31  ;;  %v4327_v51 = vpop.f32.mrb[4].mxu0  ;;  %v10387_v61 = vmax.f32 %v4473_v18, 0.0 }
 0xd80   : >> { %v10381_v10 = vmax.f32 %v4474_v9, 0.0  ;;  %v6205_v11 = vadd.f32 %v4327_v51, %v3997_v40  ;;  %v4329_v3 = vpop.f32.mrb[5].mxu0  ;;  %4540 = vrot.lane.b32.xlu0 %v10379_v37, %s7348_s6 }
 0xd81   : >> { %v10389_v15 = vmax.f32 %v4475_v26, 0.0  ;;  %v6206_v45 = vadd.f32 %v4329_v3, %v3997_v40  ;;  %v4331_v28 = vpop.f32.mrb[6].mxu0  ;;  %v4405_v7 = vpop.permute.xlu1 %4404 }
 0xd82   : >> { %v4860_v1 = vpack.c.bf16 %v10381_v10, %v10379_v37  ;;  %v4411_v0 = vmul.f32 %v6205_v11, %v4380_v5  ;;  %v6207_v12 = vadd.f32 %v4331_v28, %v4002_v56  ;;  %v4333_v6 = vpop.f32.mrb[7].mxu0  ;;  %4542 = vrot.lane.b32.xlu1 %v10381_v10, %s7348_s6 }
 0xd83   : >> { %v4861_v42 = vpack.c.bf16 %v10389_v15, %v10387_v61  ;;  %v4412_v22 = vmul.f32 %v6206_v45, %v4380_v5  ;;  %v6208_v43 = vadd.f32 %v4333_v6, %v4002_v56 }
 0xd84   : >> { %4868 = vst [vmem:[#allocation2 + $0x100] sm:$0xff] %v4860_v1  ;;  %v4476_v39 = vadd.f32 %v4445_v4, %v4411_v0  ;;  %v4413_v50 = vmul.f32 %v6207_v12, %v4385_v34  ;;  %4620 = vrot.lane.b32.xlu0 %v10379_v37, %s7349_s7  ;;  %v4465_v12 = vpop.permute.xlu0 %4464 }
 0xd85   : >> { %4869 = vst [vmem:[#allocation2 + $0x108] sm:$0xff] %v4861_v42  ;;  %v4477_v2 = vadd.f32 %v4445_v4, %v4412_v22  ;;  %v4414_v27 = vmul.f32 %v6208_v43, %v4385_v34 }
 0xd86   : >> { %v4478_v35 = vadd.f32 %v4450_v62, %v4413_v50  ;;  %4622 = vrot.lane.b32.xlu1 %v10381_v10, %s7349_s7  ;;  %v10403_v55 = vmax.f32 %v4476_v39, 0.0  ;;  %v4470_v39 = vpop.permute.xlu1 %4469 }
 0xd87   : >> { %v4479_v21 = vadd.f32 %v4450_v62, %v4414_v27  ;;  %v4337_v33 = vpop.f32.mrb[8].mxu0  ;;  %v10409_v49 = vmax.f32 %v4477_v2, 0.0 }
 0xd88   : >> { %v10405_v13 = vmax.f32 %v4478_v35, 0.0  ;;  %v6209_v40 = vadd.f32 %v4337_v33, %v4007_v63  ;;  %v4339_v56 = vpop.f32.mrb[9].mxu0  ;;  %4700 = vrot.lane.b32.xlu0 %v10379_v37, %s7350_s2 }
 0xd89   : >> { %v10411_v5 = vmax.f32 %v4479_v21, 0.0  ;;  %v6210_v34 = vadd.f32 %v4339_v56, %v4007_v63  ;;  %v4341_v4 = vpop.f32.mrb[10].mxu0 }
 0xd8a   : >> { %v4862_v62 = vpack.c.bf16 %v10405_v13, %v10403_v55  ;;  %v4415_v17 = vmul.f32 %v6209_v40, %v4390_v36  ;;  %v6211_v44 = vadd.f32 %v4341_v4, %v10377_v57  ;;  %v4343_v38 = vpop.f32.mrb[11].mxu0  ;;  %4702 = vrot.lane.b32.xlu1 %v10381_v10, %s7350_s2 }
 0xd8b   : >> { %v4863_v58 = vpack.c.bf16 %v10411_v5, %v10409_v49  ;;  %v4416_v16 = vmul.f32 %v6210_v34, %v4390_v36  ;;  %v6212_v19 = vadd.f32 %v4343_v38, %v10377_v57 }
 0xd8c   : >> { %4870 = vst [vmem:[#allocation2 + $0x110] sm:$0xff] %v4862_v62  ;;  %v4480_v20 = vadd.f32 %v4455_v60, %v4415_v17  ;;  %v4417_v63 = vmul.f32 %v6211_v44, %v4395_v59  ;;  %4556 = vrot.lane.b32.xlu0 %v10387_v61, %s7348_s6  ;;  %v6744_v44 = vld [vmem:[%s9579_s24 + $0xa4] ss:$20 sps:$4 sm:$0xff]  }
 0xd8d   : >> { %4871 = vst [vmem:[#allocation2 + $0x118] sm:$0xff] %v4863_v58  ;;  %v4481_v47 = vadd.f32 %v4455_v60, %v4416_v16  ;;  %v4418_v46 = vmul.f32 %v6212_v19, %v4395_v59  ;;  %5308 = vmatprep.mubr.bf16.mxu1 %v6744_v44 }
 0xd8e   : >> { %v4482_v23 = vadd.f32 %v4460_v30, %v4417_v63  ;;  %4558 = vrot.lane.b32.xlu1 %v10389_v15, %s7348_s6  ;;  %v10425_v36 = vmax.f32 %v4480_v20, 0.0 }
 0xd8f   : >> { %v4483_v18 = vadd.f32 %v4460_v30, %v4418_v46  ;;  %v4347_v31 = vpop.f32.mrb[12].mxu0  ;;  %v10432_v51 = vmax.f32 %v4481_v47, 0.0 }
 0xd90   : >> { %v10427_v57 = vmax.f32 %v4482_v23, 0.0  ;;  %v6213_v9 = vadd.f32 %v4347_v31, %v10385_v32  ;;  %v4349_v26 = vpop.f32.mrb[13].mxu0  ;;  %4636 = vrot.lane.b32.xlu0 %v10387_v61, %s7349_s7 }
 0xd91   : >> { %v10434_v59 = vmax.f32 %v4483_v18, 0.0  ;;  %v6214_v11 = vadd.f32 %v4349_v26, %v10385_v32  ;;  %v4351_v3 = vpop.f32.mrb[14].mxu0 }
 0xd92   : >> { %v4864_v45 = vpack.c.bf16 %v10427_v57, %v10425_v36  ;;  %v4419_v28 = vmul.f32 %v6213_v9, %v4400_v14  ;;  %v6215_v1 = vadd.f32 %v4351_v3, %v10395_v53  ;;  %v4353_v0 = vpop.f32.mrb[15].mxu0  ;;  %4638 = vrot.lane.b32.xlu1 %v10389_v15, %s7349_s7 }
 0xd93   : >> { %v4865_v6 = vpack.c.bf16 %v10434_v59, %v10432_v51  ;;  %v4420_v42 = vmul.f32 %v6214_v11, %v4400_v14  ;;  %v6216_v22 = vadd.f32 %v4353_v0, %v10395_v53 }
 0xd94   : >> { %4872 = vst [vmem:[#allocation2 + $0x120] sm:$0xff] %v4864_v45  ;;  %v4484_v32 = vadd.f32 %v4465_v12, %v4419_v28  ;;  %v4421_v43 = vmul.f32 %v6215_v1, %v4405_v7  ;;  %4716 = vrot.lane.b32.xlu0 %v10387_v61, %s7350_s2 }
 0xd95   : >> { %4873 = vst [vmem:[#allocation2 + $0x128] sm:$0xff] %v4865_v6  ;;  %v4485_v50 = vadd.f32 %v4465_v12, %v4420_v42  ;;  %v4422_v2 = vmul.f32 %v6216_v22, %v4405_v7  ;;  %v11548_v6 = vld [vmem:[#allocation56_spill] sm:$0xff]  ;;  %v11549_v22 = vld [vmem:[#allocation57_spill] sm:$0xff] }
 0xd96   : >> { %v4486_v27 = vadd.f32 %v4470_v39, %v4421_v43  ;;  %4718 = vrot.lane.b32.xlu1 %v10389_v15, %s7350_s2  ;;  %v10449_v60 = vmax.f32 %v4484_v32, 0.0  ;;  %v11550_v32 = vld [vmem:[#allocation58_spill] sm:$0xff] }
 0xd97   : >> { %v4487_v35 = vadd.f32 %v4470_v39, %v4422_v2  ;;  %v10455_v53 = vmax.f32 %v4485_v50, 0.0  ;;  %v11551_v39 = vld [vmem:[#allocation59_spill] sm:$0xff] }
 0xd98   : >> { %v10451_v21 = vmax.f32 %v4486_v27, 0.0  ;;  %4544 = vrot.lane.b32.xlu0 %v10403_v55, %s7348_s6 }
 0xd99   : >> { %v10457_v33 = vmax.f32 %v4487_v35, 0.0 }
 0xd9a   : >> { %v4866_v40 = vpack.c.bf16 %v10451_v21, %v10449_v60  ;;  %4546 = vrot.lane.b32.xlu1 %v10405_v13, %s7348_s6 }
 0xd9b   : >> { %v4867_v56 = vpack.c.bf16 %v10457_v33, %v10455_v53 }
 0xd9c   : >> { %4874 = vst [vmem:[#allocation2 + $0x130] sm:$0xff] %v4866_v40  ;;  %4624 = vrot.lane.b32.xlu0 %v10403_v55, %s7349_s7 }
 0xd9d   : >> { %4875 = vst [vmem:[#allocation2 + $0x138] sm:$0xff] %v4867_v56 }
 0xd9e   : >> { %4626 = vrot.lane.b32.xlu1 %v10405_v13, %s7349_s7 }
 0xda0   : >> { %4704 = vrot.lane.b32.xlu0 %v10403_v55, %s7350_s2 }
 0xda2   : >> { %4706 = vrot.lane.b32.xlu1 %v10405_v13, %s7350_s2 }
 0xda4   : >> { %4560 = vrot.lane.b32.xlu0 %v10409_v49, %s7348_s6 }
 0xda6   : >> { %4562 = vrot.lane.b32.xlu1 %v10411_v5, %s7348_s6 }
 0xda8   : >> { %4640 = vrot.lane.b32.xlu0 %v10409_v49, %s7349_s7 }
 0xdaa   : >> { %4642 = vrot.lane.b32.xlu1 %v10411_v5, %s7349_s7 }
 0xdac   : >> { %4720 = vrot.lane.b32.xlu0 %v10409_v49, %s7350_s2 }
 0xdae   : >> { %4722 = vrot.lane.b32.xlu1 %v10411_v5, %s7350_s2 }
 0xdb0   : >> { %4548 = vrot.lane.b32.xlu0 %v10425_v36, %s7348_s6 }
 0xdb2   : >> { %4550 = vrot.lane.b32.xlu1 %v10427_v57, %s7348_s6 }
 0xdb4   : >> { %4628 = vrot.lane.b32.xlu0 %v10425_v36, %s7349_s7 }
 0xdb6   : >> { %4630 = vrot.lane.b32.xlu1 %v10427_v57, %s7349_s7 }
 0xdb8   : >> { %4708 = vrot.lane.b32.xlu0 %v10425_v36, %s7350_s2 }
 0xdba   : >> { %4710 = vrot.lane.b32.xlu1 %v10427_v57, %s7350_s2 }
 0xdbc   : >> { %4564 = vrot.lane.b32.xlu0 %v10432_v51, %s7348_s6 }
 0xdbe   : >> { %4566 = vrot.lane.b32.xlu1 %v10434_v59, %s7348_s6 }
 0xdc0   : >> { %4644 = vrot.lane.b32.xlu0 %v10432_v51, %s7349_s7 }
 0xdc2   : >> { %4646 = vrot.lane.b32.xlu1 %v10434_v59, %s7349_s7 }
 0xdc4   : >> { %4552 = vrot.lane.b32.xlu0 %v10449_v60, %s7348_s6 }
 0xdc6   : >> { %4554 = vrot.lane.b32.xlu1 %v10451_v21, %s7348_s6 }
 0xdc8   : >> { %4632 = vrot.lane.b32.xlu0 %v10449_v60, %s7349_s7 }
 0xdca   : >> { %4634 = vrot.lane.b32.xlu1 %v10451_v21, %s7349_s7 }
 0xdcc   : >> { %4568 = vrot.lane.b32.xlu0 %v10455_v53, %s7348_s6 }
 0xdce   : >> { %4570 = vrot.lane.b32.xlu1 %v10457_v33, %s7348_s6 }
 0xdd0   : >> { %4724 = vrot.lane.b32.xlu0 %v10432_v51, %s7350_s2 }
 0xdd2   : >> { %4726 = vrot.lane.b32.xlu1 %v10434_v59, %s7350_s2 }
 0xdd4   : >> { %4648 = vrot.lane.b32.xlu0 %v10455_v53, %s7349_s7 }
 0xdd6   : >> { %4714 = vrot.lane.b32.xlu1 %v10451_v21, %s7350_s2 }
 0xdd8   : >> { %4712 = vrot.lane.b32.xlu0 %v10449_v60, %s7350_s2 }
 0xdda   : >> { %4782 = vrot.lane.b32.xlu1 %v10381_v10, %s7351_s16 }
 0xddc   : >> { %4728 = vrot.lane.b32.xlu0 %v10455_v53, %s7350_s2 }
 0xdde   : >> { %4650 = vrot.lane.b32.xlu1 %v10457_v33, %s7349_s7 }
 0xde0   : >> { %4780 = vrot.lane.b32.xlu0 %v10379_v37, %s7351_s16 }
 0xde2   : >> { %4798 = vrot.lane.b32.xlu1 %v10389_v15, %s7351_s16 }
 0xde4   : >> { %4796 = vrot.lane.b32.xlu0 %v10387_v61, %s7351_s16 }
 0xde6   : >> { %4786 = vrot.lane.b32.xlu1 %v10405_v13, %s7351_s16 }
 0xde8   : >> { %4784 = vrot.lane.b32.xlu0 %v10403_v55, %s7351_s16 }
 0xdea   : >> { %4802 = vrot.lane.b32.xlu1 %v10411_v5, %s7351_s16 }
 0xdec   : >> { %4800 = vrot.lane.b32.xlu0 %v10409_v49, %s7351_s16 }
 0xdee   : >> { %4730 = vrot.lane.b32.xlu1 %v10457_v33, %s7350_s2 }
 0xdf0   : >> { %4788 = vrot.lane.b32.xlu0 %v10425_v36, %s7351_s16 }
 0xdf2   : >> { %4790 = vrot.lane.b32.xlu1 %v10427_v57, %s7351_s16  ;;  %v4541_v30 = vpop.permute.xlu0 %4540 }
 0xdf4   : >> { %v4543_v34 = vpop.permute.xlu1 %4542  ;;  %4804 = vrot.lane.b32.xlu0 %v10432_v51, %s7351_s16 }
 0xdf6   : >> { %4806 = vrot.lane.b32.xlu1 %v10434_v59, %s7351_s16  ;;  %v4621_v4 = vpop.permute.xlu0 %4620 }
 0xdf8   : >> { %v4623_v62 = vpop.permute.xlu1 %4622  ;;  %4792 = vrot.lane.b32.xlu0 %v10449_v60, %s7351_s16 }
 0xdfa   : >> { %4794 = vrot.lane.b32.xlu1 %v10451_v21, %s7351_s16  ;;  %v4701_v17 = vpop.permute.xlu0 %4700 }
 0xdfc   : >> { %v10562_v38 = vpop.permute.xlu1 %4702  ;;  %4808 = vrot.lane.b32.xlu0 %v10455_v53, %s7351_s16 }
 0xdfe   : >> { %4810 = vrot.lane.b32.xlu1 %v10457_v33, %s7351_s16  ;;  %v4557_v58 = vpop.permute.xlu0 %4556 }
 0xdff   : >> { %v4572_v16 = vsel %vm3363_vm2, %v4541_v30, %v4557_v58  ;;  %v4580_v19 = vsel %vm3363_vm2, %v4557_v58, %v4541_v30 }
 0xe00   : >> { %v4588_v20 = vmul.f32 %v4580_v19, %v9776_v25  ;;  %v4589_v63 = vmul.f32 %v4572_v16, %v9780_v52  ;;  %v4559_v14 = vpop.permute.xlu1 %4558  ;;  %4876 = vrot.lane.b32.xlu0 %v10379_v37, %s7352_s29  ;;  %v4956_v47 = vmul.f32 %v4572_v16, %v9786_v54  ;;  %v4957_v46 = vmul.f32 %v4580_v19, %v9790_v48  ;;  %v11552_v19 = vld [vmem:[#allocation60_spill] sm:$0xff] }
 0xe01   : >> { %v4573_v23 = vsel %vm3363_vm2, %v4543_v34, %v4559_v14  ;;  %v4581_v7 = vsel %vm3363_vm2, %v4559_v14, %v4543_v34 }
 0xe02   : >> { %v4590_v18 = vmul.f32 %v4581_v7, %v9776_v25  ;;  %v4591_v31 = vmul.f32 %v4573_v23, %v9780_v52  ;;  %v4958_v9 = vmul.f32 %v4573_v23, %v9786_v54  ;;  %v4959_v26 = vmul.f32 %v4581_v7, %v9790_v48  ;;  %4878 = vrot.lane.b32.xlu1 %v10381_v10, %s7352_s29  ;;  %v4637_v37 = vpop.permute.xlu0 %4636  ;;  %v11556_v23 = vld [vmem:[#allocation28_spill] sm:$0xff] }
 0xe03   : >> { %v4652_v11 = vsel %vm3452_vm3, %v4621_v4, %v4637_v37  ;;  %v4660_v3 = vsel %vm3452_vm3, %v4637_v37, %v4621_v4  ;;  %v11557_v7 = vmov %v11556_v23 }
 0xe04   : >> { %v4604_v45 = vpack.c.bf16 %v4590_v18, %v4588_v20  ;;  %v4605_v28 = vpack.c.bf16 %v4591_v31, %v4589_v63  ;;  %v4972_v1 = vpack.c.bf16 %v4958_v9, %v4956_v47  ;;  %v4973_v0 = vpack.c.bf16 %v4959_v26, %v4957_v46  ;;  %v4639_v12 = vpop.permute.xlu1 %4638  ;;  %4892 = vrot.lane.b32.xlu0 %v10387_v61, %s7352_s29  ;;  %v11553_v63 = vld [vmem:[#allocation61_spill] sm:$0xff] }
 0xe05   : >> { %v10595_v42 = vmul.f32 %v4660_v3, %v11548_v6  ;;  %v10598_v10 = vmul.f32 %v4652_v11, %v11549_v22  ;;  %v4988_v43 = vmul.f32 %v4652_v11, %v11550_v32  ;;  %v4989_v50 = vmul.f32 %v4660_v3, %v11551_v39 }
 0xe06   : >> { %4980 = vst [vmem:[#allocation2 + $0x180] sm:$0xff] %v4972_v1  ;;  %4981 = vst [vmem:[#allocation2 + $0x188] sm:$0xff] %v4973_v0  ;;  %v4653_v2 = vsel %vm3452_vm3, %v4623_v62, %v4639_v12  ;;  %v4661_v27 = vsel %vm3452_vm3, %v4639_v12, %v4623_v62  ;;  %4894 = vrot.lane.b32.xlu1 %v10389_v15, %s7352_s29  ;;  %v4717_v61 = vpop.permute.xlu0 %4716  ;;  %5276 = vmatprep.subr.bf16.mxu1 %v4605_v28 }
 0xe07   : >> { %v10609_v35 = vmul.f32 %v4661_v27, %v11548_v6  ;;  %v10612_v40 = vmul.f32 %v4653_v2, %v11549_v22  ;;  %v4990_v56 = vmul.f32 %v4653_v2, %v11550_v32  ;;  %v4991_v30 = vmul.f32 %v4661_v27, %v11551_v39  ;;  %5277 = vmatpush1.bf16.msra.mxu1 %v4604_v45 }
 0xe08   : >> { %v4732_v34 = vsel %vm3541_vm4, %v4701_v17, %v4717_v61  ;;  %v4740_v4 = vsel %vm3541_vm4, %v4717_v61, %v4701_v17  ;;  %v4719_v15 = vpop.permute.xlu1 %4718  ;;  %4880 = vrot.lane.b32.xlu0 %v10403_v55, %s7352_s29  ;;  %v11554_v55 = vld [vmem:[#allocation27_spill] sm:$0xff] }
 0xe09   : >> { %v5004_v58 = vpack.c.bf16 %v4990_v56, %v4988_v43  ;;  %v5005_v16 = vpack.c.bf16 %v4991_v30, %v4989_v50  ;;  %v10627_v20 = vmul.f32 %v4740_v4, %v11552_v19  ;;  %v10630_v14 = vmul.f32 %v4732_v34, %v11553_v63 }
 0xe0a   : >> { %4882 = vrot.lane.b32.xlu1 %v10405_v13, %s7352_s29  ;;  %v4545_v17 = vpop.permute.xlu0 %4544  ;;  %v11555_v47 = vmov %v11554_v55  ;;  %v5020_v46 = vmul.f32 %v11554_v55, %v4732_v34  ;;  %v5021_v18 = vmul.f32 %v11556_v23, %v4740_v4  ;;  %v4733_v31 = vsel %vm3541_vm4, %v10562_v38, %v4719_v15 }
 0xe0b   : >> { %5012 = vst [vmem:[#allocation2 + $0x1c0] sm:$0xff] %v5004_v58  ;;  %5013 = vst [vmem:[#allocation2 + $0x1c8] sm:$0xff] %v5005_v16  ;;  %v4741_v9 = vsel %vm3541_vm4, %v4719_v15, %v10562_v38  ;;  %v10646_v13 = vmul.f32 %v4733_v31, %v11553_v63  ;;  %v5022_v37 = vmul.f32 %v11555_v47, %v4733_v31 }
 0xe0c   : >> { %v10643_v26 = vmul.f32 %v4741_v9, %v11552_v19  ;;  %v5023_v11 = vmul.f32 %v11557_v7, %v4741_v9  ;;  %v4547_v3 = vpop.permute.xlu1 %4546  ;;  %4896 = vrot.lane.b32.xlu0 %v10409_v49, %s7352_s29 }
 0xe0d   : >> { %v5036_v28 = vpack.c.bf16 %v5022_v37, %v5020_v46  ;;  %v6115_v37 = vld [vmem:[%s9946_s28 + $0x40] sm:$0xff] }
 0xe0e   : >> { %v5037_v1 = vpack.c.bf16 %v5023_v11, %v5021_v18  ;;  %4898 = vrot.lane.b32.xlu1 %v10411_v5, %s7352_s29  ;;  %v4625_v0 = vpop.permute.xlu0 %4624 }
 0xe0f   : >> { %5044 = vst [vmem:[#allocation2 + $0x200] sm:$0xff] %v5036_v28 }
 0xe10   : >> { %5045 = vst [vmem:[#allocation2 + $0x208] sm:$0xff] %v5037_v1  ;;  %v4627_v12 = vpop.permute.xlu1 %4626  ;;  %4884 = vrot.lane.b32.xlu0 %v10425_v36, %s7352_s29 }
 0xe12   : >> { %4886 = vrot.lane.b32.xlu1 %v10427_v57, %s7352_s29  ;;  %v4705_v49 = vpop.permute.xlu0 %4704 }
 0xe14   : >> { %v10662_v43 = vpop.permute.xlu1 %4706  ;;  %4900 = vrot.lane.b32.xlu0 %v10432_v51, %s7352_s29 }
 0xe16   : >> { %4902 = vrot.lane.b32.xlu1 %v10434_v59, %s7352_s29  ;;  %v4561_v5 = vpop.permute.xlu0 %4560 }
 0xe17   : >> { %v4574_v50 = vsel %vm3363_vm2, %v4545_v17, %v4561_v5  ;;  %v4582_v2 = vsel %vm3363_vm2, %v4561_v5, %v4545_v17 }
 0xe18   : >> { %v4592_v36 = vmul.f32 %v4582_v2, %v9776_v25  ;;  %v4593_v57 = vmul.f32 %v4574_v50, %v9780_v52  ;;  %v4563_v27 = vpop.permute.xlu1 %4562  ;;  %4888 = vrot.lane.b32.xlu0 %v10449_v60, %s7352_s29  ;;  %v4960_v51 = vmul.f32 %v4574_v50, %v9786_v54  ;;  %v4961_v61 = vmul.f32 %v4582_v2, %v9790_v48  ;;  %v6116_v2 = vld [vmem:[%s9946_s28 + $0x48] sm:$0xff] }
 0xe19   : >> { %v4575_v59 = vsel %vm3363_vm2, %v4547_v3, %v4563_v27  ;;  %v4583_v56 = vsel %vm3363_vm2, %v4563_v27, %v4547_v3 }
 0xe1a   : >> { %v4594_v30 = vmul.f32 %v4583_v56, %v9776_v25  ;;  %v4595_v34 = vmul.f32 %v4575_v59, %v9780_v52  ;;  %v4962_v4 = vmul.f32 %v4575_v59, %v9786_v54  ;;  %v4963_v15 = vmul.f32 %v4583_v56, %v9790_v48  ;;  %4890 = vrot.lane.b32.xlu1 %v10451_v21, %s7352_s29  ;;  %v4641_v60 = vpop.permute.xlu0 %4640  ;;  %v6117_v59 = vld [vmem:[%s9946_s28 + $0x50] sm:$0xff] }
 0xe1b   : >> { %v4654_v58 = vsel %vm3452_vm3, %v4625_v0, %v4641_v60  ;;  %v4662_v16 = vsel %vm3452_vm3, %v4641_v60, %v4625_v0 }
 0xe1c   : >> { %v4606_v17 = vpack.c.bf16 %v4594_v30, %v4592_v36  ;;  %v4607_v55 = vpack.c.bf16 %v4595_v34, %v4593_v57  ;;  %v10692_v46 = vpack.c.bf16 %v4962_v4, %v4960_v51  ;;  %v10694_v23 = vpack.c.bf16 %v4963_v15, %v4961_v61  ;;  %v4643_v18 = vpop.permute.xlu1 %4642  ;;  %4904 = vrot.lane.b32.xlu0 %v10455_v53, %s7352_s29 }
 0xe1d   : >> { %v10699_v31 = vmul.f32 %v4662_v16, %v11548_v6  ;;  %v10702_v21 = vmul.f32 %v4654_v58, %v11549_v22  ;;  %v10705_v9 = vmul.f32 %v4654_v58, %v11550_v32  ;;  %v10711_v11 = vmul.f32 %v4662_v16, %v11551_v39  ;;  %v6118_v58 = vld [vmem:[%s9946_s28 + $0x58] sm:$0xff] }
 0xe1e   : >> { %4982 = vst [vmem:[#allocation2 + $0x190] sm:$0xff] %v10692_v46  ;;  %4983 = vst [vmem:[#allocation2 + $0x198] sm:$0xff] %v10694_v23  ;;  %v4655_v53 = vsel %vm3452_vm3, %v4627_v12, %v4643_v18  ;;  %v4663_v3 = vsel %vm3452_vm3, %v4643_v18, %v4627_v12  ;;  %4906 = vrot.lane.b32.xlu1 %v10457_v33, %s7352_s29  ;;  %v4721_v28 = vpop.permute.xlu0 %4720  ;;  %5278 = vmatprep.subr.bf16.mxu1 %v4607_v55 }
 0xe1f   : >> { %v10720_v1 = vmul.f32 %v4663_v3, %v11548_v6  ;;  %v10723_v0 = vmul.f32 %v4655_v53, %v11549_v22  ;;  %v10726_v5 = vmul.f32 %v4655_v53, %v11550_v32  ;;  %v10729_v50 = vmul.f32 %v4663_v3, %v11551_v39  ;;  %5279 = vmatpush1.bf16.msra.mxu1 %v4606_v17  ;;  %v6119_v53 = vld [vmem:[%s9946_s28 + $0x60] sm:$0xff] }
 0xe20   : >> { %v4734_v33 = vsel %vm3541_vm4, %v4705_v49, %v4721_v28  ;;  %v4742_v12 = vsel %vm3541_vm4, %v4721_v28, %v4705_v49  ;;  %v4723_v36 = vpop.permute.xlu1 %4722  ;;  %5126 = vperm.xlu0 %6712, %v6115_v37  }
 0xe21   : >> { %v10746_v56 = vmul.f32 %v4742_v12, %v11552_v19  ;;  %v10749_v49 = vmul.f32 %v4734_v33, %v11553_v63  ;;  %v10752_v34 = vmul.f32 %v11555_v47, %v4734_v33  ;;  %v10755_v4 = vmul.f32 %v11557_v7, %v4742_v12  ;;  %v6120_v12 = vld [vmem:[%s9946_s28 + $0x68] sm:$0xff] }
 0xe22   : >> { %5131 = vperm.xlu1 %6713, %v6116_v2   ;;  %v4549_v30 = vpop.permute.xlu0 %4548  ;;  %v4735_v15 = vsel %vm3541_vm4, %v10662_v43, %v4723_v36  ;;  %v4743_v60 = vsel %vm3541_vm4, %v4723_v36, %v10662_v43 }
 0xe23   : >> { %11558 = vst [vmem:[#allocation56_spill] sm:$0xff] %v10752_v34  ;;  %11559 = vst [vmem:[#allocation57_spill] sm:$0xff] %v10755_v4  ;;  %v10765_v16 = vmul.f32 %v4743_v60, %v11552_v19  ;;  %v10768_v17 = vmul.f32 %v4735_v15, %v11553_v63  ;;  %v10771_v55 = vmul.f32 %v11555_v47, %v4735_v15  ;;  %v6121_v15 = vld [vmem:[%s9946_s28 + $0x70] sm:$0xff] }
 0xe24   : >> { %v10774_v18 = vmul.f32 %v11557_v7, %v4743_v60  ;;  %v4551_v37 = vpop.permute.xlu1 %4550  ;;  %5136 = vperm.xlu0 %6712, %v6117_v59   ;;  %v6122_v60 = vld [vmem:[%s9946_s28 + $0x78] sm:$0xff] }
 0xe25   : >> { %11560 = vst [vmem:[#allocation58_spill] sm:$0xff] %v10771_v55 }
 0xe26   : >> { %11561 = vst [vmem:[#allocation59_spill] sm:$0xff] %v10774_v18  ;;  %5141 = vperm.xlu1 %6713, %v6118_v58   ;;  %v4629_v33 = vpop.permute.xlu0 %4628 }
 0xe28   : >> { %v4631_v36 = vpop.permute.xlu1 %4630  ;;  %5146 = vperm.xlu0 %6712, %v6119_v53  }
 0xe2a   : >> { %5151 = vperm.xlu1 %6713, %v6120_v12   ;;  %v10787_v59 = vpop.permute.xlu0 %4708 }
 0xe2c   : >> { %v10790_v51 = vpop.permute.xlu1 %4710  ;;  %5156 = vperm.xlu0 %6712, %v6121_v15  }
 0xe2e   : >> { %5161 = vperm.xlu1 %6713, %v6122_v60   ;;  %v4565_v61 = vpop.permute.xlu0 %4564 }
 0xe2f   : >> { %v4576_v28 = vsel %vm3363_vm2, %v4549_v30, %v4565_v61  ;;  %v4584_v58 = vsel %vm3363_vm2, %v4565_v61, %v4549_v30 }
 0xe30   : >> { %v4596_v2 = vmul.f32 %v4584_v58, %v9776_v25  ;;  %v4597_v53 = vmul.f32 %v4576_v28, %v9780_v52  ;;  %v4567_v43 = vpop.permute.xlu1 %4566  ;;  %v4964_v12 = vmul.f32 %v4576_v28, %v9786_v54  ;;  %v4965_v3 = vmul.f32 %v4584_v58, %v9790_v48 }
 0xe31   : >> { %v4577_v15 = vsel %vm3363_vm2, %v4551_v37, %v4567_v43  ;;  %v4585_v60 = vsel %vm3363_vm2, %v4567_v43, %v4551_v37 }
 0xe32   : >> { %v4598_v45 = vmul.f32 %v4585_v60, %v9776_v25  ;;  %v4599_v38 = vmul.f32 %v4577_v15, %v9780_v52  ;;  %v4966_v61 = vmul.f32 %v4577_v15, %v9786_v54  ;;  %v4967_v30 = vmul.f32 %v4585_v60, %v9790_v48  ;;  %v4645_v57 = vpop.permute.xlu0 %4644 }
 0xe33   : >> { %v4656_v28 = vsel %vm3452_vm3, %v4629_v33, %v4645_v57  ;;  %v4664_v58 = vsel %vm3452_vm3, %v4645_v57, %v4629_v33 }
 0xe34   : >> { %v4608_v27 = vpack.c.bf16 %v4598_v45, %v4596_v2  ;;  %v4609_v62 = vpack.c.bf16 %v4599_v38, %v4597_v53  ;;  %v10812_v44 = vpack.c.bf16 %v4966_v61, %v4964_v12  ;;  %v10814_v37 = vpack.c.bf16 %v4967_v30, %v4965_v3  ;;  %v4647_v43 = vpop.permute.xlu1 %4646 }
 0xe35   : >> { %v10817_v29 = vmul.f32 %v4664_v58, %v11548_v6  ;;  %v10820_v15 = vmul.f32 %v4656_v28, %v11549_v22  ;;  %v10825_v60 = vmul.f32 %v4656_v28, %v11550_v32  ;;  %v10828_v45 = vmul.f32 %v4664_v58, %v11551_v39 }
 0xe36   : >> { %4984 = vst [vmem:[#allocation2 + $0x1a0] sm:$0xff] %v10812_v44  ;;  %4985 = vst [vmem:[#allocation2 + $0x1a8] sm:$0xff] %v10814_v37  ;;  %v4657_v38 = vsel %vm3452_vm3, %v4631_v36, %v4647_v43  ;;  %v4665_v57 = vsel %vm3452_vm3, %v4647_v43, %v4631_v36  ;;  %v4553_v3 = vpop.permute.xlu0 %4552  ;;  %5280 = vmatprep.subr.bf16.mxu1 %v4609_v62 }
 0xe37   : >> { %11562 = vst [vmem:[#allocation60_spill] sm:$0xff] %v10825_v60  ;;  %v10835_v2 = vmul.f32 %v4665_v57, %v11548_v6  ;;  %v10838_v33 = vmul.f32 %v4657_v38, %v11549_v22  ;;  %v10841_v53 = vmul.f32 %v4657_v38, %v11550_v32  ;;  %v10844_v12 = vmul.f32 %v4665_v57, %v11551_v39 }
 0xe38   : >> { %5281 = vmatpush1.bf16.msra.mxu1 %v4608_v27  ;;  %v4555_v61 = vpop.permute.xlu1 %4554 }
 0xe39   : >> { %11563 = vst [vmem:[#allocation61_spill] sm:$0xff] %v10841_v53  ;;  %v4689_v62 = vpack.c.bf16 %v10838_v33, %v10820_v15 }
 0xe3a   : >> { %v4633_v58 = vpop.permute.xlu0 %4632 }
 0xe3c   : >> { %v4635_v43 = vpop.permute.xlu1 %4634 }
 0xe3e   : >> { %v4569_v38 = vpop.permute.xlu0 %4568 }
 0xe3f   : >> { %v4578_v57 = vsel %vm3363_vm2, %v4553_v3, %v4569_v38  ;;  %v4586_v27 = vsel %vm3363_vm2, %v4569_v38, %v4553_v3 }
 0xe40   : >> { %v4600_v30 = vmul.f32 %v4586_v27, %v9776_v25  ;;  %v4601_v34 = vmul.f32 %v4578_v57, %v9780_v52  ;;  %v4571_v15 = vpop.permute.xlu1 %4570  ;;  %v4968_v33 = vmul.f32 %v4578_v57, %v9786_v54  ;;  %v10862_v36 = vmul.f32 %v4586_v27, %v9790_v48 }
 0xe41   : >> { %v4579_v28 = vsel %vm3363_vm2, %v4555_v61, %v4571_v15  ;;  %v4587_v55 = vsel %vm3363_vm2, %v4571_v15, %v4555_v61 }
 0xe42   : >> { %v4602_v4 = vmul.f32 %v4587_v55, %v9776_v25  ;;  %v4603_v3 = vmul.f32 %v4579_v28, %v9780_v52  ;;  %v4970_v38 = vmul.f32 %v4579_v28, %v9786_v54  ;;  %v10872_v18 = vmul.f32 %v4587_v55, %v9790_v48  ;;  %v4725_v60 = vpop.permute.xlu0 %4724 }
 0xe43   : >> { %v4736_v57 = vsel %vm3541_vm4, %v10787_v59, %v4725_v60  ;;  %v4744_v27 = vsel %vm3541_vm4, %v4725_v60, %v10787_v59 }
 0xe44   : >> { %v4610_v53 = vpack.c.bf16 %v4602_v4, %v4600_v30  ;;  %v4611_v61 = vpack.c.bf16 %v4603_v3, %v4601_v34  ;;  %v10880_v15 = vpack.c.bf16 %v4970_v38, %v4968_v33  ;;  %v4979_v25 = vpack.c.bf16 %v10872_v18, %v10862_v36  ;;  %v4727_v52 = vpop.permute.xlu1 %4726  ;;  %v11578_v18 = vld [vmem:[#allocation61_spill] sm:$0xff] }
 0xe45   : >> { %v10885_v54 = vmul.f32 %v4744_v27, %v11552_v19  ;;  %v10888_v48 = vmul.f32 %v4736_v57, %v11553_v63  ;;  %v10892_v55 = vmul.f32 %v11555_v47, %v4736_v57  ;;  %v10895_v4 = vmul.f32 %v11557_v7, %v4744_v27 }
 0xe46   : >> { %4986 = vst [vmem:[#allocation2 + $0x1b0] sm:$0xff] %v10880_v15  ;;  %v4737_v34 = vsel %vm3541_vm4, %v10790_v51, %v4727_v52  ;;  %v4745_v59 = vsel %vm3541_vm4, %v4727_v52, %v10790_v51  ;;  %v4649_v60 = vpop.permute.xlu0 %4648  ;;  %5282 = vmatprep.subr.bf16.mxu1 %v4611_v61  ;;  %v11564_v51 = vpack.c.bf16 %v10612_v40, %v10598_v10 }
 0xe47   : >> { %v10904_v30 = vmul.f32 %v4745_v59, %v11552_v19  ;;  %v10907_v28 = vmul.f32 %v4737_v34, %v11553_v63  ;;  %v10910_v33 = vmul.f32 %v11555_v47, %v4737_v34  ;;  %v10913_v3 = vmul.f32 %v11557_v7, %v4745_v59  ;;  %5283 = vmatpush1.bf16.msra.mxu1 %v4610_v53 }
 0xe48   : >> { %v10915_v38 = vpop.permute.xlu1 %4714  ;;  %5284 = vmatprep.subr.bf16.mxu1 %v11564_v51  ;;  %v11565_v53 = vpack.c.bf16 %v10609_v35, %v10595_v42  ;;  %v11566_v10 = vpack.c.bf16 %v10723_v0, %v10702_v21  ;;  %v4658_v40 = vsel %vm3452_vm3, %v4633_v58, %v4649_v60  ;;  %v11567_v51 = vpack.c.bf16 %v10720_v1, %v10699_v31 }
 0xe49   : >> { %v4768_v57 = vpack.c.bf16 %v10904_v30, %v10885_v54  ;;  %v4769_v27 = vpack.c.bf16 %v10907_v28, %v10888_v48  ;;  %v4666_v48 = vsel %vm3452_vm3, %v4649_v60, %v4633_v58  ;;  %v4681_v42 = vmul.f32 %v4658_v40, %v11549_v22 }
 0xe4a   : >> { %v4713_v34 = vpop.permute.xlu0 %4712  ;;  %v4680_v61 = vmul.f32 %v4666_v48, %v11548_v6  ;;  %v10944_v21 = vmul.f32 %v4658_v40, %v11550_v32  ;;  %v10947_v0 = vmul.f32 %v4666_v48, %v11551_v39  ;;  %v11568_v40 = vpack.c.bf16 %v10835_v2, %v10817_v29 }
 0xe4b   : >> { %5285 = vmatpush1.bf16.msra.mxu1 %v11565_v53 }
 0xe4c   : >> { %v4783_v59 = vpop.permute.xlu1 %4782  ;;  %5286 = vmatprep.subr.bf16.mxu1 %v11566_v10 }
 0xe4e   : >> { %v4729_v28 = vpop.permute.xlu0 %4728 }
 0xe4f   : >> { %5287 = vmatpush1.bf16.msra.mxu1 %v11567_v51 }
 0xe50   : >> { %v4651_v35 = vpop.permute.xlu1 %4650  ;;  %5288 = vmatprep.subr.bf16.mxu1 %v4689_v62 }
 0xe51   : >> { %v4659_v58 = vsel %vm3452_vm3, %v4635_v43, %v4651_v35  ;;  %v4667_v60 = vsel %vm3452_vm3, %v4651_v35, %v4635_v43 }
 0xe52   : >> { %v4682_v31 = vmul.f32 %v4667_v60, %v11548_v6  ;;  %v4683_v1 = vmul.f32 %v4659_v58, %v11549_v22  ;;  %v10956_v53 = vmul.f32 %v4659_v58, %v11550_v32  ;;  %v10959_v62 = vmul.f32 %v4667_v60, %v11551_v39  ;;  %v4781_v10 = vpop.permute.xlu0 %4780  ;;  %v11570_v58 = vld [vmem:[#allocation63_spill] sm:$0xff] }
 0xe53   : >> { %5289 = vmatpush1.bf16.msra.mxu1 %v11568_v40 }
 0xe54   : >> { %v4690_v48 = vpack.c.bf16 %v4682_v31, %v4680_v61  ;;  %v4691_v51 = vpack.c.bf16 %v4683_v1, %v4681_v42  ;;  %v5010_v43 = vpack.c.bf16 %v10956_v53, %v10944_v21  ;;  %v5011_v6 = vpack.c.bf16 %v10959_v62, %v10947_v0  ;;  %v4799_v22 = vpop.permute.xlu1 %4798  ;;  %v11569_v61 = vld [vmem:[#allocation62_spill] sm:$0xff]  ;;  %v11585_v62 = vld [vmem:[#allocation56_spill] sm:$0xff] }
 0xe55   : >> { %v4813_v32 = vsel %vm3630_vm5, %v4783_v59, %v4799_v22  ;;  %v4821_v39 = vsel %vm3630_vm5, %v4799_v22, %v4783_v59  ;;  %v11571_v59 = vpack.c.bf16 %v10646_v13, %v10630_v14  ;;  %v4738_v14 = vsel %vm3541_vm4, %v4713_v34, %v4729_v28  ;;  %v11584_v0 = vld [vmem:[#allocation58_spill] sm:$0xff] }
 0xe56   : >> { %v4797_v35 = vpop.permute.xlu0 %4796  ;;  %5290 = vmatprep.subr.bf16.mxu1 %v4691_v51  ;;  %v4830_v42 = vmul.f32 %v4821_v39, %v11569_v61  ;;  %v4831_v60 = vmul.f32 %v4813_v32, %v11570_v58  ;;  %v11573_v32 = vpack.c.bf16 %v10768_v17, %v10749_v49  ;;  %v4746_v13 = vsel %vm3541_vm4, %v4729_v28, %v4713_v34  ;;  %v6760_v21 = vld [vmem:[%s9579_s24 + $0xfc] ss:$20 sps:$4 sm:$0xff]  }
 0xe57   : >> { %v4812_v29 = vsel %vm3630_vm5, %v4781_v10, %v4797_v35  ;;  %v4820_v2 = vsel %vm3630_vm5, %v4797_v35, %v4781_v10  ;;  %5291 = vmatpush1.bf16.msra.mxu1 %v4690_v48  ;;  %v11572_v10 = vpack.c.bf16 %v10643_v26, %v10627_v20  ;;  %v11574_v49 = vpack.c.bf16 %v10765_v16, %v10746_v56 }
 0xe58   : >> { %v4828_v31 = vmul.f32 %v4820_v2, %v11569_v61  ;;  %v4829_v1 = vmul.f32 %v4812_v29, %v11570_v58  ;;  %v4787_v40 = vpop.permute.xlu1 %4786  ;;  %5292 = vmatprep.subr.bf16.mxu1 %v11571_v59  ;;  %v4760_v28 = vmul.f32 %v4746_v13, %v11552_v19  ;;  %v11587_v53 = vpack.c.bf16 %v10913_v3, %v10895_v4  ;;  %v6763_v4 = vld [vmem:[%s9579_s24 + $0x124] ss:$20 sps:$4 sm:$0xff]   ;;  %v6765_v3 = vld [vmem:[%s9579_s24 + $0x120] ss:$20 sps:$4 sm:$0xff]  }
 0xe5a   : >> { %v4844_v51 = vpack.c.bf16 %v4830_v42, %v4828_v31  ;;  %v4845_v22 = vpack.c.bf16 %v4831_v60, %v4829_v1  ;;  %v4785_v52 = vpop.permute.xlu0 %4784  ;;  %v4761_v31 = vmul.f32 %v4738_v14, %v11553_v63 }
 0xe5b   : >> { %5293 = vmatpush1.bf16.msra.mxu1 %v11572_v10 }
 0xe5c   : >> { %v4803_v48 = vpop.permute.xlu1 %4802  ;;  %5294 = vmatprep.subr.bf16.mxu1 %v11573_v32 }
 0xe5d   : >> { %v4815_v39 = vsel %vm3630_vm5, %v4787_v40, %v4803_v48  ;;  %v4823_v35 = vsel %vm3630_vm5, %v4803_v48, %v4787_v40  ;;  %v11022_v48 = vmul.f32 %v11557_v7, %v4746_v13 }
 0xe5e   : >> { %v4801_v29 = vpop.permute.xlu0 %4800  ;;  %v4834_v17 = vmul.f32 %v4823_v35, %v11569_v61  ;;  %v4835_v2 = vmul.f32 %v4815_v39, %v11570_v58 }
 0xe5f   : >> { %v4814_v20 = vsel %vm3630_vm5, %v4785_v52, %v4801_v29  ;;  %v4822_v26 = vsel %vm3630_vm5, %v4801_v29, %v4785_v52  ;;  %5295 = vmatpush1.bf16.msra.mxu1 %v11574_v49 }
 0xe60   : >> { %v4832_v42 = vmul.f32 %v4822_v26, %v11569_v61  ;;  %v4833_v60 = vmul.f32 %v4814_v20, %v11570_v58  ;;  %v4731_v34 = vpop.permute.xlu1 %4730  ;;  %5296 = vmatprep.subr.bf16.mxu1 %v4769_v27  ;;  %v11019_v27 = vmul.f32 %v11555_v47, %v4738_v14 }
 0xe61   : >> { %v4739_v52 = vsel %vm3541_vm4, %v10915_v38, %v4731_v34  ;;  %v4747_v56 = vsel %vm3541_vm4, %v4731_v34, %v10915_v38 }
 0xe62   : >> { %v4846_v16 = vpack.c.bf16 %v4834_v17, %v4832_v42  ;;  %v4847_v1 = vpack.c.bf16 %v4835_v2, %v4833_v60  ;;  %v4762_v40 = vmul.f32 %v4747_v56, %v11552_v19  ;;  %v4763_v59 = vmul.f32 %v4739_v52, %v11553_v63  ;;  %v4789_v10 = vpop.permute.xlu0 %4788 }
 0xe63   : >> { %v11025_v32 = vmul.f32 %v11555_v47, %v4739_v52  ;;  %v11028_v39 = vmul.f32 %v11557_v7, %v4747_v56  ;;  %5297 = vmatpush1.bf16.msra.mxu1 %v4768_v57 }
 0xe64   : >> { %v4770_v19 = vpack.c.bf16 %v4762_v40, %v4760_v28  ;;  %v4771_v38 = vpack.c.bf16 %v4763_v59, %v4761_v31  ;;  %v4791_v63 = vpop.permute.xlu1 %4790 }
 0xe65   : >> { %v5042_v35 = vpack.c.bf16 %v11025_v32, %v11019_v27  ;;  %v5043_v14 = vpack.c.bf16 %v11028_v39, %v11022_v48  ;;  %v6768_v27 = vld [vmem:[%s9579_s24 + $0x100] ss:$20 sps:$4 sm:$0xff]   ;;  %v6769_v48 = vld [vmem:[%s9579_s24 + $0x128] ss:$20 sps:$4 sm:$0xff]  }
 0xe66   : >> { %v4805_v13 = vpop.permute.xlu0 %4804  ;;  %5298 = vmatprep.subr.bf16.mxu1 %v4771_v38 }
 0xe67   : >> { %v4816_v29 = vsel %vm3630_vm5, %v4789_v10, %v4805_v13  ;;  %v4824_v20 = vsel %vm3630_vm5, %v4805_v13, %v4789_v10  ;;  %5299 = vmatpush1.bf16.msra.mxu1 %v4770_v19 }
 0xe68   : >> { %v4807_v54 = vpop.permute.xlu1 %4806  ;;  %5300 = vmatprep.subr.bf16.mxu1 %v4845_v22  ;;  %v4836_v26 = vmul.f32 %v4824_v20, %v11569_v61  ;;  %v4837_v49 = vmul.f32 %v4816_v29, %v11570_v58  ;;  %v6742_v20 = vld [vmem:[%s9579_s24 + $0xa0] ss:$20 sps:$4 sm:$0xff]  }
 0xe69   : >> { %v4817_v30 = vsel %vm3630_vm5, %v4791_v63, %v4807_v54  ;;  %v4825_v57 = vsel %vm3630_vm5, %v4807_v54, %v4791_v63 }
 0xe6a   : >> { %v4838_v17 = vmul.f32 %v4825_v57, %v11569_v61  ;;  %v4839_v2 = vmul.f32 %v4817_v30, %v11570_v58  ;;  %v4793_v42 = vpop.permute.xlu0 %4792  ;;  %v5085_v57 = vld [vmem:[#allocation2 + $0x108] sm:$0xff] }
 0xe6b   : >> { %5301 = vmatpush1.bf16.msra.mxu1 %v4844_v51 }
 0xe6c   : >> { %v4848_v60 = vpack.c.bf16 %v4838_v17, %v4836_v26  ;;  %v4849_v34 = vpack.c.bf16 %v4839_v2, %v4837_v49  ;;  %v4795_v28 = vpop.permute.xlu1 %4794  ;;  %5302 = vmatprep.subr.bf16.mxu1 %v4847_v1  ;;  %v6745_v26 = vld [vmem:[%s9579_s24 + $0xcc] ss:$20 sps:$4 sm:$0xff]  }
 0xe6e   : >> { %v4809_v22 = vpop.permute.xlu0 %4808 }
 0xe6f   : >> { %v4818_v31 = vsel %vm3630_vm5, %v4793_v42, %v4809_v22  ;;  %v4826_v52 = vsel %vm3630_vm5, %v4809_v22, %v4793_v42  ;;  %5303 = vmatpush1.bf16.msra.mxu1 %v4846_v16  ;;  %v5087_v22 = vld [vmem:[#allocation2 + $0x118] sm:$0xff] }
 0xe70   : >> { %v4811_v56 = vpop.permute.xlu1 %4810  ;;  %5304 = vmatprep.subr.bf16.mxu1 %v4849_v34  ;;  %v4840_v59 = vmul.f32 %v4826_v52, %v11569_v61  ;;  %v4841_v1 = vmul.f32 %v4818_v31, %v11570_v58 }
 0xe71   : >> { %v4819_v40 = vsel %vm3630_vm5, %v4795_v28, %v4811_v56  ;;  %v4827_v51 = vsel %vm3630_vm5, %v4811_v56, %v4795_v28  ;;  %v5084_v28 = vld [vmem:[#allocation2 + $0x100] sm:$0xff] }
 0xe72   : >> { %v4842_v10 = vmul.f32 %v4827_v51, %v11569_v61  ;;  %v4843_v19 = vmul.f32 %v4819_v40, %v11570_v58  ;;  %v4877_v38 = vpop.permute.xlu0 %4876  ;;  %v5086_v51 = vld [vmem:[#allocation2 + $0x110] sm:$0xff] }
 0xe73   : >> { %5305 = vmatpush1.bf16.msra.mxu1 %v4848_v60 }
 0xe74   : >> { %v4850_v16 = vpack.c.bf16 %v4842_v10, %v4840_v59  ;;  %v4851_v63 = vpack.c.bf16 %v4843_v19, %v4841_v1  ;;  %v4879_v13 = vpop.permute.xlu1 %4878  ;;  %v6747_v59 = vld [vmem:[%s9579_s24 + $0xc8] ss:$20 sps:$4 sm:$0xff]  }
 0xe75   : >> { %v5089_v19 = vld [vmem:[#allocation2 + $0x128] sm:$0xff] }
 0xe76   : >> { %v4893_v29 = vpop.permute.xlu0 %4892  ;;  %5306 = vmatprep.subr.bf16.mxu1 %v4851_v63 }
 0xe77   : >> { %v4908_v54 = vsel %vm3735_vm6, %v4877_v38, %v4893_v29  ;;  %v4916_v30 = vsel %vm3735_vm6, %v4893_v29, %v4877_v38  ;;  %5307 = vmatpush1.bf16.msra.mxu1 %v4850_v16  ;;  %v6748_v38 = vld [vmem:[%s9579_s24 + $0xf4] ss:$20 sps:$4 sm:$0xff]  }
 0xe78   : >> { %v4895_v61 = vpop.permute.xlu1 %4894  ;;  %5349 = vmatprep.subr.bf16.mxu1 %v5085_v57  ;;  %v4924_v17 = vmul.f32 %v4908_v54, %v10260_v41  ;;  %v4925_v2 = vmul.f32 %v4916_v30, %v10251_v8 }
 0xe79   : >> { %v4909_v58 = vsel %vm3735_vm6, %v4879_v13, %v4895_v61  ;;  %v4917_v49 = vsel %vm3735_vm6, %v4895_v61, %v4879_v13  ;;  %v5091_v61 = vld [vmem:[#allocation2 + $0x138] sm:$0xff] }
 0xe7a   : >> { %v4926_v42 = vmul.f32 %v4909_v58, %v10260_v41  ;;  %v4927_v60 = vmul.f32 %v4917_v49, %v10251_v8  ;;  %v4881_v34 = vpop.permute.xlu0 %4880  ;;  %5309 = vmatmul.mubr.bf16.vlgmr.msra.gmra.mrb[0].mxu1 %v6742_v20 }
 0xe7b   : >> { %5350 = vmatpush1.bf16.msra.mxu1 %v5084_v28  ;;  %5318 = vmatprep.mubr.bf16.mxu1 %v6745_v26  ;;  %v5088_v26 = vld [vmem:[#allocation2 + $0x120] sm:$0xff] }
 0xe7c   : >> { %v4940_v31 = vpack.c.bf16 %v4926_v42, %v4924_v17  ;;  %v4941_v52 = vpack.c.bf16 %v4927_v60, %v4925_v2  ;;  %v4883_v56 = vpop.permute.xlu1 %4882  ;;  %5351 = vmatprep.subr.bf16.mxu1 %v5087_v22  ;;  %v5090_v42 = vld [vmem:[#allocation2 + $0x130] sm:$0xff] }
 0xe7d   : >> { %v6750_v60 = vld [vmem:[%s9579_s24 + $0xf0] ss:$20 sps:$4 sm:$0xff]  }
 0xe7e   : >> { %v4897_v40 = vpop.permute.xlu0 %4896  ;;  %v6751_v22 = vld [vmem:[%s9579_s24 + $0x11c] ss:$20 sps:$4 sm:$0xff]  }
 0xe7f   : >> { %v4910_v1 = vsel %vm3735_vm6, %v4881_v34, %v4897_v40  ;;  %v4918_v10 = vsel %vm3735_vm6, %v4897_v40, %v4881_v34  ;;  %5352 = vmatpush1.bf16.msra.mxu1 %v5086_v51 }
 0xe80   : >> { %v4899_v16 = vpop.permute.xlu1 %4898  ;;  %5353 = vmatprep.subr.bf16.mxu1 %v5089_v19  ;;  %v4928_v29 = vmul.f32 %v4910_v1, %v10260_v41  ;;  %v4929_v20 = vmul.f32 %v4918_v10, %v10251_v8 }
 0xe81   : >> { %v4911_v63 = vsel %vm3735_vm6, %v4883_v56, %v4899_v16  ;;  %v4919_v13 = vsel %vm3735_vm6, %v4899_v16, %v4883_v56 }
 0xe82   : >> { %v4930_v54 = vmul.f32 %v4911_v63, %v10260_v41  ;;  %v4931_v30 = vmul.f32 %v4919_v13, %v10251_v8  ;;  %v4885_v57 = vpop.permute.xlu0 %4884  ;;  %5319 = vmatmul.mubr.bf16.gmra.mrb[4].mxu1 %v6747_v59 }
 0xe83   : >> { %5354 = vmatpush1.bf16.msra.mxu1 %v5088_v26  ;;  %5328 = vmatprep.mubr.bf16.mxu1 %v6748_v38 }
 0xe84   : >> { %v4942_v58 = vpack.c.bf16 %v4930_v54, %v4928_v29  ;;  %v4943_v49 = vpack.c.bf16 %v4931_v30, %v4929_v20  ;;  %v4887_v17 = vpop.permute.xlu1 %4886  ;;  %5355 = vmatprep.subr.bf16.mxu1 %v5091_v61  ;;  %v6753_v29 = vld [vmem:[%s9579_s24 + $0x118] ss:$20 sps:$4 sm:$0xff]  }
 0xe85   : >> { %v6756_v30 = vld [vmem:[%s9579_s24 + $0xac] ss:$20 sps:$4 sm:$0xff]  }
 0xe86   : >> { %v4901_v2 = vpop.permute.xlu0 %4900 }
 0xe87   : >> { %v4912_v34 = vsel %vm3735_vm6, %v4885_v57, %v4901_v2  ;;  %v4920_v28 = vsel %vm3735_vm6, %v4901_v2, %v4885_v57  ;;  %5356 = vmatpush1.bf16.msra.mxu1 %v5090_v42 }
 0xe88   : >> { %v4903_v56 = vpop.permute.xlu1 %4902  ;;  %5357 = vmatprep.subr.bf16.mxu1 %v4941_v52  ;;  %v4932_v59 = vmul.f32 %v4912_v34, %v10260_v41  ;;  %v4933_v1 = vmul.f32 %v4920_v28, %v10251_v8  ;;  %v5100_v34 = vld [vmem:[#allocation2 + $0x180] sm:$0xff]  ;;  %v6762_v28 = vld [vmem:[%s9579_s24 + $0xf8] ss:$20 sps:$4 sm:$0xff]  }
 0xe89   : >> { %v4913_v40 = vsel %vm3735_vm6, %v4887_v17, %v4903_v56  ;;  %v4921_v51 = vsel %vm3735_vm6, %v4903_v56, %v4887_v17 }
 0xe8a   : >> { %v4934_v10 = vmul.f32 %v4913_v40, %v10260_v41  ;;  %v4935_v19 = vmul.f32 %v4921_v51, %v10251_v8  ;;  %v4889_v38 = vpop.permute.xlu0 %4888  ;;  %5329 = vmatmul.mubr.bf16.gmra.mrb[8].mxu1 %v6750_v60  ;;  %v5101_v60 = vld [vmem:[#allocation2 + $0x188] sm:$0xff] }
 0xe8b   : >> { %5358 = vmatpush1.bf16.msra.mxu1 %v4940_v31  ;;  %5338 = vmatprep.mubr.bf16.mxu1 %v6751_v22  ;;  %v11589_v22 = vmov 0  }
 0xe8c   : >> { %v4944_v52 = vpack.c.bf16 %v4934_v10, %v4932_v59  ;;  %v4945_v16 = vpack.c.bf16 %v4935_v19, %v4933_v1  ;;  %v4891_v63 = vpop.permute.xlu1 %4890  ;;  %5359 = vmatprep.subr.bf16.mxu1 %v4943_v49  ;;  %v11590_v59 = vld [vmem:[#allocation55_spill] sm:$0xff] }
 0xe8e   : >> { %v4905_v13 = vpop.permute.xlu0 %4904 }
 0xe8f   : >> { %v4914_v20 = vsel %vm3735_vm6, %v4889_v38, %v4905_v13  ;;  %v4922_v54 = vsel %vm3735_vm6, %v4905_v13, %v4889_v38  ;;  %5360 = vmatpush1.bf16.msra.mxu1 %v4942_v58  ;;  %v11592_v38 = vld [vmem:[#allocation54_spill] sm:$0xff]  ;;  %v11596_v13 = vld [vmem:[#allocation52_spill] sm:$0xff] }
 0xe90   : >> { %v4907_v57 = vpop.permute.xlu1 %4906  ;;  %5361 = vmatprep.subr.bf16.mxu1 %v4945_v16  ;;  %v4936_v61 = vmul.f32 %v4914_v20, %v10260_v41  ;;  %v4937_v49 = vmul.f32 %v4922_v54, %v10251_v8 }
 0xe91   : >> { %v4915_v31 = vsel %vm3735_vm6, %v4891_v63, %v4907_v57  ;;  %v4923_v26 = vsel %vm3735_vm6, %v4907_v57, %v4891_v63  ;;  %v11594_v63 = vld [vmem:[#allocation53_spill] sm:$0xff] }
 0xe92   : >> { %v4938_v17 = vmul.f32 %v4915_v31, %v10260_v41  ;;  %v4939_v2 = vmul.f32 %v4923_v26, %v10251_v8  ;;  %5339 = vmatmul.mubr.bf16.gmra.mrb[12].mxu1 %v6753_v29  ;;  %v5109_v8 = vld [vmem:[#allocation2 + $0x1c8] sm:$0xff]  ;;  %v5108_v41 = vld [vmem:[#allocation2 + $0x1c0] sm:$0xff] }
 0xe93   : >> { %5362 = vmatpush1.bf16.msra.mxu1 %v4944_v52  ;;  %5381 = vmatprep.mubr.bf16.mxu1 %v6756_v30 }
 0xe94   : >> { %v4946_v58 = vpack.c.bf16 %v4938_v17, %v4936_v61  ;;  %v4947_v42 = vpack.c.bf16 %v4939_v2, %v4937_v49  ;;  %v11598_v17 = vld [vmem:[#allocation51_spill] sm:$0xff] }
 0xe96   : >> { %5363 = vmatprep.subr.bf16.mxu1 %v4947_v42 }
 0xe97   : >> { %5364 = vmatpush1.bf16.msra.mxu1 %v4946_v58 }
 0xe98   : >> { %5365 = vmatprep.subr.bf16.mxu1 %v5101_v60 }
 0xe9b   : >> { %5366 = vmatpush1.bf16.msra.mxu1 %v5100_v34 }
 0xe9c   : >> { %5367 = vmatprep.subr.bf16.mxu1 %v10694_v23  ;;  %v11575_v23 = vpack.c.bf16 %v10729_v50, %v10711_v11  ;;  %v6754_v11 = vld [vmem:[%s9579_s24 + $0xa8] ss:$20 sps:$4 sm:$0xff]   ;;  %v5116_v50 = vld [vmem:[#allocation2 + $0x200] sm:$0xff] }
 0xe9f   : >> { %5368 = vmatpush1.bf16.msra.mxu1 %v10692_v46  ;;  %v11576_v46 = vpack.c.bf16 %v10726_v5, %v10705_v9  ;;  %v5117_v9 = vld [vmem:[#allocation2 + $0x208] sm:$0xff]  ;;  %v5127_v32 = vpop.permute.xlu0 %5126 }
 0xea0   : >> { %5369 = vmatprep.subr.bf16.mxu1 %v10814_v37  ;;  %v11579_v37 = vld [vmem:[#allocation60_spill] sm:$0xff] }
 0xea1   : >> { %v11580_v36 = vpack.c.bf16 %v11578_v18, %v11579_v37  ;;  %v6757_v5 = vld [vmem:[%s9579_s24 + $0xd4] ss:$20 sps:$4 sm:$0xff]   ;;  %v5132_v56 = vpop.permute.xlu1 %5131 }
 0xea3   : >> { %5370 = vmatpush1.bf16.msra.mxu1 %v10812_v44  ;;  %v11577_v44 = vpack.c.bf16 %v10844_v12, %v10828_v45  ;;  %v11581_v45 = vld [vmem:[#allocation59_spill] sm:$0xff]  ;;  %v11582_v12 = vld [vmem:[#allocation57_spill] sm:$0xff]  ;;  %v5137_v54 = vpop.permute.xlu0 %5136 }
 0xea4   : >> { %5371 = vmatprep.subr.bf16.mxu1 %v4979_v25  ;;  %v6759_v25 = vld [vmem:[%s9579_s24 + $0xd0] ss:$20 sps:$4 sm:$0xff]  }
 0xea5   : >> { %v5142_v26 = vpop.permute.xlu1 %5141 }
 0xea7   : >> { %5372 = vmatpush1.bf16.msra.mxu1 %v10880_v15  ;;  %v11583_v15 = vpack.c.bf16 %v11581_v45, %v11582_v12  ;;  %v11603_v12 = vld [vmem:[#allocation47_spill] sm:$0xff] }
 0xea8   : >> { %5373 = vmatprep.subr.bf16.mxu1 %v5109_v8  ;;  %v11600_v8 = vld [vmem:[#allocation50_spill] sm:$0xff] }
 0xeab   : >> { %5374 = vmatpush1.bf16.msra.mxu1 %v5108_v41 }
 0xeac   : >> { %5375 = vmatprep.subr.bf16.mxu1 %v11575_v23 }
 0xeaf   : >> { %5376 = vmatpush1.bf16.msra.mxu1 %v11576_v46 }
 0xeb0   : >> { %5377 = vmatprep.subr.bf16.mxu1 %v11577_v44 }
 0xeb3   : >> { %5378 = vmatpush1.bf16.msra.mxu1 %v11580_v36 }
 0xeb4   : >> { %5379 = vmatprep.subr.bf16.mxu1 %v5011_v6  ;;  %v11586_v6 = vpack.c.bf16 %v11584_v0, %v11585_v62  ;;  %v11604_v0 = vld [vmem:[#allocation46_spill] sm:$0xff] }
 0xeb7   : >> { %5380 = vmatpush1.bf16.msra.mxu1 %v5010_v43  ;;  %v11588_v43 = vpack.c.bf16 %v10910_v33, %v10892_v55  ;;  %v6766_v55 = vld [vmem:[%s9579_s24 + $0xb0] ss:$20 sps:$4 sm:$0xff]   ;;  %v6767_v33 = vld [vmem:[%s9579_s24 + $0xd8] ss:$20 sps:$4 sm:$0xff]  }
 0xeb8   : >> { %5422 = vmatprep.subr.bf16.mxu1 %v5117_v9 }
 0xeba   : >> { %5382 = vmatmul.mubr.bf16.vlgmr.msra.gmra.mrb[0].mxu1 %v6754_v11 }
 0xebb   : >> { %5423 = vmatpush1.bf16.msra.mxu1 %v5116_v50  ;;  %5391 = vmatprep.mubr.bf16.mxu1 %v6757_v5  ;;  %v5152_v5 = vpop.permute.xlu1 %5151 }
 0xebc   : >> { %5424 = vmatprep.subr.bf16.mxu1 %v11583_v15 }
 0xebf   : >> { %5425 = vmatpush1.bf16.msra.mxu1 %v11586_v6 }
 0xec0   : >> { %5426 = vmatprep.subr.bf16.mxu1 %v11587_v53 }
 0xec2   : >> { %5392 = vmatmul.mubr.bf16.gmra.mrb[4].mxu1 %v6759_v25 }
 0xec3   : >> { %5427 = vmatpush1.bf16.msra.mxu1 %v11588_v43  ;;  %5401 = vmatprep.mubr.bf16.mxu1 %v6760_v21  ;;  %v11605_v21 = vld [vmem:[#allocation45_spill] sm:$0xff]  ;;  %v11606_v43 = vld [vmem:[#allocation44_spill] sm:$0xff] }
 0xec4   : >> { %5428 = vmatprep.subr.bf16.mxu1 %v5043_v14 }
 0xec7   : >> { %5429 = vmatpush1.bf16.msra.mxu1 %v5042_v35 }
 0xeca   : >> { %5402 = vmatmul.mubr.bf16.gmra.mrb[8].mxu1 %v6762_v28 }
 0xecb   : >> { %5411 = vmatprep.mubr.bf16.mxu1 %v6763_v4 }
 0xed2   : >> { %5412 = vmatmul.mubr.bf16.gmra.mrb[12].mxu1 %v6765_v3 }
 0xed3   : >> { %5454 = vmatprep.mubr.bf16.mxu1 %v11589_v22 }
 0xeda   : >> { %6143 = vmatmul.mubr.msk.bf16.vlgmr.msra.gmra.mrb[0].mxu1 %vm4124_vm7, %v6766_v55 }
 0xedb   : >> { %5464 = vmatprep.mubr.bf16.mxu1 %v11589_v22 }
 0xee2   : >> { %6144 = vmatmul.mubr.msk.bf16.gmra.mrb[4].mxu1 %vm4124_vm7, %v6767_v33  ;;  %v5162_v33 = vpop.permute.xlu1 %5161 }
 0xee3   : >> { %5474 = vmatprep.mubr.bf16.mxu1 %v11589_v22 }
 0xeea   : >> { %6145 = vmatmul.mubr.msk.bf16.gmra.mrb[8].mxu1 %vm4124_vm7, %v6768_v27 }
 0xeeb   : >> { %5484 = vmatprep.mubr.bf16.mxu1 %v11589_v22 }
 0xef2   : >> { %6146 = vmatmul.mubr.msk.bf16.gmra.mrb[12].mxu1 %vm4124_vm7, %v6769_v48 }
 0xfad   : >> { %v5456_v39 = vpop.f32.mrb[0].mxu1 }
 0xfae   : >> { %v6217_v35 = vadd.f32 %v5456_v39, %v5127_v32  ;;  %v5458_v14 = vpop.f32.mrb[1].mxu1 }
 0xfaf   : >> { %v6218_v40 = vadd.f32 %v5458_v14, %v5127_v32  ;;  %v5460_v51 = vpop.f32.mrb[2].mxu1  ;;  %v11607_v32 = vld [vmem:[#allocation43_spill] sm:$0xff] }
 0xfb0   : >> { %v11181_v46 = vadd.f32 %v11590_v59, %v6217_v35   ;;  %v6219_v10 = vadd.f32 %v5460_v51, %v5132_v56  ;;  %v5462_v19 = vpop.f32.mrb[3].mxu1  ;;  %v11609_v59 = vld [vmem:[#allocation41_spill] sm:$0xff] }
 0xfb1   : >> { %v11184_v23 = vadd.f32 %v11592_v38, %v6218_v40   ;;  %v6220_v16 = vadd.f32 %v5462_v19, %v5132_v56  ;;  %v11608_v56 = vld [vmem:[#allocation42_spill] sm:$0xff]  ;;  %v11610_v19 = vld [vmem:[#allocation40_spill] sm:$0xff] }
 0xfb2   : >> { %v11591_v1 = vmov %v11181_v46  ;;  %v11187_v58 = vadd.f32 %v11594_v63, %v6219_v10   ;;  %v5147_v46 = vpop.permute.xlu0 %5146 }
 0xfb3   : >> { %v11593_v52 = vmov %v11184_v23  ;;  %v11190_v16 = vadd.f32 %v11596_v13, %v6220_v16   ;;  %v11601_v23 = vld [vmem:[#allocation49_spill] sm:$0xff] }
 0xfb4   : >> { %v11595_v29 = vmov %v11187_v58  ;;  %v11602_v58 = vld [vmem:[#allocation48_spill] sm:$0xff] }
 0xfb5   : >> { %v11597_v20 = vmov %v11190_v16  ;;  %v5466_v30 = vpop.f32.mrb[4].mxu1 }
 0xfb6   : >> { %v6221_v57 = vadd.f32 %v5466_v30, %v5137_v54  ;;  %v5468_v31 = vpop.f32.mrb[5].mxu1  ;;  %v5157_v4 = vpop.permute.xlu0 %5156  ;;  %v11624_v16 = vmov %v11597_v20  ;;  %v5513_v63 = vpack.c.bf16 (%p11207_p2), %v11597_v20, %v11593_v52 }
 0xfb7   : >> { %v6222_v61 = vadd.f32 %v5468_v31, %v5137_v54  ;;  %v5470_v49 = vpop.f32.mrb[6].mxu1  ;;  %v5512_v54 = vpack.c.bf16 (%p11207_p2), %v11595_v29, %v11591_v1 }
 0xfb8   : >> { %v11193_v34 = vadd.f32 %v11598_v17, %v6221_v57   ;;  %v6223_v42 = vadd.f32 %v5470_v49, %v5142_v26  ;;  %v5472_v60 = vpop.f32.mrb[7].mxu1  ;;  %5530 = vmatprep.subr.bf16.mxu0 (%p11207_p2), %v5513_v63 }
 0xfb9   : >> { %v5500_v44 = vadd.f32 %v11600_v8, %v6222_v61   ;;  %v6224_v41 = vadd.f32 %v5472_v60, %v5142_v26  ;;  %v11628_v26 = vmov (%p11207_p2), 0   ;;  %v5520_v61 = vld [vmem:[#allocation16] sm:$0xf] (%p11207_p2)  ;;  %5531 = vmatpush1.bf16.msra.mxu0 (%p11207_p2), %v5512_v54 }
 0xfba   : >> { %v11599_v2 = vmov %v11193_v34  ;;  %v5501_v18 = vadd.f32 %v11601_v23, %v6223_v42   ;;  %v11626_v23 = vmov %v11593_v52  ;;  %5562 = vmatprep.mubr.bf16.mxu0 (%p11207_p2), %v11628_v26  ;;  %6770 = vset.pattern.permute.xlu0 (%p11207_p2), %v11628_v26 }
 0xfbb   : >> { %v5502_v37 = vadd.f32 %v11602_v58, %v6224_v41   ;;  %v11622_v57 = vmov %v5500_v44  ;;  %v11625_v58 = vmov %v11595_v29  ;;  %5523 = vperm.xlu0 (%p11207_p2), %6770, %v5520_v61  }
 0xfbc   : >> { %v11621_v17 = vmov %v5501_v18  ;;  %v5514_v49 = vpack.c.bf16 (%p11207_p2), %v5501_v18, %v11599_v2 }
 0xfbd   : >> { %v5476_v36 = vpop.f32.mrb[8].mxu1  ;;  %v11620_v13 = vmov %v5502_v37  ;;  %v5515_v31 = vpack.c.bf16 (%p11207_p2), %v5502_v37, %v5500_v44 }
 0xfbe   : >> { %v6225_v11 = vadd.f32 %v5476_v36, %v5147_v46  ;;  %v5478_v9 = vpop.f32.mrb[9].mxu1 }
 0xfbf   : >> { %v6226_v50 = vadd.f32 %v5478_v9, %v5147_v46  ;;  %v5480_v45 = vpop.f32.mrb[10].mxu1  ;;  %v11627_v46 = vmov %v11591_v1  ;;  %5532 = vmatprep.subr.bf16.mxu0 (%p11207_p2), %v5515_v31  ;;  %v5511_v1 = vld [vmem:[#allocation14] sm:$0x3] (%p11207_p2) }
 0xfc0   : >> { %v5503_v15 = vadd.f32 %v11603_v12, %v6225_v11   ;;  %v6227_v25 = vadd.f32 %v5480_v45, %v5152_v5  ;;  %v5482_v34 = vpop.f32.mrb[11].mxu1  ;;  %5533 = vmatpush1.bf16.msra.mxu0 (%p11207_p2), %v5514_v49 }
 0xfc1   : >> { %v5504_v62 = vadd.f32 %v11604_v0, %v6226_v50   ;;  %v6228_v6 = vadd.f32 %v5482_v34, %v5152_v5  ;;  %v11623_v34 = vmov %v11599_v2 }
 0xfc2   : >> { %v5505_v53 = vadd.f32 %v11605_v21, %v6227_v25  }
 0xfc3   : >> { %v5506_v28 = vadd.f32 %v11606_v43, %v6228_v6  }
 0xfc4   : >> { %v11617_v30 = vmov %v5505_v53  ;;  %v5516_v24 = vpack.c.bf16 (%p11207_p2), %v5505_v53, %v5503_v15 }
 0xfc5   : >> { %v5486_v3 = vpop.f32.mrb[12].mxu1  ;;  %v11616_v60 = vmov %v5506_v28  ;;  %v5517_v42 = vpack.c.bf16 (%p11207_p2), %v5506_v28, %v5504_v62 }
 0xfc6   : >> { %v6229_v22 = vadd.f32 %v5486_v3, %v5157_v4  ;;  %v5488_v55 = vpop.f32.mrb[13].mxu1 }
 0xfc7   : >> { %v6230_v27 = vadd.f32 %v5488_v55, %v5157_v4  ;;  %v5490_v48 = vpop.f32.mrb[14].mxu1  ;;  %v11618_v55 = vmov %v5504_v62  ;;  %v11619_v4 = vmov %v5503_v15  ;;  %3129 = sbr.rel (!%p11207_p2) target bundleno = 2745 (0xab9), region = 242  ;;  %5534 = vmatprep.subr.bf16.mxu0 (%p11207_p2), %v5517_v42 }
 0xfc8   : >> { %v5507_v39 = vadd.f32 %v11607_v32, %v6229_v22   ;;  %v6231_v35 = vadd.f32 %v5490_v48, %v5162_v33  ;;  %v5492_v14 = vpop.f32.mrb[15].mxu1  ;;  %5535 = vmatpush1.bf16.msra.mxu0 (%p11207_p2), %v5516_v24 }
 0xfc9   : >> { %v5508_v51 = vadd.f32 %v11608_v56, %v6230_v27   ;;  %v6232_v40 = vadd.f32 %v5492_v14, %v5162_v33 }
 0xfca   : >> { %v5509_v10 = vadd.f32 %v11609_v59, %v6231_v35   ;;  %v11615_v59 = vmov %v5507_v39 }
 0xfcb   : >> { %v5510_v38 = vadd.f32 %v11610_v19, %v6232_v40   ;;  %v11614_v41 = vmov %v5508_v51 }
 0xfcc   : >> { %v11613_v40 = vmov %v5509_v10  ;;  %v5518_v7 = vpack.c.bf16 (%p11207_p2), %v5509_v10, %v5507_v39 }
 0xfcd   : >> { %v11612_v35 = vmov %v5510_v38  ;;  %v5519_v47 = vpack.c.bf16 (%p11207_p2), %v5510_v38, %v5508_v51 }
 0xfcf   : > { %5536 = vmatprep.subr.bf16.mxu0 %v5519_v47 }
 0xfd0   : > { %5537 = vmatpush1.bf16.msra.mxu0 %v5518_v7 }
 0xfd3   : > { %6147 = vmatmul.mubr.msk.bf16.vlgmr.msra.gmra.mrb[0].mxu0 %vm4124_vm7, %v5511_v1 }
0x103a   : > { %v5524_v52 = vpop.permute.xlu0 %5523 }
0x10a6   : > { %v5564_v16 = vpop.f32.mrb[0].mxu0 }
0x10a7   : > { %v5565_v29 = vadd.f32 %v5564_v16, %v5524_v52  ;;  %v5566_v13 = vpop.f32.mrb[1].mxu0 }
0x10a8   : > { %v5567_v20 = vadd.f32 %v5566_v13, %v5524_v52  ;;  %v5568_v30 = vpop.f32.mrb[2].mxu0 }
0x10a9   : > { %v5572_v57 = vsel %vm5571_vm8, %v5565_v29, -inf  ;;  %v5569_v17 = vpop.f32.mrb[3].mxu0 }
0x10aa   : > { %v5573_v2 = vrot.slane %v5572_v57, 4  ;;  %v5579_v60 = vsel %vm5571_vm8, %v5567_v20, -inf }
0x10ab   : > { %v5580_v8 = vrot.slane %v5579_v60, 4 }
0x10ac   : > { %v5574_v44 = vmax.f32 %v5572_v57, %v5573_v2 }
0x10ad   : > { %v5581_v41 = vmax.f32 %v5579_v60, %v5580_v8 }
0x10ae   : > { %v5575_v23 = vrot.slane %v5574_v44, 2 }
0x10af   : > { %v5582_v18 = vrot.slane %v5581_v41, 2 }
0x10b0   : > { %v5576_v58 = vmax.f32 %v5574_v44, %v5575_v23 }
0x10b1   : > { %v5583_v37 = vmax.f32 %v5581_v41, %v5582_v18 }
0x10b2   : > { %v5577_v46 = vrot.slane %v5576_v58, 1 }
0x10b3   : > { %v5584_v36 = vrot.slane %v5583_v37, 1 }
0x10b4   : > { %v5578_v11 = vmax.f32 %v5576_v58, %v5577_v46 }
0x10b5   : > { %v5585_v9 = vmax.f32 %v5583_v37, %v5584_v36 }
0x10b6   : > { %v5586_v5 = vsub.f32 %v5565_v29, %v5578_v11 }
0x10b7   : > { %v5587_v50 = vsub.f32 %v5567_v20, %v5585_v9 }
0x10b8   : > { %v5588_v45 = vmul.f32 1.442695, %v5586_v5 }
0x10b9   : > { %v5590_v12 = vmul.f32 1.442695, %v5587_v50 }
0x10ba   : > { %6771 = vpow2.f32 %v5588_v45 }
0x10bb   : > { %6773 = vpow2.f32 %v5590_v12 }
0x10c4   : > { %v6772_v15 = vpop.eup %6771 }
0x10c5   : > { %v6774_v25 = vpop.eup %6773  ;;  %v5592_v34 = vsel %vm5571_vm8, %v6772_v15, 0.0 }
0x10c6   : > { %v5593_v0 = vrot.slane %v5592_v34, 4  ;;  %v5599_v62 = vsel %vm5571_vm8, %v6774_v25, 0.0 }
0x10c7   : > { %v5600_v6 = vrot.slane %v5599_v62, 4 }
0x10c8   : > { %v5594_v21 = vadd.f32 %v5593_v0, %v5592_v34 }
0x10c9   : > { %v5601_v53 = vadd.f32 %v5600_v6, %v5599_v62 }
0x10ca   : > { %v5595_v43 = vrot.slane %v5594_v21, 2 }
0x10cb   : > { %v5602_v28 = vrot.slane %v5601_v53, 2 }
0x10cc   : > { %v5596_v4 = vadd.f32 %v5595_v43, %v5594_v21 }
0x10cd   : > { %v5603_v3 = vadd.f32 %v5602_v28, %v5601_v53 }
0x10ce   : > { %v5597_v22 = vrot.slane %v5596_v4, 1 }
0x10cf   : > { %v5604_v55 = vrot.slane %v5603_v3, 1 }
0x10d0   : > { %v5598_v33 = vadd.f32 %v5597_v22, %v5596_v4 }
0x10d1   : > { %v5605_v27 = vadd.f32 %v5604_v55, %v5603_v3 }
0x10d2   : > { %6775 = vrcp.f32 %v5598_v33 }
0x10d3   : > { %6777 = vrcp.f32 %v5605_v27 }
0x10dc   : > { %v6776_v48 = vpop.eup %6775 }
0x10dd   : > { %v6778_v32 = vpop.eup %6777  ;;  %v5608_v39 = vmul.f32 %v6776_v48, %v6772_v15 }
0x10de   : > { %v5609_v35 = vmul.f32 %v6778_v32, %v6774_v25 }
0x10e0   : > { %v5612_v14 = vcombine.low %v5608_v39, %v5609_v35 }
0x10e2   : > { %5614 = vst [vmem:[%s7724_s19] sm:$0xff] %v5612_v14 }
0x10e3 PF: > { %s11629_s26 = sld [smem:[#allocation22_spill]] }
0x10e9   : > { %s37_s3 = sadd.s32 1, %s11629_s26  }
0x10ea   : > { %p34_p3 = scmp.ge.s32.totalorder %s37_s3, 4  }
0x10ec   :  { %36 = sbr.rel (!%p34_p3) target bundleno = 20 (0x14), region = 253 }
0x10f3   :  { %5636 = vsyncpa [#allocation4], 1 }
0x10f4   :  { %5638 = vsyncpa [#allocation4 + $0x1], 1 }
0x10f5   :  { %5639 = vsyncpa [#allocation6], 1 }
0x10f6   :  { %5640 = vsyncpa [#allocation9], 1 }
0x10f7   :  { %5641 = vsyncpa [#allocation12], 1 }
0x10f8   :  { %5642 = vsyncpa [#allocation15], 1 }

</bundles_post_ra>
